<compile_context>
chip_gen: v6e
topology: v6e:2x2x1
jax: 0.10.0
libtpu: 0.0.40
codegen_flags: <defaults>
</compile_context>

<pallas_src>
from functools import partial

import numpy as np
import jax
import jax.numpy as jnp
from jax import lax
from jax.experimental import pallas as pl
from jax.experimental.pallas import tpu as pltpu


# ----------------------------------------------------------------------------
# Host-side helper: per-tap boundary masks over the flattened spatial axis
# ----------------------------------------------------------------------------
def _tap_mask_array(n, h, w):
    """(9, n*h*w) 0/1 floats: masks[k, s] = 1 iff tap k of pixel s is in-bounds."""
    s = n * h * w
    row = np.tile(np.repeat(np.arange(h), w), n)
    col = np.tile(np.tile(np.arange(w), h), n)
    masks = np.empty((9, s), np.float32)
    k = 0
    for ddy in (-1, 0, 1):
        for ddx in (-1, 0, 1):
            ok = np.ones(s, bool)
            if ddy == -1:
                ok &= row >= 1
            elif ddy == 1:
                ok &= row <= h - 2
            if ddx == -1:
                ok &= col >= 1
            elif ddx == 1:
                ok &= col <= w - 2
            masks[k] = ok
            k += 1
    return masks


# ----------------------------------------------------------------------------
# Fused Pallas kernel: whole forward pass, whole batch, one grid step
# ----------------------------------------------------------------------------
def _fused_bridge_kernel(dts_ref,                       # SMEM (n_steps,) dt_i
                         x_ref,                         # (c_in, S) measurements
                         m_ref,                         # (9, S) tap masks (0/1)
                         wi_ref, bi_ref,                # initial reconstructor
                         w1_ref, fb_ref,                # velocity conv1 + fused bias
                         w2_ref, b2_ref,                # velocity conv2
                         wf_ref, bf_ref,                # final reconstructor
                         o_ref,                         # (c_out, S) output
                         xbuf, hbuf, pxbuf, phbuf,      # VMEM scratch
                         *, pad, tap_offsets):
    S = x_ref.shape[1]
    n_steps = dts_ref.shape[0]

    # Zero the flat-padded buffers once per call (single grid step). Only the
    # halo borders must stay zero; interiors are fully overwritten before every
    # conv.
    xbuf[...] = jnp.zeros(xbuf.shape, xbuf.dtype)
    hbuf[...] = jnp.zeros(hbuf.shape, hbuf.dtype)

    def conv3x3(src_buf, pbuf, w_ref):
        """3x3 'same' conv, channels-first flattened-spatial, single MXU dot.

        im2col: 9 shifted (and boundary-masked) copies of the (Cin, S)
        activation are packed into a (9*Cin, S) patch matrix in VMEM; the conv
        is then one (Cout, 9*Cin) @ (9*Cin, S) matmul.
        """
        c = src_buf.shape[0]
        for k, off in enumerate(tap_offsets):
            v = src_buf[:, pad + off:pad + off + S]           # shifted copy
            if k != 4:                                        # center tap: no mask
                v = v * m_ref[k:k + 1, :]
            pbuf[k * c:(k + 1) * c, :] = v
        return jnp.dot(w_ref[...], pbuf[...],
                       preferred_element_type=jnp.float32)    # (Cout, S)

    # ---- initial_reconstructor -------------------------------------------
    xbuf[:, pad:pad + S] = x_ref[...]
    x = conv3x3(xbuf, pxbuf, wi_ref) + bi_ref[...]            # (c_img, S)

    # ---- diffusion_model.reverse_sample (Euler), fully in VMEM ------------
    def euler_step(i, x):
        xbuf[:, pad:pad + S] = x
        pre = conv3x3(xbuf, pxbuf, w1_ref) + fb_ref[i]        # fb = b1 + tb + tw*t_i
        h = pre * jax.nn.sigmoid(pre)                         # SiLU (EUP)
        hbuf[:, pad:pad + S] = h
        v = conv3x3(hbuf, phbuf, w2_ref) + b2_ref[...]
        return x + dts_ref[i] * v                             # dt_i < 0

    x = lax.fori_loop(0, n_steps, euler_step, x,
                      unroll=True if n_steps <= 8 else 4)

    # ---- final_reconstructor ----------------------------------------------
    xbuf[:, pad:pad + S] = x
    o_ref[...] = conv3x3(xbuf, pxbuf, wf_ref) + bf_ref[...]   # lane-dense store


# ----------------------------------------------------------------------------
# pallas_call wrapper: batch folded into one grid step, channels-first layout
# ----------------------------------------------------------------------------
def _bridge_forward(measurements_nchw, params, timesteps):
    N, c_in, H, W = measurements_nchw.shape
    c_img = params["init_w"].shape[-1]
    hidden = params["w1"].shape[-1]
    c_out = params["final_w"].shape[-1]
    # xbuf scratch is shared between the measurements and the diffusion state.
    assert c_in == c_img, "need a separate input buffer if C_in != C_img"

    S = N * H * W
    pad = ((W + 1 + 127) // 128) * 128        # halo >= W+1, lane-aligned interior
    n_steps = timesteps.shape[0] - 1

    # Channels-first, flattened-spatial (lane-dense) layout: (C, N*H*W).
    x_cf = jnp.transpose(measurements_nchw, (1, 0, 2, 3)).reshape(c_in, S)
    x_cf = x_cf.astype(jnp.float32)

    ts = timesteps.astype(jnp.float32)
    dts = ts[1:] - ts[:-1]                                            # (n_steps,)
    fb = (params["b1"] + params["tb"])[None, :] + ts[:-1, None] * params["tw"][None, :]
    fb = fb[:, :, None].astype(jnp.float32)                          # (n_steps, hidden, 1)

    def w2d(w):                                                       # HWIO -> (Cout, 9*Cin)
        return w.reshape(-1, w.shape[-1]).T.astype(jnp.float32)

    def bcol(b):                                                      # (C,) -> (C, 1)
        return b.reshape(-1, 1).astype(jnp.float32)

    masks = jnp.asarray(_tap_mask_array(N, H, W))                     # (9, S)
    tap_offsets = tuple(dy * W + dx for dy in (-1, 0, 1) for dx in (-1, 0, 1))

    grid_spec = pltpu.PrefetchScalarGridSpec(
        num_scalar_prefetch=1,                       # dt_i -> SMEM
        grid=(1,),                                   # whole batch in one step
        in_specs=[
            pl.BlockSpec((c_in, S), lambda i, _: (0, 0)),
            pl.BlockSpec((9, S), lambda i, _: (0, 0)),
            pl.BlockSpec((c_img, 9 * c_in), lambda i, _: (0, 0)),
            pl.BlockSpec((c_img, 1), lambda i, _: (0, 0)),
            pl.BlockSpec((hidden, 9 * c_img), lambda i, _: (0, 0)),
            pl.BlockSpec((n_steps, hidden, 1), lambda i, _: (0, 0, 0)),
            pl.BlockSpec((c_img, 9 * hidden), lambda i, _: (0, 0)),
            pl.BlockSpec((c_img, 1), lambda i, _: (0, 0)),
            pl.BlockSpec((c_out, 9 * c_img), lambda i, _: (0, 0)),
            pl.BlockSpec((c_out, 1), lambda i, _: (0, 0)),
        ],
        out_specs=pl.BlockSpec((c_out, S), lambda i, _: (0, 0)),
        scratch_shapes=[
            pltpu.VMEM((c_img, S + 2 * pad), jnp.float32),    # flat-padded x
            pltpu.VMEM((hidden, S + 2 * pad), jnp.float32),   # flat-padded hidden
            pltpu.VMEM((9 * c_img, S), jnp.float32),          # im2col patches (x)
            pltpu.VMEM((9 * hidden, S), jnp.float32),         # im2col patches (h)
        ],
    )

    out_cf = pl.pallas_call(
        partial(_fused_bridge_kernel, pad=pad, tap_offsets=tap_offsets),
        out_shape=jax.ShapeDtypeStruct((c_out, S), jnp.float32),
        grid_spec=grid_spec,
        compiler_params=pltpu.CompilerParams(
            dimension_semantics=("arbitrary",)),
    )(dts, x_cf, masks,
      w2d(params["init_w"]), bcol(params["init_b"]),
      w2d(params["w1"]), fb,
      w2d(params["w2"]), bcol(params["b2"]),
      w2d(params["final_w"]), bcol(params["final_b"]))

    return jnp.transpose(out_cf.reshape(c_out, N, H, W), (1, 0, 2, 3))   # NCHW


_jitted_bridge_forward = jax.jit(_bridge_forward)


def forward(measurements_nchw, params, timesteps=None, num_timesteps=None,
            sampler="euler"):
    """Mirrors DiffusionBridgeImageReconstructor.forward."""
    # TODO(synk): only the 'euler' sampler of reverse_sample is implemented.
    assert sampler == "euler"
    if timesteps is None:
        if num_timesteps is None:
            num_timesteps = 32
        timesteps = np.linspace(1.0, 0.0, num_timesteps + 1)
    timesteps = np.asarray(timesteps, dtype=np.float32)
    assert timesteps.ndim == 1
    assert timesteps.shape[0] > 1
    assert timesteps[0] == 1.0
    assert timesteps[-1] == 0.0
    for i in range(1, timesteps.shape[0]):
        assert timesteps[i] < timesteps[i - 1]
    return _jitted_bridge_forward(measurements_nchw, params, jnp.asarray(timesteps))


# ----------------------------------------------------------------------------
# Pure-JAX reference (correctness check only)
# ----------------------------------------------------------------------------
def _conv3x3_ref(x_nhwc, w, b):
    y = lax.conv_general_dilated(
        x_nhwc, w, window_strides=(1, 1), padding="SAME",
        dimension_numbers=("NHWC", "HWIO", "NHWC"),
        precision=lax.Precision.HIGHEST)
    return y + b


def reference_forward(measurements_nchw, params, timesteps):
    x = jnp.transpose(measurements_nchw, (0, 2, 3, 1)).astype(jnp.float32)
    x = _conv3x3_ref(x, params["init_w"], params["init_b"])
    ts = np.asarray(timesteps, dtype=np.float32)
    for i in range(ts.shape[0] - 1):
        t = float(ts[i])
        dt = float(ts[i + 1] - ts[i])
        temb = params["tw"] * t + params["tb"]
        pre = _conv3x3_ref(x, params["w1"], params["b1"]) + temb
        h = pre * jax.nn.sigmoid(pre)
        v = _conv3x3_ref(h, params["w2"], params["b2"])
        x = x + dt * v
    rec = _conv3x3_ref(x, params["final_w"], params["final_b"])
    return jnp.transpose(rec, (0, 3, 1, 2))


# ----------------------------------------------------------------------------
# Deterministic parameter init
# ----------------------------------------------------------------------------
def init_params(key, c_in=4, c_img=4, hidden=16, c_out=4):
    ks = jax.random.split(key, 6)

    def conv_w(k, ci, co):
        return jax.random.normal(k, (3, 3, ci, co), jnp.float32) / np.sqrt(9.0 * ci)

    return dict(
        init_w=conv_w(ks[0], c_in, c_img),
        init_b=jnp.zeros((c_img,), jnp.float32),
        w1=conv_w(ks[1], c_img, hidden),
        b1=jnp.zeros((hidden,), jnp.float32),
        tw=0.1 * jax.random.normal(ks[2], (hidden,), jnp.float32),
        tb=0.1 * jax.random.normal(ks[3], (hidden,), jnp.float32),
        w2=conv_w(ks[4], hidden, c_img),
        b2=jnp.zeros((c_img,), jnp.float32),
        final_w=conv_w(ks[5], c_img, c_out),
        final_b=jnp.zeros((c_out,), jnp.float32),
    )


if __name__ == "__main__":
    key = jax.random.PRNGKey(0)
    k_meas, k_params = jax.random.split(key)

    # PyTorch-style NCHW measurements: batch=2, channels=4, spatial=16x16.
    measurements = jax.random.normal(k_meas, (2, 4, 16, 16), jnp.float32)
    params = init_params(k_params)

    num_timesteps = 4
    timesteps = np.linspace(1.0, 0.0, num_timesteps + 1).astype(np.float32)

    out = forward(measurements, params, timesteps=timesteps)
    jax.block_until_ready(out)

    ref = reference_forward(measurements, params, timesteps)
    np.testing.assert_allclose(np.asarray(out), np.asarray(ref),
                               rtol=1e-3, atol=1e-3)

    assert out.shape == (2, 4, 16, 16)
    assert bool(jnp.all(jnp.isfinite(out)))
    print("KERNEL_OK")
</pallas_src>

<mosaic_0001>
module attributes {stable_mosaic.version = 11 : i64} {
  func.func @_fused_bridge_kernel(%arg0: i32, %arg1: memref<4xf32, #tpu.memory_space<smem>>, %arg2: memref<4x512xf32, #tpu.memory_space<vmem>>, %arg3: memref<9x512xf32, #tpu.memory_space<vmem>>, %arg4: memref<4x36xf32, #tpu.memory_space<vmem>>, %arg5: memref<4x1xf32, #tpu.memory_space<vmem>>, %arg6: memref<16x36xf32, #tpu.memory_space<vmem>>, %arg7: memref<4x16x1xf32, #tpu.memory_space<vmem>>, %arg8: memref<4x144xf32, #tpu.memory_space<vmem>>, %arg9: memref<4x1xf32, #tpu.memory_space<vmem>>, %arg10: memref<4x36xf32, #tpu.memory_space<vmem>>, %arg11: memref<4x1xf32, #tpu.memory_space<vmem>>, %arg12: memref<4x512xf32, #tpu.memory_space<vmem>>, %arg13: memref<4x768xf32, #tpu.memory_space<vmem>>, %arg14: memref<16x768xf32, #tpu.memory_space<vmem>>, %arg15: memref<36x512xf32, #tpu.memory_space<vmem>>, %arg16: memref<144x512xf32, #tpu.memory_space<vmem>>) attributes {dimension_semantics = [#tpu.dimension_semantics<arbitrary>], iteration_bounds = array<i64: 1>, scalar_prefetch = 1 : i64, scratch_operands = 4 : i64, tpu.core_type = #tpu.core_type<tc>, window_params = [{pipeline_mode = #tpu.pipeline_mode<synchronous>, transform_indices = @transform_0, window_bounds = array<i64: 4, 512>}, {pipeline_mode = #tpu.pipeline_mode<synchronous>, transform_indices = @transform_1, window_bounds = array<i64: 9, 512>}, {pipeline_mode = #tpu.pipeline_mode<synchronous>, transform_indices = @transform_2, window_bounds = array<i64: 4, 36>}, {pipeline_mode = #tpu.pipeline_mode<synchronous>, transform_indices = @transform_3, window_bounds = array<i64: 4, 1>}, {pipeline_mode = #tpu.pipeline_mode<synchronous>, transform_indices = @transform_4, window_bounds = array<i64: 16, 36>}, {pipeline_mode = #tpu.pipeline_mode<synchronous>, transform_indices = @transform_5, window_bounds = array<i64: 4, 16, 1>}, {pipeline_mode = #tpu.pipeline_mode<synchronous>, transform_indices = @transform_6, window_bounds = array<i64: 4, 144>}, {pipeline_mode = #tpu.pipeline_mode<synchronous>, transform_indices = @transform_7, window_bounds = array<i64: 4, 1>}, {pipeline_mode = #tpu.pipeline_mode<synchronous>, transform_indices = @transform_8, window_bounds = array<i64: 4, 36>}, {pipeline_mode = #tpu.pipeline_mode<synchronous>, transform_indices = @transform_9, window_bounds = array<i64: 4, 1>}, {pipeline_mode = #tpu.pipeline_mode<synchronous>, transform_indices = @transform_10, window_bounds = array<i64: 4, 512>}]} {
    %cst = arith.constant 0.000000e+00 : f32
    %0 = vector.broadcast %cst : f32 to vector<4x768xf32>
    %c0 = arith.constant 0 : index
    %c0_0 = arith.constant 0 : index
    %1 = vector.load %arg13[%c0, %c0_0] : memref<4x768xf32, #tpu.memory_space<vmem>>, vector<4x768xf32>
    tpu.vector_store %arg13[%c0, %c0_0], %0 {strides = array<i32>} : memref<4x768xf32, #tpu.memory_space<vmem>>, vector<4x768xf32>,
    %cst_1 = arith.constant 0.000000e+00 : f32
    %2 = vector.broadcast %cst_1 : f32 to vector<16x768xf32>
    %c0_2 = arith.constant 0 : index
    %c0_3 = arith.constant 0 : index
    %3 = vector.load %arg14[%c0_2, %c0_3] : memref<16x768xf32, #tpu.memory_space<vmem>>, vector<16x768xf32>
    tpu.vector_store %arg14[%c0_2, %c0_3], %2 {strides = array<i32>} : memref<16x768xf32, #tpu.memory_space<vmem>>, vector<16x768xf32>,
    %c0_4 = arith.constant 0 : index
    %c0_5 = arith.constant 0 : index
    %4 = vector.load %arg2[%c0_4, %c0_5] : memref<4x512xf32, #tpu.memory_space<vmem>>, vector<4x512xf32>
    %c0_6 = arith.constant 0 : index
    %c128 = arith.constant 128 : index
    %5 = vector.load %arg13[%c0_6, %c128] : memref<4x768xf32, #tpu.memory_space<vmem>>, vector<4x512xf32>
    tpu.vector_store %arg13[%c0_6, %c128], %4 {strides = array<i32>} : memref<4x768xf32, #tpu.memory_space<vmem>>, vector<4x512xf32>,
    %c0_7 = arith.constant 0 : index
    %c111 = arith.constant 111 : index
    %6 = vector.load %arg13[%c0_7, %c111] : memref<4x768xf32, #tpu.memory_space<vmem>>, vector<4x512xf32>
    %c0_8 = arith.constant 0 : index
    %c0_9 = arith.constant 0 : index
    %7 = vector.load %arg3[%c0_8, %c0_9] : memref<9x512xf32, #tpu.memory_space<vmem>>, vector<1x512xf32>
    %8 = vector.broadcast %7 : vector<1x512xf32> to vector<4x512xf32>
    %9 = arith.mulf %6, %8 : vector<4x512xf32>
    %c0_10 = arith.constant 0 : index
    %c0_11 = arith.constant 0 : index
    %10 = vector.load %arg15[%c0_10, %c0_11] : memref<36x512xf32, #tpu.memory_space<vmem>>, vector<4x512xf32>
    tpu.vector_store %arg15[%c0_10, %c0_11], %9 {strides = array<i32>} : memref<36x512xf32, #tpu.memory_space<vmem>>, vector<4x512xf32>,
    %c0_12 = arith.constant 0 : index
    %c112 = arith.constant 112 : index
    %11 = vector.load %arg13[%c0_12, %c112] : memref<4x768xf32, #tpu.memory_space<vmem>>, vector<4x512xf32>
    %c1 = arith.constant 1 : index
    %c0_13 = arith.constant 0 : index
    %12 = vector.load %arg3[%c1, %c0_13] : memref<9x512xf32, #tpu.memory_space<vmem>>, vector<1x512xf32>
    %13 = vector.broadcast %12 : vector<1x512xf32> to vector<4x512xf32>
    %14 = arith.mulf %11, %13 : vector<4x512xf32>
    %c4 = arith.constant 4 : index
    %c0_14 = arith.constant 0 : index
    %15 = vector.load %arg15[%c4, %c0_14] : memref<36x512xf32, #tpu.memory_space<vmem>>, vector<4x512xf32>
    tpu.vector_store %arg15[%c4, %c0_14], %14 {strides = array<i32>} : memref<36x512xf32, #tpu.memory_space<vmem>>, vector<4x512xf32>,
    %c0_15 = arith.constant 0 : index
    %c113 = arith.constant 113 : index
    %16 = vector.load %arg13[%c0_15, %c113] : memref<4x768xf32, #tpu.memory_space<vmem>>, vector<4x512xf32>
    %c2 = arith.constant 2 : index
    %c0_16 = arith.constant 0 : index
    %17 = vector.load %arg3[%c2, %c0_16] : memref<9x512xf32, #tpu.memory_space<vmem>>, vector<1x512xf32>
    %18 = vector.broadcast %17 : vector<1x512xf32> to vector<4x512xf32>
    %19 = arith.mulf %16, %18 : vector<4x512xf32>
    %c8 = arith.constant 8 : index
    %c0_17 = arith.constant 0 : index
    %20 = vector.load %arg15[%c8, %c0_17] : memref<36x512xf32, #tpu.memory_space<vmem>>, vector<4x512xf32>
    tpu.vector_store %arg15[%c8, %c0_17], %19 {strides = array<i32>} : memref<36x512xf32, #tpu.memory_space<vmem>>, vector<4x512xf32>,
    %c0_18 = arith.constant 0 : index
    %c127 = arith.constant 127 : index
    %21 = vector.load %arg13[%c0_18, %c127] : memref<4x768xf32, #tpu.memory_space<vmem>>, vector<4x512xf32>
    %c3 = arith.constant 3 : index
    %c0_19 = arith.constant 0 : index
    %22 = vector.load %arg3[%c3, %c0_19] : memref<9x512xf32, #tpu.memory_space<vmem>>, vector<1x512xf32>
    %23 = vector.broadcast %22 : vector<1x512xf32> to vector<4x512xf32>
    %24 = arith.mulf %21, %23 : vector<4x512xf32>
    %c12 = arith.constant 12 : index
    %c0_20 = arith.constant 0 : index
    %25 = vector.load %arg15[%c12, %c0_20] : memref<36x512xf32, #tpu.memory_space<vmem>>, vector<4x512xf32>
    tpu.vector_store %arg15[%c12, %c0_20], %24 {strides = array<i32>} : memref<36x512xf32, #tpu.memory_space<vmem>>, vector<4x512xf32>,
    %c0_21 = arith.constant 0 : index
    %c128_22 = arith.constant 128 : index
    %26 = vector.load %arg13[%c0_21, %c128_22] : memref<4x768xf32, #tpu.memory_space<vmem>>, vector<4x512xf32>
    %c16 = arith.constant 16 : index
    %c0_23 = arith.constant 0 : index
    %27 = vector.load %arg15[%c16, %c0_23] : memref<36x512xf32, #tpu.memory_space<vmem>>, vector<4x512xf32>
    tpu.vector_store %arg15[%c16, %c0_23], %26 {strides = array<i32>} : memref<36x512xf32, #tpu.memory_space<vmem>>, vector<4x512xf32>,
    %c0_24 = arith.constant 0 : index
    %c129 = arith.constant 129 : index
    %28 = vector.load %arg13[%c0_24, %c129] : memref<4x768xf32, #tpu.memory_space<vmem>>, vector<4x512xf32>
    %c5 = arith.constant 5 : index
    %c0_25 = arith.constant 0 : index
    %29 = vector.load %arg3[%c5, %c0_25] : memref<9x512xf32, #tpu.memory_space<vmem>>, vector<1x512xf32>
    %30 = vector.broadcast %29 : vector<1x512xf32> to vector<4x512xf32>
    %31 = arith.mulf %28, %30 : vector<4x512xf32>
    %c20 = arith.constant 20 : index
    %c0_26 = arith.constant 0 : index
    %32 = vector.load %arg15[%c20, %c0_26] : memref<36x512xf32, #tpu.memory_space<vmem>>, vector<4x512xf32>
    tpu.vector_store %arg15[%c20, %c0_26], %31 {strides = array<i32>} : memref<36x512xf32, #tpu.memory_space<vmem>>, vector<4x512xf32>,
    %c0_27 = arith.constant 0 : index
    %c143 = arith.constant 143 : index
    %33 = vector.load %arg13[%c0_27, %c143] : memref<4x768xf32, #tpu.memory_space<vmem>>, vector<4x512xf32>
    %c6 = arith.constant 6 : index
    %c0_28 = arith.constant 0 : index
    %34 = vector.load %arg3[%c6, %c0_28] : memref<9x512xf32, #tpu.memory_space<vmem>>, vector<1x512xf32>
    %35 = vector.broadcast %34 : vector<1x512xf32> to vector<4x512xf32>
    %36 = arith.mulf %33, %35 : vector<4x512xf32>
    %c24 = arith.constant 24 : index
    %c0_29 = arith.constant 0 : index
    %37 = vector.load %arg15[%c24, %c0_29] : memref<36x512xf32, #tpu.memory_space<vmem>>, vector<4x512xf32>
    tpu.vector_store %arg15[%c24, %c0_29], %36 {strides = array<i32>} : memref<36x512xf32, #tpu.memory_space<vmem>>, vector<4x512xf32>,
    %c0_30 = arith.constant 0 : index
    %c144 = arith.constant 144 : index
    %38 = vector.load %arg13[%c0_30, %c144] : memref<4x768xf32, #tpu.memory_space<vmem>>, vector<4x512xf32>
    %c7 = arith.constant 7 : index
    %c0_31 = arith.constant 0 : index
    %39 = vector.load %arg3[%c7, %c0_31] : memref<9x512xf32, #tpu.memory_space<vmem>>, vector<1x512xf32>
    %40 = vector.broadcast %39 : vector<1x512xf32> to vector<4x512xf32>
    %41 = arith.mulf %38, %40 : vector<4x512xf32>
    %c28 = arith.constant 28 : index
    %c0_32 = arith.constant 0 : index
    %42 = vector.load %arg15[%c28, %c0_32] : memref<36x512xf32, #tpu.memory_space<vmem>>, vector<4x512xf32>
    tpu.vector_store %arg15[%c28, %c0_32], %41 {strides = array<i32>} : memref<36x512xf32, #tpu.memory_space<vmem>>, vector<4x512xf32>,
    %c0_33 = arith.constant 0 : index
    %c145 = arith.constant 145 : index
    %43 = vector.load %arg13[%c0_33, %c145] : memref<4x768xf32, #tpu.memory_space<vmem>>, vector<4x512xf32>
    %c8_34 = arith.constant 8 : index
    %c0_35 = arith.constant 0 : index
    %44 = vector.load %arg3[%c8_34, %c0_35] : memref<9x512xf32, #tpu.memory_space<vmem>>, vector<1x512xf32>
    %45 = vector.broadcast %44 : vector<1x512xf32> to vector<4x512xf32>
    %46 = arith.mulf %43, %45 : vector<4x512xf32>
    %c32 = arith.constant 32 : index
    %c0_36 = arith.constant 0 : index
    %47 = vector.load %arg15[%c32, %c0_36] : memref<36x512xf32, #tpu.memory_space<vmem>>, vector<4x512xf32>
    tpu.vector_store %arg15[%c32, %c0_36], %46 {strides = array<i32>} : memref<36x512xf32, #tpu.memory_space<vmem>>, vector<4x512xf32>,
    %c0_37 = arith.constant 0 : index
    %c0_38 = arith.constant 0 : index
    %48 = vector.load %arg4[%c0_37, %c0_38] : memref<4x36xf32, #tpu.memory_space<vmem>>, vector<4x36xf32>
    %c0_39 = arith.constant 0 : index
    %c0_40 = arith.constant 0 : index
    %49 = vector.load %arg15[%c0_39, %c0_40] : memref<36x512xf32, #tpu.memory_space<vmem>>, vector<36x512xf32>
    %cst_41 = arith.constant dense<0.000000e+00> : vector<4x512xf32>
    %50 = tpu.matmul %48, %49, %cst_41 {dimension_numbers = #tpu.dot_dimension_numbers<[1], [0], [0], [1], [0, 0, 1, 1], [], []>} : vector<4x36xf32>, vector<36x512xf32>, vector<4x512xf32> -> vector<4x512xf32>
    %c0_42 = arith.constant 0 : index
    %c0_43 = arith.constant 0 : index
    %51 = vector.load %arg5[%c0_42, %c0_43] : memref<4x1xf32, #tpu.memory_space<vmem>>, vector<4x1xf32>
    %52 = vector.broadcast %51 : vector<4x1xf32> to vector<4x512xf32>
    %53 = arith.addf %50, %52 : vector<4x512xf32>
    %c0_i32 = arith.constant 0 : i32
    %c0_44 = arith.constant 0 : index
    %c128_45 = arith.constant 128 : index
    %54 = vector.load %arg13[%c0_44, %c128_45] : memref<4x768xf32, #tpu.memory_space<vmem>>, vector<4x512xf32>
    tpu.vector_store %arg13[%c0_44, %c128_45], %53 {strides = array<i32>} : memref<4x768xf32, #tpu.memory_space<vmem>>, vector<4x512xf32>,
    %c0_46 = arith.constant 0 : index
    %c111_47 = arith.constant 111 : index
    %55 = vector.load %arg13[%c0_46, %c111_47] : memref<4x768xf32, #tpu.memory_space<vmem>>, vector<4x512xf32>
    %c0_48 = arith.constant 0 : index
    %c0_49 = arith.constant 0 : index
    %56 = vector.load %arg3[%c0_48, %c0_49] : memref<9x512xf32, #tpu.memory_space<vmem>>, vector<1x512xf32>
    %57 = vector.broadcast %56 : vector<1x512xf32> to vector<4x512xf32>
    %58 = arith.mulf %55, %57 : vector<4x512xf32>
    %c0_50 = arith.constant 0 : index
    %c0_51 = arith.constant 0 : index
    %59 = vector.load %arg15[%c0_50, %c0_51] : memref<36x512xf32, #tpu.memory_space<vmem>>, vector<4x512xf32>
    tpu.vector_store %arg15[%c0_50, %c0_51], %58 {strides = array<i32>} : memref<36x512xf32, #tpu.memory_space<vmem>>, vector<4x512xf32>,
    %c0_52 = arith.constant 0 : index
    %c112_53 = arith.constant 112 : index
    %60 = vector.load %arg13[%c0_52, %c112_53] : memref<4x768xf32, #tpu.memory_space<vmem>>, vector<4x512xf32>
    %c1_54 = arith.constant 1 : index
    %c0_55 = arith.constant 0 : index
    %61 = vector.load %arg3[%c1_54, %c0_55] : memref<9x512xf32, #tpu.memory_space<vmem>>, vector<1x512xf32>
    %62 = vector.broadcast %61 : vector<1x512xf32> to vector<4x512xf32>
    %63 = arith.mulf %60, %62 : vector<4x512xf32>
    %c4_56 = arith.constant 4 : index
    %c0_57 = arith.constant 0 : index
    %64 = vector.load %arg15[%c4_56, %c0_57] : memref<36x512xf32, #tpu.memory_space<vmem>>, vector<4x512xf32>
    tpu.vector_store %arg15[%c4_56, %c0_57], %63 {strides = array<i32>} : memref<36x512xf32, #tpu.memory_space<vmem>>, vector<4x512xf32>,
    %c0_58 = arith.constant 0 : index
    %c113_59 = arith.constant 113 : index
    %65 = vector.load %arg13[%c0_58, %c113_59] : memref<4x768xf32, #tpu.memory_space<vmem>>, vector<4x512xf32>
    %c2_60 = arith.constant 2 : index
    %c0_61 = arith.constant 0 : index
    %66 = vector.load %arg3[%c2_60, %c0_61] : memref<9x512xf32, #tpu.memory_space<vmem>>, vector<1x512xf32>
    %67 = vector.broadcast %66 : vector<1x512xf32> to vector<4x512xf32>
    %68 = arith.mulf %65, %67 : vector<4x512xf32>
    %c8_62 = arith.constant 8 : index
    %c0_63 = arith.constant 0 : index
    %69 = vector.load %arg15[%c8_62, %c0_63] : memref<36x512xf32, #tpu.memory_space<vmem>>, vector<4x512xf32>
    tpu.vector_store %arg15[%c8_62, %c0_63], %68 {strides = array<i32>} : memref<36x512xf32, #tpu.memory_space<vmem>>, vector<4x512xf32>,
    %c0_64 = arith.constant 0 : index
    %c127_65 = arith.constant 127 : index
    %70 = vector.load %arg13[%c0_64, %c127_65] : memref<4x768xf32, #tpu.memory_space<vmem>>, vector<4x512xf32>
    %c3_66 = arith.constant 3 : index
    %c0_67 = arith.constant 0 : index
    %71 = vector.load %arg3[%c3_66, %c0_67] : memref<9x512xf32, #tpu.memory_space<vmem>>, vector<1x512xf32>
    %72 = vector.broadcast %71 : vector<1x512xf32> to vector<4x512xf32>
    %73 = arith.mulf %70, %72 : vector<4x512xf32>
    %c12_68 = arith.constant 12 : index
    %c0_69 = arith.constant 0 : index
    %74 = vector.load %arg15[%c12_68, %c0_69] : memref<36x512xf32, #tpu.memory_space<vmem>>, vector<4x512xf32>
    tpu.vector_store %arg15[%c12_68, %c0_69], %73 {strides = array<i32>} : memref<36x512xf32, #tpu.memory_space<vmem>>, vector<4x512xf32>,
    %c0_70 = arith.constant 0 : index
    %c128_71 = arith.constant 128 : index
    %75 = vector.load %arg13[%c0_70, %c128_71] : memref<4x768xf32, #tpu.memory_space<vmem>>, vector<4x512xf32>
    %c16_72 = arith.constant 16 : index
    %c0_73 = arith.constant 0 : index
    %76 = vector.load %arg15[%c16_72, %c0_73] : memref<36x512xf32, #tpu.memory_space<vmem>>, vector<4x512xf32>
    tpu.vector_store %arg15[%c16_72, %c0_73], %75 {strides = array<i32>} : memref<36x512xf32, #tpu.memory_space<vmem>>, vector<4x512xf32>,
    %c0_74 = arith.constant 0 : index
    %c129_75 = arith.constant 129 : index
    %77 = vector.load %arg13[%c0_74, %c129_75] : memref<4x768xf32, #tpu.memory_space<vmem>>, vector<4x512xf32>
    %c5_76 = arith.constant 5 : index
    %c0_77 = arith.constant 0 : index
    %78 = vector.load %arg3[%c5_76, %c0_77] : memref<9x512xf32, #tpu.memory_space<vmem>>, vector<1x512xf32>
    %79 = vector.broadcast %78 : vector<1x512xf32> to vector<4x512xf32>
    %80 = arith.mulf %77, %79 : vector<4x512xf32>
    %c20_78 = arith.constant 20 : index
    %c0_79 = arith.constant 0 : index
    %81 = vector.load %arg15[%c20_78, %c0_79] : memref<36x512xf32, #tpu.memory_space<vmem>>, vector<4x512xf32>
    tpu.vector_store %arg15[%c20_78, %c0_79], %80 {strides = array<i32>} : memref<36x512xf32, #tpu.memory_space<vmem>>, vector<4x512xf32>,
    %c0_80 = arith.constant 0 : index
    %c143_81 = arith.constant 143 : index
    %82 = vector.load %arg13[%c0_80, %c143_81] : memref<4x768xf32, #tpu.memory_space<vmem>>, vector<4x512xf32>
    %c6_82 = arith.constant 6 : index
    %c0_83 = arith.constant 0 : index
    %83 = vector.load %arg3[%c6_82, %c0_83] : memref<9x512xf32, #tpu.memory_space<vmem>>, vector<1x512xf32>
    %84 = vector.broadcast %83 : vector<1x512xf32> to vector<4x512xf32>
    %85 = arith.mulf %82, %84 : vector<4x512xf32>
    %c24_84 = arith.constant 24 : index
    %c0_85 = arith.constant 0 : index
    %86 = vector.load %arg15[%c24_84, %c0_85] : memref<36x512xf32, #tpu.memory_space<vmem>>, vector<4x512xf32>
    tpu.vector_store %arg15[%c24_84, %c0_85], %85 {strides = array<i32>} : memref<36x512xf32, #tpu.memory_space<vmem>>, vector<4x512xf32>,
    %c0_86 = arith.constant 0 : index
    %c144_87 = arith.constant 144 : index
    %87 = vector.load %arg13[%c0_86, %c144_87] : memref<4x768xf32, #tpu.memory_space<vmem>>, vector<4x512xf32>
    %c7_88 = arith.constant 7 : index
    %c0_89 = arith.constant 0 : index
    %88 = vector.load %arg3[%c7_88, %c0_89] : memref<9x512xf32, #tpu.memory_space<vmem>>, vector<1x512xf32>
    %89 = vector.broadcast %88 : vector<1x512xf32> to vector<4x512xf32>
    %90 = arith.mulf %87, %89 : vector<4x512xf32>
    %c28_90 = arith.constant 28 : index
    %c0_91 = arith.constant 0 : index
    %91 = vector.load %arg15[%c28_90, %c0_91] : memref<36x512xf32, #tpu.memory_space<vmem>>, vector<4x512xf32>
    tpu.vector_store %arg15[%c28_90, %c0_91], %90 {strides = array<i32>} : memref<36x512xf32, #tpu.memory_space<vmem>>, vector<4x512xf32>,
    %c0_92 = arith.constant 0 : index
    %c145_93 = arith.constant 145 : index
    %92 = vector.load %arg13[%c0_92, %c145_93] : memref<4x768xf32, #tpu.memory_space<vmem>>, vector<4x512xf32>
    %c8_94 = arith.constant 8 : index
    %c0_95 = arith.constant 0 : index
    %93 = vector.load %arg3[%c8_94, %c0_95] : memref<9x512xf32, #tpu.memory_space<vmem>>, vector<1x512xf32>
    %94 = vector.broadcast %93 : vector<1x512xf32> to vector<4x512xf32>
    %95 = arith.mulf %92, %94 : vector<4x512xf32>
    %c32_96 = arith.constant 32 : index
    %c0_97 = arith.constant 0 : index
    %96 = vector.load %arg15[%c32_96, %c0_97] : memref<36x512xf32, #tpu.memory_space<vmem>>, vector<4x512xf32>
    tpu.vector_store %arg15[%c32_96, %c0_97], %95 {strides = array<i32>} : memref<36x512xf32, #tpu.memory_space<vmem>>, vector<4x512xf32>,
    %c0_98 = arith.constant 0 : index
    %c0_99 = arith.constant 0 : index
    %97 = vector.load %arg6[%c0_98, %c0_99] : memref<16x36xf32, #tpu.memory_space<vmem>>, vector<16x36xf32>
    %c0_100 = arith.constant 0 : index
    %c0_101 = arith.constant 0 : index
    %98 = vector.load %arg15[%c0_100, %c0_101] : memref<36x512xf32, #tpu.memory_space<vmem>>, vector<36x512xf32>
    %cst_102 = arith.constant dense<0.000000e+00> : vector<16x512xf32>
    %99 = tpu.matmul %97, %98, %cst_102 {dimension_numbers = #tpu.dot_dimension_numbers<[1], [0], [0], [1], [0, 0, 1, 1], [], []>} : vector<16x36xf32>, vector<36x512xf32>, vector<16x512xf32> -> vector<16x512xf32>
    %100 = arith.index_cast %c0_i32 : i32 to index
    %c0_103 = arith.constant 0 : index
    %c0_104 = arith.constant 0 : index
    %101 = vector.load %arg7[%100, %c0_103, %c0_104] : memref<4x16x1xf32, #tpu.memory_space<vmem>>, vector<1x16x1xf32>
    %102 = vector.shape_cast %101 : vector<1x16x1xf32> to vector<16x1xf32>
    %103 = vector.broadcast %102 : vector<16x1xf32> to vector<16x512xf32>
    %104 = arith.addf %99, %103 : vector<16x512xf32>
    %105 = arith.negf %104 : vector<16x512xf32>
    %106 = math.exp %105 : vector<16x512xf32>
    %cst_105 = arith.constant 1.000000e+00 : f32
    %107 = vector.broadcast %cst_105 : f32 to vector<16x512xf32>
    %108 = arith.addf %107, %106 : vector<16x512xf32>
    %109 = arith.divf %107, %108 : vector<16x512xf32>
    %110 = arith.mulf %104, %109 : vector<16x512xf32>
    %c0_106 = arith.constant 0 : index
    %c128_107 = arith.constant 128 : index
    %111 = vector.load %arg14[%c0_106, %c128_107] : memref<16x768xf32, #tpu.memory_space<vmem>>, vector<16x512xf32>
    tpu.vector_store %arg14[%c0_106, %c128_107], %110 {strides = array<i32>} : memref<16x768xf32, #tpu.memory_space<vmem>>, vector<16x512xf32>,
    %c0_108 = arith.constant 0 : index
    %c111_109 = arith.constant 111 : index
    %112 = vector.load %arg14[%c0_108, %c111_109] : memref<16x768xf32, #tpu.memory_space<vmem>>, vector<16x512xf32>
    %c0_110 = arith.constant 0 : index
    %c0_111 = arith.constant 0 : index
    %113 = vector.load %arg3[%c0_110, %c0_111] : memref<9x512xf32, #tpu.memory_space<vmem>>, vector<1x512xf32>
    %114 = vector.broadcast %113 : vector<1x512xf32> to vector<16x512xf32>
    %115 = arith.mulf %112, %114 : vector<16x512xf32>
    %c0_112 = arith.constant 0 : index
    %c0_113 = arith.constant 0 : index
    %116 = vector.load %arg16[%c0_112, %c0_113] : memref<144x512xf32, #tpu.memory_space<vmem>>, vector<16x512xf32>
    tpu.vector_store %arg16[%c0_112, %c0_113], %115 {strides = array<i32>} : memref<144x512xf32, #tpu.memory_space<vmem>>, vector<16x512xf32>,
    %c0_114 = arith.constant 0 : index
    %c112_115 = arith.constant 112 : index
    %117 = vector.load %arg14[%c0_114, %c112_115] : memref<16x768xf32, #tpu.memory_space<vmem>>, vector<16x512xf32>
    %c1_116 = arith.constant 1 : index
    %c0_117 = arith.constant 0 : index
    %118 = vector.load %arg3[%c1_116, %c0_117] : memref<9x512xf32, #tpu.memory_space<vmem>>, vector<1x512xf32>
    %119 = vector.broadcast %118 : vector<1x512xf32> to vector<16x512xf32>
    %120 = arith.mulf %117, %119 : vector<16x512xf32>
    %c16_118 = arith.constant 16 : index
    %c0_119 = arith.constant 0 : index
    %121 = vector.load %arg16[%c16_118, %c0_119] : memref<144x512xf32, #tpu.memory_space<vmem>>, vector<16x512xf32>
    tpu.vector_store %arg16[%c16_118, %c0_119], %120 {strides = array<i32>} : memref<144x512xf32, #tpu.memory_space<vmem>>, vector<16x512xf32>,
    %c0_120 = arith.constant 0 : index
    %c113_121 = arith.constant 113 : index
    %122 = vector.load %arg14[%c0_120, %c113_121] : memref<16x768xf32, #tpu.memory_space<vmem>>, vector<16x512xf32>
    %c2_122 = arith.constant 2 : index
    %c0_123 = arith.constant 0 : index
    %123 = vector.load %arg3[%c2_122, %c0_123] : memref<9x512xf32, #tpu.memory_space<vmem>>, vector<1x512xf32>
    %124 = vector.broadcast %123 : vector<1x512xf32> to vector<16x512xf32>
    %125 = arith.mulf %122, %124 : vector<16x512xf32>
    %c32_124 = arith.constant 32 : index
    %c0_125 = arith.constant 0 : index
    %126 = vector.load %arg16[%c32_124, %c0_125] : memref<144x512xf32, #tpu.memory_space<vmem>>, vector<16x512xf32>
    tpu.vector_store %arg16[%c32_124, %c0_125], %125 {strides = array<i32>} : memref<144x512xf32, #tpu.memory_space<vmem>>, vector<16x512xf32>,
    %c0_126 = arith.constant 0 : index
    %c127_127 = arith.constant 127 : index
    %127 = vector.load %arg14[%c0_126, %c127_127] : memref<16x768xf32, #tpu.memory_space<vmem>>, vector<16x512xf32>
    %c3_128 = arith.constant 3 : index
    %c0_129 = arith.constant 0 : index
    %128 = vector.load %arg3[%c3_128, %c0_129] : memref<9x512xf32, #tpu.memory_space<vmem>>, vector<1x512xf32>
    %129 = vector.broadcast %128 : vector<1x512xf32> to vector<16x512xf32>
    %130 = arith.mulf %127, %129 : vector<16x512xf32>
    %c48 = arith.constant 48 : index
    %c0_130 = arith.constant 0 : index
    %131 = vector.load %arg16[%c48, %c0_130] : memref<144x512xf32, #tpu.memory_space<vmem>>, vector<16x512xf32>
    tpu.vector_store %arg16[%c48, %c0_130], %130 {strides = array<i32>} : memref<144x512xf32, #tpu.memory_space<vmem>>, vector<16x512xf32>,
    %c0_131 = arith.constant 0 : index
    %c128_132 = arith.constant 128 : index
    %132 = vector.load %arg14[%c0_131, %c128_132] : memref<16x768xf32, #tpu.memory_space<vmem>>, vector<16x512xf32>
    %c64 = arith.constant 64 : index
    %c0_133 = arith.constant 0 : index
    %133 = vector.load %arg16[%c64, %c0_133] : memref<144x512xf32, #tpu.memory_space<vmem>>, vector<16x512xf32>
    tpu.vector_store %arg16[%c64, %c0_133], %132 {strides = array<i32>} : memref<144x512xf32, #tpu.memory_space<vmem>>, vector<16x512xf32>,
    %c0_134 = arith.constant 0 : index
    %c129_135 = arith.constant 129 : index
    %134 = vector.load %arg14[%c0_134, %c129_135] : memref<16x768xf32, #tpu.memory_space<vmem>>, vector<16x512xf32>
    %c5_136 = arith.constant 5 : index
    %c0_137 = arith.constant 0 : index
    %135 = vector.load %arg3[%c5_136, %c0_137] : memref<9x512xf32, #tpu.memory_space<vmem>>, vector<1x512xf32>
    %136 = vector.broadcast %135 : vector<1x512xf32> to vector<16x512xf32>
    %137 = arith.mulf %134, %136 : vector<16x512xf32>
    %c80 = arith.constant 80 : index
    %c0_138 = arith.constant 0 : index
    %138 = vector.load %arg16[%c80, %c0_138] : memref<144x512xf32, #tpu.memory_space<vmem>>, vector<16x512xf32>
    tpu.vector_store %arg16[%c80, %c0_138], %137 {strides = array<i32>} : memref<144x512xf32, #tpu.memory_space<vmem>>, vector<16x512xf32>,
    %c0_139 = arith.constant 0 : index
    %c143_140 = arith.constant 143 : index
    %139 = vector.load %arg14[%c0_139, %c143_140] : memref<16x768xf32, #tpu.memory_space<vmem>>, vector<16x512xf32>
    %c6_141 = arith.constant 6 : index
    %c0_142 = arith.constant 0 : index
    %140 = vector.load %arg3[%c6_141, %c0_142] : memref<9x512xf32, #tpu.memory_space<vmem>>, vector<1x512xf32>
    %141 = vector.broadcast %140 : vector<1x512xf32> to vector<16x512xf32>
    %142 = arith.mulf %139, %141 : vector<16x512xf32>
    %c96 = arith.constant 96 : index
    %c0_143 = arith.constant 0 : index
    %143 = vector.load %arg16[%c96, %c0_143] : memref<144x512xf32, #tpu.memory_space<vmem>>, vector<16x512xf32>
    tpu.vector_store %arg16[%c96, %c0_143], %142 {strides = array<i32>} : memref<144x512xf32, #tpu.memory_space<vmem>>, vector<16x512xf32>,
    %c0_144 = arith.constant 0 : index
    %c144_145 = arith.constant 144 : index
    %144 = vector.load %arg14[%c0_144, %c144_145] : memref<16x768xf32, #tpu.memory_space<vmem>>, vector<16x512xf32>
    %c7_146 = arith.constant 7 : index
    %c0_147 = arith.constant 0 : index
    %145 = vector.load %arg3[%c7_146, %c0_147] : memref<9x512xf32, #tpu.memory_space<vmem>>, vector<1x512xf32>
    %146 = vector.broadcast %145 : vector<1x512xf32> to vector<16x512xf32>
    %147 = arith.mulf %144, %146 : vector<16x512xf32>
    %c112_148 = arith.constant 112 : index
    %c0_149 = arith.constant 0 : index
    %148 = vector.load %arg16[%c112_148, %c0_149] : memref<144x512xf32, #tpu.memory_space<vmem>>, vector<16x512xf32>
    tpu.vector_store %arg16[%c112_148, %c0_149], %147 {strides = array<i32>} : memref<144x512xf32, #tpu.memory_space<vmem>>, vector<16x512xf32>,
    %c0_150 = arith.constant 0 : index
    %c145_151 = arith.constant 145 : index
    %149 = vector.load %arg14[%c0_150, %c145_151] : memref<16x768xf32, #tpu.memory_space<vmem>>, vector<16x512xf32>
    %c8_152 = arith.constant 8 : index
    %c0_153 = arith.constant 0 : index
    %150 = vector.load %arg3[%c8_152, %c0_153] : memref<9x512xf32, #tpu.memory_space<vmem>>, vector<1x512xf32>
    %151 = vector.broadcast %150 : vector<1x512xf32> to vector<16x512xf32>
    %152 = arith.mulf %149, %151 : vector<16x512xf32>
    %c128_154 = arith.constant 128 : index
    %c0_155 = arith.constant 0 : index
    %153 = vector.load %arg16[%c128_154, %c0_155] : memref<144x512xf32, #tpu.memory_space<vmem>>, vector<16x512xf32>
    tpu.vector_store %arg16[%c128_154, %c0_155], %152 {strides = array<i32>} : memref<144x512xf32, #tpu.memory_space<vmem>>, vector<16x512xf32>,
    %c0_156 = arith.constant 0 : index
    %c0_157 = arith.constant 0 : index
    %154 = vector.load %arg8[%c0_156, %c0_157] : memref<4x144xf32, #tpu.memory_space<vmem>>, vector<4x144xf32>
    %c0_158 = arith.constant 0 : index
    %c0_159 = arith.constant 0 : index
    %155 = vector.load %arg16[%c0_158, %c0_159] : memref<144x512xf32, #tpu.memory_space<vmem>>, vector<144x512xf32>
    %cst_160 = arith.constant dense<0.000000e+00> : vector<4x512xf32>
    %156 = tpu.matmul %154, %155, %cst_160 {dimension_numbers = #tpu.dot_dimension_numbers<[1], [0], [0], [1], [0, 0, 1, 1], [], []>} : vector<4x144xf32>, vector<144x512xf32>, vector<4x512xf32> -> vector<4x512xf32>
    %c0_161 = arith.constant 0 : index
    %c0_162 = arith.constant 0 : index
    %157 = vector.load %arg9[%c0_161, %c0_162] : memref<4x1xf32, #tpu.memory_space<vmem>>, vector<4x1xf32>
    %158 = vector.broadcast %157 : vector<4x1xf32> to vector<4x512xf32>
    %159 = arith.addf %156, %158 : vector<4x512xf32>
    %160 = arith.index_cast %c0_i32 : i32 to index
    %161 = memref.load %arg1[%160] : memref<4xf32, #tpu.memory_space<smem>>
    %162 = vector.broadcast %161 : f32 to vector<4x512xf32>
    %163 = arith.mulf %162, %159 : vector<4x512xf32>
    %164 = arith.addf %53, %163 : vector<4x512xf32>
    %c1_i32 = arith.constant 1 : i32
    %c0_163 = arith.constant 0 : index
    %c128_164 = arith.constant 128 : index
    %165 = vector.load %arg13[%c0_163, %c128_164] : memref<4x768xf32, #tpu.memory_space<vmem>>, vector<4x512xf32>
    tpu.vector_store %arg13[%c0_163, %c128_164], %164 {strides = array<i32>} : memref<4x768xf32, #tpu.memory_space<vmem>>, vector<4x512xf32>,
    %c0_165 = arith.constant 0 : index
    %c111_166 = arith.constant 111 : index
    %166 = vector.load %arg13[%c0_165, %c111_166] : memref<4x768xf32, #tpu.memory_space<vmem>>, vector<4x512xf32>
    %c0_167 = arith.constant 0 : index
    %c0_168 = arith.constant 0 : index
    %167 = vector.load %arg3[%c0_167, %c0_168] : memref<9x512xf32, #tpu.memory_space<vmem>>, vector<1x512xf32>
    %168 = vector.broadcast %167 : vector<1x512xf32> to vector<4x512xf32>
    %169 = arith.mulf %166, %168 : vector<4x512xf32>
    %c0_169 = arith.constant 0 : index
    %c0_170 = arith.constant 0 : index
    %170 = vector.load %arg15[%c0_169, %c0_170] : memref<36x512xf32, #tpu.memory_space<vmem>>, vector<4x512xf32>
    tpu.vector_store %arg15[%c0_169, %c0_170], %169 {strides = array<i32>} : memref<36x512xf32, #tpu.memory_space<vmem>>, vector<4x512xf32>,
    %c0_171 = arith.constant 0 : index
    %c112_172 = arith.constant 112 : index
    %171 = vector.load %arg13[%c0_171, %c112_172] : memref<4x768xf32, #tpu.memory_space<vmem>>, vector<4x512xf32>
    %c1_173 = arith.constant 1 : index
    %c0_174 = arith.constant 0 : index
    %172 = vector.load %arg3[%c1_173, %c0_174] : memref<9x512xf32, #tpu.memory_space<vmem>>, vector<1x512xf32>
    %173 = vector.broadcast %172 : vector<1x512xf32> to vector<4x512xf32>
    %174 = arith.mulf %171, %173 : vector<4x512xf32>
    %c4_175 = arith.constant 4 : index
    %c0_176 = arith.constant 0 : index
    %175 = vector.load %arg15[%c4_175, %c0_176] : memref<36x512xf32, #tpu.memory_space<vmem>>, vector<4x512xf32>
    tpu.vector_store %arg15[%c4_175, %c0_176], %174 {strides = array<i32>} : memref<36x512xf32, #tpu.memory_space<vmem>>, vector<4x512xf32>,
    %c0_177 = arith.constant 0 : index
    %c113_178 = arith.constant 113 : index
    %176 = vector.load %arg13[%c0_177, %c113_178] : memref<4x768xf32, #tpu.memory_space<vmem>>, vector<4x512xf32>
    %c2_179 = arith.constant 2 : index
    %c0_180 = arith.constant 0 : index
    %177 = vector.load %arg3[%c2_179, %c0_180] : memref<9x512xf32, #tpu.memory_space<vmem>>, vector<1x512xf32>
    %178 = vector.broadcast %177 : vector<1x512xf32> to vector<4x512xf32>
    %179 = arith.mulf %176, %178 : vector<4x512xf32>
    %c8_181 = arith.constant 8 : index
    %c0_182 = arith.constant 0 : index
    %180 = vector.load %arg15[%c8_181, %c0_182] : memref<36x512xf32, #tpu.memory_space<vmem>>, vector<4x512xf32>
    tpu.vector_store %arg15[%c8_181, %c0_182], %179 {strides = array<i32>} : memref<36x512xf32, #tpu.memory_space<vmem>>, vector<4x512xf32>,
    %c0_183 = arith.constant 0 : index
    %c127_184 = arith.constant 127 : index
    %181 = vector.load %arg13[%c0_183, %c127_184] : memref<4x768xf32, #tpu.memory_space<vmem>>, vector<4x512xf32>
    %c3_185 = arith.constant 3 : index
    %c0_186 = arith.constant 0 : index
    %182 = vector.load %arg3[%c3_185, %c0_186] : memref<9x512xf32, #tpu.memory_space<vmem>>, vector<1x512xf32>
    %183 = vector.broadcast %182 : vector<1x512xf32> to vector<4x512xf32>
    %184 = arith.mulf %181, %183 : vector<4x512xf32>
    %c12_187 = arith.constant 12 : index
    %c0_188 = arith.constant 0 : index
    %185 = vector.load %arg15[%c12_187, %c0_188] : memref<36x512xf32, #tpu.memory_space<vmem>>, vector<4x512xf32>
    tpu.vector_store %arg15[%c12_187, %c0_188], %184 {strides = array<i32>} : memref<36x512xf32, #tpu.memory_space<vmem>>, vector<4x512xf32>,
    %c0_189 = arith.constant 0 : index
    %c128_190 = arith.constant 128 : index
    %186 = vector.load %arg13[%c0_189, %c128_190] : memref<4x768xf32, #tpu.memory_space<vmem>>, vector<4x512xf32>
    %c16_191 = arith.constant 16 : index
    %c0_192 = arith.constant 0 : index
    %187 = vector.load %arg15[%c16_191, %c0_192] : memref<36x512xf32, #tpu.memory_space<vmem>>, vector<4x512xf32>
    tpu.vector_store %arg15[%c16_191, %c0_192], %186 {strides = array<i32>} : memref<36x512xf32, #tpu.memory_space<vmem>>, vector<4x512xf32>,
    %c0_193 = arith.constant 0 : index
    %c129_194 = arith.constant 129 : index
    %188 = vector.load %arg13[%c0_193, %c129_194] : memref<4x768xf32, #tpu.memory_space<vmem>>, vector<4x512xf32>
    %c5_195 = arith.constant 5 : index
    %c0_196 = arith.constant 0 : index
    %189 = vector.load %arg3[%c5_195, %c0_196] : memref<9x512xf32, #tpu.memory_space<vmem>>, vector<1x512xf32>
    %190 = vector.broadcast %189 : vector<1x512xf32> to vector<4x512xf32>
    %191 = arith.mulf %188, %190 : vector<4x512xf32>
    %c20_197 = arith.constant 20 : index
    %c0_198 = arith.constant 0 : index
    %192 = vector.load %arg15[%c20_197, %c0_198] : memref<36x512xf32, #tpu.memory_space<vmem>>, vector<4x512xf32>
    tpu.vector_store %arg15[%c20_197, %c0_198], %191 {strides = array<i32>} : memref<36x512xf32, #tpu.memory_space<vmem>>, vector<4x512xf32>,
    %c0_199 = arith.constant 0 : index
    %c143_200 = arith.constant 143 : index
    %193 = vector.load %arg13[%c0_199, %c143_200] : memref<4x768xf32, #tpu.memory_space<vmem>>, vector<4x512xf32>
    %c6_201 = arith.constant 6 : index
    %c0_202 = arith.constant 0 : index
    %194 = vector.load %arg3[%c6_201, %c0_202] : memref<9x512xf32, #tpu.memory_space<vmem>>, vector<1x512xf32>
    %195 = vector.broadcast %194 : vector<1x512xf32> to vector<4x512xf32>
    %196 = arith.mulf %193, %195 : vector<4x512xf32>
    %c24_203 = arith.constant 24 : index
    %c0_204 = arith.constant 0 : index
    %197 = vector.load %arg15[%c24_203, %c0_204] : memref<36x512xf32, #tpu.memory_space<vmem>>, vector<4x512xf32>
    tpu.vector_store %arg15[%c24_203, %c0_204], %196 {strides = array<i32>} : memref<36x512xf32, #tpu.memory_space<vmem>>, vector<4x512xf32>,
    %c0_205 = arith.constant 0 : index
    %c144_206 = arith.constant 144 : index
    %198 = vector.load %arg13[%c0_205, %c144_206] : memref<4x768xf32, #tpu.memory_space<vmem>>, vector<4x512xf32>
    %c7_207 = arith.constant 7 : index
    %c0_208 = arith.constant 0 : index
    %199 = vector.load %arg3[%c7_207, %c0_208] : memref<9x512xf32, #tpu.memory_space<vmem>>, vector<1x512xf32>
    %200 = vector.broadcast %199 : vector<1x512xf32> to vector<4x512xf32>
    %201 = arith.mulf %198, %200 : vector<4x512xf32>
    %c28_209 = arith.constant 28 : index
    %c0_210 = arith.constant 0 : index
    %202 = vector.load %arg15[%c28_209, %c0_210] : memref<36x512xf32, #tpu.memory_space<vmem>>, vector<4x512xf32>
    tpu.vector_store %arg15[%c28_209, %c0_210], %201 {strides = array<i32>} : memref<36x512xf32, #tpu.memory_space<vmem>>, vector<4x512xf32>,
    %c0_211 = arith.constant 0 : index
    %c145_212 = arith.constant 145 : index
    %203 = vector.load %arg13[%c0_211, %c145_212] : memref<4x768xf32, #tpu.memory_space<vmem>>, vector<4x512xf32>
    %c8_213 = arith.constant 8 : index
    %c0_214 = arith.constant 0 : index
    %204 = vector.load %arg3[%c8_213, %c0_214] : memref<9x512xf32, #tpu.memory_space<vmem>>, vector<1x512xf32>
    %205 = vector.broadcast %204 : vector<1x512xf32> to vector<4x512xf32>
    %206 = arith.mulf %203, %205 : vector<4x512xf32>
    %c32_215 = arith.constant 32 : index
    %c0_216 = arith.constant 0 : index
    %207 = vector.load %arg15[%c32_215, %c0_216] : memref<36x512xf32, #tpu.memory_space<vmem>>, vector<4x512xf32>
    tpu.vector_store %arg15[%c32_215, %c0_216], %206 {strides = array<i32>} : memref<36x512xf32, #tpu.memory_space<vmem>>, vector<4x512xf32>,
    %c0_217 = arith.constant 0 : index
    %c0_218 = arith.constant 0 : index
    %208 = vector.load %arg6[%c0_217, %c0_218] : memref<16x36xf32, #tpu.memory_space<vmem>>, vector<16x36xf32>
    %c0_219 = arith.constant 0 : index
    %c0_220 = arith.constant 0 : index
    %209 = vector.load %arg15[%c0_219, %c0_220] : memref<36x512xf32, #tpu.memory_space<vmem>>, vector<36x512xf32>
    %cst_221 = arith.constant dense<0.000000e+00> : vector<16x512xf32>
    %210 = tpu.matmul %208, %209, %cst_221 {dimension_numbers = #tpu.dot_dimension_numbers<[1], [0], [0], [1], [0, 0, 1, 1], [], []>} : vector<16x36xf32>, vector<36x512xf32>, vector<16x512xf32> -> vector<16x512xf32>
    %211 = arith.index_cast %c1_i32 : i32 to index
    %c0_222 = arith.constant 0 : index
    %c0_223 = arith.constant 0 : index
    %212 = vector.load %arg7[%211, %c0_222, %c0_223] : memref<4x16x1xf32, #tpu.memory_space<vmem>>, vector<1x16x1xf32>
    %213 = vector.shape_cast %212 : vector<1x16x1xf32> to vector<16x1xf32>
    %214 = vector.broadcast %213 : vector<16x1xf32> to vector<16x512xf32>
    %215 = arith.addf %210, %214 : vector<16x512xf32>
    %216 = arith.negf %215 : vector<16x512xf32>
    %217 = math.exp %216 : vector<16x512xf32>
    %cst_224 = arith.constant 1.000000e+00 : f32
    %218 = vector.broadcast %cst_224 : f32 to vector<16x512xf32>
    %219 = arith.addf %218, %217 : vector<16x512xf32>
    %220 = arith.divf %218, %219 : vector<16x512xf32>
    %221 = arith.mulf %215, %220 : vector<16x512xf32>
    %c0_225 = arith.constant 0 : index
    %c128_226 = arith.constant 128 : index
    %222 = vector.load %arg14[%c0_225, %c128_226] : memref<16x768xf32, #tpu.memory_space<vmem>>, vector<16x512xf32>
    tpu.vector_store %arg14[%c0_225, %c128_226], %221 {strides = array<i32>} : memref<16x768xf32, #tpu.memory_space<vmem>>, vector<16x512xf32>,
    %c0_227 = arith.constant 0 : index
    %c111_228 = arith.constant 111 : index
    %223 = vector.load %arg14[%c0_227, %c111_228] : memref<16x768xf32, #tpu.memory_space<vmem>>, vector<16x512xf32>
    %c0_229 = arith.constant 0 : index
    %c0_230 = arith.constant 0 : index
    %224 = vector.load %arg3[%c0_229, %c0_230] : memref<9x512xf32, #tpu.memory_space<vmem>>, vector<1x512xf32>
    %225 = vector.broadcast %224 : vector<1x512xf32> to vector<16x512xf32>
    %226 = arith.mulf %223, %225 : vector<16x512xf32>
    %c0_231 = arith.constant 0 : index
    %c0_232 = arith.constant 0 : index
    %227 = vector.load %arg16[%c0_231, %c0_232] : memref<144x512xf32, #tpu.memory_space<vmem>>, vector<16x512xf32>
    tpu.vector_store %arg16[%c0_231, %c0_232], %226 {strides = array<i32>} : memref<144x512xf32, #tpu.memory_space<vmem>>, vector<16x512xf32>,
    %c0_233 = arith.constant 0 : index
    %c112_234 = arith.constant 112 : index
    %228 = vector.load %arg14[%c0_233, %c112_234] : memref<16x768xf32, #tpu.memory_space<vmem>>, vector<16x512xf32>
    %c1_235 = arith.constant 1 : index
    %c0_236 = arith.constant 0 : index
    %229 = vector.load %arg3[%c1_235, %c0_236] : memref<9x512xf32, #tpu.memory_space<vmem>>, vector<1x512xf32>
    %230 = vector.broadcast %229 : vector<1x512xf32> to vector<16x512xf32>
    %231 = arith.mulf %228, %230 : vector<16x512xf32>
    %c16_237 = arith.constant 16 : index
    %c0_238 = arith.constant 0 : index
    %232 = vector.load %arg16[%c16_237, %c0_238] : memref<144x512xf32, #tpu.memory_space<vmem>>, vector<16x512xf32>
    tpu.vector_store %arg16[%c16_237, %c0_238], %231 {strides = array<i32>} : memref<144x512xf32, #tpu.memory_space<vmem>>, vector<16x512xf32>,
    %c0_239 = arith.constant 0 : index
    %c113_240 = arith.constant 113 : index
    %233 = vector.load %arg14[%c0_239, %c113_240] : memref<16x768xf32, #tpu.memory_space<vmem>>, vector<16x512xf32>
    %c2_241 = arith.constant 2 : index
    %c0_242 = arith.constant 0 : index
    %234 = vector.load %arg3[%c2_241, %c0_242] : memref<9x512xf32, #tpu.memory_space<vmem>>, vector<1x512xf32>
    %235 = vector.broadcast %234 : vector<1x512xf32> to vector<16x512xf32>
    %236 = arith.mulf %233, %235 : vector<16x512xf32>
    %c32_243 = arith.constant 32 : index
    %c0_244 = arith.constant 0 : index
    %237 = vector.load %arg16[%c32_243, %c0_244] : memref<144x512xf32, #tpu.memory_space<vmem>>, vector<16x512xf32>
    tpu.vector_store %arg16[%c32_243, %c0_244], %236 {strides = array<i32>} : memref<144x512xf32, #tpu.memory_space<vmem>>, vector<16x512xf32>,
    %c0_245 = arith.constant 0 : index
    %c127_246 = arith.constant 127 : index
    %238 = vector.load %arg14[%c0_245, %c127_246] : memref<16x768xf32, #tpu.memory_space<vmem>>, vector<16x512xf32>
    %c3_247 = arith.constant 3 : index
    %c0_248 = arith.constant 0 : index
    %239 = vector.load %arg3[%c3_247, %c0_248] : memref<9x512xf32, #tpu.memory_space<vmem>>, vector<1x512xf32>
    %240 = vector.broadcast %239 : vector<1x512xf32> to vector<16x512xf32>
    %241 = arith.mulf %238, %240 : vector<16x512xf32>
    %c48_249 = arith.constant 48 : index
    %c0_250 = arith.constant 0 : index
    %242 = vector.load %arg16[%c48_249, %c0_250] : memref<144x512xf32, #tpu.memory_space<vmem>>, vector<16x512xf32>
    tpu.vector_store %arg16[%c48_249, %c0_250], %241 {strides = array<i32>} : memref<144x512xf32, #tpu.memory_space<vmem>>, vector<16x512xf32>,
    %c0_251 = arith.constant 0 : index
    %c128_252 = arith.constant 128 : index
    %243 = vector.load %arg14[%c0_251, %c128_252] : memref<16x768xf32, #tpu.memory_space<vmem>>, vector<16x512xf32>
    %c64_253 = arith.constant 64 : index
    %c0_254 = arith.constant 0 : index
    %244 = vector.load %arg16[%c64_253, %c0_254] : memref<144x512xf32, #tpu.memory_space<vmem>>, vector<16x512xf32>
    tpu.vector_store %arg16[%c64_253, %c0_254], %243 {strides = array<i32>} : memref<144x512xf32, #tpu.memory_space<vmem>>, vector<16x512xf32>,
    %c0_255 = arith.constant 0 : index
    %c129_256 = arith.constant 129 : index
    %245 = vector.load %arg14[%c0_255, %c129_256] : memref<16x768xf32, #tpu.memory_space<vmem>>, vector<16x512xf32>
    %c5_257 = arith.constant 5 : index
    %c0_258 = arith.constant 0 : index
    %246 = vector.load %arg3[%c5_257, %c0_258] : memref<9x512xf32, #tpu.memory_space<vmem>>, vector<1x512xf32>
    %247 = vector.broadcast %246 : vector<1x512xf32> to vector<16x512xf32>
    %248 = arith.mulf %245, %247 : vector<16x512xf32>
    %c80_259 = arith.constant 80 : index
    %c0_260 = arith.constant 0 : index
    %249 = vector.load %arg16[%c80_259, %c0_260] : memref<144x512xf32, #tpu.memory_space<vmem>>, vector<16x512xf32>
    tpu.vector_store %arg16[%c80_259, %c0_260], %248 {strides = array<i32>} : memref<144x512xf32, #tpu.memory_space<vmem>>, vector<16x512xf32>,
    %c0_261 = arith.constant 0 : index
    %c143_262 = arith.constant 143 : index
    %250 = vector.load %arg14[%c0_261, %c143_262] : memref<16x768xf32, #tpu.memory_space<vmem>>, vector<16x512xf32>
    %c6_263 = arith.constant 6 : index
    %c0_264 = arith.constant 0 : index
    %251 = vector.load %arg3[%c6_263, %c0_264] : memref<9x512xf32, #tpu.memory_space<vmem>>, vector<1x512xf32>
    %252 = vector.broadcast %251 : vector<1x512xf32> to vector<16x512xf32>
    %253 = arith.mulf %250, %252 : vector<16x512xf32>
    %c96_265 = arith.constant 96 : index
    %c0_266 = arith.constant 0 : index
    %254 = vector.load %arg16[%c96_265, %c0_266] : memref<144x512xf32, #tpu.memory_space<vmem>>, vector<16x512xf32>
    tpu.vector_store %arg16[%c96_265, %c0_266], %253 {strides = array<i32>} : memref<144x512xf32, #tpu.memory_space<vmem>>, vector<16x512xf32>,
    %c0_267 = arith.constant 0 : index
    %c144_268 = arith.constant 144 : index
    %255 = vector.load %arg14[%c0_267, %c144_268] : memref<16x768xf32, #tpu.memory_space<vmem>>, vector<16x512xf32>
    %c7_269 = arith.constant 7 : index
    %c0_270 = arith.constant 0 : index
    %256 = vector.load %arg3[%c7_269, %c0_270] : memref<9x512xf32, #tpu.memory_space<vmem>>, vector<1x512xf32>
    %257 = vector.broadcast %256 : vector<1x512xf32> to vector<16x512xf32>
    %258 = arith.mulf %255, %257 : vector<16x512xf32>
    %c112_271 = arith.constant 112 : index
    %c0_272 = arith.constant 0 : index
    %259 = vector.load %arg16[%c112_271, %c0_272] : memref<144x512xf32, #tpu.memory_space<vmem>>, vector<16x512xf32>
    tpu.vector_store %arg16[%c112_271, %c0_272], %258 {strides = array<i32>} : memref<144x512xf32, #tpu.memory_space<vmem>>, vector<16x512xf32>,
    %c0_273 = arith.constant 0 : index
    %c145_274 = arith.constant 145 : index
    %260 = vector.load %arg14[%c0_273, %c145_274] : memref<16x768xf32, #tpu.memory_space<vmem>>, vector<16x512xf32>
    %c8_275 = arith.constant 8 : index
    %c0_276 = arith.constant 0 : index
    %261 = vector.load %arg3[%c8_275, %c0_276] : memref<9x512xf32, #tpu.memory_space<vmem>>, vector<1x512xf32>
    %262 = vector.broadcast %261 : vector<1x512xf32> to vector<16x512xf32>
    %263 = arith.mulf %260, %262 : vector<16x512xf32>
    %c128_277 = arith.constant 128 : index
    %c0_278 = arith.constant 0 : index
    %264 = vector.load %arg16[%c128_277, %c0_278] : memref<144x512xf32, #tpu.memory_space<vmem>>, vector<16x512xf32>
    tpu.vector_store %arg16[%c128_277, %c0_278], %263 {strides = array<i32>} : memref<144x512xf32, #tpu.memory_space<vmem>>, vector<16x512xf32>,
    %c0_279 = arith.constant 0 : index
    %c0_280 = arith.constant 0 : index
    %265 = vector.load %arg8[%c0_279, %c0_280] : memref<4x144xf32, #tpu.memory_space<vmem>>, vector<4x144xf32>
    %c0_281 = arith.constant 0 : index
    %c0_282 = arith.constant 0 : index
    %266 = vector.load %arg16[%c0_281, %c0_282] : memref<144x512xf32, #tpu.memory_space<vmem>>, vector<144x512xf32>
    %cst_283 = arith.constant dense<0.000000e+00> : vector<4x512xf32>
    %267 = tpu.matmul %265, %266, %cst_283 {dimension_numbers = #tpu.dot_dimension_numbers<[1], [0], [0], [1], [0, 0, 1, 1], [], []>} : vector<4x144xf32>, vector<144x512xf32>, vector<4x512xf32> -> vector<4x512xf32>
    %c0_284 = arith.constant 0 : index
    %c0_285 = arith.constant 0 : index
    %268 = vector.load %arg9[%c0_284, %c0_285] : memref<4x1xf32, #tpu.memory_space<vmem>>, vector<4x1xf32>
    %269 = vector.broadcast %268 : vector<4x1xf32> to vector<4x512xf32>
    %270 = arith.addf %267, %269 : vector<4x512xf32>
    %271 = arith.index_cast %c1_i32 : i32 to index
    %272 = memref.load %arg1[%271] : memref<4xf32, #tpu.memory_space<smem>>
    %273 = vector.broadcast %272 : f32 to vector<4x512xf32>
    %274 = arith.mulf %273, %270 : vector<4x512xf32>
    %275 = arith.addf %164, %274 : vector<4x512xf32>
    %c2_i32 = arith.constant 2 : i32
    %c0_286 = arith.constant 0 : index
    %c128_287 = arith.constant 128 : index
    %276 = vector.load %arg13[%c0_286, %c128_287] : memref<4x768xf32, #tpu.memory_space<vmem>>, vector<4x512xf32>
    tpu.vector_store %arg13[%c0_286, %c128_287], %275 {strides = array<i32>} : memref<4x768xf32, #tpu.memory_space<vmem>>, vector<4x512xf32>,
    %c0_288 = arith.constant 0 : index
    %c111_289 = arith.constant 111 : index
    %277 = vector.load %arg13[%c0_288, %c111_289] : memref<4x768xf32, #tpu.memory_space<vmem>>, vector<4x512xf32>
    %c0_290 = arith.constant 0 : index
    %c0_291 = arith.constant 0 : index
    %278 = vector.load %arg3[%c0_290, %c0_291] : memref<9x512xf32, #tpu.memory_space<vmem>>, vector<1x512xf32>
    %279 = vector.broadcast %278 : vector<1x512xf32> to vector<4x512xf32>
    %280 = arith.mulf %277, %279 : vector<4x512xf32>
    %c0_292 = arith.constant 0 : index
    %c0_293 = arith.constant 0 : index
    %281 = vector.load %arg15[%c0_292, %c0_293] : memref<36x512xf32, #tpu.memory_space<vmem>>, vector<4x512xf32>
    tpu.vector_store %arg15[%c0_292, %c0_293], %280 {strides = array<i32>} : memref<36x512xf32, #tpu.memory_space<vmem>>, vector<4x512xf32>,
    %c0_294 = arith.constant 0 : index
    %c112_295 = arith.constant 112 : index
    %282 = vector.load %arg13[%c0_294, %c112_295] : memref<4x768xf32, #tpu.memory_space<vmem>>, vector<4x512xf32>
    %c1_296 = arith.constant 1 : index
    %c0_297 = arith.constant 0 : index
    %283 = vector.load %arg3[%c1_296, %c0_297] : memref<9x512xf32, #tpu.memory_space<vmem>>, vector<1x512xf32>
    %284 = vector.broadcast %283 : vector<1x512xf32> to vector<4x512xf32>
    %285 = arith.mulf %282, %284 : vector<4x512xf32>
    %c4_298 = arith.constant 4 : index
    %c0_299 = arith.constant 0 : index
    %286 = vector.load %arg15[%c4_298, %c0_299] : memref<36x512xf32, #tpu.memory_space<vmem>>, vector<4x512xf32>
    tpu.vector_store %arg15[%c4_298, %c0_299], %285 {strides = array<i32>} : memref<36x512xf32, #tpu.memory_space<vmem>>, vector<4x512xf32>,
    %c0_300 = arith.constant 0 : index
    %c113_301 = arith.constant 113 : index
    %287 = vector.load %arg13[%c0_300, %c113_301] : memref<4x768xf32, #tpu.memory_space<vmem>>, vector<4x512xf32>
    %c2_302 = arith.constant 2 : index
    %c0_303 = arith.constant 0 : index
    %288 = vector.load %arg3[%c2_302, %c0_303] : memref<9x512xf32, #tpu.memory_space<vmem>>, vector<1x512xf32>
    %289 = vector.broadcast %288 : vector<1x512xf32> to vector<4x512xf32>
    %290 = arith.mulf %287, %289 : vector<4x512xf32>
    %c8_304 = arith.constant 8 : index
    %c0_305 = arith.constant 0 : index
    %291 = vector.load %arg15[%c8_304, %c0_305] : memref<36x512xf32, #tpu.memory_space<vmem>>, vector<4x512xf32>
    tpu.vector_store %arg15[%c8_304, %c0_305], %290 {strides = array<i32>} : memref<36x512xf32, #tpu.memory_space<vmem>>, vector<4x512xf32>,
    %c0_306 = arith.constant 0 : index
    %c127_307 = arith.constant 127 : index
    %292 = vector.load %arg13[%c0_306, %c127_307] : memref<4x768xf32, #tpu.memory_space<vmem>>, vector<4x512xf32>
    %c3_308 = arith.constant 3 : index
    %c0_309 = arith.constant 0 : index
    %293 = vector.load %arg3[%c3_308, %c0_309] : memref<9x512xf32, #tpu.memory_space<vmem>>, vector<1x512xf32>
    %294 = vector.broadcast %293 : vector<1x512xf32> to vector<4x512xf32>
    %295 = arith.mulf %292, %294 : vector<4x512xf32>
    %c12_310 = arith.constant 12 : index
    %c0_311 = arith.constant 0 : index
    %296 = vector.load %arg15[%c12_310, %c0_311] : memref<36x512xf32, #tpu.memory_space<vmem>>, vector<4x512xf32>
    tpu.vector_store %arg15[%c12_310, %c0_311], %295 {strides = array<i32>} : memref<36x512xf32, #tpu.memory_space<vmem>>, vector<4x512xf32>,
    %c0_312 = arith.constant 0 : index
    %c128_313 = arith.constant 128 : index
    %297 = vector.load %arg13[%c0_312, %c128_313] : memref<4x768xf32, #tpu.memory_space<vmem>>, vector<4x512xf32>
    %c16_314 = arith.constant 16 : index
    %c0_315 = arith.constant 0 : index
    %298 = vector.load %arg15[%c16_314, %c0_315] : memref<36x512xf32, #tpu.memory_space<vmem>>, vector<4x512xf32>
    tpu.vector_store %arg15[%c16_314, %c0_315], %297 {strides = array<i32>} : memref<36x512xf32, #tpu.memory_space<vmem>>, vector<4x512xf32>,
    %c0_316 = arith.constant 0 : index
    %c129_317 = arith.constant 129 : index
    %299 = vector.load %arg13[%c0_316, %c129_317] : memref<4x768xf32, #tpu.memory_space<vmem>>, vector<4x512xf32>
    %c5_318 = arith.constant 5 : index
    %c0_319 = arith.constant 0 : index
    %300 = vector.load %arg3[%c5_318, %c0_319] : memref<9x512xf32, #tpu.memory_space<vmem>>, vector<1x512xf32>
    %301 = vector.broadcast %300 : vector<1x512xf32> to vector<4x512xf32>
    %302 = arith.mulf %299, %301 : vector<4x512xf32>
    %c20_320 = arith.constant 20 : index
    %c0_321 = arith.constant 0 : index
    %303 = vector.load %arg15[%c20_320, %c0_321] : memref<36x512xf32, #tpu.memory_space<vmem>>, vector<4x512xf32>
    tpu.vector_store %arg15[%c20_320, %c0_321], %302 {strides = array<i32>} : memref<36x512xf32, #tpu.memory_space<vmem>>, vector<4x512xf32>,
    %c0_322 = arith.constant 0 : index
    %c143_323 = arith.constant 143 : index
    %304 = vector.load %arg13[%c0_322, %c143_323] : memref<4x768xf32, #tpu.memory_space<vmem>>, vector<4x512xf32>
    %c6_324 = arith.constant 6 : index
    %c0_325 = arith.constant 0 : index
    %305 = vector.load %arg3[%c6_324, %c0_325] : memref<9x512xf32, #tpu.memory_space<vmem>>, vector<1x512xf32>
    %306 = vector.broadcast %305 : vector<1x512xf32> to vector<4x512xf32>
    %307 = arith.mulf %304, %306 : vector<4x512xf32>
    %c24_326 = arith.constant 24 : index
    %c0_327 = arith.constant 0 : index
    %308 = vector.load %arg15[%c24_326, %c0_327] : memref<36x512xf32, #tpu.memory_space<vmem>>, vector<4x512xf32>
    tpu.vector_store %arg15[%c24_326, %c0_327], %307 {strides = array<i32>} : memref<36x512xf32, #tpu.memory_space<vmem>>, vector<4x512xf32>,
    %c0_328 = arith.constant 0 : index
    %c144_329 = arith.constant 144 : index
    %309 = vector.load %arg13[%c0_328, %c144_329] : memref<4x768xf32, #tpu.memory_space<vmem>>, vector<4x512xf32>
    %c7_330 = arith.constant 7 : index
    %c0_331 = arith.constant 0 : index
    %310 = vector.load %arg3[%c7_330, %c0_331] : memref<9x512xf32, #tpu.memory_space<vmem>>, vector<1x512xf32>
    %311 = vector.broadcast %310 : vector<1x512xf32> to vector<4x512xf32>
    %312 = arith.mulf %309, %311 : vector<4x512xf32>
    %c28_332 = arith.constant 28 : index
    %c0_333 = arith.constant 0 : index
    %313 = vector.load %arg15[%c28_332, %c0_333] : memref<36x512xf32, #tpu.memory_space<vmem>>, vector<4x512xf32>
    tpu.vector_store %arg15[%c28_332, %c0_333], %312 {strides = array<i32>} : memref<36x512xf32, #tpu.memory_space<vmem>>, vector<4x512xf32>,
    %c0_334 = arith.constant 0 : index
    %c145_335 = arith.constant 145 : index
    %314 = vector.load %arg13[%c0_334, %c145_335] : memref<4x768xf32, #tpu.memory_space<vmem>>, vector<4x512xf32>
    %c8_336 = arith.constant 8 : index
    %c0_337 = arith.constant 0 : index
    %315 = vector.load %arg3[%c8_336, %c0_337] : memref<9x512xf32, #tpu.memory_space<vmem>>, vector<1x512xf32>
    %316 = vector.broadcast %315 : vector<1x512xf32> to vector<4x512xf32>
    %317 = arith.mulf %314, %316 : vector<4x512xf32>
    %c32_338 = arith.constant 32 : index
    %c0_339 = arith.constant 0 : index
    %318 = vector.load %arg15[%c32_338, %c0_339] : memref<36x512xf32, #tpu.memory_space<vmem>>, vector<4x512xf32>
    tpu.vector_store %arg15[%c32_338, %c0_339], %317 {strides = array<i32>} : memref<36x512xf32, #tpu.memory_space<vmem>>, vector<4x512xf32>,
    %c0_340 = arith.constant 0 : index
    %c0_341 = arith.constant 0 : index
    %319 = vector.load %arg6[%c0_340, %c0_341] : memref<16x36xf32, #tpu.memory_space<vmem>>, vector<16x36xf32>
    %c0_342 = arith.constant 0 : index
    %c0_343 = arith.constant 0 : index
    %320 = vector.load %arg15[%c0_342, %c0_343] : memref<36x512xf32, #tpu.memory_space<vmem>>, vector<36x512xf32>
    %cst_344 = arith.constant dense<0.000000e+00> : vector<16x512xf32>
    %321 = tpu.matmul %319, %320, %cst_344 {dimension_numbers = #tpu.dot_dimension_numbers<[1], [0], [0], [1], [0, 0, 1, 1], [], []>} : vector<16x36xf32>, vector<36x512xf32>, vector<16x512xf32> -> vector<16x512xf32>
    %322 = arith.index_cast %c2_i32 : i32 to index
    %c0_345 = arith.constant 0 : index
    %c0_346 = arith.constant 0 : index
    %323 = vector.load %arg7[%322, %c0_345, %c0_346] : memref<4x16x1xf32, #tpu.memory_space<vmem>>, vector<1x16x1xf32>
    %324 = vector.shape_cast %323 : vector<1x16x1xf32> to vector<16x1xf32>
    %325 = vector.broadcast %324 : vector<16x1xf32> to vector<16x512xf32>
    %326 = arith.addf %321, %325 : vector<16x512xf32>
    %327 = arith.negf %326 : vector<16x512xf32>
    %328 = math.exp %327 : vector<16x512xf32>
    %cst_347 = arith.constant 1.000000e+00 : f32
    %329 = vector.broadcast %cst_347 : f32 to vector<16x512xf32>
    %330 = arith.addf %329, %328 : vector<16x512xf32>
    %331 = arith.divf %329, %330 : vector<16x512xf32>
    %332 = arith.mulf %326, %331 : vector<16x512xf32>
    %c0_348 = arith.constant 0 : index
    %c128_349 = arith.constant 128 : index
    %333 = vector.load %arg14[%c0_348, %c128_349] : memref<16x768xf32, #tpu.memory_space<vmem>>, vector<16x512xf32>
    tpu.vector_store %arg14[%c0_348, %c128_349], %332 {strides = array<i32>} : memref<16x768xf32, #tpu.memory_space<vmem>>, vector<16x512xf32>,
    %c0_350 = arith.constant 0 : index
    %c111_351 = arith.constant 111 : index
    %334 = vector.load %arg14[%c0_350, %c111_351] : memref<16x768xf32, #tpu.memory_space<vmem>>, vector<16x512xf32>
    %c0_352 = arith.constant 0 : index
    %c0_353 = arith.constant 0 : index
    %335 = vector.load %arg3[%c0_352, %c0_353] : memref<9x512xf32, #tpu.memory_space<vmem>>, vector<1x512xf32>
    %336 = vector.broadcast %335 : vector<1x512xf32> to vector<16x512xf32>
    %337 = arith.mulf %334, %336 : vector<16x512xf32>
    %c0_354 = arith.constant 0 : index
    %c0_355 = arith.constant 0 : index
    %338 = vector.load %arg16[%c0_354, %c0_355] : memref<144x512xf32, #tpu.memory_space<vmem>>, vector<16x512xf32>
    tpu.vector_store %arg16[%c0_354, %c0_355], %337 {strides = array<i32>} : memref<144x512xf32, #tpu.memory_space<vmem>>, vector<16x512xf32>,
    %c0_356 = arith.constant 0 : index
    %c112_357 = arith.constant 112 : index
    %339 = vector.load %arg14[%c0_356, %c112_357] : memref<16x768xf32, #tpu.memory_space<vmem>>, vector<16x512xf32>
    %c1_358 = arith.constant 1 : index
    %c0_359 = arith.constant 0 : index
    %340 = vector.load %arg3[%c1_358, %c0_359] : memref<9x512xf32, #tpu.memory_space<vmem>>, vector<1x512xf32>
    %341 = vector.broadcast %340 : vector<1x512xf32> to vector<16x512xf32>
    %342 = arith.mulf %339, %341 : vector<16x512xf32>
    %c16_360 = arith.constant 16 : index
    %c0_361 = arith.constant 0 : index
    %343 = vector.load %arg16[%c16_360, %c0_361] : memref<144x512xf32, #tpu.memory_space<vmem>>, vector<16x512xf32>
    tpu.vector_store %arg16[%c16_360, %c0_361], %342 {strides = array<i32>} : memref<144x512xf32, #tpu.memory_space<vmem>>, vector<16x512xf32>,
    %c0_362 = arith.constant 0 : index
    %c113_363 = arith.constant 113 : index
    %344 = vector.load %arg14[%c0_362, %c113_363] : memref<16x768xf32, #tpu.memory_space<vmem>>, vector<16x512xf32>
    %c2_364 = arith.constant 2 : index
    %c0_365 = arith.constant 0 : index
    %345 = vector.load %arg3[%c2_364, %c0_365] : memref<9x512xf32, #tpu.memory_space<vmem>>, vector<1x512xf32>
    %346 = vector.broadcast %345 : vector<1x512xf32> to vector<16x512xf32>
    %347 = arith.mulf %344, %346 : vector<16x512xf32>
    %c32_366 = arith.constant 32 : index
    %c0_367 = arith.constant 0 : index
    %348 = vector.load %arg16[%c32_366, %c0_367] : memref<144x512xf32, #tpu.memory_space<vmem>>, vector<16x512xf32>
    tpu.vector_store %arg16[%c32_366, %c0_367], %347 {strides = array<i32>} : memref<144x512xf32, #tpu.memory_space<vmem>>, vector<16x512xf32>,
    %c0_368 = arith.constant 0 : index
    %c127_369 = arith.constant 127 : index
    %349 = vector.load %arg14[%c0_368, %c127_369] : memref<16x768xf32, #tpu.memory_space<vmem>>, vector<16x512xf32>
    %c3_370 = arith.constant 3 : index
    %c0_371 = arith.constant 0 : index
    %350 = vector.load %arg3[%c3_370, %c0_371] : memref<9x512xf32, #tpu.memory_space<vmem>>, vector<1x512xf32>
    %351 = vector.broadcast %350 : vector<1x512xf32> to vector<16x512xf32>
    %352 = arith.mulf %349, %351 : vector<16x512xf32>
    %c48_372 = arith.constant 48 : index
    %c0_373 = arith.constant 0 : index
    %353 = vector.load %arg16[%c48_372, %c0_373] : memref<144x512xf32, #tpu.memory_space<vmem>>, vector<16x512xf32>
    tpu.vector_store %arg16[%c48_372, %c0_373], %352 {strides = array<i32>} : memref<144x512xf32, #tpu.memory_space<vmem>>, vector<16x512xf32>,
    %c0_374 = arith.constant 0 : index
    %c128_375 = arith.constant 128 : index
    %354 = vector.load %arg14[%c0_374, %c128_375] : memref<16x768xf32, #tpu.memory_space<vmem>>, vector<16x512xf32>
    %c64_376 = arith.constant 64 : index
    %c0_377 = arith.constant 0 : index
    %355 = vector.load %arg16[%c64_376, %c0_377] : memref<144x512xf32, #tpu.memory_space<vmem>>, vector<16x512xf32>
    tpu.vector_store %arg16[%c64_376, %c0_377], %354 {strides = array<i32>} : memref<144x512xf32, #tpu.memory_space<vmem>>, vector<16x512xf32>,
    %c0_378 = arith.constant 0 : index
    %c129_379 = arith.constant 129 : index
    %356 = vector.load %arg14[%c0_378, %c129_379] : memref<16x768xf32, #tpu.memory_space<vmem>>, vector<16x512xf32>
    %c5_380 = arith.constant 5 : index
    %c0_381 = arith.constant 0 : index
    %357 = vector.load %arg3[%c5_380, %c0_381] : memref<9x512xf32, #tpu.memory_space<vmem>>, vector<1x512xf32>
    %358 = vector.broadcast %357 : vector<1x512xf32> to vector<16x512xf32>
    %359 = arith.mulf %356, %358 : vector<16x512xf32>
    %c80_382 = arith.constant 80 : index
    %c0_383 = arith.constant 0 : index
    %360 = vector.load %arg16[%c80_382, %c0_383] : memref<144x512xf32, #tpu.memory_space<vmem>>, vector<16x512xf32>
    tpu.vector_store %arg16[%c80_382, %c0_383], %359 {strides = array<i32>} : memref<144x512xf32, #tpu.memory_space<vmem>>, vector<16x512xf32>,
    %c0_384 = arith.constant 0 : index
    %c143_385 = arith.constant 143 : index
    %361 = vector.load %arg14[%c0_384, %c143_385] : memref<16x768xf32, #tpu.memory_space<vmem>>, vector<16x512xf32>
    %c6_386 = arith.constant 6 : index
    %c0_387 = arith.constant 0 : index
    %362 = vector.load %arg3[%c6_386, %c0_387] : memref<9x512xf32, #tpu.memory_space<vmem>>, vector<1x512xf32>
    %363 = vector.broadcast %362 : vector<1x512xf32> to vector<16x512xf32>
    %364 = arith.mulf %361, %363 : vector<16x512xf32>
    %c96_388 = arith.constant 96 : index
    %c0_389 = arith.constant 0 : index
    %365 = vector.load %arg16[%c96_388, %c0_389] : memref<144x512xf32, #tpu.memory_space<vmem>>, vector<16x512xf32>
    tpu.vector_store %arg16[%c96_388, %c0_389], %364 {strides = array<i32>} : memref<144x512xf32, #tpu.memory_space<vmem>>, vector<16x512xf32>,
    %c0_390 = arith.constant 0 : index
    %c144_391 = arith.constant 144 : index
    %366 = vector.load %arg14[%c0_390, %c144_391] : memref<16x768xf32, #tpu.memory_space<vmem>>, vector<16x512xf32>
    %c7_392 = arith.constant 7 : index
    %c0_393 = arith.constant 0 : index
    %367 = vector.load %arg3[%c7_392, %c0_393] : memref<9x512xf32, #tpu.memory_space<vmem>>, vector<1x512xf32>
    %368 = vector.broadcast %367 : vector<1x512xf32> to vector<16x512xf32>
    %369 = arith.mulf %366, %368 : vector<16x512xf32>
    %c112_394 = arith.constant 112 : index
    %c0_395 = arith.constant 0 : index
    %370 = vector.load %arg16[%c112_394, %c0_395] : memref<144x512xf32, #tpu.memory_space<vmem>>, vector<16x512xf32>
    tpu.vector_store %arg16[%c112_394, %c0_395], %369 {strides = array<i32>} : memref<144x512xf32, #tpu.memory_space<vmem>>, vector<16x512xf32>,
    %c0_396 = arith.constant 0 : index
    %c145_397 = arith.constant 145 : index
    %371 = vector.load %arg14[%c0_396, %c145_397] : memref<16x768xf32, #tpu.memory_space<vmem>>, vector<16x512xf32>
    %c8_398 = arith.constant 8 : index
    %c0_399 = arith.constant 0 : index
    %372 = vector.load %arg3[%c8_398, %c0_399] : memref<9x512xf32, #tpu.memory_space<vmem>>, vector<1x512xf32>
    %373 = vector.broadcast %372 : vector<1x512xf32> to vector<16x512xf32>
    %374 = arith.mulf %371, %373 : vector<16x512xf32>
    %c128_400 = arith.constant 128 : index
    %c0_401 = arith.constant 0 : index
    %375 = vector.load %arg16[%c128_400, %c0_401] : memref<144x512xf32, #tpu.memory_space<vmem>>, vector<16x512xf32>
    tpu.vector_store %arg16[%c128_400, %c0_401], %374 {strides = array<i32>} : memref<144x512xf32, #tpu.memory_space<vmem>>, vector<16x512xf32>,
    %c0_402 = arith.constant 0 : index
    %c0_403 = arith.constant 0 : index
    %376 = vector.load %arg8[%c0_402, %c0_403] : memref<4x144xf32, #tpu.memory_space<vmem>>, vector<4x144xf32>
    %c0_404 = arith.constant 0 : index
    %c0_405 = arith.constant 0 : index
    %377 = vector.load %arg16[%c0_404, %c0_405] : memref<144x512xf32, #tpu.memory_space<vmem>>, vector<144x512xf32>
    %cst_406 = arith.constant dense<0.000000e+00> : vector<4x512xf32>
    %378 = tpu.matmul %376, %377, %cst_406 {dimension_numbers = #tpu.dot_dimension_numbers<[1], [0], [0], [1], [0, 0, 1, 1], [], []>} : vector<4x144xf32>, vector<144x512xf32>, vector<4x512xf32> -> vector<4x512xf32>
    %c0_407 = arith.constant 0 : index
    %c0_408 = arith.constant 0 : index
    %379 = vector.load %arg9[%c0_407, %c0_408] : memref<4x1xf32, #tpu.memory_space<vmem>>, vector<4x1xf32>
    %380 = vector.broadcast %379 : vector<4x1xf32> to vector<4x512xf32>
    %381 = arith.addf %378, %380 : vector<4x512xf32>
    %382 = arith.index_cast %c2_i32 : i32 to index
    %383 = memref.load %arg1[%382] : memref<4xf32, #tpu.memory_space<smem>>
    %384 = vector.broadcast %383 : f32 to vector<4x512xf32>
    %385 = arith.mulf %384, %381 : vector<4x512xf32>
    %386 = arith.addf %275, %385 : vector<4x512xf32>
    %c3_i32 = arith.constant 3 : i32
    %c0_409 = arith.constant 0 : index
    %c128_410 = arith.constant 128 : index
    %387 = vector.load %arg13[%c0_409, %c128_410] : memref<4x768xf32, #tpu.memory_space<vmem>>, vector<4x512xf32>
    tpu.vector_store %arg13[%c0_409, %c128_410], %386 {strides = array<i32>} : memref<4x768xf32, #tpu.memory_space<vmem>>, vector<4x512xf32>,
    %c0_411 = arith.constant 0 : index
    %c111_412 = arith.constant 111 : index
    %388 = vector.load %arg13[%c0_411, %c111_412] : memref<4x768xf32, #tpu.memory_space<vmem>>, vector<4x512xf32>
    %c0_413 = arith.constant 0 : index
    %c0_414 = arith.constant 0 : index
    %389 = vector.load %arg3[%c0_413, %c0_414] : memref<9x512xf32, #tpu.memory_space<vmem>>, vector<1x512xf32>
    %390 = vector.broadcast %389 : vector<1x512xf32> to vector<4x512xf32>
    %391 = arith.mulf %388, %390 : vector<4x512xf32>
    %c0_415 = arith.constant 0 : index
    %c0_416 = arith.constant 0 : index
    %392 = vector.load %arg15[%c0_415, %c0_416] : memref<36x512xf32, #tpu.memory_space<vmem>>, vector<4x512xf32>
    tpu.vector_store %arg15[%c0_415, %c0_416], %391 {strides = array<i32>} : memref<36x512xf32, #tpu.memory_space<vmem>>, vector<4x512xf32>,
    %c0_417 = arith.constant 0 : index
    %c112_418 = arith.constant 112 : index
    %393 = vector.load %arg13[%c0_417, %c112_418] : memref<4x768xf32, #tpu.memory_space<vmem>>, vector<4x512xf32>
    %c1_419 = arith.constant 1 : index
    %c0_420 = arith.constant 0 : index
    %394 = vector.load %arg3[%c1_419, %c0_420] : memref<9x512xf32, #tpu.memory_space<vmem>>, vector<1x512xf32>
    %395 = vector.broadcast %394 : vector<1x512xf32> to vector<4x512xf32>
    %396 = arith.mulf %393, %395 : vector<4x512xf32>
    %c4_421 = arith.constant 4 : index
    %c0_422 = arith.constant 0 : index
    %397 = vector.load %arg15[%c4_421, %c0_422] : memref<36x512xf32, #tpu.memory_space<vmem>>, vector<4x512xf32>
    tpu.vector_store %arg15[%c4_421, %c0_422], %396 {strides = array<i32>} : memref<36x512xf32, #tpu.memory_space<vmem>>, vector<4x512xf32>,
    %c0_423 = arith.constant 0 : index
    %c113_424 = arith.constant 113 : index
    %398 = vector.load %arg13[%c0_423, %c113_424] : memref<4x768xf32, #tpu.memory_space<vmem>>, vector<4x512xf32>
    %c2_425 = arith.constant 2 : index
    %c0_426 = arith.constant 0 : index
    %399 = vector.load %arg3[%c2_425, %c0_426] : memref<9x512xf32, #tpu.memory_space<vmem>>, vector<1x512xf32>
    %400 = vector.broadcast %399 : vector<1x512xf32> to vector<4x512xf32>
    %401 = arith.mulf %398, %400 : vector<4x512xf32>
    %c8_427 = arith.constant 8 : index
    %c0_428 = arith.constant 0 : index
    %402 = vector.load %arg15[%c8_427, %c0_428] : memref<36x512xf32, #tpu.memory_space<vmem>>, vector<4x512xf32>
    tpu.vector_store %arg15[%c8_427, %c0_428], %401 {strides = array<i32>} : memref<36x512xf32, #tpu.memory_space<vmem>>, vector<4x512xf32>,
    %c0_429 = arith.constant 0 : index
    %c127_430 = arith.constant 127 : index
    %403 = vector.load %arg13[%c0_429, %c127_430] : memref<4x768xf32, #tpu.memory_space<vmem>>, vector<4x512xf32>
    %c3_431 = arith.constant 3 : index
    %c0_432 = arith.constant 0 : index
    %404 = vector.load %arg3[%c3_431, %c0_432] : memref<9x512xf32, #tpu.memory_space<vmem>>, vector<1x512xf32>
    %405 = vector.broadcast %404 : vector<1x512xf32> to vector<4x512xf32>
    %406 = arith.mulf %403, %405 : vector<4x512xf32>
    %c12_433 = arith.constant 12 : index
    %c0_434 = arith.constant 0 : index
    %407 = vector.load %arg15[%c12_433, %c0_434] : memref<36x512xf32, #tpu.memory_space<vmem>>, vector<4x512xf32>
    tpu.vector_store %arg15[%c12_433, %c0_434], %406 {strides = array<i32>} : memref<36x512xf32, #tpu.memory_space<vmem>>, vector<4x512xf32>,
    %c0_435 = arith.constant 0 : index
    %c128_436 = arith.constant 128 : index
    %408 = vector.load %arg13[%c0_435, %c128_436] : memref<4x768xf32, #tpu.memory_space<vmem>>, vector<4x512xf32>
    %c16_437 = arith.constant 16 : index
    %c0_438 = arith.constant 0 : index
    %409 = vector.load %arg15[%c16_437, %c0_438] : memref<36x512xf32, #tpu.memory_space<vmem>>, vector<4x512xf32>
    tpu.vector_store %arg15[%c16_437, %c0_438], %408 {strides = array<i32>} : memref<36x512xf32, #tpu.memory_space<vmem>>, vector<4x512xf32>,
    %c0_439 = arith.constant 0 : index
    %c129_440 = arith.constant 129 : index
    %410 = vector.load %arg13[%c0_439, %c129_440] : memref<4x768xf32, #tpu.memory_space<vmem>>, vector<4x512xf32>
    %c5_441 = arith.constant 5 : index
    %c0_442 = arith.constant 0 : index
    %411 = vector.load %arg3[%c5_441, %c0_442] : memref<9x512xf32, #tpu.memory_space<vmem>>, vector<1x512xf32>
    %412 = vector.broadcast %411 : vector<1x512xf32> to vector<4x512xf32>
    %413 = arith.mulf %410, %412 : vector<4x512xf32>
    %c20_443 = arith.constant 20 : index
    %c0_444 = arith.constant 0 : index
    %414 = vector.load %arg15[%c20_443, %c0_444] : memref<36x512xf32, #tpu.memory_space<vmem>>, vector<4x512xf32>
    tpu.vector_store %arg15[%c20_443, %c0_444], %413 {strides = array<i32>} : memref<36x512xf32, #tpu.memory_space<vmem>>, vector<4x512xf32>,
    %c0_445 = arith.constant 0 : index
    %c143_446 = arith.constant 143 : index
    %415 = vector.load %arg13[%c0_445, %c143_446] : memref<4x768xf32, #tpu.memory_space<vmem>>, vector<4x512xf32>
    %c6_447 = arith.constant 6 : index
    %c0_448 = arith.constant 0 : index
    %416 = vector.load %arg3[%c6_447, %c0_448] : memref<9x512xf32, #tpu.memory_space<vmem>>, vector<1x512xf32>
    %417 = vector.broadcast %416 : vector<1x512xf32> to vector<4x512xf32>
    %418 = arith.mulf %415, %417 : vector<4x512xf32>
    %c24_449 = arith.constant 24 : index
    %c0_450 = arith.constant 0 : index
    %419 = vector.load %arg15[%c24_449, %c0_450] : memref<36x512xf32, #tpu.memory_space<vmem>>, vector<4x512xf32>
    tpu.vector_store %arg15[%c24_449, %c0_450], %418 {strides = array<i32>} : memref<36x512xf32, #tpu.memory_space<vmem>>, vector<4x512xf32>,
    %c0_451 = arith.constant 0 : index
    %c144_452 = arith.constant 144 : index
    %420 = vector.load %arg13[%c0_451, %c144_452] : memref<4x768xf32, #tpu.memory_space<vmem>>, vector<4x512xf32>
    %c7_453 = arith.constant 7 : index
    %c0_454 = arith.constant 0 : index
    %421 = vector.load %arg3[%c7_453, %c0_454] : memref<9x512xf32, #tpu.memory_space<vmem>>, vector<1x512xf32>
    %422 = vector.broadcast %421 : vector<1x512xf32> to vector<4x512xf32>
    %423 = arith.mulf %420, %422 : vector<4x512xf32>
    %c28_455 = arith.constant 28 : index
    %c0_456 = arith.constant 0 : index
    %424 = vector.load %arg15[%c28_455, %c0_456] : memref<36x512xf32, #tpu.memory_space<vmem>>, vector<4x512xf32>
    tpu.vector_store %arg15[%c28_455, %c0_456], %423 {strides = array<i32>} : memref<36x512xf32, #tpu.memory_space<vmem>>, vector<4x512xf32>,
    %c0_457 = arith.constant 0 : index
    %c145_458 = arith.constant 145 : index
    %425 = vector.load %arg13[%c0_457, %c145_458] : memref<4x768xf32, #tpu.memory_space<vmem>>, vector<4x512xf32>
    %c8_459 = arith.constant 8 : index
    %c0_460 = arith.constant 0 : index
    %426 = vector.load %arg3[%c8_459, %c0_460] : memref<9x512xf32, #tpu.memory_space<vmem>>, vector<1x512xf32>
    %427 = vector.broadcast %426 : vector<1x512xf32> to vector<4x512xf32>
    %428 = arith.mulf %425, %427 : vector<4x512xf32>
    %c32_461 = arith.constant 32 : index
    %c0_462 = arith.constant 0 : index
    %429 = vector.load %arg15[%c32_461, %c0_462] : memref<36x512xf32, #tpu.memory_space<vmem>>, vector<4x512xf32>
    tpu.vector_store %arg15[%c32_461, %c0_462], %428 {strides = array<i32>} : memref<36x512xf32, #tpu.memory_space<vmem>>, vector<4x512xf32>,
    %c0_463 = arith.constant 0 : index
    %c0_464 = arith.constant 0 : index
    %430 = vector.load %arg6[%c0_463, %c0_464] : memref<16x36xf32, #tpu.memory_space<vmem>>, vector<16x36xf32>
    %c0_465 = arith.constant 0 : index
    %c0_466 = arith.constant 0 : index
    %431 = vector.load %arg15[%c0_465, %c0_466] : memref<36x512xf32, #tpu.memory_space<vmem>>, vector<36x512xf32>
    %cst_467 = arith.constant dense<0.000000e+00> : vector<16x512xf32>
    %432 = tpu.matmul %430, %431, %cst_467 {dimension_numbers = #tpu.dot_dimension_numbers<[1], [0], [0], [1], [0, 0, 1, 1], [], []>} : vector<16x36xf32>, vector<36x512xf32>, vector<16x512xf32> -> vector<16x512xf32>
    %433 = arith.index_cast %c3_i32 : i32 to index
    %c0_468 = arith.constant 0 : index
    %c0_469 = arith.constant 0 : index
    %434 = vector.load %arg7[%433, %c0_468, %c0_469] : memref<4x16x1xf32, #tpu.memory_space<vmem>>, vector<1x16x1xf32>
    %435 = vector.shape_cast %434 : vector<1x16x1xf32> to vector<16x1xf32>
    %436 = vector.broadcast %435 : vector<16x1xf32> to vector<16x512xf32>
    %437 = arith.addf %432, %436 : vector<16x512xf32>
    %438 = arith.negf %437 : vector<16x512xf32>
    %439 = math.exp %438 : vector<16x512xf32>
    %cst_470 = arith.constant 1.000000e+00 : f32
    %440 = vector.broadcast %cst_470 : f32 to vector<16x512xf32>
    %441 = arith.addf %440, %439 : vector<16x512xf32>
    %442 = arith.divf %440, %441 : vector<16x512xf32>
    %443 = arith.mulf %437, %442 : vector<16x512xf32>
    %c0_471 = arith.constant 0 : index
    %c128_472 = arith.constant 128 : index
    %444 = vector.load %arg14[%c0_471, %c128_472] : memref<16x768xf32, #tpu.memory_space<vmem>>, vector<16x512xf32>
    tpu.vector_store %arg14[%c0_471, %c128_472], %443 {strides = array<i32>} : memref<16x768xf32, #tpu.memory_space<vmem>>, vector<16x512xf32>,
    %c0_473 = arith.constant 0 : index
    %c111_474 = arith.constant 111 : index
    %445 = vector.load %arg14[%c0_473, %c111_474] : memref<16x768xf32, #tpu.memory_space<vmem>>, vector<16x512xf32>
    %c0_475 = arith.constant 0 : index
    %c0_476 = arith.constant 0 : index
    %446 = vector.load %arg3[%c0_475, %c0_476] : memref<9x512xf32, #tpu.memory_space<vmem>>, vector<1x512xf32>
    %447 = vector.broadcast %446 : vector<1x512xf32> to vector<16x512xf32>
    %448 = arith.mulf %445, %447 : vector<16x512xf32>
    %c0_477 = arith.constant 0 : index
    %c0_478 = arith.constant 0 : index
    %449 = vector.load %arg16[%c0_477, %c0_478] : memref<144x512xf32, #tpu.memory_space<vmem>>, vector<16x512xf32>
    tpu.vector_store %arg16[%c0_477, %c0_478], %448 {strides = array<i32>} : memref<144x512xf32, #tpu.memory_space<vmem>>, vector<16x512xf32>,
    %c0_479 = arith.constant 0 : index
    %c112_480 = arith.constant 112 : index
    %450 = vector.load %arg14[%c0_479, %c112_480] : memref<16x768xf32, #tpu.memory_space<vmem>>, vector<16x512xf32>
    %c1_481 = arith.constant 1 : index
    %c0_482 = arith.constant 0 : index
    %451 = vector.load %arg3[%c1_481, %c0_482] : memref<9x512xf32, #tpu.memory_space<vmem>>, vector<1x512xf32>
    %452 = vector.broadcast %451 : vector<1x512xf32> to vector<16x512xf32>
    %453 = arith.mulf %450, %452 : vector<16x512xf32>
    %c16_483 = arith.constant 16 : index
    %c0_484 = arith.constant 0 : index
    %454 = vector.load %arg16[%c16_483, %c0_484] : memref<144x512xf32, #tpu.memory_space<vmem>>, vector<16x512xf32>
    tpu.vector_store %arg16[%c16_483, %c0_484], %453 {strides = array<i32>} : memref<144x512xf32, #tpu.memory_space<vmem>>, vector<16x512xf32>,
    %c0_485 = arith.constant 0 : index
    %c113_486 = arith.constant 113 : index
    %455 = vector.load %arg14[%c0_485, %c113_486] : memref<16x768xf32, #tpu.memory_space<vmem>>, vector<16x512xf32>
    %c2_487 = arith.constant 2 : index
    %c0_488 = arith.constant 0 : index
    %456 = vector.load %arg3[%c2_487, %c0_488] : memref<9x512xf32, #tpu.memory_space<vmem>>, vector<1x512xf32>
    %457 = vector.broadcast %456 : vector<1x512xf32> to vector<16x512xf32>
    %458 = arith.mulf %455, %457 : vector<16x512xf32>
    %c32_489 = arith.constant 32 : index
    %c0_490 = arith.constant 0 : index
    %459 = vector.load %arg16[%c32_489, %c0_490] : memref<144x512xf32, #tpu.memory_space<vmem>>, vector<16x512xf32>
    tpu.vector_store %arg16[%c32_489, %c0_490], %458 {strides = array<i32>} : memref<144x512xf32, #tpu.memory_space<vmem>>, vector<16x512xf32>,
    %c0_491 = arith.constant 0 : index
    %c127_492 = arith.constant 127 : index
    %460 = vector.load %arg14[%c0_491, %c127_492] : memref<16x768xf32, #tpu.memory_space<vmem>>, vector<16x512xf32>
    %c3_493 = arith.constant 3 : index
    %c0_494 = arith.constant 0 : index
    %461 = vector.load %arg3[%c3_493, %c0_494] : memref<9x512xf32, #tpu.memory_space<vmem>>, vector<1x512xf32>
    %462 = vector.broadcast %461 : vector<1x512xf32> to vector<16x512xf32>
    %463 = arith.mulf %460, %462 : vector<16x512xf32>
    %c48_495 = arith.constant 48 : index
    %c0_496 = arith.constant 0 : index
    %464 = vector.load %arg16[%c48_495, %c0_496] : memref<144x512xf32, #tpu.memory_space<vmem>>, vector<16x512xf32>
    tpu.vector_store %arg16[%c48_495, %c0_496], %463 {strides = array<i32>} : memref<144x512xf32, #tpu.memory_space<vmem>>, vector<16x512xf32>,
    %c0_497 = arith.constant 0 : index
    %c128_498 = arith.constant 128 : index
    %465 = vector.load %arg14[%c0_497, %c128_498] : memref<16x768xf32, #tpu.memory_space<vmem>>, vector<16x512xf32>
    %c64_499 = arith.constant 64 : index
    %c0_500 = arith.constant 0 : index
    %466 = vector.load %arg16[%c64_499, %c0_500] : memref<144x512xf32, #tpu.memory_space<vmem>>, vector<16x512xf32>
    tpu.vector_store %arg16[%c64_499, %c0_500], %465 {strides = array<i32>} : memref<144x512xf32, #tpu.memory_space<vmem>>, vector<16x512xf32>,
    %c0_501 = arith.constant 0 : index
    %c129_502 = arith.constant 129 : index
    %467 = vector.load %arg14[%c0_501, %c129_502] : memref<16x768xf32, #tpu.memory_space<vmem>>, vector<16x512xf32>
    %c5_503 = arith.constant 5 : index
    %c0_504 = arith.constant 0 : index
    %468 = vector.load %arg3[%c5_503, %c0_504] : memref<9x512xf32, #tpu.memory_space<vmem>>, vector<1x512xf32>
    %469 = vector.broadcast %468 : vector<1x512xf32> to vector<16x512xf32>
    %470 = arith.mulf %467, %469 : vector<16x512xf32>
    %c80_505 = arith.constant 80 : index
    %c0_506 = arith.constant 0 : index
    %471 = vector.load %arg16[%c80_505, %c0_506] : memref<144x512xf32, #tpu.memory_space<vmem>>, vector<16x512xf32>
    tpu.vector_store %arg16[%c80_505, %c0_506], %470 {strides = array<i32>} : memref<144x512xf32, #tpu.memory_space<vmem>>, vector<16x512xf32>,
    %c0_507 = arith.constant 0 : index
    %c143_508 = arith.constant 143 : index
    %472 = vector.load %arg14[%c0_507, %c143_508] : memref<16x768xf32, #tpu.memory_space<vmem>>, vector<16x512xf32>
    %c6_509 = arith.constant 6 : index
    %c0_510 = arith.constant 0 : index
    %473 = vector.load %arg3[%c6_509, %c0_510] : memref<9x512xf32, #tpu.memory_space<vmem>>, vector<1x512xf32>
    %474 = vector.broadcast %473 : vector<1x512xf32> to vector<16x512xf32>
    %475 = arith.mulf %472, %474 : vector<16x512xf32>
    %c96_511 = arith.constant 96 : index
    %c0_512 = arith.constant 0 : index
    %476 = vector.load %arg16[%c96_511, %c0_512] : memref<144x512xf32, #tpu.memory_space<vmem>>, vector<16x512xf32>
    tpu.vector_store %arg16[%c96_511, %c0_512], %475 {strides = array<i32>} : memref<144x512xf32, #tpu.memory_space<vmem>>, vector<16x512xf32>,
    %c0_513 = arith.constant 0 : index
    %c144_514 = arith.constant 144 : index
    %477 = vector.load %arg14[%c0_513, %c144_514] : memref<16x768xf32, #tpu.memory_space<vmem>>, vector<16x512xf32>
    %c7_515 = arith.constant 7 : index
    %c0_516 = arith.constant 0 : index
    %478 = vector.load %arg3[%c7_515, %c0_516] : memref<9x512xf32, #tpu.memory_space<vmem>>, vector<1x512xf32>
    %479 = vector.broadcast %478 : vector<1x512xf32> to vector<16x512xf32>
    %480 = arith.mulf %477, %479 : vector<16x512xf32>
    %c112_517 = arith.constant 112 : index
    %c0_518 = arith.constant 0 : index
    %481 = vector.load %arg16[%c112_517, %c0_518] : memref<144x512xf32, #tpu.memory_space<vmem>>, vector<16x512xf32>
    tpu.vector_store %arg16[%c112_517, %c0_518], %480 {strides = array<i32>} : memref<144x512xf32, #tpu.memory_space<vmem>>, vector<16x512xf32>,
    %c0_519 = arith.constant 0 : index
    %c145_520 = arith.constant 145 : index
    %482 = vector.load %arg14[%c0_519, %c145_520] : memref<16x768xf32, #tpu.memory_space<vmem>>, vector<16x512xf32>
    %c8_521 = arith.constant 8 : index
    %c0_522 = arith.constant 0 : index
    %483 = vector.load %arg3[%c8_521, %c0_522] : memref<9x512xf32, #tpu.memory_space<vmem>>, vector<1x512xf32>
    %484 = vector.broadcast %483 : vector<1x512xf32> to vector<16x512xf32>
    %485 = arith.mulf %482, %484 : vector<16x512xf32>
    %c128_523 = arith.constant 128 : index
    %c0_524 = arith.constant 0 : index
    %486 = vector.load %arg16[%c128_523, %c0_524] : memref<144x512xf32, #tpu.memory_space<vmem>>, vector<16x512xf32>
    tpu.vector_store %arg16[%c128_523, %c0_524], %485 {strides = array<i32>} : memref<144x512xf32, #tpu.memory_space<vmem>>, vector<16x512xf32>,
    %c0_525 = arith.constant 0 : index
    %c0_526 = arith.constant 0 : index
    %487 = vector.load %arg8[%c0_525, %c0_526] : memref<4x144xf32, #tpu.memory_space<vmem>>, vector<4x144xf32>
    %c0_527 = arith.constant 0 : index
    %c0_528 = arith.constant 0 : index
    %488 = vector.load %arg16[%c0_527, %c0_528] : memref<144x512xf32, #tpu.memory_space<vmem>>, vector<144x512xf32>
    %cst_529 = arith.constant dense<0.000000e+00> : vector<4x512xf32>
    %489 = tpu.matmul %487, %488, %cst_529 {dimension_numbers = #tpu.dot_dimension_numbers<[1], [0], [0], [1], [0, 0, 1, 1], [], []>} : vector<4x144xf32>, vector<144x512xf32>, vector<4x512xf32> -> vector<4x512xf32>
    %c0_530 = arith.constant 0 : index
    %c0_531 = arith.constant 0 : index
    %490 = vector.load %arg9[%c0_530, %c0_531] : memref<4x1xf32, #tpu.memory_space<vmem>>, vector<4x1xf32>
    %491 = vector.broadcast %490 : vector<4x1xf32> to vector<4x512xf32>
    %492 = arith.addf %489, %491 : vector<4x512xf32>
    %493 = arith.index_cast %c3_i32 : i32 to index
    %494 = memref.load %arg1[%493] : memref<4xf32, #tpu.memory_space<smem>>
    %495 = vector.broadcast %494 : f32 to vector<4x512xf32>
    %496 = arith.mulf %495, %492 : vector<4x512xf32>
    %497 = arith.addf %386, %496 : vector<4x512xf32>
    %c4_i32 = arith.constant 4 : i32
    %c0_532 = arith.constant 0 : index
    %c128_533 = arith.constant 128 : index
    %498 = vector.load %arg13[%c0_532, %c128_533] : memref<4x768xf32, #tpu.memory_space<vmem>>, vector<4x512xf32>
    tpu.vector_store %arg13[%c0_532, %c128_533], %497 {strides = array<i32>} : memref<4x768xf32, #tpu.memory_space<vmem>>, vector<4x512xf32>,
    %c0_534 = arith.constant 0 : index
    %c111_535 = arith.constant 111 : index
    %499 = vector.load %arg13[%c0_534, %c111_535] : memref<4x768xf32, #tpu.memory_space<vmem>>, vector<4x512xf32>
    %c0_536 = arith.constant 0 : index
    %c0_537 = arith.constant 0 : index
    %500 = vector.load %arg3[%c0_536, %c0_537] : memref<9x512xf32, #tpu.memory_space<vmem>>, vector<1x512xf32>
    %501 = vector.broadcast %500 : vector<1x512xf32> to vector<4x512xf32>
    %502 = arith.mulf %499, %501 : vector<4x512xf32>
    %c0_538 = arith.constant 0 : index
    %c0_539 = arith.constant 0 : index
    %503 = vector.load %arg15[%c0_538, %c0_539] : memref<36x512xf32, #tpu.memory_space<vmem>>, vector<4x512xf32>
    tpu.vector_store %arg15[%c0_538, %c0_539], %502 {strides = array<i32>} : memref<36x512xf32, #tpu.memory_space<vmem>>, vector<4x512xf32>,
    %c0_540 = arith.constant 0 : index
    %c112_541 = arith.constant 112 : index
    %504 = vector.load %arg13[%c0_540, %c112_541] : memref<4x768xf32, #tpu.memory_space<vmem>>, vector<4x512xf32>
    %c1_542 = arith.constant 1 : index
    %c0_543 = arith.constant 0 : index
    %505 = vector.load %arg3[%c1_542, %c0_543] : memref<9x512xf32, #tpu.memory_space<vmem>>, vector<1x512xf32>
    %506 = vector.broadcast %505 : vector<1x512xf32> to vector<4x512xf32>
    %507 = arith.mulf %504, %506 : vector<4x512xf32>
    %c4_544 = arith.constant 4 : index
    %c0_545 = arith.constant 0 : index
    %508 = vector.load %arg15[%c4_544, %c0_545] : memref<36x512xf32, #tpu.memory_space<vmem>>, vector<4x512xf32>
    tpu.vector_store %arg15[%c4_544, %c0_545], %507 {strides = array<i32>} : memref<36x512xf32, #tpu.memory_space<vmem>>, vector<4x512xf32>,
    %c0_546 = arith.constant 0 : index
    %c113_547 = arith.constant 113 : index
    %509 = vector.load %arg13[%c0_546, %c113_547] : memref<4x768xf32, #tpu.memory_space<vmem>>, vector<4x512xf32>
    %c2_548 = arith.constant 2 : index
    %c0_549 = arith.constant 0 : index
    %510 = vector.load %arg3[%c2_548, %c0_549] : memref<9x512xf32, #tpu.memory_space<vmem>>, vector<1x512xf32>
    %511 = vector.broadcast %510 : vector<1x512xf32> to vector<4x512xf32>
    %512 = arith.mulf %509, %511 : vector<4x512xf32>
    %c8_550 = arith.constant 8 : index
    %c0_551 = arith.constant 0 : index
    %513 = vector.load %arg15[%c8_550, %c0_551] : memref<36x512xf32, #tpu.memory_space<vmem>>, vector<4x512xf32>
    tpu.vector_store %arg15[%c8_550, %c0_551], %512 {strides = array<i32>} : memref<36x512xf32, #tpu.memory_space<vmem>>, vector<4x512xf32>,
    %c0_552 = arith.constant 0 : index
    %c127_553 = arith.constant 127 : index
    %514 = vector.load %arg13[%c0_552, %c127_553] : memref<4x768xf32, #tpu.memory_space<vmem>>, vector<4x512xf32>
    %c3_554 = arith.constant 3 : index
    %c0_555 = arith.constant 0 : index
    %515 = vector.load %arg3[%c3_554, %c0_555] : memref<9x512xf32, #tpu.memory_space<vmem>>, vector<1x512xf32>
    %516 = vector.broadcast %515 : vector<1x512xf32> to vector<4x512xf32>
    %517 = arith.mulf %514, %516 : vector<4x512xf32>
    %c12_556 = arith.constant 12 : index
    %c0_557 = arith.constant 0 : index
    %518 = vector.load %arg15[%c12_556, %c0_557] : memref<36x512xf32, #tpu.memory_space<vmem>>, vector<4x512xf32>
    tpu.vector_store %arg15[%c12_556, %c0_557], %517 {strides = array<i32>} : memref<36x512xf32, #tpu.memory_space<vmem>>, vector<4x512xf32>,
    %c0_558 = arith.constant 0 : index
    %c128_559 = arith.constant 128 : index
    %519 = vector.load %arg13[%c0_558, %c128_559] : memref<4x768xf32, #tpu.memory_space<vmem>>, vector<4x512xf32>
    %c16_560 = arith.constant 16 : index
    %c0_561 = arith.constant 0 : index
    %520 = vector.load %arg15[%c16_560, %c0_561] : memref<36x512xf32, #tpu.memory_space<vmem>>, vector<4x512xf32>
    tpu.vector_store %arg15[%c16_560, %c0_561], %519 {strides = array<i32>} : memref<36x512xf32, #tpu.memory_space<vmem>>, vector<4x512xf32>,
    %c0_562 = arith.constant 0 : index
    %c129_563 = arith.constant 129 : index
    %521 = vector.load %arg13[%c0_562, %c129_563] : memref<4x768xf32, #tpu.memory_space<vmem>>, vector<4x512xf32>
    %c5_564 = arith.constant 5 : index
    %c0_565 = arith.constant 0 : index
    %522 = vector.load %arg3[%c5_564, %c0_565] : memref<9x512xf32, #tpu.memory_space<vmem>>, vector<1x512xf32>
    %523 = vector.broadcast %522 : vector<1x512xf32> to vector<4x512xf32>
    %524 = arith.mulf %521, %523 : vector<4x512xf32>
    %c20_566 = arith.constant 20 : index
    %c0_567 = arith.constant 0 : index
    %525 = vector.load %arg15[%c20_566, %c0_567] : memref<36x512xf32, #tpu.memory_space<vmem>>, vector<4x512xf32>
    tpu.vector_store %arg15[%c20_566, %c0_567], %524 {strides = array<i32>} : memref<36x512xf32, #tpu.memory_space<vmem>>, vector<4x512xf32>,
    %c0_568 = arith.constant 0 : index
    %c143_569 = arith.constant 143 : index
    %526 = vector.load %arg13[%c0_568, %c143_569] : memref<4x768xf32, #tpu.memory_space<vmem>>, vector<4x512xf32>
    %c6_570 = arith.constant 6 : index
    %c0_571 = arith.constant 0 : index
    %527 = vector.load %arg3[%c6_570, %c0_571] : memref<9x512xf32, #tpu.memory_space<vmem>>, vector<1x512xf32>
    %528 = vector.broadcast %527 : vector<1x512xf32> to vector<4x512xf32>
    %529 = arith.mulf %526, %528 : vector<4x512xf32>
    %c24_572 = arith.constant 24 : index
    %c0_573 = arith.constant 0 : index
    %530 = vector.load %arg15[%c24_572, %c0_573] : memref<36x512xf32, #tpu.memory_space<vmem>>, vector<4x512xf32>
    tpu.vector_store %arg15[%c24_572, %c0_573], %529 {strides = array<i32>} : memref<36x512xf32, #tpu.memory_space<vmem>>, vector<4x512xf32>,
    %c0_574 = arith.constant 0 : index
    %c144_575 = arith.constant 144 : index
    %531 = vector.load %arg13[%c0_574, %c144_575] : memref<4x768xf32, #tpu.memory_space<vmem>>, vector<4x512xf32>
    %c7_576 = arith.constant 7 : index
    %c0_577 = arith.constant 0 : index
    %532 = vector.load %arg3[%c7_576, %c0_577] : memref<9x512xf32, #tpu.memory_space<vmem>>, vector<1x512xf32>
    %533 = vector.broadcast %532 : vector<1x512xf32> to vector<4x512xf32>
    %534 = arith.mulf %531, %533 : vector<4x512xf32>
    %c28_578 = arith.constant 28 : index
    %c0_579 = arith.constant 0 : index
    %535 = vector.load %arg15[%c28_578, %c0_579] : memref<36x512xf32, #tpu.memory_space<vmem>>, vector<4x512xf32>
    tpu.vector_store %arg15[%c28_578, %c0_579], %534 {strides = array<i32>} : memref<36x512xf32, #tpu.memory_space<vmem>>, vector<4x512xf32>,
    %c0_580 = arith.constant 0 : index
    %c145_581 = arith.constant 145 : index
    %536 = vector.load %arg13[%c0_580, %c145_581] : memref<4x768xf32, #tpu.memory_space<vmem>>, vector<4x512xf32>
    %c8_582 = arith.constant 8 : index
    %c0_583 = arith.constant 0 : index
    %537 = vector.load %arg3[%c8_582, %c0_583] : memref<9x512xf32, #tpu.memory_space<vmem>>, vector<1x512xf32>
    %538 = vector.broadcast %537 : vector<1x512xf32> to vector<4x512xf32>
    %539 = arith.mulf %536, %538 : vector<4x512xf32>
    %c32_584 = arith.constant 32 : index
    %c0_585 = arith.constant 0 : index
    %540 = vector.load %arg15[%c32_584, %c0_585] : memref<36x512xf32, #tpu.memory_space<vmem>>, vector<4x512xf32>
    tpu.vector_store %arg15[%c32_584, %c0_585], %539 {strides = array<i32>} : memref<36x512xf32, #tpu.memory_space<vmem>>, vector<4x512xf32>,
    %c0_586 = arith.constant 0 : index
    %c0_587 = arith.constant 0 : index
    %541 = vector.load %arg10[%c0_586, %c0_587] : memref<4x36xf32, #tpu.memory_space<vmem>>, vector<4x36xf32>
    %c0_588 = arith.constant 0 : index
    %c0_589 = arith.constant 0 : index
    %542 = vector.load %arg15[%c0_588, %c0_589] : memref<36x512xf32, #tpu.memory_space<vmem>>, vector<36x512xf32>
    %cst_590 = arith.constant dense<0.000000e+00> : vector<4x512xf32>
    %543 = tpu.matmul %541, %542, %cst_590 {dimension_numbers = #tpu.dot_dimension_numbers<[1], [0], [0], [1], [0, 0, 1, 1], [], []>} : vector<4x36xf32>, vector<36x512xf32>, vector<4x512xf32> -> vector<4x512xf32>
    %c0_591 = arith.constant 0 : index
    %c0_592 = arith.constant 0 : index
    %544 = vector.load %arg11[%c0_591, %c0_592] : memref<4x1xf32, #tpu.memory_space<vmem>>, vector<4x1xf32>
    %545 = vector.broadcast %544 : vector<4x1xf32> to vector<4x512xf32>
    %546 = arith.addf %543, %545 : vector<4x512xf32>
    %c0_593 = arith.constant 0 : index
    %c0_594 = arith.constant 0 : index
    %547 = vector.load %arg12[%c0_593, %c0_594] : memref<4x512xf32, #tpu.memory_space<vmem>>, vector<4x512xf32>
    tpu.vector_store %arg12[%c0_593, %c0_594], %546 {strides = array<i32>} : memref<4x512xf32, #tpu.memory_space<vmem>>, vector<4x512xf32>,
    return
  }
  func.func @transform_0(%arg0: i32, %arg1: memref<4xf32, #tpu.memory_space<smem>>) -> (i32, i32) {
    %c0_i32 = arith.constant 0 : i32
    %c0_i32_0 = arith.constant 0 : i32
    %c0_i32_1 = arith.constant 0 : i32
    return %c0_i32, %c0_i32_0 : i32, i32
  }
  func.func @transform_1(%arg0: i32, %arg1: memref<4xf32, #tpu.memory_space<smem>>) -> (i32, i32) {
    %c0_i32 = arith.constant 0 : i32
    %c0_i32_0 = arith.constant 0 : i32
    %c0_i32_1 = arith.constant 0 : i32
    return %c0_i32, %c0_i32_0 : i32, i32
  }
  func.func @transform_2(%arg0: i32, %arg1: memref<4xf32, #tpu.memory_space<smem>>) -> (i32, i32) {
    %c0_i32 = arith.constant 0 : i32
    %c0_i32_0 = arith.constant 0 : i32
    %c0_i32_1 = arith.constant 0 : i32
    return %c0_i32, %c0_i32_0 : i32, i32
  }
  func.func @transform_3(%arg0: i32, %arg1: memref<4xf32, #tpu.memory_space<smem>>) -> (i32, i32) {
    %c0_i32 = arith.constant 0 : i32
    %c0_i32_0 = arith.constant 0 : i32
    %c0_i32_1 = arith.constant 0 : i32
    return %c0_i32, %c0_i32_0 : i32, i32
  }
  func.func @transform_4(%arg0: i32, %arg1: memref<4xf32, #tpu.memory_space<smem>>) -> (i32, i32) {
    %c0_i32 = arith.constant 0 : i32
    %c0_i32_0 = arith.constant 0 : i32
    %c0_i32_1 = arith.constant 0 : i32
    return %c0_i32, %c0_i32_0 : i32, i32
  }
  func.func @transform_5(%arg0: i32, %arg1: memref<4xf32, #tpu.memory_space<smem>>) -> (i32, i32, i32) {
    %c0_i32 = arith.constant 0 : i32
    %c0_i32_0 = arith.constant 0 : i32
    %c0_i32_1 = arith.constant 0 : i32
    %c0_i32_2 = arith.constant 0 : i32
    return %c0_i32, %c0_i32_0, %c0_i32_1 : i32, i32, i32
  }
  func.func @transform_6(%arg0: i32, %arg1: memref<4xf32, #tpu.memory_space<smem>>) -> (i32, i32) {
    %c0_i32 = arith.constant 0 : i32
    %c0_i32_0 = arith.constant 0 : i32
    %c0_i32_1 = arith.constant 0 : i32
    return %c0_i32, %c0_i32_0 : i32, i32
  }
  func.func @transform_7(%arg0: i32, %arg1: memref<4xf32, #tpu.memory_space<smem>>) -> (i32, i32) {
    %c0_i32 = arith.constant 0 : i32
    %c0_i32_0 = arith.constant 0 : i32
    %c0_i32_1 = arith.constant 0 : i32
    return %c0_i32, %c0_i32_0 : i32, i32
  }
  func.func @transform_8(%arg0: i32, %arg1: memref<4xf32, #tpu.memory_space<smem>>) -> (i32, i32) {
    %c0_i32 = arith.constant 0 : i32
    %c0_i32_0 = arith.constant 0 : i32
    %c0_i32_1 = arith.constant 0 : i32
    return %c0_i32, %c0_i32_0 : i32, i32
  }
  func.func @transform_9(%arg0: i32, %arg1: memref<4xf32, #tpu.memory_space<smem>>) -> (i32, i32) {
    %c0_i32 = arith.constant 0 : i32
    %c0_i32_0 = arith.constant 0 : i32
    %c0_i32_1 = arith.constant 0 : i32
    return %c0_i32, %c0_i32_0 : i32, i32
  }
  func.func @transform_10(%arg0: i32, %arg1: memref<4xf32, #tpu.memory_space<smem>>) -> (i32, i32) {
    %c0_i32 = arith.constant 0 : i32
    %c0_i32_0 = arith.constant 0 : i32
    %c0_i32_1 = arith.constant 0 : i32
    return %c0_i32, %c0_i32_0 : i32, i32
  }
}

</mosaic_0001>

<bundles_post_ra>
// kernel: _bridge_forward.1
= control target key start
LH: loop header
LB: loop body
LE: loop exit
PB: predicated region body
PF: predicated region fallthrough
CT: control target
= control target key end

     0   :  { %s14781_s0 = inlined_call_operand.vmem [shape: f32[4], index: 0, kind: input, shape index: {}]   ;;  %s14782_s1 = inlined_call_operand.vmem [shape: f32[4,512], index: 1, kind: input, shape index: {}]   ;;  %s14783_s2 = inlined_call_operand.vmem [shape: f32[9,512], index: 2, kind: input, shape index: {}]   ;;  %s14784_s3 = inlined_call_operand.vmem [shape: f32[4,36], index: 3, kind: input, shape index: {}]   ;;  %s14785_s4 = inlined_call_operand.vmem [shape: f32[4,1], index: 4, kind: input, shape index: {}]   ;;  %s14786_s5 = inlined_call_operand.vmem [shape: f32[16,36], index: 5, kind: input, shape index: {}]   ;;  %s14787_s6 = inlined_call_operand.vmem [shape: f32[4,16,1], index: 6, kind: input, shape index: {}]   ;;  %s14788_s7 = inlined_call_operand.vmem [shape: f32[4,144], index: 7, kind: input, shape index: {}]   ;;  %s14789_s8 = inlined_call_operand.vmem [shape: f32[4,1], index: 8, kind: input, shape index: {}]   ;;  %s14790_s9 = inlined_call_operand.vmem [shape: f32[4,36], index: 9, kind: input, shape index: {}]   ;;  %s14791_s10 = inlined_call_operand.vmem [shape: f32[4,1], index: 10, kind: input, shape index: {}]   ;;  %s14792_s11 = inlined_call_operand.vmem [shape: f32[4,512], index: 11, kind: output, shape index: {}]  }
   0x1   :  { %s16_s19 = sshll.u32 %s14781_s0, 4  ;;  %s17_s19 = int_to_ptr.vmem [resolvable:$true] %s16_s19 }
   0x2   :  { %s9589_s20 = scalar_lea.vmem %s17_s19, 16  ;;  %p9594_p1 = scmp.lt.s32.totalorder %s17_s19, %s17_s19 }
   0x3   :  { %p9590_p0 = scmp.ne.s32.totalorder %s17_s19, %s9589_s20  ;;  %p9595_p2 = scmp.lt.s32.totalorder %s9589_s20, %s9589_s20 }
   0x5   :  { %p9596_p3 = por %p9595_p2, %p9594_p1 }
   0x7   :  { %p9597_p4 = pnand %p9596_p3, %p9590_p0 }
   0x9   :  { %9600 = shalt.err (!%p9597_p4)  }
   0xa   :  { %s9603_s21 = smov [#allocation7]  }
   0xb   :  { %19 = dma.vmem_to_smem %s17_s19, 16, %s9603_s21, [#allocation6] }
   0xc   :  { %9601 = dma.done.wait [#allocation6], 16 }
   0xd   :  { %9602 = vsyncadd [#allocation6], 4294967280 }
   0xe   :  { %21 = sfence }
   0xf   :  { %v66_v0 = vlaneseq  ;;  %v9275_v2 = vld [vmem:[%s14783_s2 + $0x20] ss:$8 sm:$0xf]  ;;  %v9273_v3 = vld [vmem:[%s14783_s2 + $0x6] ss:$8 sm:$0xf] }
  0x10   :  { %v9274_v12 = vld [vmem:[%s14783_s2 + $0x7] ss:$8 sm:$0xf]  ;;  %s9605_s12 = smov 15   ;;  %s9606_s17 = smov 16   ;;  %v14793_v42 = vmov 0.0  }
  0x11   :  { %v67_v1 = vshrl.u32 %v66_v0, 7  ;;  %v9701_v13 = vld [vmem:[%s14782_s1] sm:$0xff]  ;;  %v9706_v14 = vld [vmem:[%s14782_s1 + $0x8] sm:$0xff]  ;;  %s9604_s1 = smov 17   ;;  %44 = vst [vmem:[#allocation2 + $0x10] sm:$0xff] %v14793_v42  ;;  %42 = vst [vmem:[#allocation2] sm:$0xff] %v14793_v42  ;;  %791 = vmatprep.mubr.f32.mxu1 %v14793_v42  ;;  %720 = vmatprep.mubr.f32.mxu0 %v14793_v42 }
  0x12   :  { %343 = vst [vmem:[#allocation4 + $0x8] sm:$0xf] %v9701_v13  ;;  %345 = vst [vmem:[#allocation4 + $0x28] sm:$0xf] %v9706_v14  ;;  %s9608_s20 = smov 1   ;;  %s9609_s23 = smov 113  }
  0x13   :  { %v9683_v4 = vsub.s32 0, %v67_v1  ;;  %v9685_v5 = vsub.s32 1, %v67_v1  ;;  %v9687_v6 = vsub.s32 2, %v67_v1  ;;  %v9689_v7 = vsub.s32 3, %v67_v1  ;;  %43 = vst [vmem:[#allocation2 + $0x8] sm:$0xff] %v14793_v42  ;;  %s9610_s25 = smov 127  }
  0x14   :  { %v9272_v27 = vld [vmem:[%s14783_s2 + $0x5] ss:$8 sm:$0xf]  ;;  %v9270_v34 = vld [vmem:[%s14783_s2 + $0x2] ss:$8 sm:$0xf] }
  0x15   :  { %14856 = vst [vmem:[#allocation9_spill] sm:$0xff] %v9683_v4  ;;  %14857 = vst [vmem:[#allocation10_spill] sm:$0xff] %v9685_v5  ;;  %v556_v8 = vrot.slane %v9275_v2, %v9683_v4  ;;  %v560_v9 = vrot.slane %v9275_v2, %v9685_v5  ;;  %v423_v10 = vrot.slane %v9273_v3, %v9683_v4  ;;  %v9271_v41 = vld [vmem:[%s14783_s2 + $0x3] ss:$8 sm:$0xf]  ;;  %s9611_s26 = smov 111  }
  0x16   :  { %14858 = vst [vmem:[#allocation11_spill] sm:$0xff] %v9687_v6  ;;  %14859 = vst [vmem:[#allocation12_spill] sm:$0xff] %v9689_v7  ;;  %v427_v11 = vrot.slane %v9273_v3, %v9685_v5  ;;  %v564_v15 = vrot.slane %v9275_v2, %v9687_v6  ;;  %v568_v16 = vrot.slane %v9275_v2, %v9689_v7  ;;  %v64_v49 = vld [vmem:[%s14783_s2] ss:$8 sm:$0xf]  ;;  %s9612_s27 = smov 112  }
  0x17   :  { %v431_v17 = vrot.slane %v9273_v3, %v9687_v6  ;;  %v435_v18 = vrot.slane %v9273_v3, %v9689_v7  ;;  %v569_v19 = vcombine.low %v556_v8, %v560_v9  ;;  %v489_v22 = vrot.slane %v9274_v12, %v9683_v4  ;;  %59 = vst [vmem:[#allocation2 + $0x4] sm:$0xff] %v9701_v13  ;;  %v9269_v56 = vld [vmem:[%s14783_s2 + $0x1] ss:$8 sm:$0xf]  ;;  %s2719_s15 = sld [smem:[#allocation7]] }
  0x18   :  { %v436_v20 = vcombine.low %v423_v10, %v427_v11  ;;  %v570_v21 = vcombine.low %v564_v15, %v568_v16  ;;  %v493_v23 = vrot.slane %v9274_v12, %v9685_v5  ;;  %v497_v25 = vrot.slane %v9274_v12, %v9687_v6  ;;  %60 = vst [vmem:[#allocation2 + $0xc] sm:$0xff] %v9706_v14  ;;  %v416_v10 = vld [vmem:[#allocation2 + $0x14] sm:$0xf] }
  0x19   :  { %571 = vrot.lane.b32.xlu0 %v569_v19, %s9604_s1  ;;  %v437_v24 = vcombine.low %v431_v17, %v435_v18  ;;  %v501_v26 = vrot.slane %v9274_v12, %v9689_v7  ;;  %v364_v29 = vrot.slane %v9272_v27, %v9687_v6  ;;  %v368_v30 = vrot.slane %v9272_v27, %v9689_v7  ;;  %v549_v11 = vld [vmem:[#allocation2 + $0x14] sm:$0xf] }
  0x1a   :  { %438 = vrot.lane.b32.xlu1 %v436_v20, %s9605_s12  ;;  %v502_v28 = vcombine.low %v489_v22, %v493_v23  ;;  %v356_v32 = vrot.slane %v9272_v27, %v9683_v4  ;;  %v360_v33 = vrot.slane %v9272_v27, %v9685_v5  ;;  %v215_v36 = vrot.slane %v9270_v34, %v9687_v6 }
  0x1b   :  { %v503_v31 = vcombine.low %v497_v25, %v501_v26  ;;  %v370_v35 = vcombine.low %v364_v29, %v368_v30  ;;  %v219_v37 = vrot.slane %v9270_v34, %v9689_v7  ;;  %v207_v39 = vrot.slane %v9270_v34, %v9683_v4 }
  0x1c   :  { %v369_v38 = vcombine.low %v356_v32, %v360_v33  ;;  %v211_v40 = vrot.slane %v9270_v34, %v9685_v5  ;;  %v283_v43 = vrot.slane %v9271_v41, %v9687_v6  ;;  %v287_v44 = vrot.slane %v9271_v41, %v9689_v7 }
  0x1d   :  { %573 = vrot.lane.b32.xlu0 %v570_v21, %s9604_s1  ;;  %v275_v45 = vrot.slane %v9271_v41, %v9683_v4  ;;  %v221_v46 = vcombine.low %v215_v36, %v219_v37  ;;  %v279_v48 = vrot.slane %v9271_v41, %v9685_v5  ;;  %v77_v51 = vrot.slane %v64_v49, %v9687_v6 }
  0x1e   :  { %440 = vrot.lane.b32.xlu1 %v437_v24, %s9605_s12  ;;  %v220_v47 = vcombine.low %v207_v39, %v211_v40  ;;  %v289_v50 = vcombine.low %v283_v43, %v287_v44  ;;  %v81_v52 = vrot.slane %v64_v49, %v9689_v7  ;;  %v69_v54 = vrot.slane %v64_v49, %v9683_v4  ;;  %v9815_v34 = vld [vmem:[#allocation2] sm:$0xff] }
  0x1f   :  { %v288_v53 = vcombine.low %v275_v45, %v279_v48  ;;  %v73_v55 = vrot.slane %v64_v49, %v9685_v5  ;;  %v138_v58 = vrot.slane %v9269_v56, %v9683_v4  ;;  %v142_v59 = vrot.slane %v9269_v56, %v9685_v5  ;;  %v200_v26 = vld [vmem:[#allocation2 + $0x10] sm:$0xf] }
  0x20   :  { %v83_v57 = vcombine.low %v77_v51, %v81_v52  ;;  %v146_v61 = vrot.slane %v9269_v56, %v9687_v6  ;;  %v150_v62 = vrot.slane %v9269_v56, %v9689_v7  ;;  %vm116_vm0 = vcmask 138240   ;;  %v63_v39 = vld [vmem:[#allocation2 + $0x10] sm:$0xf] }
  0x21   :  { %504 = vrot.lane.b32.xlu0 %v502_v28, %s9606_s17  ;;  %v82_v60 = vcombine.low %v69_v54, %v73_v55  ;;  %v151_v63 = vcombine.low %v138_v58, %v142_v59  ;;  %vm296_vm1 = vcmask 1039360   ;;  %vm228_vm2 = vcmask 924672  }
  0x22   :  { %506 = vrot.lane.b32.xlu1 %v503_v31, %s9606_s17  ;;  %v152_v0 = vcombine.low %v146_v61, %v150_v62  ;;  %vm185_vm3 = vcmask 130048   ;;  %vm92_vm4 = vcmask 1043456   ;;  %vm159_vm5 = vcmask 916480  }
  0x23   :  { %vm253_vm6 = vcmask 121856   ;;  %vm322_vm7 = vcmask 7168   ;;  %vm90_vm8 = vcmask 908288   ;;  %vm640_vm9 = vcmask 293888  }
  0x25   :  { %371 = vrot.lane.b32.xlu0 %v369_v38, %s9608_s20 }
  0x26   :  { %373 = vrot.lane.b32.xlu1 %v370_v35, %s9608_s20 }
  0x29   :  { %222 = vrot.lane.b32.xlu0 %v220_v47, %s9609_s23 }
  0x2a   :  { %224 = vrot.lane.b32.xlu1 %v221_v46, %s9609_s23 }
  0x2d   :  { %290 = vrot.lane.b32.xlu0 %v288_v53, %s9610_s25 }
  0x2e   :  { %292 = vrot.lane.b32.xlu1 %v289_v50, %s9610_s25 }
  0x31   :  { %84 = vrot.lane.b32.xlu0 %v82_v60, %s9611_s26 }
  0x32   :  { %86 = vrot.lane.b32.xlu1 %v83_v57, %s9611_s26  ;;  %v482_v57 = vld [vmem:[#allocation2 + $0x14] sm:$0xf] }
  0x35   :  { %153 = vrot.lane.b32.xlu0 %v151_v63, %s9612_s27 }
  0x36   :  { %155 = vrot.lane.b32.xlu1 %v152_v0, %s9612_s27  ;;  %v349_v0 = vld [vmem:[#allocation2 + $0x14] sm:$0xf] }
  0x8b   :  { %v9776_v1 = vpop.permute.xlu0 %571 }
  0x8c   :  { %v439_v2 = vpop.permute.xlu1 %438  ;;  %v575_v3 = vrot.slane %v9776_v1, 4 }
  0x8d   :  { %v442_v44 = vrot.slane %v439_v2, 4 }
  0x8e   :  { %v577_v18 = vsel %vm116_vm0, %v575_v3, %v9776_v1 }
  0x8f   :  { %v9779_v8 = vpop.permute.xlu0 %573  ;;  %v9795_v21 = vmul.f32 %v577_v18, %v9701_v13  ;;  %v444_v52 = vsel %vm253_vm6, %v442_v44, %v439_v2 }
  0x90   :  { %v441_v9 = vpop.permute.xlu1 %440  ;;  %v576_v12 = vrot.slane %v9779_v8, 4  ;;  %v9859_v58 = vmul.f32 %v444_v52, %v9701_v13 }
  0x91   :  { %v443_v15 = vrot.slane %v441_v9, 4 }
  0x92   :  { %v585_v17 = vmul.f32 %v576_v12, %v549_v11  ;;  %v578_v63 = vsel %vm92_vm4, %v575_v3, %v576_v12  ;;  %v340_v3 = vcombine.high %v9706_v14, %v9706_v14 }
  0x93   :  { %v452_v16 = vmul.f32 %v443_v15, %v416_v10  ;;  %v9788_v19 = vpop.permute.xlu0 %504  ;;  %v445_v49 = vsel %vm92_vm4, %v442_v44, %v443_v15  ;;  %v579_v11 = vsel %vm116_vm0, %v578_v63, %v9779_v8  ;;  %v268_v44 = vld [vmem:[#allocation2 + $0x10] sm:$0xf]  ;;  %v9613_v63 = vmov 0  }
  0x94   :  { %v9790_v20 = vpop.permute.xlu1 %506  ;;  %599 = vrot.lane.b32.xlu1 %v585_v17, %s9611_s26  ;;  %v508_v35 = vrot.slane %v9788_v19, 4  ;;  %v446_v56 = vsel %vm253_vm6, %v445_v49, %v441_v9  ;;  %346 = vst [vmem:[#allocation4 + $0x40] sm:$0xf] %v340_v3  ;;  %v584_v18 = vmul.f32 %v579_v11, %v9706_v14  ;;  %9443 = vset.pattern.permute.xlu0 %v9613_v63 }
  0x95   :  { %466 = vrot.lane.b32.xlu0 %v452_v16, %s9609_s23  ;;  %v509_v53 = vrot.slane %v9790_v20, 4  ;;  %v9865_v61 = vmul.f32 %v446_v56, %v9706_v14  ;;  %9444 = vset.pattern.permute.xlu1 %v9613_v63 }
  0x96   :  { %v510_v45 = vsel %vm185_vm3, %v508_v35, %v9788_v19 }
  0x97   :  { %v9799_v23 = vpop.permute.xlu0 %371  ;;  %v9845_v51 = vmul.f32 %v510_v45, %v9701_v13  ;;  %v518_v62 = vmul.f32 %v509_v53, %v482_v57  ;;  %v511_v12 = vsel %vm92_vm4, %v508_v35, %v509_v53  ;;  %v456_v53 = vcombine.high %v9859_v58, %v9859_v58 }
  0x98   :  { %v9797_v22 = vpop.permute.xlu1 %373  ;;  %v375_v54 = vrot.slane %v9799_v23, 4  ;;  %v512_v8 = vsel %vm185_vm3, %v511_v12, %v9790_v20  ;;  %v457_v57 = vcombine.high %v9865_v61, %v9865_v61  ;;  %v9287_v12 = vld [vmem:[%s14783_s2 + $0x7] ss:$8 sm:$0xf] }
  0x99   :  { %591 = vrot.lane.b32.xlu0 %v9795_v21, %s9611_s26  ;;  %v376_v59 = vrot.slane %v9797_v22, 4  ;;  %v524_v15 = vcombine.low %v518_v62, %v518_v62 }
  0x9a   :  { %v377_v60 = vsel %vm322_vm7, %v375_v54, %v9799_v23 }
  0x9b   :  { %v9805_v25 = vpop.permute.xlu0 %222  ;;  %v9878_v10 = vmul.f32 %v377_v60, %v9701_v13  ;;  %v385_v1 = vmul.f32 %v376_v59, %v349_v0  ;;  %v634_v0 = vld [vmem:[%s14785_s4] sm:$0xf] }
  0x9c   :  { %v9803_v24 = vpop.permute.xlu1 %224  ;;  %v226_v31 = vrot.slane %v9805_v25, 4 }
  0x9d   :  { %v227_v27 = vrot.slane %v9803_v24, 4  ;;  %v391_v19 = vcombine.low %v385_v1, %v385_v1 }
  0x9e   :  { %v229_v40 = vsel %vm228_vm2, %v226_v31, %v9805_v25  ;;  %v589_v25 = vcombine.high %v9795_v21, %v9795_v21 }
  0x9f   :  { %v237_v28 = vmul.f32 %v227_v27, %v200_v26  ;;  %v291_v30 = vpop.permute.xlu0 %290  ;;  %v9837_v47 = vmul.f32 %v229_v40, %v9815_v34  ;;  %v378_v26 = vsel %vm92_vm4, %v375_v54, %v376_v59 }
  0xa0   :  { %v9810_v29 = vpop.permute.xlu1 %292  ;;  %v294_v32 = vrot.slane %v291_v30, 4  ;;  %v379_v35 = vsel %vm322_vm7, %v378_v26, %v9797_v22  ;;  %v9285_v26 = vld [vmem:[%s14783_s2 + $0x5] ss:$8 sm:$0xf] }
  0xa1   :  { %251 = vrot.lane.b32.xlu1 %v237_v28, %s9605_s12  ;;  %v295_v2 = vrot.slane %v9810_v29, 4  ;;  %v241_v52 = vcombine.high %v9837_v47, %v9837_v47 }
  0xa2   :  { %v297_v33 = vsel %vm296_vm1, %v294_v32, %v291_v30  ;;  %v517_v30 = vmul.f32 %v512_v8, %v9706_v14 }
  0xa3   :  { %v9820_v37 = vpop.permute.xlu0 %84  ;;  %v9823_v38 = vmul.f32 %v297_v33, %v9815_v34  ;;  %v298_v17 = vsel %vm92_vm4, %v294_v32, %v295_v2  ;;  %v267_v32 = vld [vmem:[#allocation2 + $0x8] sm:$0xff] }
  0xa4   :  { %v9818_v36 = vpop.permute.xlu1 %86  ;;  %v299_v23 = vsel %vm296_vm1, %v298_v17, %v9810_v29  ;;  %v230_v29 = vsel %vm92_vm4, %v226_v31, %v227_v27  ;;  %v88_v22 = vrot.slane %v9820_v37, 4  ;;  %v522_v27 = vcombine.low %v9845_v51, %v9845_v51 }
  0xa5   :  { %v89_v41 = vrot.slane %v9818_v36, 4  ;;  %314 = vrot.lane.b32.xlu0 %v9823_v38, %s9608_s20  ;;  %v304_v33 = vmul.f32 %v299_v23, %v267_v32  ;;  %v523_v54 = vcombine.low %v517_v30, %v517_v30  ;;  %v1221_v17 = vrot.slane %v9287_v12, %v9683_v4 }
  0xa6   :  { %v91_v21 = vsel %vm90_vm8, %v88_v22, %v9820_v37  ;;  %v339_v37 = vcombine.high %v9701_v13, %v9701_v13  ;;  %v309_v13 = vcombine.low %v9823_v38, %v9823_v38 }
  0xa7   :  { %v100_v43 = vmul.f32 %v89_v41, %v63_v39  ;;  %v154_v46 = vpop.permute.xlu0 %153  ;;  %v384_v39 = vmul.f32 %v379_v35, %v9706_v14  ;;  %v93_v14 = vsel %vm92_vm4, %v88_v22, %v89_v41  ;;  %v98_v41 = vmul.f32 %v91_v21, %v9815_v34  ;;  %v811_v21 = vld [vmem:[%s14783_s2] ss:$8 sm:$0xf] }
  0xa8   :  { %v157_v48 = vrot.slane %v154_v46, 4  ;;  %v156_v9 = vpop.permute.xlu1 %155  ;;  %v94_v31 = vsel %vm90_vm8, %v93_v14, %v9818_v36  ;;  %344 = vst [vmem:[#allocation4 + $0x88] sm:$0xf] %v339_v37  ;;  %v310_v59 = vcombine.low %v304_v33, %v304_v33  ;;  %v1229_v35 = vrot.slane %v9287_v12, %v9687_v6  ;;  %v9282_v37 = vld [vmem:[%s14783_s2 + $0x1] ss:$8 sm:$0xf] }
  0xa9   :  { %114 = vrot.lane.b32.xlu1 %v100_v43, %s9604_s1  ;;  %243 = vrot.lane.b32.xlu0 %v9837_v47, %s9605_s12  ;;  %v158_v16 = vrot.slane %v156_v9, 4  ;;  %v231_v43 = vsel %vm228_vm2, %v230_v29, %v9803_v24  ;;  %v99_v49 = vmul.f32 %v267_v32, %v94_v31  ;;  %v389_v47 = vcombine.low %v9878_v10, %v9878_v10  ;;  %v9283_v29 = vld [vmem:[%s14783_s2 + $0x2] ss:$8 sm:$0xf] }
  0xaa   :  { %v160_v50 = vsel %vm159_vm5, %v157_v48, %v154_v46  ;;  %v236_v45 = vmul.f32 %v267_v32, %v231_v43  ;;  %v305_v46 = vmul.f32 %v295_v2, %v268_v44  ;;  %v390_v56 = vcombine.low %v384_v39, %v384_v39 }
  0xab   :  { %v9851_v55 = vmul.f32 %v160_v50, %v9815_v34  ;;  %v161_v28 = vsel %vm92_vm4, %v157_v48, %v158_v16  ;;  %v131_v48 = vld [vmem:[#allocation2 + $0x10] sm:$0xf]  ;;  %v590_v34 = vcombine.high %v584_v18, %v584_v18  ;;  %v105_v60 = vcombine.high %v99_v49, %v99_v49 }
  0xac   :  { %v162_v20 = vsel %vm159_vm5, %v161_v28, %v156_v9  ;;  %v311_v24 = vcombine.low %v305_v46, %v305_v46  ;;  %v168_v50 = vmul.f32 %v158_v16, %v131_v48  ;;  %v951_v43 = vrot.slane %v9283_v29, %v9685_v5  ;;  %v9284_v46 = vld [vmem:[%s14783_s2 + $0x3] ss:$8 sm:$0xf] }
  0xad   :  { %527 = vrot.lane.b32.xlu1 %v9845_v51, %s9612_s27  ;;  %177 = vrot.lane.b32.xlu0 %v9851_v55, %s9606_s17  ;;  %v167_v40 = vmul.f32 %v267_v32, %v162_v20  ;;  %v104_v51 = vcombine.high %v98_v41, %v98_v41  ;;  %v172_v62 = vcombine.low %v9851_v55, %v9851_v55 }
  0xae   :  { %v174_v36 = vcombine.low %v168_v50, %v168_v50  ;;  %v1094_v32 = vrot.slane %v9285_v26, %v9685_v5  ;;  %v1233_v20 = vrot.slane %v9287_v12, %v9689_v7  ;;  %v1098_v22 = vrot.slane %v9285_v26, %v9687_v6 }
  0xaf   :  { %v173_v38 = vcombine.low %v167_v40, %v167_v40  ;;  %v1012_v14 = vrot.slane %v9284_v46, %v9683_v4  ;;  %v955_v31 = vrot.slane %v9283_v29, %v9687_v6  ;;  %v959_v48 = vrot.slane %v9283_v29, %v9689_v7 }
  0xb0   :  { %v1235_v44 = vcombine.low %v1229_v35, %v1233_v20  ;;  %v816_v50 = vrot.slane %v811_v21, %v9683_v4 }
  0xb1   :  { %458 = vrot.lane.b32.xlu1 %v9859_v58, %s9609_s23  ;;  %462 = vrot.lane.b32.xlu0 %v9865_v61, %s9609_s23  ;;  %v242_v58 = vcombine.high %v236_v45, %v236_v45  ;;  %v9288_v61 = vld [vmem:[%s14783_s2 + $0x20] ss:$8 sm:$0xf] }
  0xb2   :  { %v1287_v2 = vrot.slane %v9288_v61, %v9683_v4  ;;  %v1291_v9 = vrot.slane %v9288_v61, %v9685_v5  ;;  %v1295_v1 = vrot.slane %v9288_v61, %v9687_v6  ;;  %v1299_v3 = vrot.slane %v9288_v61, %v9689_v7 }
  0xb4   :  { %v1300_v55 = vcombine.low %v1287_v2, %v1291_v9  ;;  %v1301_v8 = vcombine.low %v1295_v1, %v1299_v3 }
  0xb5   :  { %394 = vrot.lane.b32.xlu1 %v9878_v10, %s9610_s25  ;;  %533 = vrot.lane.b32.xlu0 %v524_v15, %s9612_s27  ;;  %v9286_v10 = vld [vmem:[%s14783_s2 + $0x6] ss:$8 sm:$0xf] }
  0xb6   :  { %v1156_v11 = vrot.slane %v9286_v10, %v9683_v4  ;;  %v1160_v15 = vrot.slane %v9286_v10, %v9685_v5  ;;  %v1168_v23 = vrot.slane %v9286_v10, %v9689_v7 }
  0xb8   :  { %v1169_v16 = vcombine.low %v1156_v11, %v1160_v15 }
  0xb9   :  { %595 = vrot.lane.b32.xlu1 %v584_v18, %s9611_s26  ;;  %400 = vrot.lane.b32.xlu0 %v391_v19, %s9610_s25  ;;  %v1225_v18 = vrot.slane %v9287_v12, %v9685_v5  ;;  %v1164_v19 = vrot.slane %v9286_v10, %v9687_v6 }
  0xbb   :  { %v1234_v28 = vcombine.low %v1221_v17, %v1225_v18 }
  0xbd   :  { %531 = vrot.lane.b32.xlu1 %v517_v30, %s9612_s27  ;;  %318 = vrot.lane.b32.xlu0 %v304_v33, %s9608_s20  ;;  %v1090_v30 = vrot.slane %v9285_v26, %v9683_v4  ;;  %v1170_v33 = vcombine.low %v1164_v19, %v1168_v23 }
  0xc1   :  { %398 = vrot.lane.b32.xlu1 %v384_v39, %s9610_s25  ;;  %181 = vrot.lane.b32.xlu0 %v167_v40, %s9606_s17  ;;  %v1103_v39 = vcombine.low %v1090_v30, %v1094_v32  ;;  %v947_v40 = vrot.slane %v9283_v29, %v9683_v4 }
  0xc5   :  { %247 = vrot.lane.b32.xlu1 %v236_v45, %s9605_s12  ;;  %593 = vrot.lane.b32.xlu0 %v589_v25, %s9611_s26  ;;  %v1102_v45 = vrot.slane %v9285_v26, %v9689_v7  ;;  %v960_v25 = vcombine.low %v947_v40, %v951_v43 }
  0xc9   :  { %320 = vrot.lane.b32.xlu1 %v311_v24, %s9608_s20  ;;  %525 = vrot.lane.b32.xlu0 %v522_v27, %s9612_s27  ;;  %v1016_v24 = vrot.slane %v9284_v46, %v9685_v5  ;;  %v1104_v27 = vcombine.low %v1098_v22, %v1102_v45 }
  0xcd   :  { %110 = vrot.lane.b32.xlu1 %v99_v49, %s9604_s1  ;;  %245 = vrot.lane.b32.xlu0 %v241_v52, %s9605_s12  ;;  %v1025_v49 = vcombine.low %v1012_v14, %v1016_v24  ;;  %v961_v52 = vcombine.low %v955_v31, %v959_v48 }
  0xd1   :  { %183 = vrot.lane.b32.xlu1 %v174_v36, %s9606_s17  ;;  %108 = vrot.lane.b32.xlu0 %v104_v51, %s9604_s1  ;;  %v1020_v36 = vrot.slane %v9284_v46, %v9687_v6  ;;  %v1024_v51 = vrot.slane %v9284_v46, %v9689_v7 }
  0xd5   :  { %460 = vrot.lane.b32.xlu1 %v456_v53, %s9609_s23  ;;  %597 = vrot.lane.b32.xlu0 %v590_v34, %s9611_s26  ;;  %v881_v34 = vrot.slane %v9282_v37, %v9683_v4 }
  0xd9   :  { %392 = vrot.lane.b32.xlu1 %v389_v47, %s9610_s25  ;;  %529 = vrot.lane.b32.xlu0 %v523_v54, %s9612_s27  ;;  %v885_v47 = vrot.slane %v9282_v37, %v9685_v5  ;;  %v1026_v54 = vcombine.low %v1020_v36, %v1024_v51 }
  0xdd   :  { %312 = vrot.lane.b32.xlu1 %v309_v13, %s9608_s20  ;;  %396 = vrot.lane.b32.xlu0 %v390_v56, %s9610_s25  ;;  %v824_v13 = vrot.slane %v811_v21, %v9687_v6  ;;  %v828_v56 = vrot.slane %v811_v21, %v9689_v7 }
  0xe1   :  { %464 = vrot.lane.b32.xlu1 %v457_v57, %s9609_s23  ;;  %249 = vrot.lane.b32.xlu0 %v242_v58, %s9605_s12  ;;  %v894_v57 = vcombine.low %v881_v34, %v885_v47  ;;  %v830_v58 = vcombine.low %v824_v13, %v828_v56 }
  0xe5   :  { %316 = vrot.lane.b32.xlu1 %v310_v59, %s9608_s20  ;;  %112 = vrot.lane.b32.xlu0 %v105_v60, %s9604_s1  ;;  %v889_v59 = vrot.slane %v9282_v37, %v9687_v6  ;;  %v893_v60 = vrot.slane %v9282_v37, %v9689_v7 }
  0xe9   :  { %179 = vrot.lane.b32.xlu1 %v173_v38, %s9606_s17  ;;  %106 = vrot.lane.b32.xlu0 %v98_v41, %s9604_s1  ;;  %v820_v41 = vrot.slane %v811_v21, %v9685_v5  ;;  %v895_v38 = vcombine.low %v889_v59, %v893_v60 }
  0xeb   :  { %v829_v53 = vcombine.low %v816_v50, %v820_v41 }
  0xed   :  { %175 = vrot.lane.b32.xlu1 %v172_v62, %s9606_s17  ;;  %637 = vperm.xlu0 %9443, %v634_v0  }
  0xf1   :  { %1302 = vrot.lane.b32.xlu1 %v1300_v55, %s9604_s1  ;;  %1171 = vrot.lane.b32.xlu0 %v1169_v16, %s9605_s12 }
  0xf5   :  { %1304 = vrot.lane.b32.xlu1 %v1301_v8, %s9604_s1  ;;  %1236 = vrot.lane.b32.xlu0 %v1234_v28, %s9606_s17 }
  0xf9   :  { %1173 = vrot.lane.b32.xlu1 %v1170_v33, %s9605_s12  ;;  %1105 = vrot.lane.b32.xlu0 %v1103_v39, %s9608_s20 }
  0xfd   :  { %1238 = vrot.lane.b32.xlu1 %v1235_v44, %s9606_s17  ;;  %962 = vrot.lane.b32.xlu0 %v960_v25, %s9609_s23 }
 0x101   :  { %1107 = vrot.lane.b32.xlu1 %v1104_v27, %s9608_s20  ;;  %1027 = vrot.lane.b32.xlu0 %v1025_v49, %s9610_s25 }
 0x105   :  { %964 = vrot.lane.b32.xlu1 %v961_v52, %s9609_s23  ;;  %831 = vrot.lane.b32.xlu0 %v829_v53, %s9611_s26 }
 0x106   :  { %v600_v62 = vpop.permute.xlu1 %599 }
 0x107   :  { %v10036_v61 = vpop.permute.xlu0 %466 }
 0x109   :  { %1029 = vrot.lane.b32.xlu1 %v1026_v54, %s9610_s25  ;;  %896 = vrot.lane.b32.xlu0 %v894_v57, %s9612_s27 }
 0x10b   :  { %v592_v63 = vpop.permute.xlu0 %591 }
 0x10d   :  { %833 = vrot.lane.b32.xlu1 %v830_v58, %s9611_s26 }
 0x111   :  { %898 = vrot.lane.b32.xlu1 %v895_v38, %s9612_s27 }
 0x113   :  { %v10039_v0 = vpop.permute.xlu1 %251 }
 0x117   :  { %v10041_v2 = vpop.permute.xlu0 %314 }
 0x11b   :  { %v10043_v9 = vpop.permute.xlu1 %114  ;;  %v244_v10 = vpop.permute.xlu0 %243 }
 0x11f   :  { %v528_v11 = vpop.permute.xlu1 %527  ;;  %v10045_v15 = vpop.permute.xlu0 %177 }
 0x123   :  { %v459_v55 = vpop.permute.xlu1 %458  ;;  %v10047_v1 = vpop.permute.xlu0 %462 }
 0x127   :  { %v10049_v3 = vpop.permute.xlu1 %394  ;;  %v534_v12 = vpop.permute.xlu0 %533 }
 0x12b   :  { %v596_v16 = vpop.permute.xlu1 %595  ;;  %v401_v17 = vpop.permute.xlu0 %400 }
 0x12f   :  { %v532_v18 = vpop.permute.xlu1 %531  ;;  %v10052_v19 = vpop.permute.xlu0 %318 }
 0x130   :  { %v538_v8 = vsel %vm159_vm5, %v532_v18, %v534_v12 }
 0x131   :  { %546 = vst [vmem:[#allocation4 + $0x60] sm:$0xf0] %v538_v8 }
 0x133   :  { %v399_v23 = vpop.permute.xlu1 %398  ;;  %v10055_v28 = vpop.permute.xlu0 %181 }
 0x134   :  { %v405_v26 = vsel %vm296_vm1, %v399_v23, %v401_v17 }
 0x135   :  { %413 = vst [vmem:[#allocation4 + $0x40] sm:$0xf0] %v405_v26 }
 0x137   :  { %v10057_v30 = vpop.permute.xlu1 %247  ;;  %v594_v32 = vpop.permute.xlu0 %593 }
 0x138   :  { %v601_v33 = vsel %vm90_vm8, %v592_v63, %v594_v32  ;;  %v602_v35 = vsel %vm90_vm8, %v594_v32, %v596_v16 }
 0x139   :  { %609 = vst [vmem:[#allocation4 + $0x20] sm:$0xf] %v601_v33  ;;  %610 = vst [vmem:[#allocation4 + $0x48] sm:$0xf] %v602_v35 }
 0x13b   :  { %v321_v20 = vpop.permute.xlu1 %320  ;;  %v526_v39 = vpop.permute.xlu0 %525 }
 0x13c   :  { %v326_v29 = vsel %vm322_vm7, %v10052_v19, %v321_v20  ;;  %v535_v40 = vsel %vm159_vm5, %v526_v39, %v528_v11  ;;  %v625_v33 = vld [vmem:[#allocation4 + $0x40] sm:$0xff] }
 0x13d   :  { %334 = vst [vmem:[#allocation4 + $0x80] sm:$0xf0] %v326_v29  ;;  %543 = vst [vmem:[#allocation4 + $0x58] sm:$0xf0] %v535_v40 }
 0x13f   :  { %v10064_v43 = vpop.permute.xlu1 %110  ;;  %v246_v44 = vpop.permute.xlu0 %245 }
 0x140   :  { %v254_v22 = vsel %vm253_vm6, %v244_v10, %v246_v44  ;;  %v255_v45 = vsel %vm253_vm6, %v246_v44, %v10057_v30  ;;  %v631_v46 = vld [vmem:[#allocation4 + $0x48] sm:$0xf]  ;;  %v630_v25 = vld [vmem:[#allocation4 + $0x20] sm:$0xf] }
 0x141   :  { %262 = vst [vmem:[#allocation4 + $0x30] sm:$0xf] %v254_v22  ;;  %263 = vst [vmem:[#allocation4 + $0x68] sm:$0xf] %v255_v45  ;;  %9276 = vmatprep.subr.msk.mxu0 %vm92_vm4, %v631_v46  ;;  %v613_v22 = vld [vmem:[%s14784_s3] sm:$0xf] }
 0x142   :  { %9277 = vmatpush1.msk.msra.mxu0 %vm92_vm4, %v630_v25 }
 0x143   :  { %v184_v14 = vpop.permute.xlu1 %183  ;;  %v10073_v27 = vpop.permute.xlu0 %108 }
 0x144   :  { %v189_v24 = vsel %vm185_vm3, %v10055_v28, %v184_v14  ;;  %v118_v31 = vsel %vm116_vm0, %v10073_v27, %v10064_v43 }
 0x145   :  { %197 = vst [vmem:[#allocation4 + $0x18] sm:$0xf0] %v189_v24  ;;  %126 = vst [vmem:[#allocation4 + $0x38] sm:$0xf] %v118_v31 }
 0x147   :  { %v461_v48 = vpop.permute.xlu1 %460  ;;  %v598_v50 = vpop.permute.xlu0 %597 }
 0x148   :  { %v468_v21 = vsel %vm228_vm2, %v459_v55, %v461_v48  ;;  %v469_v49 = vsel %vm228_vm2, %v461_v48, %v10047_v1  ;;  %v603_v41 = vsel %vm90_vm8, %v596_v16, %v598_v50  ;;  %v604_v52 = vsel %vm90_vm8, %v598_v50, %v600_v62 }
 0x149   :  { %476 = vst [vmem:[#allocation4 + $0x58] sm:$0xf] %v468_v21  ;;  %477 = vst [vmem:[#allocation4 + $0x10] sm:$0xf] %v469_v49  ;;  %v1150_v21 = vld [vmem:[#allocation2 + $0x14] sm:$0xf] }
 0x14a   :  { %611 = vst [vmem:[#allocation4 + $0x70] sm:$0xf] %v603_v41  ;;  %612 = vst [vmem:[#allocation4 + $0x90] sm:$0xf] %v604_v52  ;;  %v1281_v52 = vld [vmem:[#allocation2 + $0x14] sm:$0xf] }
 0x14b   :  { %v393_v36 = vpop.permute.xlu1 %392  ;;  %v530_v37 = vpop.permute.xlu0 %529 }
 0x14c   :  { %v402_v51 = vsel %vm296_vm1, %v393_v36, %v10049_v3  ;;  %v536_v53 = vsel %vm159_vm5, %v528_v11, %v530_v37  ;;  %v537_v34 = vsel %vm159_vm5, %v530_v37, %v532_v18  ;;  %v1215_v36 = vld [vmem:[#allocation2 + $0x14] sm:$0xf] }
 0x14d   :  { %410 = vst [vmem:[#allocation4 + $0x8] sm:$0xf0] %v402_v51  ;;  %544 = vst [vmem:[#allocation4 + $0x10] sm:$0xf0] %v536_v53 }
 0x14e   :  { %545 = vst [vmem:[#allocation4 + $0x98] sm:$0xf0] %v537_v34 }
 0x14f   :  { %v313_v47 = vpop.permute.xlu1 %312  ;;  %v397_v13 = vpop.permute.xlu0 %396 }
 0x150   :  { %v323_v54 = vsel %vm322_vm7, %v313_v47, %v10041_v2  ;;  %v403_v56 = vsel %vm296_vm1, %v10049_v3, %v397_v13  ;;  %v404_v57 = vsel %vm296_vm1, %v397_v13, %v399_v23  ;;  %v626_v3 = vld [vmem:[#allocation4 + $0x58] sm:$0xff] }
 0x151   :  { %331 = vst [vmem:[#allocation4 + $0x30] sm:$0xf0] %v323_v54  ;;  %v633_v58 = vld [vmem:[#allocation4 + $0x90] sm:$0xf]  ;;  %411 = vst [vmem:[#allocation4 + $0x88] sm:$0xf0] %v403_v56 }
 0x152   :  { %v632_v59 = vld [vmem:[#allocation4 + $0x70] sm:$0xf]  ;;  %412 = vst [vmem:[#allocation4 + $0x28] sm:$0xf0] %v404_v57  ;;  %9279 = vmatprep.subr.msk.mxu1 %vm92_vm4, %v633_v58  ;;  %v1084_v47 = vld [vmem:[#allocation2 + $0x14] sm:$0xf] }
 0x153   :  { %v465_v60 = vpop.permute.xlu1 %464  ;;  %9280 = vmatpush1.msk.msra.mxu1 %vm92_vm4, %v632_v59  ;;  %v250_v63 = vpop.permute.xlu0 %249 }
 0x154   :  { %v470_v38 = vsel %vm228_vm2, %v10047_v1, %v465_v60  ;;  %v471_v62 = vsel %vm228_vm2, %v465_v60, %v10036_v61  ;;  %v256_v10 = vsel %vm253_vm6, %v10057_v30, %v250_v63  ;;  %v257_v11 = vsel %vm253_vm6, %v250_v63, %v10039_v0  ;;  %v627_v55 = vld [vmem:[#allocation4 + $0x10] sm:$0xff]  ;;  %v622_v8 = vld [vmem:[#allocation4 + $0x8] sm:$0xff] }
 0x155   :  { %478 = vst [vmem:[#allocation4 + $0x98] sm:$0xf] %v470_v38  ;;  %479 = vst [vmem:[#allocation4 + $0x60] sm:$0xf] %v471_v62  ;;  %680 = vmatprep.subr.mxu0 %v627_v55 }
 0x156   :  { %264 = vst [vmem:[#allocation4 + $0x78] sm:$0xf] %v256_v10  ;;  %265 = vst [vmem:[#allocation4 + $0x80] sm:$0xf] %v257_v11  ;;  %681 = vmatpush1.msra.mxu0 %v626_v3 }
 0x157   :  { %v317_v12 = vpop.permute.xlu1 %316  ;;  %v113_v16 = vpop.permute.xlu0 %112 }
 0x158   :  { %v324_v1 = vsel %vm322_vm7, %v10041_v2, %v317_v12  ;;  %v325_v61 = vsel %vm322_vm7, %v317_v12, %v10052_v19  ;;  %v119_v17 = vsel %vm116_vm0, %v10064_v43, %v113_v16  ;;  %v120_v0 = vsel %vm116_vm0, %v113_v16, %v10043_v9  ;;  %v623_v18 = vld [vmem:[#allocation4 + $0x88] sm:$0xff]  ;;  %v618_v43 = vld [vmem:[#allocation4 + $0x30] sm:$0xff] }
 0x159   :  { %332 = vst [vmem:[#allocation4 + $0x68] sm:$0xf0] %v324_v1  ;;  %333 = vst [vmem:[#allocation4 + $0x78] sm:$0xf0] %v325_v61  ;;  %682 = vmatprep.subr.mxu0 %v623_v18  ;;  %v624_v20 = vld [vmem:[#allocation4 + $0x28] sm:$0xff] }
 0x15a   :  { %127 = vst [vmem:[#allocation4 + $0x50] sm:$0xf] %v119_v17  ;;  %128 = vst [vmem:[#allocation4 + $0x18] sm:$0xf] %v120_v0  ;;  %683 = vmatpush1.msra.mxu0 %v622_v8 }
 0x15b   :  { %v180_v23 = vpop.permute.xlu1 %179  ;;  %v107_v26 = vpop.permute.xlu0 %106 }
 0x15c   :  { %v187_v2 = vsel %vm185_vm3, %v10045_v15, %v180_v23  ;;  %v188_v19 = vsel %vm185_vm3, %v180_v23, %v10055_v28  ;;  %v629_v30 = vld [vmem:[#allocation4 + $0x60] sm:$0xff]  ;;  %v628_v32 = vld [vmem:[#allocation4 + $0x98] sm:$0xff]  ;;  %v117_v9 = vsel %vm116_vm0, %v107_v26, %v10073_v27 }
 0x15d   :  { %195 = vst [vmem:[#allocation4 + $0x38] sm:$0xf0] %v187_v2  ;;  %196 = vst [vmem:[#allocation4 + $0x50] sm:$0xf0] %v188_v19  ;;  %751 = vmatprep.subr.mxu1 %v629_v30  ;;  %v621_v39 = vld [vmem:[#allocation4 + $0x80] sm:$0xff] }
 0x15e   :  { %125 = vst [vmem:[#allocation4] sm:$0xf] %v117_v9  ;;  %752 = vmatpush1.msra.mxu1 %v628_v32 }
 0x15f   :  { %v176_v35 = vpop.permute.xlu1 %175  ;;  %753 = vmatprep.subr.mxu1 %v625_v33 }
 0x160   :  { %v186_v29 = vsel %vm185_vm3, %v176_v35, %v10045_v15  ;;  %754 = vmatpush1.msra.mxu1 %v624_v20  ;;  %v619_v28 = vld [vmem:[#allocation4 + $0x68] sm:$0xff]  ;;  %v620_v40 = vld [vmem:[#allocation4 + $0x78] sm:$0xff] }
 0x161   :  { %194 = vst [vmem:[#allocation4] sm:$0xf0] %v186_v29  ;;  %684 = vmatprep.subr.mxu0 %v619_v28  ;;  %755 = vmatprep.subr.mxu1 %v621_v39  ;;  %v617_v44 = vld [vmem:[#allocation4 + $0x18] sm:$0xff] }
 0x162   :  { %685 = vmatpush1.msra.mxu0 %v618_v43  ;;  %756 = vmatpush1.msra.mxu1 %v620_v40 }
 0x163   :  { %757 = vmatprep.subr.mxu1 %v617_v44  ;;  %v10125_v25 = vpop.permute.xlu1 %1302 }
 0x164   :  { %v615_v45 = vld [vmem:[#allocation4 + $0x38] sm:$0xff]  ;;  %v616_v46 = vld [vmem:[#allocation4 + $0x50] sm:$0xff]  ;;  %v1306_v12 = vrot.slane %v10125_v25, 4 }
 0x165   :  { %686 = vmatprep.subr.mxu0 %v615_v45  ;;  %758 = vmatpush1.msra.mxu1 %v616_v46 }
 0x166   :  { %9281 = vmatmul.mubr.msk.f32.vlgmr.msra.gmra.mxu1 %vm640_vm9, %v613_v22  ;;  %v1308_v8 = vsel %vm116_vm0, %v1306_v12, %v10125_v25 }
 0x167   :  { %1537 = vmatprep.mubr.f32.mxu1 %v14793_v42  ;;  %v10127_v14 = vpop.permute.xlu1 %1304 }
 0x168   :  { %v614_v15 = vld [vmem:[#allocation4] sm:$0xff]  ;;  %v1307_v49 = vrot.slane %v10127_v14, 4  ;;  %v638_v56 = vpop.permute.xlu0 %637 }
 0x169   :  { %687 = vmatpush1.msra.mxu0 %v614_v15 }
 0x16a   :  { %9278 = vmatmul.mubr.msk.f32.vlgmr.msra.gmra.mxu0 %vm640_vm9, %v613_v22  ;;  %v1316_v37 = vmul.f32 %v1307_v49, %v1281_v52  ;;  %v1309_v45 = vsel %vm92_vm4, %v1306_v12, %v1307_v49 }
 0x16b   :  { %1460 = vmatprep.mubr.f32.mxu0 %v14793_v42  ;;  %v10129_v24 = vpop.permute.xlu1 %1173 }
 0x16c   :  { %v1176_v31 = vrot.slane %v10129_v24, 4  ;;  %1330 = vrot.lane.b32.xlu1 %v1316_v37, %s9611_s26  ;;  %v10151_v57 = vpop.permute.xlu0 %1171 }
 0x16d   :  { %v1175_v32 = vrot.slane %v10151_v57, 4 }
 0x16e   :  { %v1185_v50 = vmul.f32 %v1176_v31, %v1150_v21 }
 0x16f   :  { %v10131_v27 = vpop.permute.xlu1 %1238  ;;  %v1177_v35 = vsel %vm253_vm6, %v1175_v32, %v10151_v57 }
 0x170   :  { %v1241_v48 = vrot.slane %v10131_v27, 4  ;;  %1199 = vrot.lane.b32.xlu0 %v1185_v50, %s9609_s23  ;;  %v1237_v58 = vpop.permute.xlu0 %1236  ;;  %v1310_v50 = vsel %vm116_vm0, %v1309_v45, %v10127_v14 }
 0x171   :  { %v1240_v17 = vrot.slane %v1237_v58, 4 }
 0x172   :  { %v1250_v53 = vmul.f32 %v1241_v48, %v1215_v36 }
 0x173   :  { %v10138_v41 = vpop.permute.xlu1 %1107  ;;  %v1242_v23 = vsel %vm185_vm3, %v1240_v17, %v1237_v58  ;;  %v1243_v21 = vsel %vm92_vm4, %v1240_v17, %v1241_v48 }
 0x174   :  { %v1110_v51 = vrot.slane %v10138_v41, 4  ;;  %v1256_v34 = vcombine.low %v1250_v53, %v1250_v53  ;;  %v1106_v59 = vpop.permute.xlu0 %1105 }
 0x175   :  { %v1109_v20 = vrot.slane %v1106_v59, 4 }
 0x176   :  { %1265 = vrot.lane.b32.xlu0 %v1256_v34, %s9612_s27  ;;  %v1119_v54 = vmul.f32 %v1110_v51, %v1084_v47  ;;  %v1244_v34 = vsel %vm185_vm3, %v1243_v21, %v10131_v27  ;;  %v1178_v27 = vsel %vm92_vm4, %v1175_v32, %v1176_v31 }
 0x177   :  { %v10179_v2 = vpop.permute.xlu1 %964  ;;  %v1111_v28 = vsel %vm322_vm7, %v1109_v20, %v1106_v59  ;;  %v1112_v14 = vsel %vm92_vm4, %v1109_v20, %v1110_v51  ;;  %v1179_v59 = vsel %vm253_vm6, %v1178_v27, %v10129_v24 }
 0x178   :  { %v1125_v13 = vcombine.low %v1119_v54, %v1119_v54  ;;  %v10153_v60 = vpop.permute.xlu0 %962  ;;  %v967_v48 = vrot.slane %v10179_v2, 4  ;;  %v1113_v57 = vsel %vm322_vm7, %v1112_v14, %v10138_v41 }
 0x179   :  { %v966_v44 = vrot.slane %v10153_v60, 4 }
 0x17a   :  { %1134 = vrot.lane.b32.xlu0 %v1125_v13, %s9610_s25 }
 0x17b   :  { %v10200_v39 = vpop.permute.xlu1 %1029  ;;  %v968_v49 = vsel %vm228_vm2, %v966_v44, %v10153_v60  ;;  %v969_v58 = vsel %vm92_vm4, %v966_v44, %v967_v48 }
 0x17c   :  { %v10163_v3 = vpop.permute.xlu0 %1027  ;;  %v1032_v47 = vrot.slane %v10200_v39, 4 }
 0x17d   :  { %v1031_v9 = vrot.slane %v10163_v3, 4 }
 0x17f   :  { %v1033_v40 = vsel %vm296_vm1, %v1031_v9, %v10163_v3  ;;  %v834_v52 = vpop.permute.xlu1 %833  ;;  %v1034_v51 = vsel %vm92_vm4, %v1031_v9, %v1032_v47 }
 0x180   :  { %v10181_v19 = vpop.permute.xlu0 %831  ;;  %v1035_v41 = vsel %vm296_vm1, %v1034_v51, %v10200_v39  ;;  %v836_v12 = vrot.slane %v834_v52, 4 }
 0x181   :  { %v835_v3 = vrot.slane %v10181_v19, 4 }
 0x184   :  { %v897_v43 = vpop.permute.xlu0 %896 }
 0x185   :  { %v900_v25 = vrot.slane %v897_v43, 4 }
 0x187   :  { %v902_v53 = vsel %vm159_vm5, %v900_v25, %v897_v43 }
 0x226   :  { %v793_v38 = vpop.f32.mrf.mxu1 }
 0x227   :  { %v10155_v63 = vadd.f32 %v793_v38, %v638_v56 }
 0x228   :  { %v795_v62 = vpop.f32.mrf.mxu1 }
 0x229   :  { %14860 = vst [vmem:[#allocation13_spill] sm:$0xff] %v10155_v63  ;;  %v10157_v10 = vadd.f32 %v795_v62, %v638_v56 }
 0x22a   :  { %v722_v11 = vpop.f32.mrf.mxu0 }
 0x22b   :  { %14861 = vst [vmem:[#allocation14_spill] sm:$0xff] %v10157_v10  ;;  %v10161_v55 = vcombine.low %v10155_v63, %v10157_v10  ;;  %v10167_v61 = vadd.f32 %v722_v11, %v638_v56  ;;  %v9579_v0 = vcombine.low %v10157_v10, %v10157_v10  ;;  %v970_v11 = vsel %vm228_vm2, %v969_v58, %v10179_v2 }
 0x22c   :  { %v724_v1 = vpop.f32.mrf.mxu0 }
 0x22d   :  { %807 = vst [vmem:[#allocation2 + $0xc] sm:$0xff] %v10161_v55  ;;  %14862 = vst [vmem:[#allocation15_spill] sm:$0xff] %v10167_v61  ;;  %v10169_v16 = vadd.f32 %v724_v1, %v638_v56  ;;  %v1315_v37 = vmul.f32 %v1310_v50, %v10161_v55  ;;  %v1249_v13 = vmul.f32 %v1244_v34, %v10161_v55  ;;  %v10247_v56 = vpop.permute.xlu1 %898  ;;  %v1367_v34 = vld [vmem:[%s14787_s6 + $0x8] sm:$0xff] }
 0x22e   :  { %1080 = vst [vmem:[#allocation4 + $0x28] sm:$0xf] %v10161_v55  ;;  %1081 = vst [vmem:[#allocation4 + $0x40] sm:$0xf] %v9579_v0  ;;  %v901_v60 = vrot.slane %v10247_v56, 4  ;;  %v1184_v31 = vmul.f32 %v1179_v59, %v10161_v55  ;;  %v1118_v38 = vmul.f32 %v1113_v57, %v10161_v55 }
 0x22f   :  { %14863 = vst [vmem:[#allocation16_spill] sm:$0xff] %v10169_v16  ;;  %v802_v18 = vcombine.low %v10167_v61, %v10169_v16  ;;  %v9580_v33 = vcombine.low %v10169_v16, %v10169_v16  ;;  %v1321_v44 = vcombine.high %v1315_v37, %v1315_v37  ;;  %v9314_v16 = vld [vmem:[%s14783_s2 + $0x1] ss:$8 sm:$0xf] }
 0x230   :  { %v903_v24 = vsel %vm92_vm4, %v900_v25, %v901_v60  ;;  %v1124_v25 = vcombine.low %v1118_v38, %v1118_v38 }
 0x231   :  { %806 = vst [vmem:[#allocation2 + $0x4] sm:$0xff] %v802_v18  ;;  %v10183_v26 = vmul.f32 %v1308_v8, %v802_v18  ;;  %v10185_v30 = vmul.f32 %v1242_v23, %v802_v18  ;;  %1078 = vst [vmem:[#allocation4 + $0x8] sm:$0xf] %v802_v18  ;;  %v10197_v29 = vmul.f32 %v1177_v35, %v802_v18 }
 0x232   :  { %1079 = vst [vmem:[#allocation4 + $0x88] sm:$0xf] %v9580_v33  ;;  %v10215_v15 = vmul.f32 %v1111_v28, %v802_v18  ;;  %v904_v55 = vsel %vm159_vm5, %v903_v24, %v10247_v56  ;;  %v838_v18 = vsel %vm92_vm4, %v835_v3, %v836_v12  ;;  %v837_v28 = vsel %vm90_vm8, %v835_v3, %v10181_v19  ;;  %v9309_v56 = vld [vmem:[%s14783_s2 + $0x6] ss:$8 sm:$0xf] }
 0x233   :  { %1322 = vrot.lane.b32.xlu0 %v10183_v26, %s9611_s26  ;;  %1259 = vrot.lane.b32.xlu1 %v10185_v30, %s9612_s27  ;;  %v839_v2 = vsel %vm90_vm8, %v838_v18, %v834_v52  ;;  %v1320_v32 = vcombine.high %v10183_v26, %v10183_v26  ;;  %v1254_v35 = vcombine.low %v10185_v30, %v10185_v30 }
 0x234   :  { %v941_v0 = vld [vmem:[#allocation2 + $0x10] sm:$0xf]  ;;  %v1123_v30 = vcombine.low %v10215_v15, %v10215_v15  ;;  %v2185_v51 = vrot.slane %v9309_v56, %v9683_v4  ;;  %v2189_v58 = vrot.slane %v9309_v56, %v9685_v5  ;;  %v2193_v59 = vrot.slane %v9309_v56, %v9687_v6 }
 0x235   :  { %v976_v23 = vmul.f32 %v967_v48, %v941_v0  ;;  %v810_v33 = vld [vmem:[#allocation2 + $0x10] sm:$0xf]  ;;  %v1366_v48 = vld [vmem:[%s14787_s6] sm:$0xff] }
 0x236   :  { %v845_v20 = vmul.f32 %v836_v12, %v810_v33  ;;  %v1006_v45 = vld [vmem:[#allocation2 + $0x10] sm:$0xf]  ;;  %v10355_v12 = vpop.permute.xlu0 %1199 }
 0x237   :  { %1191 = vrot.lane.b32.xlu1 %v10197_v29, %s9609_s23 }
 0x238   :  { %v10207_v22 = vld [vmem:[#allocation2] sm:$0xff]  ;;  %v1005_v62 = vld [vmem:[#allocation2 + $0x8] sm:$0xff] }
 0x239   :  { %v10213_v46 = vmul.f32 %v1033_v40, %v10207_v22  ;;  %v974_v36 = vmul.f32 %v968_v49, %v10207_v22  ;;  %v10241_v54 = vmul.f32 %v902_v53, %v10207_v22  ;;  %v1040_v1 = vmul.f32 %v1035_v41, %v1005_v62  ;;  %v875_v49 = vld [vmem:[#allocation2 + $0x10] sm:$0xf] }
 0x23a   :  { %v975_v17 = vmul.f32 %v1005_v62, %v970_v11  ;;  %v909_v8 = vmul.f32 %v1005_v62, %v904_v55  ;;  %v844_v9 = vmul.f32 %v1005_v62, %v839_v2  ;;  %v843_v39 = vmul.f32 %v837_v28, %v10207_v22  ;;  %v9307_v11 = vld [vmem:[%s14783_s2 + $0x3] ss:$8 sm:$0xf]  ;;  %v9306_v55 = vld [vmem:[%s14783_s2 + $0x2] ss:$8 sm:$0xf] }
 0x23b   :  { %1050 = vrot.lane.b32.xlu0 %v10213_v46, %s9608_s20  ;;  %1128 = vrot.lane.b32.xlu1 %v10215_v15, %s9610_s25  ;;  %v980_v26 = vcombine.high %v974_v36, %v974_v36  ;;  %v1189_v40 = vcombine.high %v10197_v29, %v10197_v29  ;;  %v1045_v19 = vcombine.low %v10213_v46, %v10213_v46 }
 0x23c   :  { %v849_v43 = vcombine.high %v843_v39, %v843_v39  ;;  %v1255_v29 = vcombine.low %v1249_v13, %v1249_v13  ;;  %v1190_v22 = vcombine.high %v1184_v31, %v1184_v31  ;;  %v1041_v15 = vmul.f32 %v1032_v47, %v1006_v45  ;;  %v9310_v47 = vld [vmem:[%s14783_s2 + $0x7] ss:$8 sm:$0xf] }
 0x23d   :  { %v1046_v21 = vcombine.low %v1040_v1, %v1040_v1  ;;  %v981_v50 = vcombine.high %v975_v17, %v975_v17  ;;  %v910_v52 = vmul.f32 %v901_v60, %v875_v49  ;;  %v914_v14 = vcombine.low %v10241_v54, %v10241_v54  ;;  %v9308_v60 = vld [vmem:[%s14783_s2 + $0x5] ss:$8 sm:$0xf] }
 0x23e   :  { %v1047_v46 = vcombine.low %v1041_v15, %v1041_v15  ;;  %v2297_v27 = vrot.slane %v9310_v47, %v9685_v5  ;;  %v2305_v57 = vrot.slane %v9310_v47, %v9689_v7  ;;  %v2081_v62 = vrot.slane %v9308_v60, %v9685_v5 }
 0x23f   :  { %982 = vrot.lane.b32.xlu0 %v974_v36, %s9605_s12  ;;  %1326 = vrot.lane.b32.xlu1 %v1315_v37, %s9611_s26  ;;  %v915_v36 = vcombine.low %v909_v8, %v909_v8  ;;  %v850_v37 = vcombine.high %v844_v9, %v844_v9  ;;  %v916_v53 = vcombine.low %v910_v52, %v910_v52 }
 0x240   :  { %v2085_v41 = vrot.slane %v9308_v60, %v9687_v6  ;;  %v2089_v3 = vrot.slane %v9308_v60, %v9689_v7  ;;  %v1953_v24 = vrot.slane %v9307_v11, %v9683_v4  ;;  %v1965_v0 = vrot.slane %v9307_v11, %v9689_v7 }
 0x241   :  { %v1845_v18 = vrot.slane %v9306_v55, %v9683_v4  ;;  %v1853_v2 = vrot.slane %v9306_v55, %v9687_v6 }
 0x243   :  { %919 = vrot.lane.b32.xlu0 %v10241_v54, %s9606_s17  ;;  %1263 = vrot.lane.b32.xlu1 %v1249_v13, %s9612_s27  ;;  %v2293_v13 = vrot.slane %v9310_v47, %v9683_v4  ;;  %v2301_v54 = vrot.slane %v9310_v47, %v9687_v6 }
 0x247   :  { %1195 = vrot.lane.b32.xlu0 %v1184_v31, %s9609_s23  ;;  %1132 = vrot.lane.b32.xlu1 %v1118_v38, %s9610_s25  ;;  %v2197_v31 = vrot.slane %v9309_v56, %v9689_v7  ;;  %v2077_v38 = vrot.slane %v9308_v60, %v9683_v4 }
 0x24b   :  { %1054 = vrot.lane.b32.xlu0 %v1040_v1, %s9608_s20  ;;  %986 = vrot.lane.b32.xlu1 %v975_v17, %s9605_s12  ;;  %v1957_v1 = vrot.slane %v9307_v11, %v9685_v5  ;;  %v1961_v17 = vrot.slane %v9307_v11, %v9687_v6 }
 0x24f   :  { %923 = vrot.lane.b32.xlu0 %v909_v8, %s9606_s17  ;;  %990 = vrot.lane.b32.xlu1 %v976_v23, %s9605_s12  ;;  %v1266_v8 = vpop.permute.xlu0 %1265  ;;  %v1849_v23 = vrot.slane %v9306_v55, %v9685_v5 }
 0x253   :  { %1324 = vrot.lane.b32.xlu0 %v1320_v32, %s9611_s26  ;;  %855 = vrot.lane.b32.xlu1 %v844_v9, %s9604_s1  ;;  %v9305_v32 = vld [vmem:[%s14783_s2 + $0x1] ss:$8 sm:$0xf]  ;;  %v10375_v9 = vpop.permute.xlu1 %1330  ;;  %v1135_v33 = vpop.permute.xlu0 %1134 }
 0x257   :  { %1257 = vrot.lane.b32.xlu0 %v1254_v35, %s9612_s27  ;;  %859 = vrot.lane.b32.xlu1 %v845_v20, %s9604_s1  ;;  %v1857_v35 = vrot.slane %v9306_v55, %v9689_v7  ;;  %v1737_v20 = vrot.slane %v9305_v32, %v9683_v4 }
 0x25b   :  { %984 = vrot.lane.b32.xlu0 %v980_v26, %s9605_s12  ;;  %1193 = vrot.lane.b32.xlu1 %v1189_v40, %s9609_s23  ;;  %v1745_v26 = vrot.slane %v9305_v32, %v9687_v6  ;;  %v1624_v40 = vld [vmem:[%s14783_s2] ss:$8 sm:$0xf] }
 0x25c   :  { %v1633_v45 = vrot.slane %v1624_v40, %v9685_v5  ;;  %v1637_v15 = vrot.slane %v1624_v40, %v9687_v6 }
 0x25f   :  { %853 = vrot.lane.b32.xlu0 %v849_v43, %s9604_s1  ;;  %1126 = vrot.lane.b32.xlu1 %v1123_v30, %s9610_s25 }
 0x263   :  { %1328 = vrot.lane.b32.xlu0 %v1321_v44, %s9611_s26  ;;  %1048 = vrot.lane.b32.xlu1 %v1045_v19, %s9608_s20  ;;  %v1749_v19 = vrot.slane %v9305_v32, %v9689_v7  ;;  %v1629_v44 = vrot.slane %v1624_v40, %v9683_v4 }
 0x267   :  { %1261 = vrot.lane.b32.xlu0 %v1255_v29, %s9612_s27  ;;  %1197 = vrot.lane.b32.xlu1 %v1190_v22, %s9609_s23 }
 0x26b   :  { %1130 = vrot.lane.b32.xlu0 %v1124_v25, %s9610_s25  ;;  %1052 = vrot.lane.b32.xlu1 %v1046_v21, %s9608_s20  ;;  %v9311_v25 = vld [vmem:[%s14783_s2 + $0x20] ss:$8 sm:$0xf] }
 0x26c   :  { %v2401_v49 = vrot.slane %v9311_v25, %v9683_v4 }
 0x26f   :  { %988 = vrot.lane.b32.xlu0 %v981_v50, %s9605_s12  ;;  %1056 = vrot.lane.b32.xlu1 %v1047_v46, %s9608_s20  ;;  %v1641_v50 = vrot.slane %v1624_v40, %v9689_v7 }
 0x273   :  { %857 = vrot.lane.b32.xlu0 %v850_v37, %s9604_s1  ;;  %921 = vrot.lane.b32.xlu1 %v915_v36, %s9606_s17 }
 0x277   :  { %851 = vrot.lane.b32.xlu0 %v843_v39, %s9604_s1  ;;  %925 = vrot.lane.b32.xlu1 %v916_v53, %s9606_s17  ;;  %v1741_v39 = vrot.slane %v9305_v32, %v9685_v5  ;;  %v2405_v53 = vrot.slane %v9311_v25, %v9685_v5 }
 0x27b   :  { %1375 = vperm.xlu0 %9443, %v1367_v34   ;;  %917 = vrot.lane.b32.xlu1 %v914_v14, %s9606_s17  ;;  %v2409_v34 = vrot.slane %v9311_v25, %v9687_v6 }
 0x27f   :  { %1370 = vperm.xlu1 %9444, %v1366_v48   ;;  %2306 = vrot.lane.b32.xlu0 %v2293_v13, %s9606_s17  ;;  %v2413_v13 = vrot.slane %v9311_v25, %v9689_v7 }
 0x283   :  { %2308 = vrot.lane.b32.xlu1 %v2297_v27, %s9606_s17  ;;  %2310 = vrot.lane.b32.xlu0 %v2301_v54, %s9606_s17 }
 0x287   :  { %2312 = vrot.lane.b32.xlu1 %v2305_v57, %s9606_s17  ;;  %2198 = vrot.lane.b32.xlu0 %v2185_v51, %s9605_s12 }
 0x28b   :  { %2200 = vrot.lane.b32.xlu1 %v2189_v58, %s9605_s12  ;;  %2202 = vrot.lane.b32.xlu0 %v2193_v59, %s9605_s12 }
 0x28f   :  { %2204 = vrot.lane.b32.xlu1 %v2197_v31, %s9605_s12  ;;  %2090 = vrot.lane.b32.xlu0 %v2077_v38, %s9608_s20 }
 0x293   :  { %2092 = vrot.lane.b32.xlu1 %v2081_v62, %s9608_s20  ;;  %2094 = vrot.lane.b32.xlu0 %v2085_v41, %s9608_s20 }
 0x297   :  { %2096 = vrot.lane.b32.xlu1 %v2089_v3, %s9608_s20  ;;  %1966 = vrot.lane.b32.xlu0 %v1953_v24, %s9610_s25 }
 0x29b   :  { %1968 = vrot.lane.b32.xlu1 %v1957_v1, %s9610_s25  ;;  %1970 = vrot.lane.b32.xlu0 %v1961_v17, %s9610_s25 }
 0x29f   :  { %1972 = vrot.lane.b32.xlu1 %v1965_v0, %s9610_s25  ;;  %1858 = vrot.lane.b32.xlu0 %v1845_v18, %s9609_s23 }
 0x2a3   :  { %1860 = vrot.lane.b32.xlu1 %v1849_v23, %s9609_s23  ;;  %1862 = vrot.lane.b32.xlu0 %v1853_v2, %s9609_s23 }
 0x2a5   :  { %v10381_v28 = vpop.permute.xlu1 %1259  ;;  %v1323_v43 = vpop.permute.xlu0 %1322 }
 0x2a7   :  { %1864 = vrot.lane.b32.xlu1 %v1857_v35, %s9609_s23  ;;  %1750 = vrot.lane.b32.xlu0 %v1737_v20, %s9612_s27 }
 0x2a9   :  { %v1192_v30 = vpop.permute.xlu1 %1191 }
 0x2ab   :  { %1752 = vrot.lane.b32.xlu1 %v1741_v39, %s9612_s27  ;;  %1754 = vrot.lane.b32.xlu0 %v1745_v26, %s9612_s27 }
 0x2ad   :  { %v10394_v29 = vpop.permute.xlu0 %1050  ;;  %v10396_v22 = vpop.permute.xlu1 %1128 }
 0x2af   :  { %1756 = vrot.lane.b32.xlu1 %v1749_v19, %s9612_s27  ;;  %1642 = vrot.lane.b32.xlu0 %v1629_v44, %s9611_s26 }
 0x2b1   :  { %v983_v21 = vpop.permute.xlu0 %982  ;;  %v1327_v46 = vpop.permute.xlu1 %1326 }
 0x2b3   :  { %1644 = vrot.lane.b32.xlu1 %v1633_v45, %s9611_s26  ;;  %1646 = vrot.lane.b32.xlu0 %v1637_v15, %s9611_s26 }
 0x2b5   :  { %v10409_v52 = vpop.permute.xlu0 %919  ;;  %v1264_v36 = vpop.permute.xlu1 %1263 }
 0x2b6   :  { %v1270_v37 = vsel %vm159_vm5, %v1264_v36, %v1266_v8 }
 0x2b7   :  { %1278 = vst [vmem:[#allocation4 + $0x60] sm:$0xf0] %v1270_v37  ;;  %1648 = vrot.lane.b32.xlu1 %v1641_v50, %s9611_s26  ;;  %2414 = vrot.lane.b32.xlu0 %v2401_v49, %s9604_s1 }
 0x2b9   :  { %v1196_v14 = vpop.permute.xlu0 %1195  ;;  %v10416_v48 = vpop.permute.xlu1 %1132 }
 0x2ba   :  { %v1139_v47 = vsel %vm296_vm1, %v10416_v48, %v1135_v33 }
 0x2bb   :  { %1147 = vst [vmem:[#allocation4 + $0x40] sm:$0xf0] %v1139_v47  ;;  %2416 = vrot.lane.b32.xlu1 %v2405_v53, %s9604_s1  ;;  %2418 = vrot.lane.b32.xlu0 %v2409_v34, %s9604_s1 }
 0x2bd   :  { %v10423_v27 = vpop.permute.xlu0 %1054  ;;  %v10425_v54 = vpop.permute.xlu1 %986 }
 0x2bf   :  { %2420 = vrot.lane.b32.xlu1 %v2413_v13, %s9604_s1 }
 0x2c1   :  { %v10428_v56 = vpop.permute.xlu0 %923  ;;  %v10430_v57 = vpop.permute.xlu1 %990 }
 0x2c5   :  { %v1325_v51 = vpop.permute.xlu0 %1324  ;;  %v10432_v58 = vpop.permute.xlu1 %855 }
 0x2c6   :  { %v1332_v59 = vsel %vm90_vm8, %v1323_v43, %v1325_v51  ;;  %v1333_v60 = vsel %vm90_vm8, %v1325_v51, %v1327_v46 }
 0x2c7   :  { %1340 = vst [vmem:[#allocation4 + $0x20] sm:$0xf] %v1332_v59  ;;  %1341 = vst [vmem:[#allocation4 + $0x48] sm:$0xf] %v1333_v60 }
 0x2c9   :  { %v1258_v31 = vpop.permute.xlu0 %1257  ;;  %v10436_v38 = vpop.permute.xlu1 %859 }
 0x2ca   :  { %v1267_v62 = vsel %vm159_vm5, %v1258_v31, %v10381_v28 }
 0x2cb   :  { %1275 = vst [vmem:[#allocation4 + $0x58] sm:$0xf0] %v1267_v62 }
 0x2cd   :  { %v985_v41 = vpop.permute.xlu0 %984  ;;  %v1194_v11 = vpop.permute.xlu1 %1193 }
 0x2ce   :  { %v992_v3 = vsel %vm253_vm6, %v983_v21, %v985_v41  ;;  %v993_v24 = vsel %vm253_vm6, %v985_v41, %v10425_v54  ;;  %v1363_v1 = vld [vmem:[#allocation4 + $0x48] sm:$0xf]  ;;  %v1362_v17 = vld [vmem:[#allocation4 + $0x20] sm:$0xf]  ;;  %v1201_v55 = vsel %vm228_vm2, %v1192_v30, %v1194_v11  ;;  %v1202_v0 = vsel %vm228_vm2, %v1194_v11, %v1196_v14 }
 0x2cf   :  { %1000 = vst [vmem:[#allocation4 + $0x30] sm:$0xf] %v992_v3  ;;  %1001 = vst [vmem:[#allocation4 + $0x68] sm:$0xf] %v993_v24  ;;  %9289 = vmatprep.subr.msk.mxu0 %vm92_vm4, %v1363_v1 }
 0x2d0   :  { %1209 = vst [vmem:[#allocation4 + $0x58] sm:$0xf] %v1201_v55  ;;  %1210 = vst [vmem:[#allocation4 + $0x10] sm:$0xf] %v1202_v0  ;;  %9290 = vmatpush1.msk.msra.mxu0 %vm92_vm4, %v1362_v17 }
 0x2d1   :  { %v10447_v18 = vpop.permute.xlu0 %853  ;;  %v1127_v8 = vpop.permute.xlu1 %1126 }
 0x2d2   :  { %v862_v23 = vsel %vm116_vm0, %v10447_v18, %v10432_v58  ;;  %v1136_v2 = vsel %vm296_vm1, %v1127_v8, %v10396_v22 }
 0x2d3   :  { %870 = vst [vmem:[#allocation4 + $0x38] sm:$0xf] %v862_v23  ;;  %1144 = vst [vmem:[#allocation4 + $0x8] sm:$0xf0] %v1136_v2 }
 0x2d5   :  { %v1329_v32 = vpop.permute.xlu0 %1328  ;;  %v1049_v33 = vpop.permute.xlu1 %1048 }
 0x2d6   :  { %v1334_v35 = vsel %vm90_vm8, %v1327_v46, %v1329_v32  ;;  %v1335_v20 = vsel %vm90_vm8, %v1329_v32, %v10375_v9  ;;  %v1058_v39 = vsel %vm322_vm7, %v1049_v33, %v10394_v29 }
 0x2d7   :  { %1342 = vst [vmem:[#allocation4 + $0x70] sm:$0xf] %v1334_v35  ;;  %1343 = vst [vmem:[#allocation4 + $0x90] sm:$0xf] %v1335_v20 }
 0x2d8   :  { %1066 = vst [vmem:[#allocation4 + $0x30] sm:$0xf0] %v1058_v39 }
 0x2d9   :  { %v1262_v26 = vpop.permute.xlu0 %1261  ;;  %v1198_v40 = vpop.permute.xlu1 %1197 }
 0x2da   :  { %v1268_v43 = vsel %vm159_vm5, %v10381_v28, %v1262_v26  ;;  %v1269_v30 = vsel %vm159_vm5, %v1262_v26, %v1264_v36  ;;  %v1203_v19 = vsel %vm228_vm2, %v1196_v14, %v1198_v40  ;;  %v1204_v44 = vsel %vm228_vm2, %v1198_v40, %v10355_v12  ;;  %v1358_v14 = vld [vmem:[#allocation4 + $0x58] sm:$0xff]  ;;  %v1354_v31 = vld [vmem:[#allocation4 + $0x8] sm:$0xff] }
 0x2db   :  { %1276 = vst [vmem:[#allocation4 + $0x10] sm:$0xf0] %v1268_v43  ;;  %1277 = vst [vmem:[#allocation4 + $0x98] sm:$0xf0] %v1269_v30 }
 0x2dc   :  { %1211 = vst [vmem:[#allocation4 + $0x98] sm:$0xf] %v1203_v19  ;;  %1212 = vst [vmem:[#allocation4 + $0x60] sm:$0xf] %v1204_v44 }
 0x2dd   :  { %v1131_v9 = vpop.permute.xlu0 %1130  ;;  %v1053_v45 = vpop.permute.xlu1 %1052 }
 0x2de   :  { %v1137_v15 = vsel %vm296_vm1, %v10396_v22, %v1131_v9  ;;  %v1138_v25 = vsel %vm296_vm1, %v1131_v9, %v10416_v48  ;;  %v1365_v28 = vld [vmem:[#allocation4 + $0x90] sm:$0xf]  ;;  %v1059_v46 = vsel %vm322_vm7, %v10394_v29, %v1053_v45  ;;  %v1060_v12 = vsel %vm322_vm7, %v1053_v45, %v10423_v27  ;;  %v1357_v48 = vld [vmem:[#allocation4 + $0x40] sm:$0xff] }
 0x2df   :  { %v1364_v21 = vld [vmem:[#allocation4 + $0x70] sm:$0xf]  ;;  %1145 = vst [vmem:[#allocation4 + $0x88] sm:$0xf0] %v1137_v15  ;;  %1146 = vst [vmem:[#allocation4 + $0x28] sm:$0xf0] %v1138_v25  ;;  %9293 = vmatprep.subr.msk.mxu1 %vm92_vm4, %v1365_v28 }
 0x2e0   :  { %1067 = vst [vmem:[#allocation4 + $0x68] sm:$0xf0] %v1059_v46  ;;  %1068 = vst [vmem:[#allocation4 + $0x78] sm:$0xf0] %v1060_v12  ;;  %9294 = vmatpush1.msk.msra.mxu1 %vm92_vm4, %v1364_v21 }
 0x2e1   :  { %v989_v22 = vpop.permute.xlu0 %988  ;;  %v1057_v50 = vpop.permute.xlu1 %1056 }
 0x2e2   :  { %v994_v49 = vsel %vm253_vm6, %v10425_v54, %v989_v22  ;;  %v995_v36 = vsel %vm253_vm6, %v989_v22, %v10430_v57  ;;  %v1359_v29 = vld [vmem:[#allocation4 + $0x10] sm:$0xff]  ;;  %v1061_v37 = vsel %vm322_vm7, %v10423_v27, %v1057_v50 }
 0x2e3   :  { %v1361_v53 = vld [vmem:[#allocation4 + $0x60] sm:$0xff]  ;;  %v1360_v34 = vld [vmem:[#allocation4 + $0x98] sm:$0xff]  ;;  %1002 = vst [vmem:[#allocation4 + $0x78] sm:$0xf] %v994_v49  ;;  %1003 = vst [vmem:[#allocation4 + $0x80] sm:$0xf] %v995_v36  ;;  %1420 = vmatprep.subr.mxu0 %v1359_v29 }
 0x2e4   :  { %1069 = vst [vmem:[#allocation4 + $0x80] sm:$0xf0] %v1061_v37  ;;  %1497 = vmatprep.subr.mxu1 %v1361_v53  ;;  %1421 = vmatpush1.msra.mxu0 %v1358_v14 }
 0x2e5   :  { %1498 = vmatpush1.msra.mxu1 %v1360_v34  ;;  %v858_v47 = vpop.permute.xlu0 %857  ;;  %v922_v13 = vpop.permute.xlu1 %921 }
 0x2e6   :  { %1499 = vmatprep.subr.mxu1 %v1357_v48  ;;  %v863_v54 = vsel %vm116_vm0, %v10432_v58, %v858_v47  ;;  %v864_v27 = vsel %vm116_vm0, %v858_v47, %v10436_v38  ;;  %v1355_v57 = vld [vmem:[#allocation4 + $0x88] sm:$0xff]  ;;  %v928_v51 = vsel %vm185_vm3, %v10409_v52, %v922_v13  ;;  %v929_v59 = vsel %vm185_vm3, %v922_v13, %v10428_v56  ;;  %v1350_v38 = vld [vmem:[#allocation4 + $0x30] sm:$0xff] }
 0x2e7   :  { %v1356_v60 = vld [vmem:[#allocation4 + $0x28] sm:$0xff]  ;;  %871 = vst [vmem:[#allocation4 + $0x50] sm:$0xf] %v863_v54  ;;  %872 = vst [vmem:[#allocation4 + $0x18] sm:$0xf] %v864_v27  ;;  %1422 = vmatprep.subr.mxu0 %v1355_v57 }
 0x2e8   :  { %936 = vst [vmem:[#allocation4 + $0x38] sm:$0xf0] %v928_v51  ;;  %937 = vst [vmem:[#allocation4 + $0x50] sm:$0xf0] %v929_v59  ;;  %1500 = vmatpush1.msra.mxu1 %v1356_v60  ;;  %1423 = vmatpush1.msra.mxu0 %v1354_v31  ;;  %v1351_v58 = vld [vmem:[#allocation4 + $0x68] sm:$0xff] }
 0x2e9   :  { %v852_v62 = vpop.permute.xlu0 %851  ;;  %1424 = vmatprep.subr.mxu0 %v1351_v58  ;;  %v926_v41 = vpop.permute.xlu1 %925 }
 0x2ea   :  { %v861_v11 = vsel %vm116_vm0, %v852_v62, %v10447_v18  ;;  %1425 = vmatpush1.msra.mxu0 %v1350_v38  ;;  %v930_v3 = vsel %vm185_vm3, %v10428_v56, %v926_v41  ;;  %v1352_v1 = vld [vmem:[#allocation4 + $0x78] sm:$0xff]  ;;  %v1344_v18 = vld [vmem:[%s14786_s5] sm:$0xff] }
 0x2eb   :  { %v1353_v24 = vld [vmem:[#allocation4 + $0x80] sm:$0xff]  ;;  %869 = vst [vmem:[#allocation4] sm:$0xf] %v861_v11  ;;  %938 = vst [vmem:[#allocation4 + $0x18] sm:$0xf0] %v930_v3 }
 0x2ec   :  { %1501 = vmatprep.subr.mxu1 %v1353_v24 }
 0x2ed   :  { %1502 = vmatpush1.msra.mxu1 %v1352_v1  ;;  %v918_v17 = vpop.permute.xlu1 %917 }
 0x2ee   :  { %v927_v55 = vsel %vm185_vm3, %v918_v17, %v10409_v52  ;;  %v1345_v52 = vld [vmem:[%s14786_s5 + $0x8] sm:$0xff] }
 0x2ef   :  { %v1347_v0 = vld [vmem:[#allocation4 + $0x38] sm:$0xff]  ;;  %935 = vst [vmem:[#allocation4] sm:$0xf0] %v927_v55  ;;  %v1348_v56 = vld [vmem:[#allocation4 + $0x50] sm:$0xff] }
 0x2f0   :  { %1426 = vmatprep.subr.mxu0 %v1347_v0 }
 0x2f2   :  { %v1349_v8 = vld [vmem:[#allocation4 + $0x18] sm:$0xff] }
 0x2f3   :  { %1503 = vmatprep.subr.mxu1 %v1349_v8 }
 0x2f4   :  { %1504 = vmatpush1.msra.mxu1 %v1348_v56 }
 0x2f5   :  { %9295 = vmatmul.mubr.msk.f32.vlgmr.msra.gmra.mxu1 %vm640_vm9, %v1344_v18 }
 0x2f6   :  { %v10499_v23 = vpop.permute.xlu0 %1375  ;;  %v1346_v2 = vld [vmem:[#allocation4] sm:$0xff]  ;;  %1543 = vmatprep.mubr.f32.mxu1 %v14793_v42 }
 0x2f7   :  { %1427 = vmatpush1.msra.mxu0 %v1346_v2 }
 0x2f8   :  { %9291 = vmatmul.mubr.msk.f32.vlgmr.msra.gmra.mxu0 %vm640_vm9, %v1344_v18 }
 0x2f9   :  { %9296 = vmatmul.mubr.msk.f32.gmra.mxu1 %vm640_vm9, %v1345_v52  ;;  %1466 = vmatprep.mubr.f32.mxu0 %v14793_v42 }
 0x2fa   :  { %v1371_v32 = vpop.permute.xlu1 %1370  ;;  %v10508_v33 = vpop.permute.xlu0 %2306 }
 0x2fc   :  { %9292 = vmatmul.mubr.msk.f32.gmra.mxu0 %vm640_vm9, %v1345_v52 }
 0x2fe   :  { %v10511_v35 = vpop.permute.xlu1 %2308  ;;  %v10513_v20 = vpop.permute.xlu0 %2310 }
 0x2ff   :  { %v10579_v56 = vsel %vm185_vm3, %v10511_v35, %v10513_v20 }
 0x302   :  { %v10515_v39 = vpop.permute.xlu1 %2312  ;;  %v10517_v26 = vpop.permute.xlu0 %2198 }
 0x303   :  { %v2326_v40 = vmul.f32 0.0, %v10515_v39 }
 0x305   :  { %2350 = vrot.lane.b32.xlu0 %v2326_v40, %s9612_s27  ;;  %2360 = vrot.lane.b32.xlu1 %v2326_v40, %s9612_s27 }
 0x306   :  { %v10522_v43 = vpop.permute.xlu1 %2200  ;;  %v10524_v30 = vpop.permute.xlu0 %2202 }
 0x30a   :  { %v10526_v19 = vpop.permute.xlu1 %2204  ;;  %v10528_v44 = vpop.permute.xlu0 %2090 }
 0x30b   :  { %v2218_v9 = vmul.f32 0.0, %v10526_v19 }
 0x30d   :  { %2242 = vrot.lane.b32.xlu0 %v2218_v9, %s9609_s23  ;;  %2252 = vrot.lane.b32.xlu1 %v2218_v9, %s9609_s23 }
 0x30e   :  { %v10533_v45 = vpop.permute.xlu1 %2092  ;;  %v10535_v15 = vpop.permute.xlu0 %2094 }
 0x312   :  { %v10537_v25 = vpop.permute.xlu1 %2096  ;;  %v10540_v21 = vpop.permute.xlu0 %1966 }
 0x313   :  { %v2110_v28 = vmul.f32 0.0, %v10537_v25  ;;  %v1982_v46 = vmul.f32 0.0, %v10540_v21 }
 0x315   :  { %2134 = vrot.lane.b32.xlu0 %v2110_v28, %s9610_s25  ;;  %2144 = vrot.lane.b32.xlu1 %v2110_v28, %s9610_s25 }
 0x316   :  { %v10547_v12 = vpop.permute.xlu0 %1970  ;;  %v1969_v1 = vpop.permute.xlu1 %1968 }
 0x319   :  { %2002 = vrot.lane.b32.xlu1 %v1982_v46, %s9608_s20  ;;  %2012 = vrot.lane.b32.xlu0 %v1982_v46, %s9608_s20 }
 0x31a   :  { %v10549_v22 = vpop.permute.xlu0 %1858  ;;  %v10581_v2 = vpop.permute.xlu1 %1972 }
 0x31b   :  { %v1874_v36 = vmul.f32 0.0, %v10549_v22 }
 0x31d   :  { %1904 = vrot.lane.b32.xlu0 %v1874_v36, %s9605_s12  ;;  %1894 = vrot.lane.b32.xlu1 %v1874_v36, %s9605_s12  ;;  %v10591_v36 = vsel %vm253_vm6, %v10522_v43, %v10524_v30 }
 0x31e   :  { %v10551_v50 = vpop.permute.xlu0 %1862  ;;  %v1861_v28 = vpop.permute.xlu1 %1860 }
 0x322   :  { %v10553_v49 = vpop.permute.xlu0 %1750 }
 0x323   :  { %v1766_v37 = vmul.f32 0.0, %v10553_v49 }
 0x325   :  { %1796 = vrot.lane.b32.xlu0 %v1766_v37, %s9606_s17  ;;  %1786 = vrot.lane.b32.xlu1 %v1766_v37, %s9606_s17 }
 0x326   :  { %v10556_v29 = vpop.permute.xlu0 %1754 }
 0x32a   :  { %v10563_v53 = vpop.permute.xlu0 %1642 }
 0x32b   :  { %v10566_v34 = vmul.f32 0.0, %v10563_v53 }
 0x32d   :  { %1688 = vrot.lane.b32.xlu0 %v10566_v34, %s9604_s1 }
 0x3b5   :  { %v1539_v14 = vpop.f32.mrf.mxu1 }
 0x3b6   :  { %v1540_v48 = vadd.f32 %v1539_v14, %v1371_v32 }
 0x3b7   :  { %v1541_v60 = vpop.f32.mrf.mxu1 }
 0x3b8   :  { %v9299_v47 = vmul.f32 -1.442695, %v1540_v48  ;;  %v1462_v13 = vpop.f32.mrf.mxu0  ;;  %v1542_v62 = vadd.f32 %v1541_v60, %v1371_v32  ;;  %v10616_v60 = vsel %vm296_vm1, %v1969_v1, %v10547_v12 }
 0x3b9   :  { %v1463_v54 = vadd.f32 %v1462_v13, %v1371_v32  ;;  %v10604_v13 = vsel %vm322_vm7, %v10533_v45, %v10535_v15 }
 0x3ba   :  { %9451 = vpow2.f32 %v9299_v47  ;;  %v1464_v27 = vpop.f32.mrf.mxu0  ;;  %v9300_v11 = vmul.f32 -1.442695, %v1542_v62  ;;  %v10597_v47 = vpop.permute.xlu1 %1864 }
 0x3bb   :  { %v9297_v57 = vmul.f32 -1.442695, %v1463_v54  ;;  %v1465_v51 = vadd.f32 %v1464_v27, %v1371_v32 }
 0x3bc   :  { %v1468_v24 = vpop.f32.mrf.mxu0 }
 0x3bd   :  { %9453 = vpow2.f32 %v9297_v57  ;;  %v9298_v59 = vmul.f32 -1.442695, %v1465_v51  ;;  %v10571_v55 = vadd.f32 %v1468_v24, %v10499_v23 }
 0x3bf   :  { %9455 = vpow2.f32 %v9298_v59  ;;  %v9301_v18 = vmul.f32 -1.442695, %v10571_v55 }
 0x3c7   :  { %v9452_v31 = vpop.eup %9451 }
 0x3c8   :  { %v1576_v58 = vadd.f32 1.0, %v9452_v31  ;;  %v1753_v31 = vpop.permute.xlu1 %1752 }
 0x3ca   :  { %v9454_v38 = vpop.eup %9453  ;;  %9457 = vrcp.f32 %v1576_v58 }
 0x3cb   :  { %v1574_v41 = vadd.f32 1.0, %v9454_v38 }
 0x3cc   :  { %v9456_v3 = vpop.eup %9455 }
 0x3cd   :  { %9459 = vrcp.f32 %v1574_v41  ;;  %v1575_v17 = vadd.f32 1.0, %v9456_v3  ;;  %v1545_v41 = vpop.f32.mrf.mxu1  ;;  %v10630_v3 = vsel %vm228_vm2, %v1861_v28, %v10551_v50 }
 0x3ce   :  { %9461 = vpow2.f32 %v9300_v11  ;;  %v10625_v11 = vsel %vm296_vm1, %v10540_v21, %v1969_v1  ;;  %v10641_v21 = vsel %vm159_vm5, %v1753_v31, %v10556_v29  ;;  %v10643_v1 = vpop.permute.xlu1 %1756 }
 0x3cf   :  { %9463 = vrcp.f32 %v1575_v17  ;;  %v10635_v17 = vadd.f32 %v1545_v41, %v10499_v23  ;;  %v1868_v41 = vsel %vm228_vm2, %v10551_v50, %v10597_v47 }
 0x3d0   :  { %9465 = vpow2.f32 %v9301_v18 }
 0x3d7   :  { %v9458_v0 = vpop.eup %9457 }
 0x3d8   :  { %v10573_v8 = vmul.f32 %v9458_v0, %v1540_v48 }
 0x3da   :  { %v2324_v52 = vmul.f32 %v10579_v56, %v10573_v8  ;;  %v9460_v32 = vpop.eup %9459  ;;  %v2216_v14 = vmul.f32 %v10591_v36, %v10573_v8  ;;  %v2108_v57 = vmul.f32 %v10604_v13, %v10573_v8 }
 0x3db   :  { %v9462_v40 = vpop.eup %9461  ;;  %v10586_v9 = vmul.f32 %v9460_v32, %v1463_v54 }
 0x3dc   :  { %2346 = vrot.lane.b32.xlu0 %v2324_v52, %s9612_s27  ;;  %v1577_v46 = vadd.f32 1.0, %v9462_v40  ;;  %v9464_v48 = vpop.eup %9463  ;;  %v1866_v52 = vsel %vm228_vm2, %v10549_v22, %v1861_v28  ;;  %v10660_v28 = vpop.permute.xlu1 %1644 }
 0x3dd   :  { %v2322_v37 = vmul.f32 %v10508_v33, %v10586_v9  ;;  %v2214_v54 = vmul.f32 %v10517_v26, %v10586_v9  ;;  %v10608_v27 = vmul.f32 %v9464_v48, %v1465_v51  ;;  %v9466_v59 = vpop.eup %9465  ;;  %v2106_v58 = vmul.f32 %v10528_v44, %v10586_v9 }
 0x3de   :  { %9467 = vrcp.f32 %v1577_v46  ;;  %v1578_v38 = vadd.f32 1.0, %v9466_v59  ;;  %v1983_v24 = vmul.f32 %v10625_v11, %v10586_v9  ;;  %v1875_v32 = vmul.f32 %v1866_v52, %v10586_v9 }
 0x3df   :  { %2342 = vrot.lane.b32.xlu1 %v2322_v37, %s9612_s27  ;;  %v1984_v51 = vmul.f32 %v10616_v60, %v10608_v27  ;;  %v1876_v0 = vmul.f32 %v10630_v3, %v10608_v27  ;;  %v9303_v46 = vmul.f32 -1.442695, %v10635_v17  ;;  %v1768_v37 = vmul.f32 %v10641_v21, %v10608_v27 }
 0x3e0   :  { %2238 = vrot.lane.b32.xlu0 %v2216_v14, %s9609_s23  ;;  %9469 = vrcp.f32 %v1578_v38  ;;  %v1758_v14 = vsel %vm159_vm5, %v10553_v49, %v1753_v31  ;;  %v10667_v48 = vsel %vm90_vm8, %v10563_v53, %v10660_v28  ;;  %v1976_v31 = vsel %vm296_vm1, %v10547_v12, %v10581_v2 }
 0x3e1   :  { %v1767_v22 = vmul.f32 %v1758_v14, %v10586_v9  ;;  %9471 = vpow2.f32 %v9303_v46  ;;  %v1659_v49 = vmul.f32 %v10667_v48, %v10586_v9  ;;  %v1985_v53 = vmul.f32 %v1976_v31, %v10573_v8 }
 0x3e3   :  { %2234 = vrot.lane.b32.xlu1 %v2214_v54, %s9609_s23  ;;  %v1470_v54 = vpop.f32.mrf.mxu0 }
 0x3e4   :  { %2130 = vrot.lane.b32.xlu0 %v2108_v57, %s9610_s25 }
 0x3e7   :  { %2126 = vrot.lane.b32.xlu1 %v2106_v58, %s9610_s25  ;;  %v10682_v58 = vadd.f32 %v1470_v54, %v10499_v23  ;;  %v10727_v54 = vsel %vm253_vm6, %v10517_v26, %v10522_v43 }
 0x3e8   :  { %2006 = vrot.lane.b32.xlu0 %v1984_v51, %s9608_s20 }
 0x3e9   :  { %v9302_v12 = vmul.f32 -1.442695, %v10682_v58 }
 0x3eb   :  { %v9468_v18 = vpop.eup %9467  ;;  %2004 = vrot.lane.b32.xlu1 %v1983_v24, %s9608_s20  ;;  %v1877_v24 = vmul.f32 %v1868_v41, %v10573_v8  ;;  %9473 = vpow2.f32 %v9302_v12 }
 0x3ec   :  { %1898 = vrot.lane.b32.xlu0 %v1876_v0, %s9605_s12  ;;  %v10650_v40 = vmul.f32 %v9468_v18, %v1542_v62 }
 0x3ed   :  { %v9470_v59 = vpop.eup %9469 }
 0x3ee   :  { %v1986_v62 = vmul.f32 %v10581_v2, %v10650_v40  ;;  %v1878_v57 = vmul.f32 %v10597_v47, %v10650_v40  ;;  %v10685_v38 = vmul.f32 %v9470_v59, %v10571_v55  ;;  %v1770_v51 = vmul.f32 %v10643_v1, %v10650_v40  ;;  %v9472_v18 = vpop.eup %9471 }
 0x3ef   :  { %1896 = vrot.lane.b32.xlu1 %v1875_v32, %s9605_s12  ;;  %v10699_v55 = vsel %vm159_vm5, %v10556_v29, %v10643_v1  ;;  %v1580_v32 = vadd.f32 1.0, %v9472_v18  ;;  %v10713_v29 = vsel %vm185_vm3, %v10508_v33, %v10511_v35 }
 0x3f0   :  { %1790 = vrot.lane.b32.xlu0 %v1768_v37, %s9606_s17  ;;  %v2327_v0 = vmul.f32 %v10508_v33, %v10685_v38  ;;  %v1769_v50 = vmul.f32 %v10699_v55, %v10573_v8  ;;  %v2219_v46 = vmul.f32 %v10517_v26, %v10685_v38  ;;  %v1547_v37 = vpop.f32.mrf.mxu1  ;;  %v2215_v33 = vmul.f32 %v10727_v54, %v10608_v27 }
 0x3f1   :  { %9475 = vrcp.f32 %v1580_v32  ;;  %v1880_v59 = vmul.f32 %v1866_v52, %v10685_v38  ;;  %v2208_v52 = vsel %vm253_vm6, %v10524_v30, %v10526_v19 }
 0x3f3   :  { %1788 = vrot.lane.b32.xlu1 %v1767_v22, %s9606_s17  ;;  %v2323_v22 = vmul.f32 %v10713_v29, %v10608_v27 }
 0x3f4   :  { %2010 = vrot.lane.b32.xlu0 %v1986_v62, %s9608_s20  ;;  %v10719_v62 = vadd.f32 %v1547_v37, %v10499_v23  ;;  %v1988_v23 = vmul.f32 %v10625_v11, %v10685_v38  ;;  %v10749_v11 = vsel %vm185_vm3, %v10513_v20, %v10515_v39  ;;  %v2217_v20 = vmul.f32 %v2208_v52, %v10650_v40 }
 0x3f6   :  { %v9304_v35 = vmul.f32 -1.442695, %v10719_v62 }
 0x3f7   :  { %1680 = vrot.lane.b32.xlu1 %v1659_v49, %s9604_s1  ;;  %v2111_v49 = vmul.f32 %v10528_v44, %v10685_v38 }
 0x3f8   :  { %1902 = vrot.lane.b32.xlu0 %v1878_v57, %s9605_s12  ;;  %v10739_v57 = vsel %vm322_vm7, %v10528_v44, %v10533_v45  ;;  %v9474_v43 = vpop.eup %9473  ;;  %9477 = vpow2.f32 %v9304_v35  ;;  %v2325_v45 = vmul.f32 %v10749_v11, %v10650_v40 }
 0x3f9   :  { %v2107_v26 = vmul.f32 %v10739_v57, %v10608_v27  ;;  %v1579_v44 = vadd.f32 1.0, %v9474_v43 }
 0x3fb   :  { %2008 = vrot.lane.b32.xlu1 %v1985_v53, %s9608_s20  ;;  %v1772_v53 = vmul.f32 %v1758_v14, %v10685_v38  ;;  %9479 = vrcp.f32 %v1579_v44  ;;  %v2100_v14 = vsel %vm322_vm7, %v10535_v15, %v10537_v25  ;;  %v10784_v25 = vpop.permute.xlu1 %1648 }
 0x3fc   :  { %1794 = vrot.lane.b32.xlu0 %v1770_v51, %s9606_s17  ;;  %v1647_v51 = vpop.permute.xlu0 %1646  ;;  %v2109_v30 = vmul.f32 %v2100_v14, %v10650_v40 }
 0x3fd   :  { %v1652_v37 = vsel %vm90_vm8, %v1647_v51, %v10784_v25 }
 0x3fe   :  { %v9476_v12 = vpop.eup %9475 }
 0x3ff   :  { %1900 = vrot.lane.b32.xlu1 %v1877_v24, %s9605_s12  ;;  %v10762_v39 = vmul.f32 %v9476_v12, %v10635_v17  ;;  %v1664_v24 = vmul.f32 %v10667_v48, %v10685_v38 }
 0x400   :  { %2352 = vrot.lane.b32.xlu0 %v2327_v0, %s9612_s27  ;;  %v10770_v0 = vpop.permute.xlu0 %2414 }
 0x401   :  { %v1990_v19 = vmul.f32 %v1976_v31, %v10762_v39  ;;  %v2329_v17 = vmul.f32 %v10579_v56, %v10762_v39  ;;  %v2221_v31 = vmul.f32 %v10591_v36, %v10762_v39  ;;  %v2113_v36 = vmul.f32 %v10604_v13, %v10762_v39 }
 0x403   :  { %1792 = vrot.lane.b32.xlu1 %v1769_v50, %s9606_s17  ;;  %v1882_v50 = vmul.f32 %v1868_v41, %v10762_v39 }
 0x404   :  { %2244 = vrot.lane.b32.xlu0 %v2219_v46, %s9609_s23  ;;  %v10780_v15 = vpop.permute.xlu0 %2418  ;;  %v1774_v46 = vmul.f32 %v10699_v55, %v10762_v39 }
 0x405   :  { %v9478_v18 = vpop.eup %9477 }
 0x406   :  { %v1581_v48 = vadd.f32 1.0, %v9478_v18 }
 0x407   :  { %2344 = vrot.lane.b32.xlu1 %v2323_v22, %s9612_s27  ;;  %v1666_v22 = vmul.f32 %v1652_v37, %v10762_v39 }
 0x408   :  { %2136 = vrot.lane.b32.xlu0 %v2111_v49, %s9610_s25  ;;  %v9480_v32 = vpop.eup %9479  ;;  %9481 = vrcp.f32 %v1581_v48  ;;  %v10790_v56 = vpop.permute.xlu0 %2350 }
 0x409   :  { %v10795_v41 = vmul.f32 %v9480_v32, %v10682_v58  ;;  %v2417_v49 = vpop.permute.xlu1 %2416 }
 0x40a   :  { %v2423_v12 = vsel %vm116_vm0, %v2417_v49, %v10780_v15 }
 0x40b   :  { %2236 = vrot.lane.b32.xlu1 %v2215_v33, %s9609_s23  ;;  %v1989_v33 = vmul.f32 %v10616_v60, %v10795_v41  ;;  %v2328_v58 = vmul.f32 %v10713_v29, %v10795_v41  ;;  %v1881_v13 = vmul.f32 %v10630_v3, %v10795_v41  ;;  %v1773_v60 = vmul.f32 %v10641_v21, %v10795_v41 }
 0x40c   :  { %2014 = vrot.lane.b32.xlu0 %v1988_v23, %s9608_s20  ;;  %v10804_v55 = vpop.permute.xlu0 %2242  ;;  %v2220_v23 = vmul.f32 %v10727_v54, %v10795_v41  ;;  %v2112_v3 = vmul.f32 %v10739_v57, %v10795_v41  ;;  %v1651_v54 = vsel %vm90_vm8, %v10660_v28, %v1647_v51 }
 0x40d   :  { %v2421_v35 = vpop.permute.xlu1 %2420 }
 0x40f   :  { %2128 = vrot.lane.b32.xlu1 %v2107_v26, %s9610_s25 }
 0x410   :  { %1906 = vrot.lane.b32.xlu0 %v1880_v59, %s9605_s12  ;;  %v10816_v26 = vpop.permute.xlu0 %2134 }
 0x411   :  { %v10822_v29 = vpop.permute.xlu1 %2360 }
 0x413   :  { %2348 = vrot.lane.b32.xlu1 %v2325_v45, %s9612_s27  ;;  %v1665_v45 = vmul.f32 %v1651_v54, %v10795_v41 }
 0x414   :  { %1798 = vrot.lane.b32.xlu0 %v1772_v53, %s9606_s17  ;;  %v10833_v44 = vpop.permute.xlu0 %2012 }
 0x415   :  { %v9482_v43 = vpop.eup %9481  ;;  %v10838_v53 = vpop.permute.xlu1 %2252 }
 0x416   :  { %v10825_v59 = vmul.f32 %v9482_v43, %v10719_v62  ;;  %v1661_v62 = vmul.f32 %v1652_v37, %v10573_v8  ;;  %v2435_v37 = vmul.f32 %v10770_v0, %v10685_v38  ;;  %v10909_v43 = vld [vmem:[%s14788_s7] sm:$0xff] }
 0x417   :  { %2240 = vrot.lane.b32.xlu1 %v2217_v20, %s9609_s23  ;;  %14864 = vst [vmem:[#allocation17_spill] sm:$0xff] %v10909_v43 }
 0x418   :  { %1690 = vrot.lane.b32.xlu0 %v1664_v24, %s9604_s1  ;;  %v2330_v21 = vmul.f32 %v10749_v11, %v10825_v59  ;;  %v2222_v57 = vmul.f32 %v2208_v52, %v10825_v59  ;;  %v10844_v28 = vpop.permute.xlu0 %1904  ;;  %v2114_v11 = vmul.f32 %v2100_v14, %v10825_v59  ;;  %v2437_v52 = vmul.f32 %v2423_v12, %v10762_v39 }
 0x419   :  { %v10848_v51 = vpop.permute.xlu1 %2144  ;;  %v1660_v24 = vmul.f32 %v1651_v54, %v10608_v27  ;;  %v2434_v14 = vmul.f32 0.0, %v2421_v35 }
 0x41b   :  { %2132 = vrot.lane.b32.xlu1 %v2109_v30, %s9610_s25 }
 0x41c   :  { %2018 = vrot.lane.b32.xlu0 %v1990_v19, %s9608_s20  ;;  %v10856_v20 = vpop.permute.xlu0 %1796  ;;  %v2422_v19 = vsel %vm116_vm0, %v10770_v0, %v2417_v49  ;;  %v2432_v49 = vmul.f32 %v2423_v12, %v10573_v8 }
 0x41d   :  { %v10860_v30 = vpop.permute.xlu1 %2002  ;;  %v2431_v48 = vmul.f32 %v2422_v19, %v10608_v27 }
 0x41f   :  { %2356 = vrot.lane.b32.xlu1 %v2329_v17, %s9612_s27 }
 0x420   :  { %1910 = vrot.lane.b32.xlu0 %v1882_v50, %s9605_s12  ;;  %v10868_v18 = vpop.permute.xlu0 %1688  ;;  %v2436_v50 = vmul.f32 %v2422_v19, %v10795_v41  ;;  %v2430_v19 = vmul.f32 %v10770_v0, %v10586_v9 }
 0x421   :  { %v10870_v17 = vpop.permute.xlu1 %1894 }
 0x423   :  { %2248 = vrot.lane.b32.xlu1 %v2221_v31, %s9609_s23 }
 0x424   :  { %1802 = vrot.lane.b32.xlu0 %v1774_v46, %s9606_s17  ;;  %v1991_v46 = vmul.f32 %v10581_v2, %v10825_v59  ;;  %v1775_v2 = vmul.f32 %v10643_v1, %v10825_v59  ;;  %v1667_v1 = vmul.f32 %v10784_v25, %v10825_v59 }
 0x425   :  { %v10877_v31 = vpop.permute.xlu1 %1786 }
 0x427   :  { %2140 = vrot.lane.b32.xlu1 %v2113_v36, %s9610_s25  ;;  %v1883_v36 = vmul.f32 %v10597_v47, %v10825_v59 }
 0x428   :  { %1694 = vrot.lane.b32.xlu0 %v1666_v22, %s9604_s1 }
 0x42b   :  { %2016 = vrot.lane.b32.xlu1 %v1989_v33, %s9608_s20 }
 0x42c   :  { %2354 = vrot.lane.b32.xlu0 %v2328_v58, %s9612_s27  ;;  %v2424_v58 = vsel %vm116_vm0, %v10780_v15, %v2421_v35 }
 0x42d   :  { %v2438_v47 = vmul.f32 %v2424_v58, %v10825_v59 }
 0x42f   :  { %1908 = vrot.lane.b32.xlu1 %v1881_v13, %s9605_s12 }
 0x430   :  { %2246 = vrot.lane.b32.xlu0 %v2220_v23, %s9609_s23 }
 0x433   :  { %1800 = vrot.lane.b32.xlu1 %v1773_v60, %s9606_s17  ;;  %v2574_v60 = vcombine.high %v10909_v43, %v10909_v43  ;;  %v2812_v43 = vrot.slane %v9314_v16, %v9683_v4 }
 0x434   :  { %2138 = vrot.lane.b32.xlu0 %v2112_v3, %s9610_s25  ;;  %v9320_v3 = vld [vmem:[%s14783_s2 + $0x20] ss:$8 sm:$0xf] }
 0x435   :  { %9313 = vmatprep.mubr.msk.f32.mxu1 %vm185_vm3, %v2574_v60  ;;  %9312 = vmatprep.mubr.msk.f32.mxu0 %vm185_vm3, %v2574_v60  ;;  %v3226_v54 = vrot.slane %v9320_v3, %v9687_v6  ;;  %v3218_v12 = vrot.slane %v9320_v3, %v9683_v4  ;;  %v9317_v60 = vld [vmem:[%s14783_s2 + $0x5] ss:$8 sm:$0xf] }
 0x437   :  { %1692 = vrot.lane.b32.xlu1 %v1665_v45, %s9604_s1  ;;  %v2433_v45 = vmul.f32 %v2424_v58, %v10650_v40 }
 0x438   :  { %2358 = vrot.lane.b32.xlu0 %v2330_v21, %s9612_s27 }
 0x43b   :  { %1684 = vrot.lane.b32.xlu1 %v1661_v62, %s9604_s1  ;;  %v2567_v62 = vld [vmem:[%s14789_s8] sm:$0xf] }
 0x43c   :  { %2250 = vrot.lane.b32.xlu0 %v2222_v57, %s9609_s23  ;;  %v9318_v57 = vld [vmem:[%s14783_s2 + $0x6] ss:$8 sm:$0xf] }
 0x43f   :  { %1678 = vrot.lane.b32.xlu1 %v10566_v34, %s9604_s1  ;;  %v1662_v34 = vmul.f32 %v10784_v25, %v10650_v40  ;;  %v3230_v25 = vrot.slane %v9320_v3, %v9689_v7 }
 0x440   :  { %2142 = vrot.lane.b32.xlu0 %v2114_v11, %s9610_s25 }
 0x443   :  { %2464 = vrot.lane.b32.xlu1 %v2437_v52, %s9611_s26  ;;  %v3222_v52 = vrot.slane %v9320_v3, %v9685_v5 }
 0x444   :  { %1682 = vrot.lane.b32.xlu0 %v1660_v24, %s9604_s1  ;;  %v3232_v24 = vcombine.low %v3226_v54, %v3230_v25 }
 0x447   :  { %2468 = vrot.lane.b32.xlu1 %v2434_v14, %s9611_s26 }
 0x448   :  { %1686 = vrot.lane.b32.xlu0 %v1662_v34, %s9604_s1  ;;  %v3099_v34 = vrot.slane %v9318_v57, %v9689_v7 }
 0x44b   :  { %2452 = vrot.lane.b32.xlu1 %v2431_v48, %s9611_s26 }
 0x44c   :  { %2462 = vrot.lane.b32.xlu0 %v2436_v50, %s9611_s26  ;;  %v9319_v50 = vld [vmem:[%s14783_s2 + $0x7] ss:$8 sm:$0xf] }
 0x44d   :  { %v3160_v0 = vrot.slane %v9319_v50, %v9687_v6  ;;  %v3164_v58 = vrot.slane %v9319_v50, %v9689_v7  ;;  %v3152_v54 = vrot.slane %v9319_v50, %v9683_v4  ;;  %v3156_v25 = vrot.slane %v9319_v50, %v9685_v5 }
 0x44e   :  { %v10880_v32 = vpop.permute.xlu0 %2346 }
 0x44f   :  { %2020 = vrot.lane.b32.xlu1 %v1991_v46, %s9608_s20 }
 0x450   :  { %2460 = vrot.lane.b32.xlu0 %v2435_v37, %s9611_s26  ;;  %v3231_v37 = vcombine.low %v3218_v12, %v3222_v52  ;;  %v9315_v52 = vld [vmem:[%s14783_s2 + $0x2] ss:$8 sm:$0xf] }
 0x451   :  { %v10890_v22 = vpop.permute.xlu1 %2342 }
 0x452   :  { %v10893_v33 = vpop.permute.xlu0 %2238 }
 0x453   :  { %1912 = vrot.lane.b32.xlu1 %v1883_v36, %s9605_s12  ;;  %v3087_v36 = vrot.slane %v9318_v57, %v9683_v4 }
 0x454   :  { %2454 = vrot.lane.b32.xlu0 %v2432_v49, %s9611_s26  ;;  %v3091_v49 = vrot.slane %v9318_v57, %v9685_v5 }
 0x455   :  { %v10901_v13 = vpop.permute.xlu1 %2234 }
 0x456   :  { %v10904_v23 = vpop.permute.xlu0 %2130  ;;  %v3100_v3 = vcombine.low %v3087_v36, %v3091_v49  ;;  %v2890_v36 = vrot.slane %v9315_v52, %v9689_v7 }
 0x457   :  { %1804 = vrot.lane.b32.xlu1 %v1775_v2, %s9606_s17 }
 0x458   :  { %2466 = vrot.lane.b32.xlu0 %v2438_v47, %s9611_s26 }
 0x459   :  { %v10917_v15 = vpop.permute.xlu1 %2126 }
 0x45a   :  { %v10921_v35 = vpop.permute.xlu0 %2006 }
 0x45b   :  { %1696 = vrot.lane.b32.xlu1 %v1667_v1, %s9604_s1 }
 0x45c   :  { %2458 = vrot.lane.b32.xlu0 %v2434_v14, %s9611_s26  ;;  %v3095_v14 = vrot.slane %v9318_v57, %v9687_v6  ;;  %v3033_v57 = vrot.slane %v9317_v60, %v9689_v7 }
 0x45d   :  { %v10931_v21 = vpop.permute.xlu1 %2004 }
 0x45e   :  { %v10939_v11 = vpop.permute.xlu0 %1898  ;;  %v3101_v2 = vcombine.low %v3095_v14, %v3099_v34  ;;  %v3165_v14 = vcombine.low %v3152_v54, %v3156_v25  ;;  %v3021_v34 = vrot.slane %v9317_v60, %v9683_v4 }
 0x45f   :  { %2456 = vrot.lane.b32.xlu1 %v2433_v45, %s9611_s26  ;;  %v3166_v45 = vcombine.low %v3160_v0, %v3164_v58 }
 0x460   :  { %2570 = vperm.xlu0 %9443, %v2567_v62   ;;  %v3029_v62 = vrot.slane %v9317_v60, %v9687_v6 }
 0x461   :  { %v10948_v48 = vpop.permute.xlu1 %1896 }
 0x462   :  { %v10953_v46 = vpop.permute.xlu0 %1790  ;;  %v3035_v50 = vcombine.low %v3029_v62, %v3033_v57  ;;  %v2742_v57 = vld [vmem:[%s14783_s2] ss:$8 sm:$0xf] }
 0x463   :  { %2450 = vrot.lane.b32.xlu1 %v2430_v19, %s9611_s26  ;;  %v3025_v19 = vrot.slane %v9317_v60, %v9685_v5  ;;  %v2878_v60 = vrot.slane %v9315_v52, %v9683_v4 }
 0x464   :  { %3235 = vrot.lane.b32.xlu0 %v3232_v24, %s9604_s1 }
 0x465   :  { %v10961_v47 = vpop.permute.xlu1 %1788  ;;  %v3034_v58 = vcombine.low %v3021_v34, %v3025_v19 }
 0x466   :  { %v10966_v1 = vpop.permute.xlu0 %2010 }
 0x467   :  { %3233 = vrot.lane.b32.xlu1 %v3231_v37, %s9604_s1  ;;  %v2886_v37 = vrot.slane %v9315_v52, %v9687_v6 }
 0x468   :  { %3104 = vrot.lane.b32.xlu0 %v3101_v2, %s9605_s12  ;;  %v9316_v2 = vld [vmem:[%s14783_s2 + $0x3] ss:$8 sm:$0xf] }
 0x469   :  { %v10974_v12 = vpop.permute.xlu1 %1680  ;;  %v2892_v54 = vcombine.low %v2886_v37, %v2890_v36  ;;  %v2951_v25 = vrot.slane %v9316_v2, %v9687_v6  ;;  %v2943_v34 = vrot.slane %v9316_v2, %v9683_v4  ;;  %v2759_v37 = vrot.slane %v2742_v57, %v9689_v7 }
 0x46a   :  { %v10979_v24 = vpop.permute.xlu0 %1902 }
 0x46b   :  { %14865 = vst [vmem:[#allocation18_spill] sm:$0xff] %v10979_v24  ;;  %3102 = vrot.lane.b32.xlu1 %v3100_v3, %s9605_s12  ;;  %v2882_v3 = vrot.slane %v9315_v52, %v9685_v5  ;;  %v2947_v52 = vrot.slane %v9316_v2, %v9685_v5 }
 0x46c   :  { %3169 = vrot.lane.b32.xlu0 %v3166_v45, %s9606_s17  ;;  %v2955_v45 = vrot.slane %v9316_v2, %v9689_v7  ;;  %v2751_v2 = vrot.slane %v2742_v57, %v9685_v5 }
 0x46d   :  { %v10987_v49 = vpop.permute.xlu1 %2008 }
 0x46e   :  { %v10992_v0 = vpop.permute.xlu0 %1794  ;;  %v2957_v19 = vcombine.low %v2951_v25, %v2955_v45  ;;  %v2824_v25 = vrot.slane %v9314_v16, %v9689_v7 }
 0x46f   :  { %14866 = vst [vmem:[#allocation19_spill] sm:$0xff] %v10992_v0  ;;  %3167 = vrot.lane.b32.xlu1 %v3165_v14, %s9606_s17  ;;  %v2891_v14 = vcombine.low %v2878_v60, %v2882_v3  ;;  %v2747_v60 = vrot.slane %v2742_v57, %v9683_v4 }
 0x470   :  { %3038 = vrot.lane.b32.xlu0 %v3035_v50, %s9608_s20  ;;  %v2755_v50 = vrot.slane %v2742_v57, %v9687_v6 }
 0x471   :  { %v11000_v62 = vpop.permute.xlu1 %1900  ;;  %v2760_v63 = vcombine.low %v2747_v60, %v2751_v2 }
 0x472   :  { %14867 = vst [vmem:[#allocation20_spill] sm:$0xff] %v11000_v62  ;;  %v2353_v42 = vpop.permute.xlu0 %2352  ;;  %v2761_v3 = vcombine.low %v2755_v50, %v2759_v37 }
 0x473   :  { %3036 = vrot.lane.b32.xlu1 %v3034_v58, %s9608_s20  ;;  %v2956_v58 = vcombine.low %v2943_v34, %v2947_v52 }
 0x474   :  { %2895 = vrot.lane.b32.xlu0 %v2892_v54, %s9609_s23  ;;  %v2820_v54 = vrot.slane %v9314_v16, %v9687_v6 }
 0x475   :  { %v11011_v36 = vpop.permute.xlu1 %1792 }
 0x476   :  { %14868 = vst [vmem:[#allocation21_spill] sm:$0xff] %v11011_v36  ;;  %v2245_v61 = vpop.permute.xlu0 %2244  ;;  %v2826_v34 = vcombine.low %v2820_v54, %v2824_v25 }
 0x477   :  { %2893 = vrot.lane.b32.xlu1 %v2891_v14, %s9609_s23  ;;  %v2816_v14 = vrot.slane %v9314_v16, %v9685_v5 }
 0x478   :  { %2960 = vrot.lane.b32.xlu0 %v2957_v19, %s9610_s25 }
 0x479   :  { %v2345_v45 = vpop.permute.xlu1 %2344  ;;  %v2825_v19 = vcombine.low %v2812_v43, %v2816_v14 }
 0x47a   :  { %v2137_v10 = vpop.permute.xlu0 %2136  ;;  %v2363_v0 = vsel %vm159_vm5, %v2345_v45, %v10880_v32  ;;  %v2362_v62 = vsel %vm159_vm5, %v10890_v22, %v2345_v45 }
 0x47b   :  { %2958 = vrot.lane.b32.xlu1 %v2956_v58, %s9610_s25 }
 0x47c   :  { %2764 = vrot.lane.b32.xlu0 %v2761_v3, %s9611_s26 }
 0x47d   :  { %v2237_v57 = vpop.permute.xlu1 %2236 }
 0x47e   :  { %v11026_v52 = vpop.permute.xlu0 %2014 }
 0x47f   :  { %2762 = vrot.lane.b32.xlu1 %v2760_v63, %s9611_s26 }
 0x480   :  { %2829 = vrot.lane.b32.xlu0 %v2826_v34, %s9612_s27 }
 0x481   :  { %v2129_v50 = vpop.permute.xlu1 %2128 }
 0x482   :  { %v11030_v37 = vpop.permute.xlu0 %1906 }
 0x483   :  { %2827 = vrot.lane.b32.xlu1 %v2825_v19, %s9612_s27 }
 0x485   :  { %v2349_v58 = vpop.permute.xlu1 %2348 }
 0x486   :  { %v11033_v60 = vpop.permute.xlu0 %1798 }
 0x489   :  { %v11035_v16 = vpop.permute.xlu1 %2240 }
 0x48a   :  { %v11037_v2 = vpop.permute.xlu0 %1690 }
 0x48d   :  { %v11039_v3 = vpop.permute.xlu1 %2132 }
 0x48e   :  { %v11041_v54 = vpop.permute.xlu0 %2018 }
 0x491   :  { %v2357_v63 = vpop.permute.xlu1 %2356 }
 0x492   :  { %v11043_v43 = vpop.permute.xlu0 %1910 }
 0x493   :  { %14869 = vst [vmem:[#allocation22_spill] sm:$0xff] %v11043_v43 }
 0x495   :  { %v2249_v25 = vpop.permute.xlu1 %2248 }
 0x496   :  { %v11045_v14 = vpop.permute.xlu0 %1802 }
 0x497   :  { %14870 = vst [vmem:[#allocation23_spill] sm:$0xff] %v11045_v14 }
 0x499   :  { %v11047_v34 = vpop.permute.xlu1 %2140 }
 0x49a   :  { %v11049_v19 = vpop.permute.xlu0 %1694 }
 0x49b   :  { %14871 = vst [vmem:[#allocation24_spill] sm:$0xff] %v11049_v19 }
 0x49d   :  { %v11051_v7 = vpop.permute.xlu1 %2016 }
 0x49e   :  { %v2355_v6 = vpop.permute.xlu0 %2354 }
 0x49f   :  { %v2367_v5 = vsel %vm159_vm5, %v2355_v6, %v2357_v63  ;;  %v2366_v4 = vsel %vm159_vm5, %v2353_v42, %v2355_v6  ;;  %v2254_v6 = vsel %vm228_vm2, %v10901_v13, %v2237_v57 }
 0x4a0   :  { %2577 = vmatprep.subr.mxu0 %v2367_v5 }
 0x4a1   :  { %v11055_v36 = vpop.permute.xlu1 %1908  ;;  %2578 = vmatpush1.msra.mxu0 %v2366_v4  ;;  %v2255_v4 = vsel %vm228_vm2, %v2237_v57, %v10893_v33  ;;  %v2365_v57 = vsel %vm159_vm5, %v2349_v58, %v10790_v56 }
 0x4a2   :  { %2579 = vmatprep.subr.mxu0 %v2363_v0  ;;  %v2247_v14 = vpop.permute.xlu0 %2246 }
 0x4a3   :  { %2580 = vmatpush1.msra.mxu0 %v2362_v62  ;;  %v2259_v19 = vsel %vm228_vm2, %v2247_v14, %v2249_v25  ;;  %v2258_v24 = vsel %vm228_vm2, %v2245_v61, %v2247_v14  ;;  %v2146_v62 = vsel %vm296_vm1, %v10917_v15, %v2129_v50 }
 0x4a4   :  { %2581 = vmatprep.subr.mxu0 %v2259_v19 }
 0x4a5   :  { %v11063_v43 = vpop.permute.xlu1 %1800  ;;  %2582 = vmatpush1.msra.mxu0 %v2258_v24  ;;  %v2147_v24 = vsel %vm296_vm1, %v2129_v50, %v10904_v23 }
 0x4a6   :  { %2583 = vmatprep.subr.mxu0 %v2255_v4  ;;  %v2139_v5 = vpop.permute.xlu0 %2138  ;;  %v2024_v4 = vsel %vm322_vm7, %v10921_v35, %v10987_v49 }
 0x4a7   :  { %2584 = vmatpush1.msra.mxu0 %v2254_v6  ;;  %v2151_v42 = vsel %vm296_vm1, %v2139_v5, %v11047_v34  ;;  %v2150_v22 = vsel %vm296_vm1, %v2137_v10, %v2139_v5  ;;  %v14872_v6 = vld [vmem:[#allocation22_spill] sm:$0xff] }
 0x4a8   :  { %2585 = vmatprep.subr.mxu0 %v2151_v42 }
 0x4a9   :  { %v11072_v61 = vpop.permute.xlu1 %1692  ;;  %2586 = vmatpush1.msra.mxu0 %v2150_v22  ;;  %v14874_v22 = vld [vmem:[#allocation20_spill] sm:$0xff] }
 0x4aa   :  { %2587 = vmatprep.subr.mxu0 %v2147_v24  ;;  %v2359_v0 = vpop.permute.xlu0 %2358 }
 0x4ab   :  { %2588 = vmatpush1.msra.mxu0 %v2146_v62  ;;  %v2369_v13 = vsel %vm159_vm5, %v2359_v0, %v10822_v29  ;;  %v2368_v45 = vsel %vm159_vm5, %v2357_v63, %v2359_v0  ;;  %v2364_v29 = vsel %vm159_vm5, %v10880_v32, %v2349_v58  ;;  %v2257_v32 = vsel %vm228_vm2, %v11035_v16, %v10804_v55  ;;  %v14875_v0 = vld [vmem:[#allocation23_spill] sm:$0xff] }
 0x4ac   :  { %2589 = vmatprep.subr.mxu0 %v10795_v41  ;;  %2648 = vmatprep.subr.mxu1 %v2369_v13  ;;  %v2027_v41 = vsel %vm322_vm7, %v11026_v52, %v11051_v7  ;;  %v2022_v58 = vsel %vm322_vm7, %v10860_v30, %v10931_v21  ;;  %v1918_v30 = vsel %vm253_vm6, %v10844_v28, %v11030_v37  ;;  %v14876_v13 = vld [vmem:[#allocation19_spill] sm:$0xff] }
 0x4ad   :  { %v11082_v10 = vpop.permute.xlu1 %1684  ;;  %2590 = vmatpush1.msra.mxu0 %v10685_v38  ;;  %2649 = vmatpush1.msra.mxu1 %v2368_v45  ;;  %v1914_v28 = vsel %vm253_vm6, %v10870_v17, %v10948_v48  ;;  %v1807_v17 = vsel %vm185_vm3, %v10961_v47, %v10953_v46  ;;  %v14877_v45 = vld [vmem:[#allocation21_spill] sm:$0xff] }
 0x4ae   :  { %2591 = vmatprep.subr.mxu0 %v10608_v27  ;;  %2650 = vmatprep.subr.mxu1 %v2365_v57  ;;  %v2251_v15 = vpop.permute.xlu0 %2250  ;;  %v2026_v27 = vsel %vm322_vm7, %v10833_v44, %v11026_v52  ;;  %v2256_v44 = vsel %vm228_vm2, %v10893_v33, %v11035_v16  ;;  %v1919_v52 = vsel %vm253_vm6, %v11030_v37, %v11055_v36 }
 0x4af   :  { %2592 = vmatpush1.msra.mxu0 %v10586_v9  ;;  %2651 = vmatpush1.msra.mxu1 %v2364_v29  ;;  %v2261_v38 = vsel %vm228_vm2, %v2251_v15, %v10838_v53  ;;  %v2260_v50 = vsel %vm228_vm2, %v2249_v25, %v2251_v15  ;;  %v2023_v9 = vsel %vm322_vm7, %v10931_v21, %v10921_v35 }
 0x4b0   :  { %2593 = vmatprep.subr.mxu0 %v2027_v41  ;;  %2652 = vmatprep.subr.mxu1 %v2261_v38  ;;  %v1915_v33 = vsel %vm253_vm6, %v10948_v48, %v10939_v11  ;;  %v2148_v37 = vsel %vm296_vm1, %v10904_v23, %v11039_v3  ;;  %v1811_v25 = vsel %vm185_vm3, %v11033_v60, %v11063_v43  ;;  %v14878_v41 = vld [vmem:[#allocation24_spill] sm:$0xff] }
 0x4b1   :  { %v1679_v56 = vpop.permute.xlu1 %1678  ;;  %2594 = vmatpush1.msra.mxu0 %v2026_v27  ;;  %2653 = vmatpush1.msra.mxu1 %v2260_v50  ;;  %v1809_v57 = vsel %vm185_vm3, %v14877_v45, %v14876_v13 }
 0x4b2   :  { %2595 = vmatprep.subr.mxu0 %v2023_v9  ;;  %2654 = vmatprep.subr.mxu1 %v2257_v32  ;;  %v2143_v53 = vpop.permute.xlu0 %2142 }
 0x4b3   :  { %2596 = vmatpush1.msra.mxu0 %v2022_v58  ;;  %2655 = vmatpush1.msra.mxu1 %v2256_v44  ;;  %v2153_v55 = vsel %vm296_vm1, %v2143_v53, %v10848_v51  ;;  %v2152_v63 = vsel %vm296_vm1, %v11047_v34, %v2143_v53  ;;  %v2149_v51 = vsel %vm296_vm1, %v11039_v3, %v10816_v26 }
 0x4b4   :  { %2597 = vmatprep.subr.mxu0 %v1919_v52  ;;  %2656 = vmatprep.subr.mxu1 %v2153_v55  ;;  %v1810_v26 = vsel %vm185_vm3, %v10856_v20, %v11033_v60  ;;  %v1703_v20 = vsel %vm116_vm0, %v11037_v2, %v11072_v61  ;;  %v2028_v34 = vsel %vm322_vm7, %v11051_v7, %v11041_v54  ;;  %v14880_v52 = vmov 0.0  }
 0x4b5   :  { %v11122_v21 = vpop.permute.xlu1 %2464  ;;  %2598 = vmatpush1.msra.mxu0 %v1918_v30  ;;  %2657 = vmatpush1.msra.mxu1 %v2152_v63  ;;  %v3212_v63 = vld [vmem:[#allocation2 + $0x14] sm:$0xf] }
 0x4b6   :  { %2599 = vmatprep.subr.mxu0 %v1915_v33  ;;  %2658 = vmatprep.subr.mxu1 %v2149_v51  ;;  %v11130_v16 = vpop.permute.xlu0 %1682  ;;  %v3081_v51 = vld [vmem:[#allocation2 + $0x14] sm:$0xf] }
 0x4b7   :  { %2600 = vmatpush1.msra.mxu0 %v1914_v28  ;;  %2659 = vmatpush1.msra.mxu1 %v2148_v37 }
 0x4b8   :  { %2601 = vmatprep.subr.mxu0 %v1811_v25  ;;  %2660 = vmatprep.subr.mxu1 %v10825_v59  ;;  %v1806_v59 = vsel %vm185_vm3, %v10877_v31, %v10961_v47  ;;  %v1698_v31 = vsel %vm116_vm0, %v1679_v56, %v10974_v12  ;;  %v1700_v56 = vsel %vm116_vm0, %v11130_v16, %v11082_v10  ;;  %v3146_v25 = vld [vmem:[#allocation2 + $0x14] sm:$0xf] }
 0x4b9   :  { %v11145_v14 = vpop.permute.xlu1 %2468  ;;  %2602 = vmatpush1.msra.mxu0 %v1810_v26  ;;  %2661 = vmatpush1.msra.mxu1 %v10762_v39  ;;  %v1702_v39 = vsel %vm116_vm0, %v10868_v18, %v11037_v2 }
 0x4ba   :  { %2603 = vmatprep.subr.mxu0 %v1807_v17  ;;  %2662 = vmatprep.subr.mxu1 %v10650_v40  ;;  %v1687_v23 = vpop.permute.xlu0 %1686  ;;  %v1699_v40 = vsel %vm116_vm0, %v10974_v12, %v11130_v16  ;;  %v2025_v12 = vsel %vm322_vm7, %v10987_v49, %v10966_v1  ;;  %v14873_v1 = vld [vmem:[#allocation18_spill] sm:$0xff]  ;;  %v1916_v49 = vsel %vm253_vm6, %v10939_v11, %v14874_v22 }
 0x4bb   :  { %2604 = vmatpush1.msra.mxu0 %v1806_v59  ;;  %2663 = vmatpush1.msra.mxu1 %v10573_v8  ;;  %v1917_v24 = vsel %vm253_vm6, %v14874_v22, %v14873_v1  ;;  %v1808_v11 = vsel %vm185_vm3, %v10953_v46, %v14877_v45  ;;  %v1701_v50 = vsel %vm116_vm0, %v11082_v10, %v1687_v23  ;;  %v14879_v10 = vld [vmem:[#allocation17_spill] sm:$0xff]  ;;  %v3015_v23 = vld [vmem:[#allocation2 + $0x14] sm:$0xf] }
 0x4bc   :  { %2605 = vmatprep.subr.mxu0 %v1703_v20  ;;  %v14887_v45 = vld [vmem:[#allocation16_spill] sm:$0xff] }
 0x4bd   :  { %v11162_v48 = vpop.permute.xlu1 %2452  ;;  %2606 = vmatpush1.msra.mxu0 %v1702_v39 }
 0x4be   :  { %2607 = vmatprep.subr.mxu0 %v1699_v40  ;;  %v2463_v8 = vpop.permute.xlu0 %2462 }
 0x4bf   :  { %2608 = vmatpush1.msra.mxu0 %v1698_v31  ;;  %v2475_v47 = vsel %vm90_vm8, %v2463_v8, %v11122_v21 }
 0x4c0   :  { %2637 = vmatprep.subr.mxu0 %v2475_v47 }
 0x4c1   :  { %v2021_v60 = vpop.permute.xlu1 %2020 }
 0x4c2   :  { %v2461_v3 = vpop.permute.xlu0 %2460  ;;  %v2029_v18 = vsel %vm322_vm7, %v11041_v54, %v2021_v60  ;;  %v1920_v54 = vsel %vm253_vm6, %v11055_v36, %v14872_v6  ;;  %v1812_v36 = vsel %vm185_vm3, %v11063_v43, %v14875_v0  ;;  %v1704_v43 = vsel %vm116_vm0, %v11072_v61, %v14878_v41 }
 0x4c3   :  { %v2474_v2 = vsel %vm90_vm8, %v2461_v3, %v2463_v8  ;;  %2664 = vmatprep.subr.mxu1 %v2029_v18  ;;  %v2720_v18 = vstv %s2719_s15  ;;  %s9348_s15 = sld [smem:[#allocation7 + $0x1]] }
 0x4c4   :  { %2638 = vmatpush2.msra.mxu0 %v2474_v2  ;;  %2665 = vmatpush1.msra.mxu1 %v2028_v34 }
 0x4c5   :  { %v1913_v19 = vpop.permute.xlu1 %1912  ;;  %2666 = vmatprep.subr.mxu1 %v2025_v12 }
 0x4c6   :  { %2667 = vmatpush1.msra.mxu1 %v2024_v4  ;;  %v2455_v5 = vpop.permute.xlu0 %2454  ;;  %v1921_v42 = vsel %vm253_vm6, %v14872_v6, %v1913_v19 }
 0x4c7   :  { %2668 = vmatprep.subr.mxu1 %v1921_v42  ;;  %v2471_v7 = vsel %vm90_vm8, %v11162_v48, %v2455_v5 }
 0x4c8   :  { %2639 = vmatprep.subr.mxu0 %v2471_v7  ;;  %2669 = vmatpush1.msra.mxu1 %v1920_v54 }
 0x4c9   :  { %v1805_v35 = vpop.permute.xlu1 %1804  ;;  %2670 = vmatprep.subr.mxu1 %v1917_v24 }
 0x4ca   :  { %2671 = vmatpush1.msra.mxu1 %v1916_v49  ;;  %v1813_v62 = vsel %vm185_vm3, %v14875_v0, %v1805_v35  ;;  %v2467_v15 = vpop.permute.xlu0 %2466  ;;  %v14881_v35 = vld [vmem:[#allocation13_spill] sm:$0xff]  ;;  %v14883_v0 = vld [vmem:[#allocation14_spill] sm:$0xff] }
 0x4cb   :  { %2672 = vmatprep.subr.mxu1 %v1813_v62  ;;  %v2477_v46 = vsel %vm90_vm8, %v2467_v15, %v11145_v14  ;;  %v2476_v32 = vsel %vm90_vm8, %v11122_v21, %v2467_v15 }
 0x4cc   :  { %2673 = vmatpush1.msra.mxu1 %v1812_v36  ;;  %v14885_v36 = vld [vmem:[#allocation15_spill] sm:$0xff] }
 0x4cd   :  { %v1697_v29 = vpop.permute.xlu1 %1696  ;;  %2674 = vmatprep.subr.mxu1 %v1809_v57 }
 0x4ce   :  { %2675 = vmatpush1.msra.mxu1 %v1808_v11  ;;  %v1705_v38 = vsel %vm116_vm0, %v14878_v41, %v1697_v29  ;;  %v2459_v9 = vpop.permute.xlu0 %2458 }
 0x4cf   :  { %2676 = vmatprep.subr.mxu1 %v1705_v38 }
 0x4d0   :  { %2677 = vmatpush1.msra.mxu1 %v1704_v43 }
 0x4d1   :  { %v2457_v27 = vpop.permute.xlu1 %2456  ;;  %2678 = vmatprep.subr.mxu1 %v1701_v50 }
 0x4d2   :  { %2679 = vmatpush1.msra.mxu1 %v1700_v56  ;;  %v2473_v61 = vsel %vm90_vm8, %v2457_v27, %v2459_v9  ;;  %v2472_v58 = vsel %vm90_vm8, %v2455_v5, %v2457_v27 }
 0x4d3   :  { %2708 = vmatprep.subr.mxu1 %v2477_v46 }
 0x4d4   :  { %2709 = vmatpush2.msra.mxu1 %v2476_v32 }
 0x4d5   :  { %v2451_v53 = vpop.permute.xlu1 %2450  ;;  %2710 = vmatprep.subr.mxu1 %v2473_v61 }
 0x4d6   :  { %v2470_v44 = vsel %vm90_vm8, %v2451_v53, %v11162_v48  ;;  %2711 = vmatpush2.msra.mxu1 %v2472_v58 }
 0x4d7   :  { %2640 = vmatpush2.msra.mxu0 %v2470_v44  ;;  %2713 = vmatmul.mubr.f32.vlgmr.msra.gmra.mxu1 %v14879_v10 }
 0x4d8   :  { %2642 = vmatmul.mubr.f32.vlgmr.msra.gmra.mxu0 %v14879_v10  ;;  %3469 = vmatprep.mubr.f32.mxu1 %v14880_v52 }
 0x4d9   :  { %3392 = vmatprep.mubr.f32.mxu0 %v14880_v52  ;;  %v3234_v31 = vpop.permute.xlu1 %3233 }
 0x4da   :  { %v3237_v15 = vrot.slane %v3234_v31, 4 }
 0x4db   :  { %v2571_v55 = vpop.permute.xlu0 %2570 }
 0x4dc   :  { %v3239_v43 = vsel %vm116_vm0, %v3237_v15, %v3234_v31 }
 0x4dd   :  { %v11253_v8 = vpop.permute.xlu1 %3102 }
 0x4de   :  { %v3106_v9 = vrot.slane %v11253_v8, 4 }
 0x4df   :  { %v11229_v30 = vpop.permute.xlu0 %3235 }
 0x4e0   :  { %v3238_v21 = vrot.slane %v11229_v30, 4  ;;  %v3108_v61 = vsel %vm253_vm6, %v3106_v9, %v11253_v8 }
 0x4e1   :  { %v11255_v47 = vpop.permute.xlu1 %3167 }
 0x4e2   :  { %v3247_v33 = vmul.f32 %v3238_v21, %v3212_v63  ;;  %v3171_v29 = vrot.slane %v11255_v47, 4 }
 0x4e3   :  { %v11234_v16 = vpop.permute.xlu0 %3104 }
 0x4e4   :  { %v3107_v28 = vrot.slane %v11234_v16, 4  ;;  %3261 = vrot.lane.b32.xlu0 %v3247_v33, %s9611_s26  ;;  %v3173_v50 = vsel %vm185_vm3, %v3171_v29, %v11255_v47 }
 0x4e5   :  { %v11257_v60 = vpop.permute.xlu1 %3036 }
 0x4e6   :  { %v3116_v37 = vmul.f32 %v3107_v28, %v3081_v51  ;;  %v3040_v10 = vrot.slane %v11257_v60, 4 }
 0x4e7   :  { %v11240_v26 = vpop.permute.xlu0 %3169 }
 0x4e8   :  { %v3172_v14 = vrot.slane %v11240_v26, 4  ;;  %3130 = vrot.lane.b32.xlu1 %v3116_v37, %s9609_s23  ;;  %v3042_v33 = vsel %vm322_vm7, %v3040_v10, %v11257_v60 }
 0x4e9   :  { %v11259_v2 = vpop.permute.xlu1 %2893 }
 0x4ea   :  { %v3181_v17 = vmul.f32 %v3172_v14, %v3146_v25  ;;  %v2897_v37 = vrot.slane %v11259_v2, 4 }
 0x4eb   :  { %v11246_v59 = vpop.permute.xlu0 %3038 }
 0x4ec   :  { %v3187_v20 = vcombine.low %v3181_v17, %v3181_v17  ;;  %v3041_v39 = vrot.slane %v11246_v59, 4  ;;  %v2899_v31 = vsel %vm228_vm2, %v2897_v37, %v11259_v2 }
 0x4ed   :  { %v11261_v24 = vpop.permute.xlu1 %2958 }
 0x4ee   :  { %v3050_v48 = vmul.f32 %v3041_v39, %v3015_v23  ;;  %3196 = vrot.lane.b32.xlu1 %v3187_v20, %s9612_s27  ;;  %v2962_v32 = vrot.slane %v11261_v24, 4  ;;  %v3240_v23 = vsel %vm92_vm4, %v3237_v15, %v3238_v21  ;;  %v3174_v21 = vsel %vm92_vm4, %v3171_v29, %v3172_v14 }
 0x4ef   :  { %v11280_v41 = vpop.permute.xlu0 %2895  ;;  %v3241_v8 = vsel %vm116_vm0, %v3240_v23, %v11229_v30  ;;  %v3043_v2 = vsel %vm92_vm4, %v3040_v10, %v3041_v39  ;;  %v3109_v14 = vsel %vm92_vm4, %v3106_v9, %v3107_v28 }
 0x4f0   :  { %v3056_v40 = vcombine.low %v3050_v48, %v3050_v48  ;;  %v2964_v63 = vsel %vm296_vm1, %v2962_v32, %v11261_v24  ;;  %v2898_v30 = vrot.slane %v11280_v41, 4  ;;  %v3044_v39 = vsel %vm322_vm7, %v3043_v2, %v11246_v59 }
 0x4f1   :  { %v11289_v27 = vpop.permute.xlu1 %2762  ;;  %v3110_v28 = vsel %vm253_vm6, %v3109_v14, %v11234_v16  ;;  %v14891_v14 = vld [vmem:[#allocation11_spill] sm:$0xff] }
 0x4f2   :  { %3065 = vrot.lane.b32.xlu1 %v3056_v40, %s9610_s25  ;;  %v2766_v16 = vrot.slane %v11289_v27, 4 }
 0x4f3   :  { %v11303_v53 = vpop.permute.xlu0 %2960 }
 0x4f5   :  { %v2828_v51 = vpop.permute.xlu1 %2827 }
 0x4f6   :  { %v2831_v48 = vrot.slane %v2828_v51, 4 }
 0x4f7   :  { %v2765_v20 = vpop.permute.xlu0 %2764 }
 0x4f8   :  { %v2833_v60 = vsel %vm159_vm5, %v2831_v48, %v2828_v51  ;;  %v2767_v24 = vrot.slane %v2765_v20, 4 }
 0x4fa   :  { %v2769_v15 = vsel %vm92_vm4, %v2766_v16, %v2767_v24 }
 0x597   :  { %v2714_v3 = vpop.f32.mrf.mxu1 }
 0x598   :  { %v2715_v34 = vadd.f32 %v2714_v3, %v2571_v55  ;;  %v2643_v12 = vpop.f32.mrf.mxu0 }
 0x599   :  { %v2644_v19 = vadd.f32 %v2643_v12, %v2571_v55  ;;  %v2716_v4 = vpop.f32.mrf.mxu1  ;;  %v3175_v12 = vsel %vm185_vm3, %v3174_v21, %v11240_v26  ;;  %v2900_v26 = vsel %vm92_vm4, %v2897_v37, %v2898_v30 }
 0x59a   :  { %v2723_v5 = vmul.f32 %v2720_v18, %v2715_v34  ;;  %v2717_v6 = vadd.f32 %v2716_v4, %v2571_v55  ;;  %v2645_v42 = vpop.f32.mrf.mxu0  ;;  %v11349_v34 = vpop.permute.xlu0 %2829 }
 0x59b   :  { %v2721_v7 = vmul.f32 %v2720_v18, %v2644_v19  ;;  %v2646_v54 = vadd.f32 %v2645_v42, %v2571_v55 }
 0x59c   :  { %v2724_v1 = vmul.f32 %v2720_v18, %v2717_v6  ;;  %v11264_v49 = vadd.f32 %v2723_v5, %v14881_v35  ;;  %v2832_v6 = vrot.slane %v11349_v34, 4 }
 0x59d   :  { %v2722_v22 = vmul.f32 %v2720_v18, %v2646_v54  ;;  %v11270_v13 = vadd.f32 %v2721_v7, %v14885_v36  ;;  %v2963_v18 = vrot.slane %v11303_v53, 4 }
 0x59e   :  { %14882 = vst [vmem:[#allocation22_spill] sm:$0xff] %v11264_v49  ;;  %v11267_v62 = vadd.f32 %v2724_v1, %v14883_v0  ;;  %v2901_v1 = vsel %vm228_vm2, %v2900_v26, %v11280_v41  ;;  %v2770_v41 = vsel %vm90_vm8, %v2769_v15, %v2765_v20  ;;  %v9342_v26 = vld [vmem:[%s14783_s2 + $0x5] ss:$8 sm:$0xf] }
 0x59f   :  { %14886 = vst [vmem:[#allocation20_spill] sm:$0xff] %v11270_v13  ;;  %v11273_v57 = vadd.f32 %v2722_v22, %v14887_v45  ;;  %v2965_v5 = vsel %vm92_vm4, %v2962_v32, %v2963_v18  ;;  %v2834_v22 = vsel %vm92_vm4, %v2831_v48, %v2832_v6  ;;  %v2768_v32 = vsel %vm90_vm8, %v2766_v16, %v11289_v27 }
 0x5a0   :  { %14884 = vst [vmem:[#allocation18_spill] sm:$0xff] %v11267_v62  ;;  %v11278_v11 = vcombine.low %v11264_v49, %v11267_v62  ;;  %v9582_v44 = vcombine.low %v11267_v62, %v11267_v62  ;;  %v2966_v59 = vsel %vm296_vm1, %v2965_v5, %v11303_v53  ;;  %v2835_v36 = vsel %vm159_vm5, %v2834_v22, %v11349_v34 }
 0x5a1   :  { %14888 = vst [vmem:[#allocation23_spill] sm:$0xff] %v11273_v57  ;;  %v2733_v38 = vcombine.low %v11270_v13, %v11273_v57  ;;  %v9581_v58 = vcombine.low %v11273_v57, %v11273_v57  ;;  %v9349_v13 = vld [vmem:[%s14783_s2 + $0x1] ss:$8 sm:$0xf] }
 0x5a2   :  { %2738 = vst [vmem:[#allocation2 + $0xc] sm:$0xff] %v11278_v11  ;;  %3011 = vst [vmem:[#allocation4 + $0x28] sm:$0xf] %v11278_v11  ;;  %v3246_v3 = vmul.f32 %v3241_v8, %v11278_v11  ;;  %v3180_v4 = vmul.f32 %v3175_v12, %v11278_v11  ;;  %v3115_v42 = vmul.f32 %v3110_v28, %v11278_v11 }
 0x5a3   :  { %2737 = vst [vmem:[#allocation2 + $0x4] sm:$0xff] %v2733_v38  ;;  %v11291_v56 = vmul.f32 %v3173_v50, %v2733_v38  ;;  %v11293_v46 = vmul.f32 %v3239_v43, %v2733_v38  ;;  %3009 = vst [vmem:[#allocation4 + $0x8] sm:$0xf] %v2733_v38  ;;  %v11310_v55 = vmul.f32 %v3108_v61, %v2733_v38 }
 0x5a4   :  { %3010 = vst [vmem:[#allocation4 + $0x88] sm:$0xf] %v9581_v58  ;;  %3012 = vst [vmem:[#allocation4 + $0x40] sm:$0xf] %v9582_v44  ;;  %v11327_v40 = vmul.f32 %v3042_v33, %v2733_v38  ;;  %v3049_v54 = vmul.f32 %v3044_v39, %v11278_v11  ;;  %v3252_v27 = vcombine.high %v3246_v3, %v3246_v3 }
 0x5a5   :  { %3190 = vrot.lane.b32.xlu0 %v11291_v56, %s9612_s27  ;;  %3253 = vrot.lane.b32.xlu1 %v11293_v46, %s9611_s26  ;;  %v3251_v38 = vcombine.high %v11293_v46, %v11293_v46  ;;  %v3185_v9 = vcombine.low %v11291_v56, %v11291_v56  ;;  %v3120_v44 = vcombine.high %v11310_v55, %v11310_v55 }
 0x5a6   :  { %v3054_v56 = vcombine.low %v11327_v40, %v11327_v40  ;;  %v3121_v33 = vcombine.high %v3115_v42, %v3115_v42  ;;  %v3055_v37 = vcombine.low %v3049_v54, %v3049_v54 }
 0x5a9   :  { %3122 = vrot.lane.b32.xlu0 %v11310_v55, %s9609_s23  ;;  %v2872_v45 = vld [vmem:[#allocation2 + $0x10] sm:$0xf]  ;;  %v3186_v55 = vcombine.low %v3180_v4, %v3180_v4 }
 0x5aa   :  { %v11319_v25 = vld [vmem:[#allocation2] sm:$0xff]  ;;  %v2871_v7 = vld [vmem:[#allocation2 + $0x8] sm:$0xff]  ;;  %v2907_v11 = vmul.f32 %v2898_v30, %v2872_v45  ;;  %v2741_v50 = vld [vmem:[#allocation2 + $0x10] sm:$0xf] }
 0x5ab   :  { %v11322_v17 = vmul.f32 %v2964_v63, %v11319_v25  ;;  %v2905_v47 = vmul.f32 %v11319_v25, %v2899_v31  ;;  %v11358_v19 = vmul.f32 %v11319_v25, %v2833_v60  ;;  %v2971_v35 = vmul.f32 %v2966_v59, %v2871_v7  ;;  %v2937_v51 = vld [vmem:[#allocation2 + $0x10] sm:$0xf]  ;;  %v14890_v30 = vld [vmem:[#allocation10_spill] sm:$0xff] }
 0x5ac   :  { %v2906_v0 = vmul.f32 %v2901_v1, %v2871_v7  ;;  %v2840_v29 = vmul.f32 %v2871_v7, %v2835_v36  ;;  %v2775_v43 = vmul.f32 %v2871_v7, %v2770_v41  ;;  %v2776_v61 = vmul.f32 %v2767_v24, %v2741_v50  ;;  %v2806_v48 = vld [vmem:[#allocation2 + $0x10] sm:$0xf]  ;;  %v11475_v24 = vpop.permute.xlu1 %3130 }
 0x5ad   :  { %2981 = vrot.lane.b32.xlu1 %v11322_v17, %s9608_s20  ;;  %3059 = vrot.lane.b32.xlu0 %v11327_v40, %s9610_s25  ;;  %v2774_v58 = vmul.f32 %v11319_v25, %v2768_v32  ;;  %v2911_v46 = vcombine.high %v2905_v47, %v2905_v47  ;;  %v2976_v63 = vcombine.low %v11322_v17, %v11322_v17  ;;  %v9321_v60 = vld [vmem:[%s14787_s6 + $0x10] sm:$0xff] }
 0x5ae   :  { %v2972_v25 = vmul.f32 %v2963_v18, %v2937_v51  ;;  %v2977_v23 = vcombine.low %v2971_v35, %v2971_v35  ;;  %v2912_v17 = vcombine.high %v2906_v0, %v2906_v0  ;;  %v2781_v40 = vcombine.high %v2775_v43, %v2775_v43  ;;  %v14889_v18 = vld [vmem:[#allocation9_spill] sm:$0xff] }
 0x5af   :  { %v2780_v10 = vcombine.high %v2774_v58, %v2774_v58  ;;  %v2841_v31 = vmul.f32 %v2832_v6, %v2806_v48  ;;  %v2846_v8 = vcombine.low %v2840_v29, %v2840_v29  ;;  %v2845_v21 = vcombine.low %v11358_v19, %v11358_v19  ;;  %v9341_v1 = vld [vmem:[%s14783_s2 + $0x3] ss:$8 sm:$0xf]  ;;  %v9340_v36 = vld [vmem:[%s14783_s2 + $0x2] ss:$8 sm:$0xf] }
 0x5b0   :  { %v2978_v20 = vcombine.low %v2972_v25, %v2972_v25  ;;  %v4009_v7 = vrot.slane %v9342_v26, %v14889_v18  ;;  %v4013_v59 = vrot.slane %v9342_v26, %v14890_v30  ;;  %v3885_v16 = vrot.slane %v9341_v1, %v14889_v18 }
 0x5b1   :  { %2913 = vrot.lane.b32.xlu1 %v2905_v47, %s9605_s12  ;;  %3257 = vrot.lane.b32.xlu0 %v3246_v3, %s9611_s26  ;;  %v2847_v53 = vcombine.low %v2841_v31, %v2841_v31  ;;  %v9322_v47 = vld [vmem:[%s14787_s6 + $0x18] sm:$0xff]  ;;  %v3777_v15 = vrot.slane %v9340_v36, %v14889_v18  ;;  %v3785_v41 = vrot.slane %v9340_v36, %v14891_v14 }
 0x5b2   :  { %v9344_v3 = vld [vmem:[%s14783_s2 + $0x7] ss:$8 sm:$0xf] }
 0x5b3   :  { %v4225_v2 = vrot.slane %v9344_v3, %v14889_v18  ;;  %v4229_v34 = vrot.slane %v9344_v3, %v14890_v30  ;;  %v4233_v12 = vrot.slane %v9344_v3, %v14891_v14 }
 0x5b5   :  { %2850 = vrot.lane.b32.xlu1 %v11358_v19, %s9606_s17  ;;  %3194 = vrot.lane.b32.xlu0 %v3180_v4, %s9612_s27  ;;  %v9343_v19 = vld [vmem:[%s14783_s2 + $0x6] ss:$8 sm:$0xf] }
 0x5b6   :  { %v14892_v4 = vld [vmem:[#allocation12_spill] sm:$0xff]  ;;  %v4117_v5 = vrot.slane %v9343_v19, %v14889_v18  ;;  %v4121_v6 = vrot.slane %v9343_v19, %v14890_v30  ;;  %v4125_v28 = vrot.slane %v9343_v19, %v14891_v14 }
 0x5b7   :  { %v4237_v39 = vrot.slane %v9344_v3, %v14892_v4  ;;  %v4021_v22 = vrot.slane %v9342_v26, %v14892_v4  ;;  %v3897_v45 = vrot.slane %v9341_v1, %v14892_v4 }
 0x5b9   :  { %3126 = vrot.lane.b32.xlu1 %v3115_v42, %s9609_s23  ;;  %3063 = vrot.lane.b32.xlu0 %v3049_v54, %s9610_s25  ;;  %v4129_v42 = vrot.slane %v9343_v19, %v14892_v4  ;;  %v4017_v54 = vrot.slane %v9342_v26, %v14891_v14 }
 0x5bd   :  { %2985 = vrot.lane.b32.xlu1 %v2971_v35, %s9608_s20  ;;  %2917 = vrot.lane.b32.xlu0 %v2906_v0, %s9605_s12  ;;  %v3889_v35 = vrot.slane %v9341_v1, %v14890_v30  ;;  %v3893_v0 = vrot.slane %v9341_v1, %v14891_v14 }
 0x5c1   :  { %2854 = vrot.lane.b32.xlu1 %v2840_v29, %s9606_s17  ;;  %2921 = vrot.lane.b32.xlu0 %v2907_v11, %s9605_s12  ;;  %v3197_v29 = vpop.permute.xlu1 %3196  ;;  %v3781_v11 = vrot.slane %v9340_v36, %v14890_v30 }
 0x5c5   :  { %3255 = vrot.lane.b32.xlu1 %v3251_v38, %s9611_s26  ;;  %2786 = vrot.lane.b32.xlu0 %v2775_v43, %s9604_s1  ;;  %v11492_v38 = vpop.permute.xlu0 %3261  ;;  %v9339_v43 = vld [vmem:[%s14783_s2 + $0x1] ss:$8 sm:$0xf]  ;;  %v3066_v50 = vpop.permute.xlu1 %3065 }
 0x5c6   :  { %v3669_v32 = vrot.slane %v9339_v43, %v14889_v18 }
 0x5c9   :  { %3188 = vrot.lane.b32.xlu1 %v3185_v9, %s9612_s27  ;;  %2790 = vrot.lane.b32.xlu0 %v2776_v61, %s9604_s1  ;;  %v3789_v9 = vrot.slane %v9340_v36, %v14892_v4 }
 0x5cd   :  { %2915 = vrot.lane.b32.xlu1 %v2911_v46, %s9605_s12  ;;  %3124 = vrot.lane.b32.xlu0 %v3120_v44, %s9609_s23  ;;  %v3677_v46 = vrot.slane %v9339_v43, %v14891_v14 }
 0x5d1   :  { %2784 = vrot.lane.b32.xlu1 %v2780_v10, %s9604_s1  ;;  %3057 = vrot.lane.b32.xlu0 %v3054_v56, %s9610_s25  ;;  %v3556_v56 = vld [vmem:[%s14783_s2] ss:$8 sm:$0xf] }
 0x5d2   :  { %v3565_v51 = vrot.slane %v3556_v56, %v14890_v30 }
 0x5d5   :  { %3259 = vrot.lane.b32.xlu1 %v3252_v27, %s9611_s26  ;;  %2979 = vrot.lane.b32.xlu0 %v2976_v63, %s9608_s20  ;;  %v3681_v27 = vrot.slane %v9339_v43, %v14892_v4  ;;  %v3561_v63 = vrot.slane %v3556_v56, %v14889_v18 }
 0x5d9   :  { %3192 = vrot.lane.b32.xlu1 %v3186_v55, %s9612_s27  ;;  %3128 = vrot.lane.b32.xlu0 %v3121_v33, %s9609_s23 }
 0x5dd   :  { %3061 = vrot.lane.b32.xlu1 %v3055_v37, %s9610_s25  ;;  %2983 = vrot.lane.b32.xlu0 %v2977_v23, %s9608_s20  ;;  %v3569_v37 = vrot.slane %v3556_v56, %v14891_v14  ;;  %v9345_v23 = vld [vmem:[%s14783_s2 + $0x20] ss:$8 sm:$0xf] }
 0x5de   :  { %v4333_v48 = vrot.slane %v9345_v23, %v14889_v18 }
 0x5e1   :  { %2919 = vrot.lane.b32.xlu1 %v2912_v17, %s9605_s12  ;;  %2987 = vrot.lane.b32.xlu0 %v2978_v20, %s9608_s20  ;;  %v3573_v20 = vrot.slane %v3556_v56, %v14892_v4 }
 0x5e5   :  { %2788 = vrot.lane.b32.xlu1 %v2781_v40, %s9604_s1  ;;  %2852 = vrot.lane.b32.xlu0 %v2846_v8, %s9606_s17 }
 0x5e9   :  { %2782 = vrot.lane.b32.xlu1 %v2774_v58, %s9604_s1  ;;  %2856 = vrot.lane.b32.xlu0 %v2847_v53, %s9606_s17  ;;  %v3673_v58 = vrot.slane %v9339_v43, %v14890_v30  ;;  %v4337_v53 = vrot.slane %v9345_v23, %v14890_v30 }
 0x5ed   :  { %3307 = vperm.xlu1 %9444, %v9322_v47   ;;  %2848 = vrot.lane.b32.xlu0 %v2845_v21, %s9606_s17  ;;  %v4341_v47 = vrot.slane %v9345_v23, %v14891_v14 }
 0x5f1   :  { %3302 = vperm.xlu0 %9443, %v9321_v60   ;;  %4238 = vrot.lane.b32.xlu1 %v4225_v2, %s9606_s17  ;;  %v4345_v2 = vrot.slane %v9345_v23, %v14892_v4 }
 0x5f5   :  { %4240 = vrot.lane.b32.xlu0 %v4229_v34, %s9606_s17  ;;  %4242 = vrot.lane.b32.xlu1 %v4233_v12, %s9606_s17 }
 0x5f9   :  { %4244 = vrot.lane.b32.xlu0 %v4237_v39, %s9606_s17  ;;  %4130 = vrot.lane.b32.xlu1 %v4117_v5, %s9605_s12 }
 0x5fd   :  { %4132 = vrot.lane.b32.xlu0 %v4121_v6, %s9605_s12  ;;  %4134 = vrot.lane.b32.xlu1 %v4125_v28, %s9605_s12 }
 0x601   :  { %4136 = vrot.lane.b32.xlu0 %v4129_v42, %s9605_s12  ;;  %4022 = vrot.lane.b32.xlu1 %v4009_v7, %s9608_s20 }
 0x605   :  { %4024 = vrot.lane.b32.xlu0 %v4013_v59, %s9608_s20  ;;  %4026 = vrot.lane.b32.xlu1 %v4017_v54, %s9608_s20 }
 0x609   :  { %4028 = vrot.lane.b32.xlu0 %v4021_v22, %s9608_s20  ;;  %3898 = vrot.lane.b32.xlu1 %v3885_v16, %s9610_s25 }
 0x60d   :  { %3900 = vrot.lane.b32.xlu0 %v3889_v35, %s9610_s25  ;;  %3902 = vrot.lane.b32.xlu1 %v3893_v0, %s9610_s25 }
 0x611   :  { %3904 = vrot.lane.b32.xlu0 %v3897_v45, %s9610_s25  ;;  %3790 = vrot.lane.b32.xlu1 %v3777_v15, %s9609_s23 }
 0x615   :  { %3792 = vrot.lane.b32.xlu0 %v3781_v11, %s9609_s23  ;;  %3794 = vrot.lane.b32.xlu1 %v3785_v41, %s9609_s23 }
 0x617   :  { %v11501_v61 = vpop.permute.xlu0 %3190  ;;  %v3254_v44 = vpop.permute.xlu1 %3253 }
 0x619   :  { %3796 = vrot.lane.b32.xlu0 %v3789_v9, %s9609_s23  ;;  %3682 = vrot.lane.b32.xlu1 %v3669_v32, %s9612_s27 }
 0x61b   :  { %v3123_v10 = vpop.permute.xlu0 %3122 }
 0x61d   :  { %3684 = vrot.lane.b32.xlu0 %v3673_v58, %s9612_s27  ;;  %3686 = vrot.lane.b32.xlu1 %v3677_v46, %s9612_s27 }
 0x61f   :  { %v11514_v55 = vpop.permute.xlu1 %2981  ;;  %v11516_v33 = vpop.permute.xlu0 %3059 }
 0x621   :  { %3688 = vrot.lane.b32.xlu0 %v3681_v27, %s9612_s27  ;;  %3574 = vrot.lane.b32.xlu1 %v3561_v63, %s9611_s26 }
 0x623   :  { %v2914_v25 = vpop.permute.xlu1 %2913  ;;  %v3258_v17 = vpop.permute.xlu0 %3257 }
 0x625   :  { %3576 = vrot.lane.b32.xlu0 %v3565_v51, %s9611_s26  ;;  %3578 = vrot.lane.b32.xlu1 %v3569_v37, %s9611_s26 }
 0x627   :  { %v11529_v40 = vpop.permute.xlu1 %2850  ;;  %v3195_v31 = vpop.permute.xlu0 %3194 }
 0x628   :  { %v3201_v8 = vsel %vm159_vm5, %v3195_v31, %v3197_v29 }
 0x629   :  { %3209 = vst [vmem:[#allocation4 + $0x60] sm:$0xf0] %v3201_v8  ;;  %3580 = vrot.lane.b32.xlu0 %v3573_v20, %s9611_s26  ;;  %4346 = vrot.lane.b32.xlu1 %v4333_v48, %s9604_s1 }
 0x62b   :  { %v3127_v21 = vpop.permute.xlu1 %3126  ;;  %v3064_v60 = vpop.permute.xlu0 %3063 }
 0x62c   :  { %v3070_v3 = vsel %vm296_vm1, %v3064_v60, %v3066_v50 }
 0x62d   :  { %3078 = vst [vmem:[#allocation4 + $0x40] sm:$0xf0] %v3070_v3  ;;  %4348 = vrot.lane.b32.xlu0 %v4337_v53, %s9604_s1  ;;  %4350 = vrot.lane.b32.xlu1 %v4341_v47, %s9604_s1 }
 0x62f   :  { %v11540_v34 = vpop.permute.xlu1 %2985  ;;  %v11542_v12 = vpop.permute.xlu0 %2917 }
 0x631   :  { %4352 = vrot.lane.b32.xlu0 %v4345_v2, %s9604_s1 }
 0x633   :  { %v11545_v19 = vpop.permute.xlu1 %2854  ;;  %v11547_v39 = vpop.permute.xlu0 %2921 }
 0x634   :  { %v3288_v3 = vld [vmem:[#allocation4 + $0x40] sm:$0xff] }
 0x637   :  { %v3256_v5 = vpop.permute.xlu1 %3255  ;;  %v11551_v26 = vpop.permute.xlu0 %2786 }
 0x638   :  { %v3263_v6 = vsel %vm90_vm8, %v3254_v44, %v3256_v5  ;;  %v3264_v28 = vsel %vm90_vm8, %v3256_v5, %v3258_v17 }
 0x639   :  { %3271 = vst [vmem:[#allocation4 + $0x20] sm:$0xf] %v3263_v6  ;;  %3272 = vst [vmem:[#allocation4 + $0x48] sm:$0xf] %v3264_v28 }
 0x63b   :  { %v3189_v42 = vpop.permute.xlu1 %3188  ;;  %v11555_v59 = vpop.permute.xlu0 %2790 }
 0x63c   :  { %v3198_v7 = vsel %vm159_vm5, %v3189_v42, %v11501_v61 }
 0x63d   :  { %3206 = vst [vmem:[#allocation4 + $0x58] sm:$0xf0] %v3198_v7 }
 0x63f   :  { %v2916_v54 = vpop.permute.xlu1 %2915  ;;  %v3125_v0 = vpop.permute.xlu0 %3124 }
 0x640   :  { %v2923_v1 = vsel %vm253_vm6, %v2914_v25, %v2916_v54  ;;  %v2924_v22 = vsel %vm253_vm6, %v2916_v54, %v11542_v12  ;;  %v3294_v16 = vld [vmem:[#allocation4 + $0x48] sm:$0xf]  ;;  %v3293_v35 = vld [vmem:[#allocation4 + $0x20] sm:$0xf]  ;;  %v3132_v36 = vsel %vm228_vm2, %v3123_v10, %v3125_v0  ;;  %v3133_v45 = vsel %vm228_vm2, %v3125_v0, %v3127_v21 }
 0x641   :  { %2931 = vst [vmem:[#allocation4 + $0x30] sm:$0xf] %v2923_v1  ;;  %2932 = vst [vmem:[#allocation4 + $0x68] sm:$0xf] %v2924_v22  ;;  %9323 = vmatprep.subr.msk.mxu0 %vm92_vm4, %v3294_v16 }
 0x642   :  { %9324 = vmatpush1.msk.msra.mxu0 %vm92_vm4, %v3293_v35  ;;  %3140 = vst [vmem:[#allocation4 + $0x58] sm:$0xf] %v3132_v36  ;;  %3141 = vst [vmem:[#allocation4 + $0x10] sm:$0xf] %v3133_v45 }
 0x643   :  { %v11564_v15 = vpop.permute.xlu1 %2784  ;;  %v3058_v11 = vpop.permute.xlu0 %3057 }
 0x644   :  { %v2793_v29 = vsel %vm116_vm0, %v11564_v15, %v11551_v26  ;;  %v3067_v41 = vsel %vm296_vm1, %v3058_v11, %v11516_v33 }
 0x645   :  { %2801 = vst [vmem:[#allocation4 + $0x38] sm:$0xf] %v2793_v29  ;;  %3075 = vst [vmem:[#allocation4 + $0x8] sm:$0xf0] %v3067_v41 }
 0x647   :  { %v3260_v43 = vpop.permute.xlu1 %3259  ;;  %v2980_v32 = vpop.permute.xlu0 %2979 }
 0x648   :  { %v3265_v50 = vsel %vm90_vm8, %v3258_v17, %v3260_v43  ;;  %v3266_v9 = vsel %vm90_vm8, %v3260_v43, %v11492_v38  ;;  %v2989_v58 = vsel %vm322_vm7, %v2980_v32, %v11514_v55 }
 0x649   :  { %3273 = vst [vmem:[#allocation4 + $0x70] sm:$0xf] %v3265_v50  ;;  %3274 = vst [vmem:[#allocation4 + $0x90] sm:$0xf] %v3266_v9 }
 0x64a   :  { %2997 = vst [vmem:[#allocation4 + $0x30] sm:$0xf0] %v2989_v58 }
 0x64b   :  { %v3193_v46 = vpop.permute.xlu1 %3192  ;;  %v3129_v56 = vpop.permute.xlu0 %3128 }
 0x64c   :  { %v3199_v44 = vsel %vm159_vm5, %v11501_v61, %v3193_v46  ;;  %v3200_v10 = vsel %vm159_vm5, %v3193_v46, %v3195_v31  ;;  %v3134_v27 = vsel %vm228_vm2, %v3127_v21, %v3129_v56  ;;  %v3135_v38 = vsel %vm228_vm2, %v3129_v56, %v11475_v24 }
 0x64d   :  { %3207 = vst [vmem:[#allocation4 + $0x10] sm:$0xf0] %v3199_v44  ;;  %3208 = vst [vmem:[#allocation4 + $0x98] sm:$0xf0] %v3200_v10 }
 0x64e   :  { %3142 = vst [vmem:[#allocation4 + $0x98] sm:$0xf] %v3134_v27  ;;  %3143 = vst [vmem:[#allocation4 + $0x60] sm:$0xf] %v3135_v38 }
 0x64f   :  { %v3062_v63 = vpop.permute.xlu1 %3061  ;;  %v2984_v23 = vpop.permute.xlu0 %2983 }
 0x650   :  { %v3068_v51 = vsel %vm296_vm1, %v11516_v33, %v3062_v63  ;;  %v3069_v37 = vsel %vm296_vm1, %v3062_v63, %v3064_v60  ;;  %v3296_v25 = vld [vmem:[#allocation4 + $0x90] sm:$0xf]  ;;  %v2990_v17 = vsel %vm322_vm7, %v11514_v55, %v2984_v23  ;;  %v2991_v24 = vsel %vm322_vm7, %v2984_v23, %v11540_v34  ;;  %v3289_v55 = vld [vmem:[#allocation4 + $0x58] sm:$0xff] }
 0x651   :  { %v3295_v61 = vld [vmem:[#allocation4 + $0x70] sm:$0xf]  ;;  %3076 = vst [vmem:[#allocation4 + $0x88] sm:$0xf0] %v3068_v51  ;;  %3077 = vst [vmem:[#allocation4 + $0x28] sm:$0xf0] %v3069_v37  ;;  %9327 = vmatprep.subr.msk.mxu1 %vm92_vm4, %v3296_v25 }
 0x652   :  { %9328 = vmatpush1.msk.msra.mxu1 %vm92_vm4, %v3295_v61  ;;  %2998 = vst [vmem:[#allocation4 + $0x68] sm:$0xf0] %v2990_v17  ;;  %2999 = vst [vmem:[#allocation4 + $0x78] sm:$0xf0] %v2991_v24 }
 0x653   :  { %v2920_v33 = vpop.permute.xlu1 %2919  ;;  %v2988_v8 = vpop.permute.xlu0 %2987 }
 0x654   :  { %v2925_v20 = vsel %vm253_vm6, %v11542_v12, %v2920_v33  ;;  %v2926_v48 = vsel %vm253_vm6, %v2920_v33, %v11547_v39  ;;  %v3290_v31 = vld [vmem:[#allocation4 + $0x10] sm:$0xff]  ;;  %v2992_v53 = vsel %vm322_vm7, %v11540_v34, %v2988_v8  ;;  %v3285_v34 = vld [vmem:[#allocation4 + $0x8] sm:$0xff] }
 0x655   :  { %2933 = vst [vmem:[#allocation4 + $0x78] sm:$0xf] %v2925_v20  ;;  %2934 = vst [vmem:[#allocation4 + $0x80] sm:$0xf] %v2926_v48  ;;  %3352 = vmatprep.subr.mxu0 %v3290_v31  ;;  %v3292_v47 = vld [vmem:[#allocation4 + $0x60] sm:$0xff]  ;;  %v3291_v21 = vld [vmem:[#allocation4 + $0x98] sm:$0xff] }
 0x656   :  { %3353 = vmatpush1.msra.mxu0 %v3289_v55  ;;  %3000 = vst [vmem:[#allocation4 + $0x80] sm:$0xf0] %v2992_v53  ;;  %3429 = vmatprep.subr.mxu1 %v3292_v47 }
 0x657   :  { %v2789_v60 = vpop.permute.xlu1 %2788  ;;  %3430 = vmatpush1.msra.mxu1 %v3291_v21  ;;  %v2853_v5 = vpop.permute.xlu0 %2852 }
 0x658   :  { %v2794_v2 = vsel %vm116_vm0, %v11551_v26, %v2789_v60  ;;  %v2795_v12 = vsel %vm116_vm0, %v2789_v60, %v11555_v59  ;;  %v3286_v39 = vld [vmem:[#allocation4 + $0x88] sm:$0xff]  ;;  %3431 = vmatprep.subr.mxu1 %v3288_v3  ;;  %v2859_v28 = vsel %vm185_vm3, %v11529_v40, %v2853_v5  ;;  %v2860_v42 = vsel %vm185_vm3, %v2853_v5, %v11545_v19  ;;  %v3281_v59 = vld [vmem:[#allocation4 + $0x30] sm:$0xff] }
 0x659   :  { %v3287_v6 = vld [vmem:[#allocation4 + $0x28] sm:$0xff]  ;;  %2802 = vst [vmem:[#allocation4 + $0x50] sm:$0xf] %v2794_v2  ;;  %2803 = vst [vmem:[#allocation4 + $0x18] sm:$0xf] %v2795_v12  ;;  %3354 = vmatprep.subr.mxu0 %v3286_v39 }
 0x65a   :  { %3432 = vmatpush1.msra.mxu1 %v3287_v6  ;;  %3355 = vmatpush1.msra.mxu0 %v3285_v34  ;;  %2867 = vst [vmem:[#allocation4 + $0x38] sm:$0xf0] %v2859_v28  ;;  %2868 = vst [vmem:[#allocation4 + $0x50] sm:$0xf0] %v2860_v42  ;;  %v3282_v26 = vld [vmem:[#allocation4 + $0x68] sm:$0xff] }
 0x65b   :  { %v2783_v7 = vpop.permute.xlu1 %2782  ;;  %3356 = vmatprep.subr.mxu0 %v3282_v26  ;;  %v2857_v1 = vpop.permute.xlu0 %2856 }
 0x65c   :  { %v2792_v54 = vsel %vm116_vm0, %v2783_v7, %v11564_v15  ;;  %3357 = vmatpush1.msra.mxu0 %v3281_v59  ;;  %v3283_v22 = vld [vmem:[#allocation4 + $0x78] sm:$0xff]  ;;  %v2861_v16 = vsel %vm185_vm3, %v11545_v19, %v2857_v1  ;;  %v3275_v15 = vld [vmem:[%s14786_s5] sm:$0xff] }
 0x65d   :  { %2800 = vst [vmem:[#allocation4] sm:$0xf] %v2792_v54  ;;  %v3284_v35 = vld [vmem:[#allocation4 + $0x80] sm:$0xff]  ;;  %2869 = vst [vmem:[#allocation4 + $0x18] sm:$0xf0] %v2861_v16 }
 0x65e   :  { %3433 = vmatprep.subr.mxu1 %v3284_v35 }
 0x65f   :  { %3434 = vmatpush1.msra.mxu1 %v3283_v22  ;;  %v2849_v0 = vpop.permute.xlu0 %2848 }
 0x660   :  { %v2858_v36 = vsel %vm185_vm3, %v2849_v0, %v11529_v40  ;;  %v3276_v40 = vld [vmem:[%s14786_s5 + $0x8] sm:$0xff] }
 0x661   :  { %v3278_v45 = vld [vmem:[#allocation4 + $0x38] sm:$0xff]  ;;  %2866 = vst [vmem:[#allocation4] sm:$0xf0] %v2858_v36  ;;  %v3279_v11 = vld [vmem:[#allocation4 + $0x50] sm:$0xff] }
 0x662   :  { %3358 = vmatprep.subr.mxu0 %v3278_v45 }
 0x664   :  { %v3280_v29 = vld [vmem:[#allocation4 + $0x18] sm:$0xff] }
 0x665   :  { %3435 = vmatprep.subr.mxu1 %v3280_v29 }
 0x666   :  { %3436 = vmatpush1.msra.mxu1 %v3279_v11 }
 0x667   :  { %9329 = vmatmul.mubr.msk.f32.vlgmr.msra.gmra.mxu1 %vm640_vm9, %v3275_v15 }
 0x668   :  { %v11614_v19 = vpop.permute.xlu1 %3307  ;;  %v3277_v41 = vld [vmem:[#allocation4] sm:$0xff]  ;;  %3475 = vmatprep.mubr.f32.mxu1 %v14880_v52 }
 0x669   :  { %3359 = vmatpush1.msra.mxu0 %v3277_v41 }
 0x66a   :  { %9325 = vmatmul.mubr.msk.f32.vlgmr.msra.gmra.mxu0 %vm640_vm9, %v3275_v15 }
 0x66b   :  { %9330 = vmatmul.mubr.msk.f32.gmra.mxu1 %vm640_vm9, %v3276_v40  ;;  %3398 = vmatprep.mubr.f32.mxu0 %v14880_v52 }
 0x66c   :  { %v11624_v43 = vpop.permute.xlu1 %4238  ;;  %v3303_v50 = vpop.permute.xlu0 %3302 }
 0x66e   :  { %9326 = vmatmul.mubr.msk.f32.gmra.mxu0 %vm640_vm9, %v3276_v40 }
 0x670   :  { %v11627_v9 = vpop.permute.xlu1 %4242  ;;  %v11629_v32 = vpop.permute.xlu0 %4240 }
 0x671   :  { %v11695_v11 = vsel %vm185_vm3, %v11629_v32, %v11627_v9 }
 0x674   :  { %v11631_v58 = vpop.permute.xlu1 %4130  ;;  %v11633_v46 = vpop.permute.xlu0 %4244 }
 0x675   :  { %v4258_v44 = vmul.f32 0.0, %v11633_v46 }
 0x677   :  { %4282 = vrot.lane.b32.xlu1 %v4258_v44, %s9612_s27  ;;  %4292 = vrot.lane.b32.xlu0 %v4258_v44, %s9612_s27 }
 0x678   :  { %v11636_v10 = vpop.permute.xlu1 %4134  ;;  %v11640_v56 = vpop.permute.xlu0 %4132 }
 0x67c   :  { %v11642_v27 = vpop.permute.xlu1 %4022  ;;  %v11644_v38 = vpop.permute.xlu0 %4136 }
 0x67d   :  { %v4150_v63 = vmul.f32 0.0, %v11644_v38 }
 0x67f   :  { %4174 = vrot.lane.b32.xlu1 %v4150_v63, %s9609_s23  ;;  %4184 = vrot.lane.b32.xlu0 %v4150_v63, %s9609_s23 }
 0x680   :  { %v11649_v51 = vpop.permute.xlu0 %4024  ;;  %v11651_v37 = vpop.permute.xlu1 %4026 }
 0x684   :  { %v11653_v25 = vpop.permute.xlu0 %4028  ;;  %v11656_v23 = vpop.permute.xlu1 %3898 }
 0x685   :  { %v4042_v61 = vmul.f32 0.0, %v11653_v25  ;;  %v3914_v17 = vmul.f32 0.0, %v11656_v23 }
 0x687   :  { %4066 = vrot.lane.b32.xlu1 %v4042_v61, %s9610_s25  ;;  %4076 = vrot.lane.b32.xlu0 %v4042_v61, %s9610_s25 }
 0x688   :  { %v11663_v24 = vpop.permute.xlu1 %3902  ;;  %v3901_v35 = vpop.permute.xlu0 %3900 }
 0x68b   :  { %3944 = vrot.lane.b32.xlu1 %v3914_v17, %s9608_s20  ;;  %3934 = vrot.lane.b32.xlu0 %v3914_v17, %s9608_s20 }
 0x68c   :  { %v11665_v33 = vpop.permute.xlu1 %3790  ;;  %v11697_v41 = vpop.permute.xlu0 %3904 }
 0x68d   :  { %v3806_v31 = vmul.f32 0.0, %v11665_v33 }
 0x68f   :  { %3836 = vrot.lane.b32.xlu1 %v3806_v31, %s9605_s12  ;;  %3826 = vrot.lane.b32.xlu0 %v3806_v31, %s9605_s12  ;;  %v11707_v31 = vsel %vm253_vm6, %v11640_v56, %v11636_v10 }
 0x690   :  { %v11667_v20 = vpop.permute.xlu1 %3794  ;;  %v3793_v61 = vpop.permute.xlu0 %3792 }
 0x694   :  { %v11669_v48 = vpop.permute.xlu1 %3682 }
 0x695   :  { %v3698_v55 = vmul.f32 0.0, %v11669_v48 }
 0x697   :  { %3728 = vrot.lane.b32.xlu1 %v3698_v55, %s9606_s17  ;;  %3718 = vrot.lane.b32.xlu0 %v3698_v55, %s9606_s17 }
 0x698   :  { %v11672_v8 = vpop.permute.xlu1 %3686 }
 0x69c   :  { %v11679_v53 = vpop.permute.xlu1 %3574 }
 0x69d   :  { %v11682_v47 = vmul.f32 0.0, %v11679_v53 }
 0x69f   :  { %3620 = vrot.lane.b32.xlu1 %v11682_v47, %s9604_s1 }
 0x727   :  { %v3471_v21 = vpop.f32.mrf.mxu1 }
 0x728   :  { %v3472_v60 = vadd.f32 %v3471_v21, %v3303_v50 }
 0x729   :  { %v3473_v28 = vpop.f32.mrf.mxu1 }
 0x72a   :  { %v9333_v3 = vmul.f32 -1.442695, %v3472_v60  ;;  %v3394_v2 = vpop.f32.mrf.mxu0  ;;  %v3474_v7 = vadd.f32 %v3473_v28, %v3303_v50  ;;  %v11732_v28 = vsel %vm296_vm1, %v3901_v35, %v11663_v24 }
 0x72b   :  { %v3395_v12 = vadd.f32 %v3394_v2, %v3303_v50  ;;  %v11720_v2 = vsel %vm322_vm7, %v11649_v51, %v11651_v37 }
 0x72c   :  { %9483 = vpow2.f32 %v9333_v3  ;;  %v3396_v39 = vpop.f32.mrf.mxu0  ;;  %v9334_v1 = vmul.f32 -1.442695, %v3474_v7  ;;  %v11713_v3 = vpop.permute.xlu0 %3796 }
 0x72d   :  { %v9331_v5 = vmul.f32 -1.442695, %v3395_v12  ;;  %v3397_v6 = vadd.f32 %v3396_v39, %v3303_v50 }
 0x72e   :  { %v3400_v16 = vpop.f32.mrf.mxu0 }
 0x72f   :  { %9485 = vpow2.f32 %v9331_v5  ;;  %v9332_v34 = vmul.f32 -1.442695, %v3397_v6  ;;  %v11687_v36 = vadd.f32 %v3400_v16, %v11614_v19 }
 0x731   :  { %9487 = vpow2.f32 %v9332_v34  ;;  %v9335_v15 = vmul.f32 -1.442695, %v11687_v36 }
 0x739   :  { %v9484_v42 = vpop.eup %9483 }
 0x73a   :  { %v3508_v26 = vadd.f32 1.0, %v9484_v42  ;;  %v3685_v42 = vpop.permute.xlu0 %3684 }
 0x73c   :  { %v9486_v59 = vpop.eup %9485  ;;  %9489 = vrcp.f32 %v3508_v26 }
 0x73d   :  { %v3506_v54 = vadd.f32 1.0, %v9486_v59 }
 0x73e   :  { %v9488_v22 = vpop.eup %9487 }
 0x73f   :  { %9491 = vrcp.f32 %v3506_v54  ;;  %v3507_v0 = vadd.f32 1.0, %v9488_v22  ;;  %v3477_v54 = vpop.f32.mrf.mxu1  ;;  %v11746_v22 = vsel %vm228_vm2, %v3793_v61, %v11667_v20 }
 0x740   :  { %9493 = vpow2.f32 %v9334_v1  ;;  %v11741_v1 = vsel %vm296_vm1, %v11656_v23, %v3901_v35  ;;  %v11757_v23 = vsel %vm159_vm5, %v3685_v42, %v11672_v8  ;;  %v11759_v35 = vpop.permute.xlu0 %3688 }
 0x741   :  { %9495 = vrcp.f32 %v3507_v0  ;;  %v11751_v0 = vadd.f32 %v3477_v54, %v11614_v19  ;;  %v3800_v54 = vsel %vm228_vm2, %v11667_v20, %v11713_v3 }
 0x742   :  { %9497 = vpow2.f32 %v9335_v15 }
 0x749   :  { %v9490_v45 = vpop.eup %9489 }
 0x74a   :  { %v11689_v29 = vmul.f32 %v9490_v45, %v3472_v60 }
 0x74c   :  { %v4256_v40 = vmul.f32 %v11695_v11, %v11689_v29  ;;  %v9492_v50 = vpop.eup %9491  ;;  %v4148_v21 = vmul.f32 %v11707_v31, %v11689_v29  ;;  %v4040_v5 = vmul.f32 %v11720_v2, %v11689_v29 }
 0x74d   :  { %v9494_v44 = vpop.eup %9493  ;;  %v11702_v63 = vmul.f32 %v9492_v50, %v3395_v12 }
 0x74e   :  { %4278 = vrot.lane.b32.xlu1 %v4256_v40, %s9612_s27  ;;  %v3509_v17 = vadd.f32 1.0, %v9494_v44  ;;  %v9496_v60 = vpop.eup %9495  ;;  %v3798_v40 = vsel %vm228_vm2, %v11665_v33, %v3793_v61  ;;  %v11776_v61 = vpop.permute.xlu0 %3576 }
 0x74f   :  { %v4254_v55 = vmul.f32 %v11624_v43, %v11702_v63  ;;  %v4146_v12 = vmul.f32 %v11631_v58, %v11702_v63  ;;  %v11724_v39 = vmul.f32 %v9496_v60, %v3397_v6  ;;  %v9498_v34 = vpop.eup %9497  ;;  %v4038_v26 = vmul.f32 %v11642_v27, %v11702_v63 }
 0x750   :  { %9499 = vrcp.f32 %v3509_v17  ;;  %v3510_v59 = vadd.f32 1.0, %v9498_v34  ;;  %v3915_v16 = vmul.f32 %v11741_v1, %v11702_v63  ;;  %v3807_v50 = vmul.f32 %v3798_v40, %v11702_v63 }
 0x751   :  { %4274 = vrot.lane.b32.xlu0 %v4254_v55, %s9612_s27  ;;  %v3916_v6 = vmul.f32 %v11732_v28, %v11724_v39  ;;  %v3808_v45 = vmul.f32 %v11746_v22, %v11724_v39  ;;  %v9337_v17 = vmul.f32 -1.442695, %v11751_v0  ;;  %v3700_v55 = vmul.f32 %v11757_v23, %v11724_v39 }
 0x752   :  { %4170 = vrot.lane.b32.xlu1 %v4148_v21, %s9609_s23  ;;  %9501 = vrcp.f32 %v3510_v59  ;;  %v3690_v21 = vsel %vm159_vm5, %v11669_v48, %v3685_v42  ;;  %v11783_v60 = vsel %vm90_vm8, %v11679_v53, %v11776_v61  ;;  %v3908_v42 = vsel %vm296_vm1, %v11663_v24, %v11697_v41 }
 0x753   :  { %v3699_v33 = vmul.f32 %v3690_v21, %v11702_v63  ;;  %9503 = vpow2.f32 %v9337_v17  ;;  %v3591_v48 = vmul.f32 %v11783_v60, %v11702_v63  ;;  %v3917_v53 = vmul.f32 %v3908_v42, %v11689_v29 }
 0x755   :  { %4166 = vrot.lane.b32.xlu0 %v4146_v12, %s9609_s23  ;;  %v3402_v12 = vpop.f32.mrf.mxu0 }
 0x756   :  { %4062 = vrot.lane.b32.xlu1 %v4040_v5, %s9610_s25 }
 0x759   :  { %4058 = vrot.lane.b32.xlu0 %v4038_v26, %s9610_s25  ;;  %v11798_v26 = vadd.f32 %v3402_v12, %v11614_v19  ;;  %v11843_v12 = vsel %vm253_vm6, %v11631_v58, %v11640_v56 }
 0x75a   :  { %3938 = vrot.lane.b32.xlu1 %v3916_v6, %s9608_s20 }
 0x75b   :  { %v9336_v24 = vmul.f32 -1.442695, %v11798_v26 }
 0x75d   :  { %v9500_v15 = vpop.eup %9499  ;;  %3936 = vrot.lane.b32.xlu0 %v3915_v16, %s9608_s20  ;;  %v3809_v16 = vmul.f32 %v3800_v54, %v11689_v29  ;;  %9505 = vpow2.f32 %v9336_v24 }
 0x75e   :  { %3830 = vrot.lane.b32.xlu1 %v3808_v45, %s9605_s12  ;;  %v11766_v44 = vmul.f32 %v9500_v15, %v3474_v7 }
 0x75f   :  { %v9502_v34 = vpop.eup %9501 }
 0x760   :  { %v3918_v7 = vmul.f32 %v11697_v41, %v11766_v44  ;;  %v3810_v5 = vmul.f32 %v11713_v3, %v11766_v44  ;;  %v11801_v59 = vmul.f32 %v9502_v34, %v11687_v36  ;;  %v3702_v6 = vmul.f32 %v11759_v35, %v11766_v44  ;;  %v9504_v15 = vpop.eup %9503 }
 0x761   :  { %3828 = vrot.lane.b32.xlu0 %v3807_v50, %s9605_s12  ;;  %v11815_v36 = vsel %vm159_vm5, %v11672_v8, %v11759_v35  ;;  %v3512_v50 = vadd.f32 1.0, %v9504_v15  ;;  %v11829_v8 = vsel %vm185_vm3, %v11624_v43, %v11629_v32 }
 0x762   :  { %3722 = vrot.lane.b32.xlu1 %v3700_v55, %s9606_s17  ;;  %v4259_v45 = vmul.f32 %v11624_v43, %v11801_v59  ;;  %v3701_v20 = vmul.f32 %v11815_v36, %v11689_v29  ;;  %v4151_v17 = vmul.f32 %v11631_v58, %v11801_v59  ;;  %v3479_v55 = vpop.f32.mrf.mxu1  ;;  %v4147_v43 = vmul.f32 %v11843_v12, %v11724_v39 }
 0x763   :  { %9507 = vrcp.f32 %v3512_v50  ;;  %v3812_v34 = vmul.f32 %v3798_v40, %v11801_v59  ;;  %v4140_v40 = vsel %vm253_vm6, %v11636_v10, %v11644_v38 }
 0x765   :  { %3720 = vrot.lane.b32.xlu0 %v3699_v33, %s9606_s17  ;;  %v4255_v33 = vmul.f32 %v11829_v8, %v11724_v39 }
 0x766   :  { %3942 = vrot.lane.b32.xlu1 %v3918_v7, %s9608_s20  ;;  %v11835_v7 = vadd.f32 %v3479_v55, %v11614_v19  ;;  %v3920_v19 = vmul.f32 %v11741_v1, %v11801_v59  ;;  %v11865_v1 = vsel %vm185_vm3, %v11627_v9, %v11633_v46  ;;  %v4149_v9 = vmul.f32 %v4140_v40, %v11766_v44 }
 0x768   :  { %v9338_v32 = vmul.f32 -1.442695, %v11835_v7 }
 0x769   :  { %3612 = vrot.lane.b32.xlu0 %v3591_v48, %s9604_s1  ;;  %v4043_v48 = vmul.f32 %v11642_v27, %v11801_v59 }
 0x76a   :  { %3834 = vrot.lane.b32.xlu1 %v3810_v5, %s9605_s12  ;;  %v11855_v5 = vsel %vm322_vm7, %v11642_v27, %v11649_v51  ;;  %v9506_v56 = vpop.eup %9505  ;;  %9509 = vpow2.f32 %v9338_v32  ;;  %v4257_v51 = vmul.f32 %v11865_v1, %v11766_v44 }
 0x76b   :  { %v4039_v58 = vmul.f32 %v11855_v5, %v11724_v39  ;;  %v3511_v27 = vadd.f32 1.0, %v9506_v56 }
 0x76d   :  { %3940 = vrot.lane.b32.xlu0 %v3917_v53, %s9608_s20  ;;  %v3704_v53 = vmul.f32 %v3690_v21, %v11801_v59  ;;  %9511 = vrcp.f32 %v3511_v27  ;;  %v4032_v21 = vsel %vm322_vm7, %v11651_v37, %v11653_v25  ;;  %v11900_v25 = vpop.permute.xlu0 %3580 }
 0x76e   :  { %3726 = vrot.lane.b32.xlu1 %v3702_v6, %s9606_s17  ;;  %v3579_v6 = vpop.permute.xlu1 %3578  ;;  %v4041_v10 = vmul.f32 %v4032_v21, %v11766_v44 }
 0x76f   :  { %v3584_v55 = vsel %vm90_vm8, %v3579_v6, %v11900_v25 }
 0x770   :  { %v9508_v24 = vpop.eup %9507 }
 0x771   :  { %3832 = vrot.lane.b32.xlu0 %v3809_v16, %s9605_s12  ;;  %v11878_v46 = vmul.f32 %v9508_v24, %v11751_v0  ;;  %v3596_v16 = vmul.f32 %v11783_v60, %v11801_v59 }
 0x772   :  { %4284 = vrot.lane.b32.xlu1 %v4259_v45, %s9612_s27  ;;  %v11886_v45 = vpop.permute.xlu1 %4346 }
 0x773   :  { %v3922_v38 = vmul.f32 %v3908_v42, %v11878_v46  ;;  %v4261_v0 = vmul.f32 %v11695_v11, %v11878_v46  ;;  %v4153_v42 = vmul.f32 %v11707_v31, %v11878_v46  ;;  %v4045_v31 = vmul.f32 %v11720_v2, %v11878_v46 }
 0x775   :  { %3724 = vrot.lane.b32.xlu0 %v3701_v20, %s9606_s17  ;;  %v3814_v20 = vmul.f32 %v3800_v54, %v11878_v46 }
 0x776   :  { %4176 = vrot.lane.b32.xlu1 %v4151_v17, %s9609_s23  ;;  %v11896_v37 = vpop.permute.xlu1 %4350  ;;  %v3706_v17 = vmul.f32 %v11815_v36, %v11878_v46 }
 0x777   :  { %v9510_v15 = vpop.eup %9509 }
 0x778   :  { %v3513_v60 = vadd.f32 1.0, %v9510_v15 }
 0x779   :  { %4276 = vrot.lane.b32.xlu0 %v4255_v33, %s9612_s27  ;;  %v3598_v33 = vmul.f32 %v3584_v55, %v11878_v46 }
 0x77a   :  { %4068 = vrot.lane.b32.xlu1 %v4043_v48, %s9610_s25  ;;  %v9512_v50 = vpop.eup %9511  ;;  %9513 = vrcp.f32 %v3513_v60  ;;  %v11906_v11 = vpop.permute.xlu1 %4282 }
 0x77b   :  { %v11911_v54 = vmul.f32 %v9512_v50, %v11798_v26  ;;  %v4349_v48 = vpop.permute.xlu0 %4348 }
 0x77c   :  { %v4355_v24 = vsel %vm116_vm0, %v4349_v48, %v11896_v37 }
 0x77d   :  { %4168 = vrot.lane.b32.xlu0 %v4147_v43, %s9609_s23  ;;  %v3921_v43 = vmul.f32 %v11732_v28, %v11911_v54  ;;  %v4260_v26 = vmul.f32 %v11829_v8, %v11911_v54  ;;  %v3813_v2 = vmul.f32 %v11746_v22, %v11911_v54  ;;  %v3705_v28 = vmul.f32 %v11757_v23, %v11911_v54 }
 0x77e   :  { %3946 = vrot.lane.b32.xlu1 %v3920_v19, %s9608_s20  ;;  %v11920_v36 = vpop.permute.xlu1 %4174  ;;  %v4152_v19 = vmul.f32 %v11843_v12, %v11911_v54  ;;  %v4044_v22 = vmul.f32 %v11855_v5, %v11911_v54  ;;  %v3583_v12 = vsel %vm90_vm8, %v11776_v61, %v3579_v6 }
 0x77f   :  { %v4353_v32 = vpop.permute.xlu0 %4352 }
 0x781   :  { %4060 = vrot.lane.b32.xlu0 %v4039_v58, %s9610_s25 }
 0x782   :  { %3838 = vrot.lane.b32.xlu1 %v3812_v34, %s9605_s12  ;;  %v11932_v58 = vpop.permute.xlu1 %4066 }
 0x783   :  { %v11938_v8 = vpop.permute.xlu0 %4292 }
 0x785   :  { %4280 = vrot.lane.b32.xlu0 %v4257_v51, %s9612_s27  ;;  %v3597_v51 = vmul.f32 %v3583_v12, %v11911_v54 }
 0x786   :  { %3730 = vrot.lane.b32.xlu1 %v3704_v53, %s9606_s17  ;;  %v11949_v27 = vpop.permute.xlu1 %3944 }
 0x787   :  { %v9514_v56 = vpop.eup %9513  ;;  %v11954_v53 = vpop.permute.xlu0 %4184 }
 0x788   :  { %v11941_v34 = vmul.f32 %v9514_v56, %v11835_v7  ;;  %v3593_v7 = vmul.f32 %v3584_v55, %v11689_v29  ;;  %v4367_v55 = vmul.f32 %v11886_v45, %v11801_v59  ;;  %v12025_v56 = vld [vmem:[%s14788_s7] sm:$0xff] }
 0x789   :  { %4172 = vrot.lane.b32.xlu0 %v4149_v9, %s9609_s23  ;;  %14893 = vst [vmem:[#allocation19_spill] sm:$0xff] %v12025_v56 }
 0x78a   :  { %3622 = vrot.lane.b32.xlu1 %v3596_v16, %s9604_s1  ;;  %v4262_v23 = vmul.f32 %v11865_v1, %v11941_v34  ;;  %v4154_v5 = vmul.f32 %v4140_v40, %v11941_v34  ;;  %v11960_v61 = vpop.permute.xlu1 %3836  ;;  %v4046_v1 = vmul.f32 %v4032_v21, %v11941_v34  ;;  %v4369_v40 = vmul.f32 %v4355_v24, %v11878_v46 }
 0x78b   :  { %v11964_v6 = vpop.permute.xlu0 %4076  ;;  %v3592_v16 = vmul.f32 %v3583_v12, %v11724_v39  ;;  %v4366_v21 = vmul.f32 0.0, %v4353_v32 }
 0x78d   :  { %4064 = vrot.lane.b32.xlu0 %v4041_v10, %s9610_s25 }
 0x78e   :  { %3950 = vrot.lane.b32.xlu1 %v3922_v38, %s9608_s20  ;;  %v11972_v9 = vpop.permute.xlu1 %3728  ;;  %v4354_v38 = vsel %vm116_vm0, %v11886_v45, %v4349_v48  ;;  %v4364_v48 = vmul.f32 %v4355_v24, %v11689_v29 }
 0x78f   :  { %v11976_v10 = vpop.permute.xlu0 %3934  ;;  %v4363_v60 = vmul.f32 %v4354_v38, %v11724_v39 }
 0x791   :  { %4288 = vrot.lane.b32.xlu0 %v4261_v0, %s9612_s27 }
 0x792   :  { %3842 = vrot.lane.b32.xlu1 %v3814_v20, %s9605_s12  ;;  %v11984_v15 = vpop.permute.xlu1 %3620  ;;  %v4368_v20 = vmul.f32 %v4354_v38, %v11911_v54  ;;  %v4362_v38 = vmul.f32 %v11886_v45, %v11702_v63 }
 0x793   :  { %v11986_v0 = vpop.permute.xlu0 %3826 }
 0x795   :  { %4180 = vrot.lane.b32.xlu0 %v4153_v42, %s9609_s23 }
 0x796   :  { %3734 = vrot.lane.b32.xlu1 %v3706_v17, %s9606_s17  ;;  %v3923_v17 = vmul.f32 %v11697_v41, %v11941_v34  ;;  %v3707_v41 = vmul.f32 %v11759_v35, %v11941_v34  ;;  %v3599_v35 = vmul.f32 %v11900_v25, %v11941_v34 }
 0x797   :  { %v11993_v42 = vpop.permute.xlu0 %3718 }
 0x799   :  { %4072 = vrot.lane.b32.xlu0 %v4045_v31, %s9610_s25  ;;  %v3815_v31 = vmul.f32 %v11713_v3, %v11941_v34 }
 0x79a   :  { %3626 = vrot.lane.b32.xlu1 %v3598_v33, %s9604_s1 }
 0x79d   :  { %3948 = vrot.lane.b32.xlu0 %v3921_v43, %s9608_s20 }
 0x79e   :  { %4286 = vrot.lane.b32.xlu1 %v4260_v26, %s9612_s27  ;;  %v4356_v26 = vsel %vm116_vm0, %v11896_v37, %v4353_v32 }
 0x79f   :  { %v4370_v3 = vmul.f32 %v4356_v26, %v11941_v34 }
 0x7a1   :  { %3840 = vrot.lane.b32.xlu0 %v3813_v2, %s9605_s12 }
 0x7a2   :  { %4178 = vrot.lane.b32.xlu1 %v4152_v19, %s9609_s23 }
 0x7a5   :  { %3732 = vrot.lane.b32.xlu0 %v3705_v28, %s9606_s17  ;;  %v4506_v28 = vcombine.high %v12025_v56, %v12025_v56  ;;  %v4744_v56 = vrot.slane %v9349_v13, %v14889_v18 }
 0x7a6   :  { %4070 = vrot.lane.b32.xlu1 %v4044_v22, %s9610_s25  ;;  %v9355_v22 = vld [vmem:[%s14783_s2 + $0x20] ss:$8 sm:$0xf] }
 0x7a7   :  { %9347 = vmatprep.mubr.msk.f32.mxu1 %vm185_vm3, %v4506_v28  ;;  %9346 = vmatprep.mubr.msk.f32.mxu0 %vm185_vm3, %v4506_v28  ;;  %v5158_v12 = vrot.slane %v9355_v22, %v14891_v14  ;;  %v5150_v24 = vrot.slane %v9355_v22, %v14889_v18  ;;  %v9352_v28 = vld [vmem:[%s14783_s2 + $0x5] ss:$8 sm:$0xf] }
 0x7a9   :  { %3624 = vrot.lane.b32.xlu0 %v3597_v51, %s9604_s1  ;;  %v4365_v51 = vmul.f32 %v4356_v26, %v11766_v44 }
 0x7aa   :  { %4290 = vrot.lane.b32.xlu1 %v4262_v23, %s9612_s27 }
 0x7ad   :  { %3616 = vrot.lane.b32.xlu0 %v3593_v7, %s9604_s1  ;;  %v4499_v7 = vld [vmem:[%s14789_s8] sm:$0xf] }
 0x7ae   :  { %4182 = vrot.lane.b32.xlu1 %v4154_v5, %s9609_s23  ;;  %v9353_v5 = vld [vmem:[%s14783_s2 + $0x6] ss:$8 sm:$0xf] }
 0x7b1   :  { %3610 = vrot.lane.b32.xlu0 %v11682_v47, %s9604_s1  ;;  %v3594_v47 = vmul.f32 %v11900_v25, %v11766_v44  ;;  %v5162_v25 = vrot.slane %v9355_v22, %v14892_v4 }
 0x7b2   :  { %4074 = vrot.lane.b32.xlu1 %v4046_v1, %s9610_s25 }
 0x7b5   :  { %4396 = vrot.lane.b32.xlu0 %v4369_v40, %s9611_s26  ;;  %v5154_v40 = vrot.slane %v9355_v22, %v14890_v30 }
 0x7b6   :  { %3614 = vrot.lane.b32.xlu1 %v3592_v16, %s9604_s1  ;;  %v5164_v16 = vcombine.low %v5158_v12, %v5162_v25 }
 0x7b9   :  { %4400 = vrot.lane.b32.xlu0 %v4366_v21, %s9611_s26 }
 0x7ba   :  { %3618 = vrot.lane.b32.xlu1 %v3594_v47, %s9604_s1  ;;  %v5031_v47 = vrot.slane %v9353_v5, %v14892_v4 }
 0x7bd   :  { %4384 = vrot.lane.b32.xlu0 %v4363_v60, %s9611_s26 }
 0x7be   :  { %4394 = vrot.lane.b32.xlu1 %v4368_v20, %s9611_s26  ;;  %v9354_v20 = vld [vmem:[%s14783_s2 + $0x7] ss:$8 sm:$0xf] }
 0x7bf   :  { %v5092_v45 = vrot.slane %v9354_v20, %v14891_v14  ;;  %v5096_v26 = vrot.slane %v9354_v20, %v14892_v4  ;;  %v5084_v12 = vrot.slane %v9354_v20, %v14889_v18  ;;  %v5088_v25 = vrot.slane %v9354_v20, %v14890_v30 }
 0x7c0   :  { %v11996_v50 = vpop.permute.xlu1 %4278 }
 0x7c1   :  { %3952 = vrot.lane.b32.xlu0 %v3923_v17, %s9608_s20 }
 0x7c2   :  { %4392 = vrot.lane.b32.xlu1 %v4367_v55, %s9611_s26  ;;  %v5163_v55 = vcombine.low %v5150_v24, %v5154_v40  ;;  %v9350_v40 = vld [vmem:[%s14783_s2 + $0x2] ss:$8 sm:$0xf] }
 0x7c3   :  { %v12006_v33 = vpop.permute.xlu0 %4274 }
 0x7c4   :  { %v12009_v43 = vpop.permute.xlu1 %4170 }
 0x7c5   :  { %3844 = vrot.lane.b32.xlu0 %v3815_v31, %s9605_s12  ;;  %v5019_v31 = vrot.slane %v9353_v5, %v14889_v18 }
 0x7c6   :  { %4386 = vrot.lane.b32.xlu1 %v4364_v48, %s9611_s26  ;;  %v5023_v48 = vrot.slane %v9353_v5, %v14890_v30 }
 0x7c7   :  { %v12017_v2 = vpop.permute.xlu0 %4166 }
 0x7c8   :  { %v12020_v19 = vpop.permute.xlu1 %4062  ;;  %v5032_v22 = vcombine.low %v5019_v31, %v5023_v48  ;;  %v4822_v31 = vrot.slane %v9350_v40, %v14892_v4 }
 0x7c9   :  { %3736 = vrot.lane.b32.xlu0 %v3707_v41, %s9606_s17 }
 0x7ca   :  { %4398 = vrot.lane.b32.xlu1 %v4370_v3, %s9611_s26 }
 0x7cb   :  { %v12033_v37 = vpop.permute.xlu0 %4058 }
 0x7cc   :  { %v12037_v32 = vpop.permute.xlu1 %3938 }
 0x7cd   :  { %3628 = vrot.lane.b32.xlu0 %v3599_v35, %s9604_s1 }
 0x7ce   :  { %4390 = vrot.lane.b32.xlu1 %v4366_v21, %s9611_s26  ;;  %v5027_v21 = vrot.slane %v9353_v5, %v14891_v14  ;;  %v4965_v5 = vrot.slane %v9352_v28, %v14892_v4 }
 0x7cf   :  { %v12047_v23 = vpop.permute.xlu0 %3936 }
 0x7d0   :  { %v12055_v1 = vpop.permute.xlu1 %3830  ;;  %v5033_v41 = vcombine.low %v5027_v21, %v5031_v47  ;;  %v5097_v21 = vcombine.low %v5084_v12, %v5088_v25  ;;  %v4953_v47 = vrot.slane %v9352_v28, %v14889_v18 }
 0x7d1   :  { %4388 = vrot.lane.b32.xlu0 %v4365_v51, %s9611_s26  ;;  %v5098_v51 = vcombine.low %v5092_v45, %v5096_v26 }
 0x7d2   :  { %4502 = vperm.xlu1 %9444, %v4499_v7   ;;  %v4961_v7 = vrot.slane %v9352_v28, %v14891_v14 }
 0x7d3   :  { %v12064_v60 = vpop.permute.xlu0 %3828 }
 0x7d4   :  { %v12069_v17 = vpop.permute.xlu1 %3722  ;;  %v4967_v20 = vcombine.low %v4961_v7, %v4965_v5  ;;  %v4674_v5 = vld [vmem:[%s14783_s2] ss:$8 sm:$0xf] }
 0x7d5   :  { %4382 = vrot.lane.b32.xlu0 %v4362_v38, %s9611_s26  ;;  %v4957_v38 = vrot.slane %v9352_v28, %v14890_v30  ;;  %v4810_v28 = vrot.slane %v9350_v40, %v14889_v18 }
 0x7d6   :  { %5167 = vrot.lane.b32.xlu1 %v5164_v16, %s9604_s1 }
 0x7d7   :  { %v12077_v3 = vpop.permute.xlu0 %3720  ;;  %v4966_v26 = vcombine.low %v4953_v47, %v4957_v38 }
 0x7d8   :  { %v12082_v35 = vpop.permute.xlu1 %3942 }
 0x7d9   :  { %5165 = vrot.lane.b32.xlu0 %v5163_v55, %s9604_s1  ;;  %v4818_v55 = vrot.slane %v9350_v40, %v14891_v14 }
 0x7da   :  { %5036 = vrot.lane.b32.xlu1 %v5033_v41, %s9605_s12  ;;  %v9351_v41 = vld [vmem:[%s14783_s2 + $0x3] ss:$8 sm:$0xf] }
 0x7db   :  { %v12090_v24 = vpop.permute.xlu0 %3612  ;;  %v4824_v12 = vcombine.low %v4818_v55, %v4822_v31  ;;  %v4883_v25 = vrot.slane %v9351_v41, %v14891_v14  ;;  %v4875_v47 = vrot.slane %v9351_v41, %v14889_v18  ;;  %v4691_v55 = vrot.slane %v4674_v5, %v14892_v4 }
 0x7dc   :  { %v12095_v16 = vpop.permute.xlu1 %3834 }
 0x7dd   :  { %14894 = vst [vmem:[#allocation21_spill] sm:$0xff] %v12095_v16  ;;  %5034 = vrot.lane.b32.xlu0 %v5032_v22, %s9605_s12  ;;  %v4814_v22 = vrot.slane %v9350_v40, %v14890_v30  ;;  %v4879_v40 = vrot.slane %v9351_v41, %v14890_v30 }
 0x7de   :  { %5101 = vrot.lane.b32.xlu1 %v5098_v51, %s9606_s17  ;;  %v4887_v51 = vrot.slane %v9351_v41, %v14892_v4  ;;  %v4683_v41 = vrot.slane %v4674_v5, %v14890_v30 }
 0x7df   :  { %v12103_v48 = vpop.permute.xlu0 %3940 }
 0x7e0   :  { %v12108_v45 = vpop.permute.xlu1 %3726  ;;  %v4889_v38 = vcombine.low %v4883_v25, %v4887_v51  ;;  %v4756_v25 = vrot.slane %v9349_v13, %v14892_v4 }
 0x7e1   :  { %14895 = vst [vmem:[#allocation24_spill] sm:$0xff] %v12108_v45  ;;  %5099 = vrot.lane.b32.xlu0 %v5097_v21, %s9606_s17  ;;  %v4823_v21 = vcombine.low %v4810_v28, %v4814_v22  ;;  %v4679_v28 = vrot.slane %v4674_v5, %v14889_v18 }
 0x7e2   :  { %4970 = vrot.lane.b32.xlu1 %v4967_v20, %s9608_s20  ;;  %v4687_v20 = vrot.slane %v4674_v5, %v14891_v14 }
 0x7e3   :  { %v12116_v7 = vpop.permute.xlu0 %3832  ;;  %v4692_v52 = vcombine.low %v4679_v28, %v4683_v41 }
 0x7e4   :  { %14896 = vst [vmem:[#allocation17_spill] sm:$0xff] %v12116_v7  ;;  %v4285_v57 = vpop.permute.xlu1 %4284  ;;  %v4693_v22 = vcombine.low %v4687_v20, %v4691_v55 }
 0x7e5   :  { %4968 = vrot.lane.b32.xlu0 %v4966_v26, %s9608_s20  ;;  %v4888_v26 = vcombine.low %v4875_v47, %v4879_v40 }
 0x7e6   :  { %4827 = vrot.lane.b32.xlu1 %v4824_v12, %s9609_s23  ;;  %v4752_v12 = vrot.slane %v9349_v13, %v14891_v14 }
 0x7e7   :  { %v12127_v31 = vpop.permute.xlu0 %3724 }
 0x7e8   :  { %14897 = vst [vmem:[#allocation13_spill] sm:$0xff] %v12127_v31  ;;  %v4177_v62 = vpop.permute.xlu1 %4176  ;;  %v4758_v47 = vcombine.low %v4752_v12, %v4756_v25 }
 0x7e9   :  { %4825 = vrot.lane.b32.xlu0 %v4823_v21, %s9609_s23  ;;  %v4748_v21 = vrot.slane %v9349_v13, %v14890_v30 }
 0x7ea   :  { %4892 = vrot.lane.b32.xlu1 %v4889_v38, %s9610_s25 }
 0x7eb   :  { %v4277_v51 = vpop.permute.xlu0 %4276  ;;  %v4757_v38 = vcombine.low %v4744_v56, %v4748_v21 }
 0x7ec   :  { %v4069_v49 = vpop.permute.xlu1 %4068  ;;  %v4295_v45 = vsel %vm159_vm5, %v4277_v51, %v11996_v50 }
 0x7ed   :  { %4890 = vrot.lane.b32.xlu0 %v4888_v26, %s9610_s25 }
 0x7ee   :  { %4696 = vrot.lane.b32.xlu1 %v4693_v22, %s9611_s26 }
 0x7ef   :  { %v4169_v5 = vpop.permute.xlu0 %4168 }
 0x7f0   :  { %v12142_v40 = vpop.permute.xlu1 %3946 }
 0x7f1   :  { %4694 = vrot.lane.b32.xlu0 %v4692_v52, %s9611_s26 }
 0x7f2   :  { %4761 = vrot.lane.b32.xlu1 %v4758_v47, %s9612_s27 }
 0x7f3   :  { %v4061_v20 = vpop.permute.xlu0 %4060 }
 0x7f4   :  { %v12146_v55 = vpop.permute.xlu1 %3838 }
 0x7f5   :  { %4759 = vrot.lane.b32.xlu0 %v4757_v38, %s9612_s27 }
 0x7f7   :  { %v4281_v26 = vpop.permute.xlu0 %4280 }
 0x7f8   :  { %v12149_v28 = vpop.permute.xlu1 %3730 }
 0x7fb   :  { %v12151_v13 = vpop.permute.xlu0 %4172 }
 0x7fc   :  { %v12153_v41 = vpop.permute.xlu1 %3622 }
 0x7ff   :  { %v12155_v22 = vpop.permute.xlu0 %4064 }
 0x800   :  { %v12157_v12 = vpop.permute.xlu1 %3950 }
 0x803   :  { %v4289_v52 = vpop.permute.xlu0 %4288 }
 0x804   :  { %v12159_v56 = vpop.permute.xlu1 %3842 }
 0x807   :  { %v4181_v25 = vpop.permute.xlu0 %4180 }
 0x808   :  { %v12161_v21 = vpop.permute.xlu1 %3734 }
 0x809   :  { %14898 = vst [vmem:[#allocation14_spill] sm:$0xff] %v12161_v21  ;;  %v4294_v21 = vsel %vm159_vm5, %v12006_v33, %v4277_v51  ;;  %v4078_v51 = vsel %vm296_vm1, %v12033_v37, %v4061_v20 }
 0x80b   :  { %v12163_v47 = vpop.permute.xlu0 %4072 }
 0x80c   :  { %v12165_v38 = vpop.permute.xlu1 %3626 }
 0x80d   :  { %14899 = vst [vmem:[#allocation15_spill] sm:$0xff] %v12165_v38 }
 0x80f   :  { %v12167_v4 = vpop.permute.xlu0 %3948 }
 0x810   :  { %v4287_v14 = vpop.permute.xlu1 %4286 }
 0x811   :  { %v4299_v30 = vsel %vm159_vm5, %v4287_v14, %v4289_v52  ;;  %v4298_v18 = vsel %vm159_vm5, %v4285_v57, %v4287_v14  ;;  %v4186_v14 = vsel %vm228_vm2, %v12017_v2, %v4169_v5 }
 0x812   :  { %4509 = vmatprep.subr.mxu0 %v4299_v30 }
 0x813   :  { %4510 = vmatpush1.msra.mxu0 %v4298_v18  ;;  %v12171_v31 = vpop.permute.xlu0 %3840  ;;  %v4187_v18 = vsel %vm228_vm2, %v4169_v5, %v12009_v43 }
 0x814   :  { %v4179_v7 = vpop.permute.xlu1 %4178  ;;  %4511 = vmatprep.subr.mxu0 %v4295_v45 }
 0x815   :  { %4512 = vmatpush1.msra.mxu0 %v4294_v21  ;;  %v4191_v38 = vsel %vm228_vm2, %v4179_v7, %v4181_v25  ;;  %v4190_v16 = vsel %vm228_vm2, %v4177_v62, %v4179_v7  ;;  %v4297_v21 = vsel %vm159_vm5, %v4281_v26, %v11906_v11 }
 0x816   :  { %4513 = vmatprep.subr.mxu0 %v4191_v38 }
 0x817   :  { %4514 = vmatpush1.msra.mxu0 %v4190_v16  ;;  %v12179_v57 = vpop.permute.xlu0 %3732  ;;  %v4079_v16 = vsel %vm296_vm1, %v4061_v20, %v12020_v19  ;;  %v3954_v20 = vsel %vm322_vm7, %v11976_v10, %v12047_v23  ;;  %v3850_v10 = vsel %vm253_vm6, %v11960_v61, %v12146_v55  ;;  %v3846_v61 = vsel %vm253_vm6, %v11986_v0, %v12064_v60 }
 0x818   :  { %v4071_v30 = vpop.permute.xlu1 %4070  ;;  %4515 = vmatprep.subr.mxu0 %v4187_v18 }
 0x819   :  { %4516 = vmatpush1.msra.mxu0 %v4186_v14  ;;  %v4083_v33 = vsel %vm296_vm1, %v4071_v30, %v12163_v47  ;;  %v4082_v45 = vsel %vm296_vm1, %v4069_v49, %v4071_v30  ;;  %v3956_v30 = vsel %vm322_vm7, %v12037_v32, %v12103_v48 }
 0x81a   :  { %4517 = vmatprep.subr.mxu0 %v4083_v33 }
 0x81b   :  { %4518 = vmatpush1.msra.mxu0 %v4082_v45  ;;  %v12188_v62 = vpop.permute.xlu0 %3624  ;;  %v14901_v45 = vld [vmem:[#allocation17_spill] sm:$0xff] }
 0x81c   :  { %v4291_v7 = vpop.permute.xlu1 %4290  ;;  %4519 = vmatprep.subr.mxu0 %v4079_v16 }
 0x81d   :  { %4520 = vmatpush1.msra.mxu0 %v4078_v51  ;;  %v4301_v2 = vsel %vm159_vm5, %v4291_v7, %v11938_v8  ;;  %v4300_v5 = vsel %vm159_vm5, %v4289_v52, %v4291_v7  ;;  %v4296_v8 = vsel %vm159_vm5, %v11996_v50, %v4281_v26  ;;  %v4189_v50 = vsel %vm228_vm2, %v12151_v13, %v11920_v36  ;;  %v14902_v7 = vld [vmem:[#allocation14_spill] sm:$0xff] }
 0x81e   :  { %4521 = vmatprep.subr.mxu0 %v11911_v54  ;;  %4580 = vmatprep.subr.mxu1 %v4301_v2  ;;  %v3743_v52 = vsel %vm185_vm3, %v12149_v28, %v12179_v57  ;;  %v14904_v2 = vld [vmem:[#allocation13_spill] sm:$0xff] }
 0x81f   :  { %4522 = vmatpush1.msra.mxu0 %v11801_v59  ;;  %4581 = vmatpush1.msra.mxu1 %v4300_v5  ;;  %v12199_v49 = vpop.permute.xlu0 %3616  ;;  %v3959_v59 = vsel %vm322_vm7, %v12142_v40, %v12167_v4 }
 0x820   :  { %v4183_v38 = vpop.permute.xlu1 %4182  ;;  %4523 = vmatprep.subr.mxu0 %v11724_v39  ;;  %4582 = vmatprep.subr.mxu1 %v4297_v21  ;;  %v3958_v39 = vsel %vm322_vm7, %v11949_v27, %v12142_v40  ;;  %v4188_v27 = vsel %vm228_vm2, %v12009_v43, %v12151_v13  ;;  %v3851_v40 = vsel %vm253_vm6, %v12146_v55, %v12171_v31 }
 0x821   :  { %4524 = vmatpush1.msra.mxu0 %v11702_v63  ;;  %4583 = vmatpush1.msra.mxu1 %v4296_v8  ;;  %v4193_v54 = vsel %vm228_vm2, %v4183_v38, %v11954_v53  ;;  %v4192_v37 = vsel %vm228_vm2, %v4181_v25, %v4183_v38  ;;  %v3955_v63 = vsel %vm322_vm7, %v12047_v23, %v12037_v32  ;;  %v14905_v8 = vld [vmem:[#allocation15_spill] sm:$0xff] }
 0x822   :  { %4525 = vmatprep.subr.mxu0 %v3959_v59  ;;  %4584 = vmatprep.subr.mxu1 %v4193_v54  ;;  %v3847_v23 = vsel %vm253_vm6, %v12064_v60, %v12055_v1  ;;  %v4080_v55 = vsel %vm296_vm1, %v12020_v19, %v12155_v22  ;;  %v3739_v19 = vsel %vm185_vm3, %v12077_v3, %v12069_v17 }
 0x823   :  { %4526 = vmatpush1.msra.mxu0 %v3958_v39  ;;  %4585 = vmatpush1.msra.mxu1 %v4192_v37  ;;  %v3611_v11 = vpop.permute.xlu0 %3610 }
 0x824   :  { %v4075_v53 = vpop.permute.xlu1 %4074  ;;  %4527 = vmatprep.subr.mxu0 %v3955_v63  ;;  %4586 = vmatprep.subr.mxu1 %v4189_v50 }
 0x825   :  { %4528 = vmatpush1.msra.mxu0 %v3954_v20  ;;  %4587 = vmatpush1.msra.mxu1 %v4188_v27  ;;  %v4085_v36 = vsel %vm296_vm1, %v4075_v53, %v11964_v6  ;;  %v4084_v26 = vsel %vm296_vm1, %v12163_v47, %v4075_v53  ;;  %v4081_v6 = vsel %vm296_vm1, %v12155_v22, %v11932_v58  ;;  %v14907_v27 = vmov 0.0  }
 0x826   :  { %4529 = vmatprep.subr.mxu0 %v3851_v40  ;;  %4588 = vmatprep.subr.mxu1 %v4085_v36  ;;  %v3742_v58 = vsel %vm185_vm3, %v11972_v9, %v12149_v28  ;;  %v3634_v9 = vsel %vm116_vm0, %v11984_v15, %v12153_v41  ;;  %v3960_v47 = vsel %vm322_vm7, %v12167_v4, %v12157_v12  ;;  %v5144_v36 = vld [vmem:[#allocation2 + $0x14] sm:$0xf] }
 0x827   :  { %4530 = vmatpush1.msra.mxu0 %v3850_v10  ;;  %4589 = vmatpush1.msra.mxu1 %v4084_v26  ;;  %v12238_v43 = vpop.permute.xlu0 %4396 }
 0x828   :  { %v12246_v13 = vpop.permute.xlu1 %3614  ;;  %4531 = vmatprep.subr.mxu0 %v3847_v23  ;;  %4590 = vmatprep.subr.mxu1 %v4081_v6  ;;  %v5013_v23 = vld [vmem:[#allocation2 + $0x14] sm:$0xf] }
 0x829   :  { %4532 = vmatpush1.msra.mxu0 %v3846_v61  ;;  %4591 = vmatpush1.msra.mxu1 %v4080_v55  ;;  %v3632_v39 = vsel %vm116_vm0, %v12246_v13, %v12199_v49  ;;  %v5078_v55 = vld [vmem:[#allocation2 + $0x14] sm:$0xf] }
 0x82a   :  { %4533 = vmatprep.subr.mxu0 %v3743_v52  ;;  %4592 = vmatprep.subr.mxu1 %v11941_v34  ;;  %v3738_v34 = vsel %vm185_vm3, %v11993_v42, %v12077_v3  ;;  %v3630_v42 = vsel %vm116_vm0, %v3611_v11, %v12090_v24 }
 0x82b   :  { %4534 = vmatpush1.msra.mxu0 %v3742_v58  ;;  %4593 = vmatpush1.msra.mxu1 %v11878_v46  ;;  %v12262_v0 = vpop.permute.xlu0 %4400  ;;  %v3635_v46 = vsel %vm116_vm0, %v12153_v41, %v12188_v62 }
 0x82c   :  { %v3619_v60 = vpop.permute.xlu1 %3618  ;;  %4535 = vmatprep.subr.mxu0 %v3739_v19  ;;  %4594 = vmatprep.subr.mxu1 %v11766_v44  ;;  %v3631_v44 = vsel %vm116_vm0, %v12090_v24, %v12246_v13  ;;  %v3957_v24 = vsel %vm322_vm7, %v12103_v48, %v12082_v35  ;;  %v14900_v35 = vld [vmem:[#allocation21_spill] sm:$0xff]  ;;  %v3848_v48 = vsel %vm253_vm6, %v12055_v1, %v14901_v45  ;;  %v4947_v19 = vld [vmem:[#allocation2 + $0x14] sm:$0xf] }
 0x82d   :  { %4536 = vmatpush1.msra.mxu0 %v3738_v34  ;;  %4595 = vmatpush1.msra.mxu1 %v11689_v29  ;;  %v3849_v16 = vsel %vm253_vm6, %v14901_v45, %v14900_v35  ;;  %v3740_v1 = vsel %vm185_vm3, %v12069_v17, %v14904_v2  ;;  %v3633_v54 = vsel %vm116_vm0, %v12199_v49, %v3619_v60  ;;  %v14906_v49 = vld [vmem:[#allocation19_spill] sm:$0xff] }
 0x82e   :  { %4537 = vmatprep.subr.mxu0 %v3635_v46 }
 0x82f   :  { %4538 = vmatpush1.msra.mxu0 %v3634_v9  ;;  %v4385_v28 = vpop.permute.xlu0 %4384 }
 0x830   :  { %v4395_v3 = vpop.permute.xlu1 %4394  ;;  %4539 = vmatprep.subr.mxu0 %v3631_v44 }
 0x831   :  { %4540 = vmatpush1.msra.mxu0 %v3630_v42  ;;  %v4407_v29 = vsel %vm90_vm8, %v4395_v3, %v12238_v43 }
 0x832   :  { %4569 = vmatprep.subr.mxu0 %v4407_v29 }
 0x833   :  { %v3953_v22 = vpop.permute.xlu0 %3952 }
 0x834   :  { %v4393_v25 = vpop.permute.xlu1 %4392  ;;  %v3961_v15 = vsel %vm322_vm7, %v12157_v12, %v3953_v22  ;;  %v3852_v12 = vsel %vm253_vm6, %v12171_v31, %v12159_v56  ;;  %v3744_v31 = vsel %vm185_vm3, %v12179_v57, %v14902_v7  ;;  %v3636_v57 = vsel %vm116_vm0, %v12188_v62, %v14905_v8 }
 0x835   :  { %v4406_v41 = vsel %vm90_vm8, %v4393_v25, %v4395_v3  ;;  %4596 = vmatprep.subr.mxu1 %v3961_v15  ;;  %v4652_v25 = vstv %s9348_s15  ;;  %s9383_s15 = sld [smem:[#allocation7 + $0x2]] }
 0x836   :  { %4570 = vmatpush2.msra.mxu0 %v4406_v41  ;;  %4597 = vmatpush1.msra.mxu1 %v3960_v47 }
 0x837   :  { %4598 = vmatprep.subr.mxu1 %v3957_v24  ;;  %v3845_v18 = vpop.permute.xlu0 %3844 }
 0x838   :  { %v4387_v14 = vpop.permute.xlu1 %4386  ;;  %4599 = vmatpush1.msra.mxu1 %v3956_v30  ;;  %v3853_v33 = vsel %vm253_vm6, %v12159_v56, %v3845_v18  ;;  %v14903_v56 = vld [vmem:[#allocation24_spill] sm:$0xff] }
 0x839   :  { %4600 = vmatprep.subr.mxu1 %v3853_v33  ;;  %v4403_v4 = vsel %vm90_vm8, %v4385_v28, %v4387_v14  ;;  %v3741_v5 = vsel %vm185_vm3, %v14904_v2, %v14903_v56  ;;  %v14914_v2 = vld [vmem:[#allocation23_spill] sm:$0xff] }
 0x83a   :  { %4571 = vmatprep.subr.mxu0 %v4403_v4  ;;  %4601 = vmatpush1.msra.mxu1 %v3852_v12 }
 0x83b   :  { %4602 = vmatprep.subr.mxu1 %v3849_v16  ;;  %v3737_v32 = vpop.permute.xlu0 %3736 }
 0x83c   :  { %4603 = vmatpush1.msra.mxu1 %v3848_v48  ;;  %v3745_v51 = vsel %vm185_vm3, %v14902_v7, %v3737_v32  ;;  %v4399_v21 = vpop.permute.xlu1 %4398  ;;  %v14908_v32 = vld [vmem:[#allocation22_spill] sm:$0xff] }
 0x83d   :  { %4604 = vmatprep.subr.mxu1 %v3745_v51  ;;  %v4409_v17 = vsel %vm90_vm8, %v4399_v21, %v12262_v0  ;;  %v4408_v63 = vsel %vm90_vm8, %v12238_v43, %v4399_v21  ;;  %v14910_v7 = vld [vmem:[#allocation18_spill] sm:$0xff] }
 0x83e   :  { %4605 = vmatpush1.msra.mxu1 %v3744_v31  ;;  %v14912_v31 = vld [vmem:[#allocation20_spill] sm:$0xff] }
 0x83f   :  { %4606 = vmatprep.subr.mxu1 %v3741_v5  ;;  %v3629_v38 = vpop.permute.xlu0 %3628 }
 0x840   :  { %4607 = vmatpush1.msra.mxu1 %v3740_v1  ;;  %v3637_v59 = vsel %vm116_vm0, %v14905_v8, %v3629_v38  ;;  %v4391_v11 = vpop.permute.xlu1 %4390 }
 0x841   :  { %4608 = vmatprep.subr.mxu1 %v3637_v59 }
 0x842   :  { %4609 = vmatpush1.msra.mxu1 %v3636_v57 }
 0x843   :  { %4610 = vmatprep.subr.mxu1 %v3633_v54  ;;  %v4389_v37 = vpop.permute.xlu0 %4388 }
 0x844   :  { %4611 = vmatpush1.msra.mxu1 %v3632_v39  ;;  %v4405_v62 = vsel %vm90_vm8, %v4389_v37, %v4391_v11  ;;  %v4404_v53 = vsel %vm90_vm8, %v4387_v14, %v4389_v37 }
 0x845   :  { %4640 = vmatprep.subr.mxu1 %v4409_v17 }
 0x846   :  { %4641 = vmatpush2.msra.mxu1 %v4408_v63 }
 0x847   :  { %4642 = vmatprep.subr.mxu1 %v4405_v62  ;;  %v4383_v50 = vpop.permute.xlu0 %4382 }
 0x848   :  { %v4402_v20 = vsel %vm90_vm8, %v4383_v50, %v4385_v28  ;;  %4643 = vmatpush2.msra.mxu1 %v4404_v53 }
 0x849   :  { %4572 = vmatpush2.msra.mxu0 %v4402_v20  ;;  %4645 = vmatmul.mubr.f32.vlgmr.msra.gmra.mxu1 %v14906_v49 }
 0x84a   :  { %4574 = vmatmul.mubr.f32.vlgmr.msra.gmra.mxu0 %v14906_v49  ;;  %5401 = vmatprep.mubr.f32.mxu1 %v14907_v27 }
 0x84b   :  { %5324 = vmatprep.mubr.f32.mxu0 %v14907_v27  ;;  %v5166_v44 = vpop.permute.xlu0 %5165 }
 0x84c   :  { %v5169_v21 = vrot.slane %v5166_v44, 4 }
 0x84d   :  { %v4503_v40 = vpop.permute.xlu1 %4502 }
 0x84e   :  { %v5171_v57 = vsel %vm116_vm0, %v5169_v21, %v5166_v44 }
 0x84f   :  { %v12365_v42 = vpop.permute.xlu0 %5034 }
 0x850   :  { %v5038_v11 = vrot.slane %v12365_v42, 4 }
 0x851   :  { %v12341_v26 = vpop.permute.xlu1 %5167 }
 0x852   :  { %v5170_v10 = vrot.slane %v12341_v26, 4  ;;  %v5040_v62 = vsel %vm253_vm6, %v5038_v11, %v12365_v42 }
 0x853   :  { %v12367_v3 = vpop.permute.xlu0 %5099 }
 0x854   :  { %v5179_v43 = vmul.f32 %v5170_v10, %v5144_v36  ;;  %v5103_v38 = vrot.slane %v12367_v3, 4 }
 0x855   :  { %v12346_v6 = vpop.permute.xlu1 %5036 }
 0x856   :  { %v5039_v13 = vrot.slane %v12346_v6, 4  ;;  %5193 = vrot.lane.b32.xlu1 %v5179_v43, %s9611_s26  ;;  %v5105_v54 = vsel %vm185_vm3, %v5103_v38, %v12367_v3 }
 0x857   :  { %v12369_v29 = vpop.permute.xlu0 %4968 }
 0x858   :  { %v5048_v61 = vmul.f32 %v5039_v13, %v5013_v23  ;;  %v4972_v49 = vrot.slane %v12369_v29, 4 }
 0x859   :  { %v12352_v52 = vpop.permute.xlu1 %5101 }
 0x85a   :  { %v5104_v58 = vrot.slane %v12352_v52, 4  ;;  %5062 = vrot.lane.b32.xlu0 %v5048_v61, %s9609_s23  ;;  %v4974_v43 = vsel %vm322_vm7, %v4972_v49, %v12369_v29 }
 0x85b   :  { %v12371_v15 = vpop.permute.xlu0 %4825 }
 0x85c   :  { %v5113_v0 = vmul.f32 %v5104_v58, %v5078_v55  ;;  %v4829_v55 = vrot.slane %v12371_v15, 4 }
 0x85d   :  { %v12358_v60 = vpop.permute.xlu1 %4970 }
 0x85e   :  { %v5119_v34 = vcombine.low %v5113_v0, %v5113_v0  ;;  %v4973_v46 = vrot.slane %v12358_v60, 4  ;;  %v4831_v44 = vsel %vm228_vm2, %v4829_v55, %v12371_v15 }
 0x85f   :  { %v4891_v16 = vpop.permute.xlu0 %4890 }
 0x860   :  { %v4982_v9 = vmul.f32 %v4973_v46, %v4947_v19  ;;  %5128 = vrot.lane.b32.xlu0 %v5119_v34, %s9612_s27  ;;  %v4894_v63 = vrot.slane %v4891_v16, 4  ;;  %v5172_v19 = vsel %vm92_vm4, %v5169_v21, %v5170_v10  ;;  %v5106_v10 = vsel %vm92_vm4, %v5103_v38, %v5104_v58 }
 0x861   :  { %v12388_v8 = vpop.permute.xlu1 %4827  ;;  %v5173_v3 = vsel %vm116_vm0, %v5172_v19, %v12341_v26  ;;  %v4975_v15 = vsel %vm92_vm4, %v4972_v49, %v4973_v46  ;;  %v5041_v26 = vsel %vm92_vm4, %v5038_v11, %v5039_v13 }
 0x862   :  { %v4988_v28 = vcombine.low %v4982_v9, %v4982_v9  ;;  %v4896_v36 = vsel %vm296_vm1, %v4894_v63, %v4891_v16 }
 0x863   :  { %v12395_v37 = vpop.permute.xlu0 %4694 }
 0x864   :  { %4997 = vrot.lane.b32.xlu0 %v4988_v28, %s9610_s25 }
 0x865   :  { %v12408_v50 = vpop.permute.xlu1 %4892 }
 0x867   :  { %v4760_v23 = vpop.permute.xlu0 %4759 }
 0x868   :  { %v4763_v9 = vrot.slane %v4760_v23, 4 }
 0x869   :  { %v4697_v34 = vpop.permute.xlu1 %4696 }
 0x86a   :  { %v4765_v29 = vsel %vm159_vm5, %v4763_v9, %v4760_v23  ;;  %v4699_v16 = vrot.slane %v4697_v34, 4 }
 0x909   :  { %v4646_v22 = vpop.f32.mrf.mxu1 }
 0x90a   :  { %v4647_v41 = vadd.f32 %v4646_v22, %v4503_v40  ;;  %v4575_v47 = vpop.f32.mrf.mxu0 }
 0x90b   :  { %v4576_v24 = vadd.f32 %v4575_v47, %v4503_v40  ;;  %v4648_v18 = vpop.f32.mrf.mxu1  ;;  %v12452_v47 = vpop.permute.xlu1 %4761 }
 0x90c   :  { %v4655_v30 = vmul.f32 %v4652_v25, %v4647_v41  ;;  %v4649_v14 = vadd.f32 %v4648_v18, %v4503_v40  ;;  %v4577_v33 = vpop.f32.mrf.mxu0  ;;  %v4830_v41 = vrot.slane %v12388_v8, 4 }
 0x90d   :  { %v4653_v4 = vmul.f32 %v4652_v25, %v4576_v24  ;;  %v4578_v12 = vadd.f32 %v4577_v33, %v4503_v40  ;;  %v5107_v24 = vsel %vm185_vm3, %v5106_v10, %v12352_v52  ;;  %v5042_v52 = vsel %vm253_vm6, %v5041_v26, %v12346_v6  ;;  %v14918_v26 = vld [vmem:[#allocation11_spill] sm:$0xff] }
 0x90e   :  { %v4656_v35 = vmul.f32 %v4652_v25, %v4649_v14  ;;  %v12374_v48 = vadd.f32 %v4655_v30, %v14908_v32  ;;  %v4764_v30 = vrot.slane %v12452_v47, 4  ;;  %v4976_v14 = vsel %vm322_vm7, %v4975_v15, %v12358_v60 }
 0x90f   :  { %v4654_v45 = vmul.f32 %v4652_v25, %v4578_v12  ;;  %v12380_v56 = vadd.f32 %v4653_v4, %v14912_v31  ;;  %v4895_v25 = vrot.slane %v12408_v50, 4  ;;  %v4832_v13 = vsel %vm92_vm4, %v4829_v55, %v4830_v41 }
 0x910   :  { %14909 = vst [vmem:[#allocation16_spill] sm:$0xff] %v12374_v48  ;;  %v12377_v51 = vadd.f32 %v4656_v35, %v14910_v7  ;;  %v4833_v60 = vsel %vm228_vm2, %v4832_v13, %v12388_v8  ;;  %v4698_v32 = vrot.slane %v12395_v37, 4 }
 0x911   :  { %14913 = vst [vmem:[#allocation17_spill] sm:$0xff] %v12380_v56  ;;  %v12383_v5 = vadd.f32 %v4654_v45, %v14914_v2  ;;  %v4897_v46 = vsel %vm92_vm4, %v4894_v63, %v4895_v25  ;;  %v4766_v45 = vsel %vm92_vm4, %v4763_v9, %v4764_v30 }
 0x912   :  { %14911 = vst [vmem:[#allocation21_spill] sm:$0xff] %v12377_v51  ;;  %v4666_v1 = vcombine.low %v12374_v48, %v12377_v51  ;;  %v9584_v20 = vcombine.low %v12377_v51, %v12377_v51  ;;  %v4898_v35 = vsel %vm296_vm1, %v4897_v46, %v12408_v50  ;;  %v4767_v31 = vsel %vm159_vm5, %v4766_v45, %v12452_v47  ;;  %v9376_v45 = vld [vmem:[%s14783_s2 + $0x3] ss:$8 sm:$0xf] }
 0x913   :  { %14915 = vst [vmem:[#allocation14_spill] sm:$0xff] %v12383_v5  ;;  %v4665_v59 = vcombine.low %v12380_v56, %v12383_v5  ;;  %v9583_v53 = vcombine.low %v12383_v5, %v12383_v5  ;;  %v4701_v21 = vsel %vm92_vm4, %v4698_v32, %v4699_v16  ;;  %v9384_v56 = vld [vmem:[%s14783_s2 + $0x1] ss:$8 sm:$0xf] }
 0x914   :  { %4670 = vst [vmem:[#allocation2 + $0xc] sm:$0xff] %v4666_v1  ;;  %4943 = vst [vmem:[#allocation4 + $0x28] sm:$0xf] %v4666_v1  ;;  %v5178_v22 = vmul.f32 %v5173_v3, %v4666_v1  ;;  %v5112_v18 = vmul.f32 %v5107_v24, %v4666_v1  ;;  %v5047_v33 = vmul.f32 %v5042_v52, %v4666_v1  ;;  %v9357_v3 = vld [vmem:[%s14787_s6 + $0x28] sm:$0xff] }
 0x915   :  { %4669 = vst [vmem:[#allocation2 + $0x4] sm:$0xff] %v4665_v59  ;;  %v12397_v39 = vmul.f32 %v5171_v57, %v4665_v59  ;;  %v12399_v17 = vmul.f32 %v5105_v54, %v4665_v59  ;;  %4941 = vst [vmem:[#allocation4 + $0x8] sm:$0xf] %v4665_v59  ;;  %v12415_v40 = vmul.f32 %v5040_v62, %v4665_v59  ;;  %v9378_v24 = vld [vmem:[%s14783_s2 + $0x6] ss:$8 sm:$0xf] }
 0x916   :  { %4942 = vst [vmem:[#allocation4 + $0x88] sm:$0xf] %v9583_v53  ;;  %4944 = vst [vmem:[#allocation4 + $0x40] sm:$0xf] %v9584_v20  ;;  %v12431_v28 = vmul.f32 %v4974_v43, %v4665_v59  ;;  %v4981_v4 = vmul.f32 %v4976_v14, %v4666_v1  ;;  %v4702_v8 = vsel %vm90_vm8, %v4701_v21, %v4697_v34 }
 0x917   :  { %5185 = vrot.lane.b32.xlu0 %v12397_v39, %s9611_s26  ;;  %5122 = vrot.lane.b32.xlu1 %v12399_v17, %s9612_s27  ;;  %v5183_v59 = vcombine.high %v12397_v39, %v12397_v39  ;;  %v5117_v11 = vcombine.low %v12399_v17, %v12399_v17  ;;  %v4700_v62 = vsel %vm90_vm8, %v4698_v32, %v12395_v37  ;;  %v9377_v52 = vld [vmem:[%s14783_s2 + $0x5] ss:$8 sm:$0xf]  ;;  %v12575_v32 = vpop.permute.xlu0 %5062 }
 0x918   :  { %v5052_v20 = vcombine.high %v12415_v40, %v12415_v40  ;;  %v4986_v17 = vcombine.low %v12431_v28, %v12431_v28  ;;  %v5184_v37 = vcombine.high %v5178_v22, %v5178_v22  ;;  %v5053_v43 = vcombine.high %v5047_v33, %v5047_v33 }
 0x919   :  { %v6057_v13 = vrot.slane %v9378_v24, %v14918_v26 }
 0x91b   :  { %5054 = vrot.lane.b32.xlu1 %v12415_v40, %s9609_s23  ;;  %v4804_v2 = vld [vmem:[#allocation2 + $0x10] sm:$0xf]  ;;  %v5118_v40 = vcombine.low %v5112_v18, %v5112_v18 }
 0x91c   :  { %v12422_v61 = vld [vmem:[#allocation2] sm:$0xff]  ;;  %v4868_v12 = vld [vmem:[#allocation2 + $0x8] sm:$0xff]  ;;  %v4839_v1 = vmul.f32 %v4830_v41, %v4804_v2  ;;  %v4673_v54 = vld [vmem:[#allocation2 + $0x10] sm:$0xf] }
 0x91d   :  { %v12426_v0 = vmul.f32 %v4896_v36, %v12422_v61  ;;  %v4837_v42 = vmul.f32 %v4831_v44, %v12422_v61  ;;  %v12459_v58 = vmul.f32 %v12422_v61, %v4765_v29  ;;  %v4903_v6 = vmul.f32 %v4898_v35, %v4868_v12  ;;  %v4869_v23 = vld [vmem:[#allocation2 + $0x10] sm:$0xf]  ;;  %v9356_v29 = vld [vmem:[%s14787_s6 + $0x20] sm:$0xff] }
 0x91e   :  { %v4838_v7 = vmul.f32 %v4868_v12, %v4833_v60  ;;  %v4772_v38 = vmul.f32 %v4868_v12, %v4767_v31  ;;  %v4707_v57 = vmul.f32 %v4868_v12, %v4702_v8  ;;  %v4708_v63 = vmul.f32 %v4699_v16, %v4673_v54  ;;  %v4738_v9 = vld [vmem:[#allocation2 + $0x10] sm:$0xf]  ;;  %v14917_v41 = vld [vmem:[#allocation10_spill] sm:$0xff] }
 0x91f   :  { %4913 = vrot.lane.b32.xlu0 %v12426_v0, %s9608_s20  ;;  %4991 = vrot.lane.b32.xlu1 %v12431_v28, %s9610_s25  ;;  %v4843_v53 = vcombine.high %v4837_v42, %v4837_v42  ;;  %v4706_v39 = vmul.f32 %v12422_v61, %v4700_v62  ;;  %v4908_v36 = vcombine.low %v12426_v0, %v12426_v0  ;;  %v9375_v31 = vld [vmem:[%s14783_s2 + $0x2] ss:$8 sm:$0xf] }
 0x920   :  { %v4987_v61 = vcombine.low %v4981_v4, %v4981_v4  ;;  %v4904_v55 = vmul.f32 %v4895_v25, %v4869_v23  ;;  %v4909_v19 = vcombine.low %v4903_v6, %v4903_v6  ;;  %v4844_v0 = vcombine.high %v4838_v7, %v4838_v7  ;;  %v14916_v25 = vld [vmem:[#allocation9_spill] sm:$0xff] }
 0x921   :  { %v4712_v49 = vcombine.high %v4706_v39, %v4706_v39  ;;  %v4713_v28 = vcombine.high %v4707_v57, %v4707_v57  ;;  %v4773_v44 = vmul.f32 %v4764_v30, %v4738_v9  ;;  %v4777_v10 = vcombine.low %v12459_v58, %v12459_v58 }
 0x922   :  { %v4910_v34 = vcombine.low %v4904_v55, %v4904_v55  ;;  %v6049_v30 = vrot.slane %v9378_v24, %v14916_v25  ;;  %v6053_v14 = vrot.slane %v9378_v24, %v14917_v41  ;;  %v5945_v12 = vrot.slane %v9377_v52, %v14917_v41 }
 0x923   :  { %4845 = vrot.lane.b32.xlu0 %v4837_v42, %s9605_s12  ;;  %5189 = vrot.lane.b32.xlu1 %v5178_v22, %s9611_s26  ;;  %v4778_v42 = vcombine.low %v4772_v38, %v4772_v38  ;;  %v4779_v50 = vcombine.low %v4773_v44, %v4773_v44  ;;  %v9379_v22 = vld [vmem:[%s14783_s2 + $0x7] ss:$8 sm:$0xf]  ;;  %v5949_v35 = vrot.slane %v9377_v52, %v14918_v26 }
 0x924   :  { %v6157_v15 = vrot.slane %v9379_v22, %v14916_v25  ;;  %v6161_v47 = vrot.slane %v9379_v22, %v14917_v41  ;;  %v5817_v16 = vrot.slane %v9376_v45, %v14916_v25  ;;  %v5709_v21 = vrot.slane %v9375_v31, %v14916_v25 }
 0x925   :  { %v5717_v8 = vrot.slane %v9375_v31, %v14918_v26 }
 0x927   :  { %4782 = vrot.lane.b32.xlu0 %v12459_v58, %s9606_s17  ;;  %5126 = vrot.lane.b32.xlu1 %v5112_v18, %s9612_s27  ;;  %v6165_v58 = vrot.slane %v9379_v22, %v14918_v26  ;;  %v14919_v18 = vld [vmem:[#allocation12_spill] sm:$0xff] }
 0x928   :  { %v6169_v46 = vrot.slane %v9379_v22, %v14919_v18  ;;  %v5953_v60 = vrot.slane %v9377_v52, %v14919_v18  ;;  %v5829_v2 = vrot.slane %v9376_v45, %v14919_v18 }
 0x92b   :  { %5058 = vrot.lane.b32.xlu0 %v5047_v33, %s9609_s23  ;;  %4995 = vrot.lane.b32.xlu1 %v4981_v4, %s9610_s25  ;;  %v6061_v33 = vrot.slane %v9378_v24, %v14919_v18  ;;  %v5941_v4 = vrot.slane %v9377_v52, %v14916_v25 }
 0x92f   :  { %4917 = vrot.lane.b32.xlu0 %v4903_v6, %s9608_s20  ;;  %4849 = vrot.lane.b32.xlu1 %v4838_v7, %s9605_s12  ;;  %v5821_v6 = vrot.slane %v9376_v45, %v14917_v41  ;;  %v5825_v7 = vrot.slane %v9376_v45, %v14918_v26 }
 0x933   :  { %4786 = vrot.lane.b32.xlu0 %v4772_v38, %s9606_s17  ;;  %4853 = vrot.lane.b32.xlu1 %v4839_v1, %s9605_s12  ;;  %v5129_v38 = vpop.permute.xlu0 %5128  ;;  %v5713_v1 = vrot.slane %v9375_v31, %v14917_v41 }
 0x937   :  { %5187 = vrot.lane.b32.xlu0 %v5183_v59, %s9611_s26  ;;  %4718 = vrot.lane.b32.xlu1 %v4707_v57, %s9604_s1  ;;  %v12592_v59 = vpop.permute.xlu1 %5193  ;;  %v9374_v57 = vld [vmem:[%s14783_s2 + $0x1] ss:$8 sm:$0xf]  ;;  %v4998_v54 = vpop.permute.xlu0 %4997 }
 0x93b   :  { %5120 = vrot.lane.b32.xlu0 %v5117_v11, %s9612_s27  ;;  %4722 = vrot.lane.b32.xlu1 %v4708_v63, %s9604_s1  ;;  %v5721_v11 = vrot.slane %v9375_v31, %v14919_v18  ;;  %v5601_v63 = vrot.slane %v9374_v57, %v14916_v25 }
 0x93f   :  { %4847 = vrot.lane.b32.xlu0 %v4843_v53, %s9605_s12  ;;  %5056 = vrot.lane.b32.xlu1 %v5052_v20, %s9609_s23  ;;  %v5605_v53 = vrot.slane %v9374_v57, %v14917_v41 }
 0x943   :  { %4716 = vrot.lane.b32.xlu0 %v4712_v49, %s9604_s1  ;;  %4989 = vrot.lane.b32.xlu1 %v4986_v17, %s9610_s25  ;;  %v5488_v17 = vld [vmem:[%s14783_s2] ss:$8 sm:$0xf] }
 0x944   :  { %v5497_v23 = vrot.slane %v5488_v17, %v14917_v41 }
 0x947   :  { %5191 = vrot.lane.b32.xlu0 %v5184_v37, %s9611_s26  ;;  %4911 = vrot.lane.b32.xlu1 %v4908_v36, %s9608_s20  ;;  %v5613_v37 = vrot.slane %v9374_v57, %v14919_v18  ;;  %v5493_v36 = vrot.slane %v5488_v17, %v14916_v25 }
 0x94b   :  { %5124 = vrot.lane.b32.xlu0 %v5118_v40, %s9612_s27  ;;  %5060 = vrot.lane.b32.xlu1 %v5053_v43, %s9609_s23 }
 0x94f   :  { %4993 = vrot.lane.b32.xlu0 %v4987_v61, %s9610_s25  ;;  %4915 = vrot.lane.b32.xlu1 %v4909_v19, %s9608_s20  ;;  %v5501_v61 = vrot.slane %v5488_v17, %v14918_v26  ;;  %v9380_v19 = vld [vmem:[%s14783_s2 + $0x20] ss:$8 sm:$0xf] }
 0x950   :  { %v6265_v9 = vrot.slane %v9380_v19, %v14916_v25 }
 0x953   :  { %4851 = vrot.lane.b32.xlu0 %v4844_v0, %s9605_s12  ;;  %4919 = vrot.lane.b32.xlu1 %v4910_v34, %s9608_s20  ;;  %v5505_v34 = vrot.slane %v5488_v17, %v14919_v18 }
 0x957   :  { %4720 = vrot.lane.b32.xlu0 %v4713_v28, %s9604_s1  ;;  %4784 = vrot.lane.b32.xlu1 %v4778_v42, %s9606_s17 }
 0x95b   :  { %4714 = vrot.lane.b32.xlu0 %v4706_v39, %s9604_s1  ;;  %4788 = vrot.lane.b32.xlu1 %v4779_v50, %s9606_s17  ;;  %v5609_v39 = vrot.slane %v9374_v57, %v14918_v26  ;;  %v6269_v50 = vrot.slane %v9380_v19, %v14917_v41 }
 0x95f   :  { %5239 = vperm.xlu0 %9443, %v9357_v3   ;;  %4780 = vrot.lane.b32.xlu1 %v4777_v10, %s9606_s17  ;;  %v6273_v3 = vrot.slane %v9380_v19, %v14918_v26 }
 0x963   :  { %5234 = vperm.xlu1 %9444, %v9356_v29   ;;  %6170 = vrot.lane.b32.xlu0 %v6157_v15, %s9606_s17  ;;  %v6277_v15 = vrot.slane %v9380_v19, %v14919_v18 }
 0x967   :  { %6172 = vrot.lane.b32.xlu1 %v6161_v47, %s9606_s17  ;;  %6174 = vrot.lane.b32.xlu0 %v6165_v58, %s9606_s17 }
 0x96b   :  { %6176 = vrot.lane.b32.xlu1 %v6169_v46, %s9606_s17  ;;  %6062 = vrot.lane.b32.xlu0 %v6049_v30, %s9605_s12 }
 0x96f   :  { %6064 = vrot.lane.b32.xlu1 %v6053_v14, %s9605_s12  ;;  %6066 = vrot.lane.b32.xlu0 %v6057_v13, %s9605_s12 }
 0x973   :  { %6068 = vrot.lane.b32.xlu1 %v6061_v33, %s9605_s12  ;;  %5954 = vrot.lane.b32.xlu0 %v5941_v4, %s9608_s20 }
 0x977   :  { %5956 = vrot.lane.b32.xlu1 %v5945_v12, %s9608_s20  ;;  %5958 = vrot.lane.b32.xlu0 %v5949_v35, %s9608_s20 }
 0x97b   :  { %5960 = vrot.lane.b32.xlu1 %v5953_v60, %s9608_s20  ;;  %5830 = vrot.lane.b32.xlu0 %v5817_v16, %s9610_s25 }
 0x97f   :  { %5832 = vrot.lane.b32.xlu1 %v5821_v6, %s9610_s25  ;;  %5834 = vrot.lane.b32.xlu0 %v5825_v7, %s9610_s25 }
 0x983   :  { %5836 = vrot.lane.b32.xlu1 %v5829_v2, %s9610_s25  ;;  %5722 = vrot.lane.b32.xlu0 %v5709_v21, %s9609_s23 }
 0x987   :  { %5724 = vrot.lane.b32.xlu1 %v5713_v1, %s9609_s23  ;;  %5726 = vrot.lane.b32.xlu0 %v5717_v8, %s9609_s23 }
 0x989   :  { %v12601_v62 = vpop.permute.xlu1 %5122  ;;  %v5186_v20 = vpop.permute.xlu0 %5185 }
 0x98b   :  { %5728 = vrot.lane.b32.xlu1 %v5721_v11, %s9609_s23  ;;  %5614 = vrot.lane.b32.xlu0 %v5601_v63, %s9612_s27 }
 0x98d   :  { %v5055_v49 = vpop.permute.xlu1 %5054 }
 0x98f   :  { %5616 = vrot.lane.b32.xlu1 %v5605_v53, %s9612_s27  ;;  %5618 = vrot.lane.b32.xlu0 %v5609_v39, %s9612_s27 }
 0x991   :  { %v12614_v40 = vpop.permute.xlu0 %4913  ;;  %v12616_v43 = vpop.permute.xlu1 %4991 }
 0x993   :  { %5620 = vrot.lane.b32.xlu1 %v5613_v37, %s9612_s27  ;;  %5506 = vrot.lane.b32.xlu0 %v5493_v36, %s9611_s26 }
 0x995   :  { %v4846_v55 = vpop.permute.xlu0 %4845  ;;  %v5190_v0 = vpop.permute.xlu1 %5189 }
 0x997   :  { %5508 = vrot.lane.b32.xlu1 %v5497_v23, %s9611_s26  ;;  %5510 = vrot.lane.b32.xlu0 %v5501_v61, %s9611_s26 }
 0x999   :  { %v12629_v28 = vpop.permute.xlu0 %4782  ;;  %v5127_v44 = vpop.permute.xlu1 %5126 }
 0x99a   :  { %v5133_v42 = vsel %vm159_vm5, %v5127_v44, %v5129_v38 }
 0x99b   :  { %5141 = vst [vmem:[#allocation4 + $0x60] sm:$0xf0] %v5133_v42  ;;  %5512 = vrot.lane.b32.xlu1 %v5505_v34, %s9611_s26  ;;  %6278 = vrot.lane.b32.xlu0 %v6265_v9, %s9604_s1 }
 0x99d   :  { %v5059_v10 = vpop.permute.xlu0 %5058  ;;  %v4996_v29 = vpop.permute.xlu1 %4995 }
 0x99e   :  { %v5002_v22 = vsel %vm296_vm1, %v4996_v29, %v4998_v54 }
 0x99f   :  { %5010 = vst [vmem:[#allocation4 + $0x40] sm:$0xf0] %v5002_v22  ;;  %6280 = vrot.lane.b32.xlu1 %v6269_v50, %s9604_s1  ;;  %6282 = vrot.lane.b32.xlu0 %v6273_v3, %s9604_s1 }
 0x9a1   :  { %v12640_v47 = vpop.permute.xlu0 %4917  ;;  %v12642_v58 = vpop.permute.xlu1 %4849 }
 0x9a3   :  { %6284 = vrot.lane.b32.xlu1 %v6277_v15, %s9604_s1 }
 0x9a5   :  { %v12645_v24 = vpop.permute.xlu0 %4786  ;;  %v12647_v46 = vpop.permute.xlu1 %4853 }
 0x9a6   :  { %v5220_v22 = vld [vmem:[#allocation4 + $0x40] sm:$0xff] }
 0x9a9   :  { %v5188_v30 = vpop.permute.xlu0 %5187  ;;  %v12651_v52 = vpop.permute.xlu1 %4718 }
 0x9aa   :  { %v5195_v14 = vsel %vm90_vm8, %v5186_v20, %v5188_v30  ;;  %v5196_v13 = vsel %vm90_vm8, %v5188_v30, %v5190_v0 }
 0x9ab   :  { %5203 = vst [vmem:[#allocation4 + $0x20] sm:$0xf] %v5195_v14  ;;  %5204 = vst [vmem:[#allocation4 + $0x48] sm:$0xf] %v5196_v13 }
 0x9ad   :  { %v5121_v33 = vpop.permute.xlu0 %5120  ;;  %v12655_v12 = vpop.permute.xlu1 %4722 }
 0x9ae   :  { %v5130_v4 = vsel %vm159_vm5, %v5121_v33, %v12601_v62 }
 0x9af   :  { %5138 = vst [vmem:[#allocation4 + $0x58] sm:$0xf0] %v5130_v4 }
 0x9b1   :  { %v4848_v35 = vpop.permute.xlu0 %4847  ;;  %v5057_v7 = vpop.permute.xlu1 %5056 }
 0x9b2   :  { %v4855_v45 = vsel %vm253_vm6, %v4846_v55, %v4848_v35  ;;  %v4856_v60 = vsel %vm253_vm6, %v4848_v35, %v12642_v58  ;;  %v5226_v16 = vld [vmem:[#allocation4 + $0x48] sm:$0xf]  ;;  %v5225_v6 = vld [vmem:[#allocation4 + $0x20] sm:$0xf]  ;;  %v5064_v31 = vsel %vm228_vm2, %v5055_v49, %v5057_v7  ;;  %v5065_v2 = vsel %vm228_vm2, %v5057_v7, %v5059_v10 }
 0x9b3   :  { %4863 = vst [vmem:[#allocation4 + $0x30] sm:$0xf] %v4855_v45  ;;  %4864 = vst [vmem:[#allocation4 + $0x68] sm:$0xf] %v4856_v60  ;;  %9358 = vmatprep.subr.msk.mxu0 %vm92_vm4, %v5226_v16 }
 0x9b4   :  { %9359 = vmatpush1.msk.msra.mxu0 %vm92_vm4, %v5225_v6  ;;  %5072 = vst [vmem:[#allocation4 + $0x58] sm:$0xf] %v5064_v31  ;;  %5073 = vst [vmem:[#allocation4 + $0x10] sm:$0xf] %v5065_v2 }
 0x9b5   :  { %v12664_v21 = vpop.permute.xlu0 %4716  ;;  %v4990_v1 = vpop.permute.xlu1 %4989 }
 0x9b6   :  { %v4725_v38 = vsel %vm116_vm0, %v12664_v21, %v12651_v52  ;;  %v4999_v8 = vsel %vm296_vm1, %v4990_v1, %v12616_v43 }
 0x9b7   :  { %4733 = vst [vmem:[#allocation4 + $0x38] sm:$0xf] %v4725_v38  ;;  %5007 = vst [vmem:[#allocation4 + $0x8] sm:$0xf0] %v4999_v8 }
 0x9b9   :  { %v5192_v57 = vpop.permute.xlu0 %5191  ;;  %v4912_v63 = vpop.permute.xlu1 %4911 }
 0x9ba   :  { %v5197_v54 = vsel %vm90_vm8, %v5190_v0, %v5192_v57  ;;  %v5198_v11 = vsel %vm90_vm8, %v5192_v57, %v12592_v59  ;;  %v4921_v53 = vsel %vm322_vm7, %v4912_v63, %v12614_v40 }
 0x9bb   :  { %5205 = vst [vmem:[#allocation4 + $0x70] sm:$0xf] %v5197_v54  ;;  %5206 = vst [vmem:[#allocation4 + $0x90] sm:$0xf] %v5198_v11 }
 0x9bc   :  { %4929 = vst [vmem:[#allocation4 + $0x30] sm:$0xf0] %v4921_v53 }
 0x9bd   :  { %v5125_v39 = vpop.permute.xlu0 %5124  ;;  %v5061_v17 = vpop.permute.xlu1 %5060 }
 0x9be   :  { %v5131_v20 = vsel %vm159_vm5, %v12601_v62, %v5125_v39  ;;  %v5132_v49 = vsel %vm159_vm5, %v5125_v39, %v5127_v44  ;;  %v5066_v37 = vsel %vm228_vm2, %v5059_v10, %v5061_v17  ;;  %v5067_v59 = vsel %vm228_vm2, %v5061_v17, %v12575_v32 }
 0x9bf   :  { %5139 = vst [vmem:[#allocation4 + $0x10] sm:$0xf0] %v5131_v20  ;;  %5140 = vst [vmem:[#allocation4 + $0x98] sm:$0xf0] %v5132_v49 }
 0x9c0   :  { %5074 = vst [vmem:[#allocation4 + $0x98] sm:$0xf] %v5066_v37  ;;  %5075 = vst [vmem:[#allocation4 + $0x60] sm:$0xf] %v5067_v59 }
 0x9c1   :  { %v4994_v36 = vpop.permute.xlu0 %4993  ;;  %v4916_v19 = vpop.permute.xlu1 %4915 }
 0x9c2   :  { %v5000_v23 = vsel %vm296_vm1, %v12616_v43, %v4994_v36  ;;  %v5001_v61 = vsel %vm296_vm1, %v4994_v36, %v4996_v29  ;;  %v5228_v55 = vld [vmem:[#allocation4 + $0x90] sm:$0xf]  ;;  %v4922_v0 = vsel %vm322_vm7, %v12614_v40, %v4916_v19  ;;  %v4923_v32 = vsel %vm322_vm7, %v4916_v19, %v12640_v47  ;;  %v5221_v40 = vld [vmem:[#allocation4 + $0x58] sm:$0xff] }
 0x9c3   :  { %v5227_v62 = vld [vmem:[#allocation4 + $0x70] sm:$0xf]  ;;  %5008 = vst [vmem:[#allocation4 + $0x88] sm:$0xf0] %v5000_v23  ;;  %5009 = vst [vmem:[#allocation4 + $0x28] sm:$0xf0] %v5001_v61  ;;  %9362 = vmatprep.subr.msk.mxu1 %vm92_vm4, %v5228_v55 }
 0x9c4   :  { %9363 = vmatpush1.msk.msra.mxu1 %vm92_vm4, %v5227_v62  ;;  %4930 = vst [vmem:[#allocation4 + $0x68] sm:$0xf0] %v4922_v0  ;;  %4931 = vst [vmem:[#allocation4 + $0x78] sm:$0xf0] %v4923_v32 }
 0x9c5   :  { %v4852_v43 = vpop.permute.xlu0 %4851  ;;  %v4920_v42 = vpop.permute.xlu1 %4919 }
 0x9c6   :  { %v4857_v34 = vsel %vm253_vm6, %v12642_v58, %v4852_v43  ;;  %v4858_v9 = vsel %vm253_vm6, %v4852_v43, %v12647_v46  ;;  %v5222_v44 = vld [vmem:[#allocation4 + $0x10] sm:$0xff]  ;;  %v4924_v50 = vsel %vm322_vm7, %v12640_v47, %v4920_v42  ;;  %v5217_v47 = vld [vmem:[#allocation4 + $0x8] sm:$0xff] }
 0x9c7   :  { %4865 = vst [vmem:[#allocation4 + $0x78] sm:$0xf] %v4857_v34  ;;  %4866 = vst [vmem:[#allocation4 + $0x80] sm:$0xf] %v4858_v9  ;;  %5284 = vmatprep.subr.mxu0 %v5222_v44  ;;  %v5224_v3 = vld [vmem:[#allocation4 + $0x60] sm:$0xff]  ;;  %v5223_v10 = vld [vmem:[#allocation4 + $0x98] sm:$0xff] }
 0x9c8   :  { %5285 = vmatpush1.msra.mxu0 %v5221_v40  ;;  %4932 = vst [vmem:[#allocation4 + $0x80] sm:$0xf0] %v4924_v50  ;;  %5361 = vmatprep.subr.mxu1 %v5224_v3 }
 0x9c9   :  { %v4721_v29 = vpop.permute.xlu0 %4720  ;;  %5362 = vmatpush1.msra.mxu1 %v5223_v10  ;;  %v4785_v30 = vpop.permute.xlu1 %4784 }
 0x9ca   :  { %v4726_v15 = vsel %vm116_vm0, %v12651_v52, %v4721_v29  ;;  %v4727_v58 = vsel %vm116_vm0, %v4721_v29, %v12655_v12  ;;  %v5218_v46 = vld [vmem:[#allocation4 + $0x88] sm:$0xff]  ;;  %5363 = vmatprep.subr.mxu1 %v5220_v22  ;;  %v4791_v13 = vsel %vm185_vm3, %v12629_v28, %v4785_v30  ;;  %v4792_v33 = vsel %vm185_vm3, %v4785_v30, %v12645_v24  ;;  %v5213_v12 = vld [vmem:[#allocation4 + $0x30] sm:$0xff] }
 0x9cb   :  { %v5219_v14 = vld [vmem:[#allocation4 + $0x28] sm:$0xff]  ;;  %4734 = vst [vmem:[#allocation4 + $0x50] sm:$0xf] %v4726_v15  ;;  %4735 = vst [vmem:[#allocation4 + $0x18] sm:$0xf] %v4727_v58  ;;  %5286 = vmatprep.subr.mxu0 %v5218_v46 }
 0x9cc   :  { %5364 = vmatpush1.msra.mxu1 %v5219_v14  ;;  %5287 = vmatpush1.msra.mxu0 %v5217_v47  ;;  %4799 = vst [vmem:[#allocation4 + $0x38] sm:$0xf0] %v4791_v13  ;;  %4800 = vst [vmem:[#allocation4 + $0x50] sm:$0xf0] %v4792_v33  ;;  %v5214_v52 = vld [vmem:[#allocation4 + $0x68] sm:$0xff] }
 0x9cd   :  { %v4715_v4 = vpop.permute.xlu0 %4714  ;;  %5288 = vmatprep.subr.mxu0 %v5214_v52  ;;  %v4789_v45 = vpop.permute.xlu1 %4788 }
 0x9ce   :  { %v4724_v35 = vsel %vm116_vm0, %v4715_v4, %v12664_v21  ;;  %5289 = vmatpush1.msra.mxu0 %v5213_v12  ;;  %v5215_v60 = vld [vmem:[#allocation4 + $0x78] sm:$0xff]  ;;  %v4793_v16 = vsel %vm185_vm3, %v12645_v24, %v4789_v45  ;;  %v5207_v21 = vld [vmem:[%s14786_s5] sm:$0xff] }
 0x9cf   :  { %4732 = vst [vmem:[#allocation4] sm:$0xf] %v4724_v35  ;;  %v5216_v6 = vld [vmem:[#allocation4 + $0x80] sm:$0xff]  ;;  %4801 = vst [vmem:[#allocation4 + $0x18] sm:$0xf0] %v4793_v16 }
 0x9d0   :  { %5365 = vmatprep.subr.mxu1 %v5216_v6 }
 0x9d1   :  { %5366 = vmatpush1.msra.mxu1 %v5215_v60  ;;  %v4781_v7 = vpop.permute.xlu1 %4780 }
 0x9d2   :  { %v4790_v31 = vsel %vm185_vm3, %v4781_v7, %v12629_v28  ;;  %v5208_v28 = vld [vmem:[%s14786_s5 + $0x8] sm:$0xff] }
 0x9d3   :  { %v5210_v2 = vld [vmem:[#allocation4 + $0x38] sm:$0xff]  ;;  %4798 = vst [vmem:[#allocation4] sm:$0xf0] %v4790_v31  ;;  %v5211_v1 = vld [vmem:[#allocation4 + $0x50] sm:$0xff] }
 0x9d4   :  { %5290 = vmatprep.subr.mxu0 %v5210_v2 }
 0x9d6   :  { %v5212_v38 = vld [vmem:[#allocation4 + $0x18] sm:$0xff] }
 0x9d7   :  { %5367 = vmatprep.subr.mxu1 %v5212_v38 }
 0x9d8   :  { %5368 = vmatpush1.msra.mxu1 %v5211_v1 }
 0x9d9   :  { %9364 = vmatmul.mubr.msk.f32.vlgmr.msra.gmra.mxu1 %vm640_vm9, %v5207_v21 }
 0x9da   :  { %v12714_v24 = vpop.permute.xlu0 %5239  ;;  %v5209_v8 = vld [vmem:[#allocation4] sm:$0xff]  ;;  %5407 = vmatprep.mubr.f32.mxu1 %v14907_v27 }
 0x9db   :  { %5291 = vmatpush1.msra.mxu0 %v5209_v8 }
 0x9dc   :  { %9360 = vmatmul.mubr.msk.f32.vlgmr.msra.gmra.mxu0 %vm640_vm9, %v5207_v21 }
 0x9dd   :  { %9365 = vmatmul.mubr.msk.f32.gmra.mxu1 %vm640_vm9, %v5208_v28  ;;  %5330 = vmatprep.mubr.f32.mxu0 %v14907_v27 }
 0x9de   :  { %v12724_v57 = vpop.permute.xlu0 %6170  ;;  %v5235_v54 = vpop.permute.xlu1 %5234 }
 0x9e0   :  { %9361 = vmatmul.mubr.msk.f32.gmra.mxu0 %vm640_vm9, %v5208_v28 }
 0x9e2   :  { %v12727_v11 = vpop.permute.xlu0 %6174  ;;  %v12729_v63 = vpop.permute.xlu1 %6172 }
 0x9e3   :  { %v12795_v1 = vsel %vm185_vm3, %v12729_v63, %v12727_v11 }
 0x9e6   :  { %v12731_v53 = vpop.permute.xlu0 %6062  ;;  %v12733_v39 = vpop.permute.xlu1 %6176 }
 0x9e7   :  { %v6190_v20 = vmul.f32 0.0, %v12733_v39 }
 0x9e9   :  { %6214 = vrot.lane.b32.xlu0 %v6190_v20, %s9612_s27  ;;  %6224 = vrot.lane.b32.xlu1 %v6190_v20, %s9612_s27 }
 0x9ea   :  { %v12736_v49 = vpop.permute.xlu0 %6066  ;;  %v12740_v17 = vpop.permute.xlu1 %6064 }
 0x9ee   :  { %v12742_v37 = vpop.permute.xlu0 %5954  ;;  %v12744_v59 = vpop.permute.xlu1 %6068 }
 0x9ef   :  { %v6082_v36 = vmul.f32 0.0, %v12744_v59 }
 0x9f1   :  { %6106 = vrot.lane.b32.xlu0 %v6082_v36, %s9609_s23  ;;  %6116 = vrot.lane.b32.xlu1 %v6082_v36, %s9609_s23 }
 0x9f2   :  { %v12749_v23 = vpop.permute.xlu1 %5956  ;;  %v12751_v61 = vpop.permute.xlu0 %5958 }
 0x9f6   :  { %v12753_v55 = vpop.permute.xlu1 %5960  ;;  %v12756_v19 = vpop.permute.xlu0 %5830 }
 0x9f7   :  { %v5974_v62 = vmul.f32 0.0, %v12753_v55  ;;  %v5846_v0 = vmul.f32 0.0, %v12756_v19 }
 0x9f9   :  { %5998 = vrot.lane.b32.xlu0 %v5974_v62, %s9610_s25  ;;  %6008 = vrot.lane.b32.xlu1 %v5974_v62, %s9610_s25 }
 0x9fa   :  { %v12763_v32 = vpop.permute.xlu0 %5834  ;;  %v5833_v6 = vpop.permute.xlu1 %5832 }
 0x9fd   :  { %5866 = vrot.lane.b32.xlu1 %v5846_v0, %s9608_s20  ;;  %5876 = vrot.lane.b32.xlu0 %v5846_v0, %s9608_s20 }
 0x9fe   :  { %v12765_v43 = vpop.permute.xlu0 %5722  ;;  %v12797_v8 = vpop.permute.xlu1 %5836 }
 0x9ff   :  { %v5738_v44 = vmul.f32 0.0, %v12765_v43 }
 0xa01   :  { %5768 = vrot.lane.b32.xlu0 %v5738_v44, %s9605_s12  ;;  %5758 = vrot.lane.b32.xlu1 %v5738_v44, %s9605_s12  ;;  %v12807_v44 = vsel %vm253_vm6, %v12740_v17, %v12736_v49 }
 0xa02   :  { %v12767_v34 = vpop.permute.xlu0 %5726  ;;  %v5725_v62 = vpop.permute.xlu1 %5724 }
 0xa06   :  { %v12769_v9 = vpop.permute.xlu0 %5614 }
 0xa07   :  { %v5630_v40 = vmul.f32 0.0, %v12769_v9 }
 0xa09   :  { %5660 = vrot.lane.b32.xlu0 %v5630_v40, %s9606_s17  ;;  %5650 = vrot.lane.b32.xlu1 %v5630_v40, %s9606_s17 }
 0xa0a   :  { %v12772_v42 = vpop.permute.xlu0 %5618 }
 0xa0e   :  { %v12779_v50 = vpop.permute.xlu0 %5506 }
 0xa0f   :  { %v12782_v3 = vmul.f32 0.0, %v12779_v50 }
 0xa11   :  { %5552 = vrot.lane.b32.xlu0 %v12782_v3, %s9604_s1 }
 0xa99   :  { %v5403_v10 = vpop.f32.mrf.mxu1 }
 0xa9a   :  { %v5404_v29 = vadd.f32 %v5403_v10, %v5235_v54 }
 0xa9b   :  { %v5405_v13 = vpop.f32.mrf.mxu1 }
 0xa9c   :  { %v9368_v22 = vmul.f32 -1.442695, %v5404_v29  ;;  %v5326_v15 = vpop.f32.mrf.mxu0  ;;  %v5406_v4 = vadd.f32 %v5405_v13, %v5235_v54  ;;  %v12832_v13 = vsel %vm296_vm1, %v5833_v6, %v12763_v32 }
 0xa9d   :  { %v5327_v58 = vadd.f32 %v5326_v15, %v5235_v54  ;;  %v12820_v15 = vsel %vm322_vm7, %v12749_v23, %v12751_v61 }
 0xa9e   :  { %9515 = vpow2.f32 %v9368_v22  ;;  %v5328_v46 = vpop.f32.mrf.mxu0  ;;  %v9369_v45 = vmul.f32 -1.442695, %v5406_v4  ;;  %v12813_v22 = vpop.permute.xlu1 %5728 }
 0xa9f   :  { %v9366_v30 = vmul.f32 -1.442695, %v5327_v58  ;;  %v5329_v14 = vadd.f32 %v5328_v46, %v5235_v54 }
 0xaa0   :  { %v5332_v16 = vpop.f32.mrf.mxu0 }
 0xaa1   :  { %9517 = vpow2.f32 %v9366_v30  ;;  %v9367_v47 = vmul.f32 -1.442695, %v5329_v14  ;;  %v12787_v31 = vadd.f32 %v5332_v16, %v12714_v24 }
 0xaa3   :  { %9519 = vpow2.f32 %v9367_v47  ;;  %v9370_v21 = vmul.f32 -1.442695, %v12787_v31 }
 0xaab   :  { %v9516_v33 = vpop.eup %9515 }
 0xaac   :  { %v5440_v52 = vadd.f32 1.0, %v9516_v33  ;;  %v5617_v33 = vpop.permute.xlu1 %5616 }
 0xaae   :  { %v9518_v12 = vpop.eup %9517  ;;  %9521 = vrcp.f32 %v5440_v52 }
 0xaaf   :  { %v5438_v35 = vadd.f32 1.0, %v9518_v12 }
 0xab0   :  { %v9520_v60 = vpop.eup %9519 }
 0xab1   :  { %9523 = vrcp.f32 %v5438_v35  ;;  %v5439_v7 = vadd.f32 1.0, %v9520_v60  ;;  %v5409_v35 = vpop.f32.mrf.mxu1  ;;  %v12846_v60 = vsel %vm228_vm2, %v5725_v62, %v12767_v34 }
 0xab2   :  { %9525 = vpow2.f32 %v9369_v45  ;;  %v12841_v45 = vsel %vm296_vm1, %v12756_v19, %v5833_v6  ;;  %v12857_v19 = vsel %vm159_vm5, %v5617_v33, %v12772_v42  ;;  %v12859_v6 = vpop.permute.xlu1 %5620 }
 0xab3   :  { %9527 = vrcp.f32 %v5439_v7  ;;  %v12851_v7 = vadd.f32 %v5409_v35, %v12714_v24  ;;  %v5732_v35 = vsel %vm228_vm2, %v12767_v34, %v12813_v22 }
 0xab4   :  { %9529 = vpow2.f32 %v9370_v21 }
 0xabb   :  { %v9522_v2 = vpop.eup %9521 }
 0xabc   :  { %v12789_v38 = vmul.f32 %v9522_v2, %v5404_v29 }
 0xabe   :  { %v6188_v28 = vmul.f32 %v12795_v1, %v12789_v38  ;;  %v9524_v54 = vpop.eup %9523  ;;  %v6080_v10 = vmul.f32 %v12807_v44, %v12789_v38  ;;  %v5972_v30 = vmul.f32 %v12820_v15, %v12789_v38 }
 0xabf   :  { %v9526_v20 = vpop.eup %9525  ;;  %v12802_v36 = vmul.f32 %v9524_v54, %v5327_v58 }
 0xac0   :  { %6210 = vrot.lane.b32.xlu0 %v6188_v28, %s9612_s27  ;;  %v5441_v0 = vadd.f32 1.0, %v9526_v20  ;;  %v9528_v29 = vpop.eup %9527  ;;  %v5730_v28 = vsel %vm228_vm2, %v12765_v43, %v5725_v62  ;;  %v12876_v62 = vpop.permute.xlu1 %5508 }
 0xac1   :  { %v6186_v40 = vmul.f32 %v12724_v57, %v12802_v36  ;;  %v6078_v58 = vmul.f32 %v12731_v53, %v12802_v36  ;;  %v12824_v46 = vmul.f32 %v9528_v29, %v5329_v14  ;;  %v9530_v47 = vpop.eup %9529  ;;  %v5970_v52 = vmul.f32 %v12742_v37, %v12802_v36 }
 0xac2   :  { %9531 = vrcp.f32 %v5441_v0  ;;  %v5442_v12 = vadd.f32 1.0, %v9530_v47  ;;  %v5847_v16 = vmul.f32 %v12841_v45, %v12802_v36  ;;  %v5739_v54 = vmul.f32 %v5730_v28, %v12802_v36 }
 0xac3   :  { %6206 = vrot.lane.b32.xlu1 %v6186_v40, %s9612_s27  ;;  %v5848_v14 = vmul.f32 %v12832_v13, %v12824_v46  ;;  %v5740_v2 = vmul.f32 %v12846_v60, %v12824_v46  ;;  %v9372_v0 = vmul.f32 -1.442695, %v12851_v7  ;;  %v5632_v40 = vmul.f32 %v12857_v19, %v12824_v46 }
 0xac4   :  { %6102 = vrot.lane.b32.xlu0 %v6080_v10, %s9609_s23  ;;  %9533 = vrcp.f32 %v5442_v12  ;;  %v5622_v10 = vsel %vm159_vm5, %v12769_v9, %v5617_v33  ;;  %v12883_v29 = vsel %vm90_vm8, %v12779_v50, %v12876_v62  ;;  %v5840_v33 = vsel %vm296_vm1, %v12763_v32, %v12797_v8 }
 0xac5   :  { %v5631_v43 = vmul.f32 %v5622_v10, %v12802_v36  ;;  %9535 = vpow2.f32 %v9372_v0  ;;  %v5523_v9 = vmul.f32 %v12883_v29, %v12802_v36  ;;  %v5849_v50 = vmul.f32 %v5840_v33, %v12789_v38 }
 0xac7   :  { %6098 = vrot.lane.b32.xlu1 %v6078_v58, %s9609_s23  ;;  %v5334_v58 = vpop.f32.mrf.mxu0 }
 0xac8   :  { %5994 = vrot.lane.b32.xlu0 %v5972_v30, %s9610_s25 }
 0xacb   :  { %5990 = vrot.lane.b32.xlu1 %v5970_v52, %s9610_s25  ;;  %v12898_v52 = vadd.f32 %v5334_v58, %v12714_v24  ;;  %v12943_v58 = vsel %vm253_vm6, %v12731_v53, %v12740_v17 }
 0xacc   :  { %5870 = vrot.lane.b32.xlu0 %v5848_v14, %s9608_s20 }
 0xacd   :  { %v9371_v32 = vmul.f32 -1.442695, %v12898_v52 }
 0xacf   :  { %v9532_v21 = vpop.eup %9531  ;;  %5868 = vrot.lane.b32.xlu1 %v5847_v16, %s9608_s20  ;;  %v5741_v16 = vmul.f32 %v5732_v35, %v12789_v38  ;;  %9537 = vpow2.f32 %v9371_v32 }
 0xad0   :  { %5762 = vrot.lane.b32.xlu0 %v5740_v2, %s9605_s12  ;;  %v12866_v20 = vmul.f32 %v9532_v21, %v5406_v4 }
 0xad1   :  { %v9534_v47 = vpop.eup %9533 }
 0xad2   :  { %v5850_v4 = vmul.f32 %v12797_v8, %v12866_v20  ;;  %v5742_v30 = vmul.f32 %v12813_v22, %v12866_v20  ;;  %v12901_v12 = vmul.f32 %v9534_v47, %v12787_v31  ;;  %v5634_v14 = vmul.f32 %v12859_v6, %v12866_v20  ;;  %v9536_v21 = vpop.eup %9535 }
 0xad3   :  { %5760 = vrot.lane.b32.xlu1 %v5739_v54, %s9605_s12  ;;  %v12915_v31 = vsel %vm159_vm5, %v12772_v42, %v12859_v6  ;;  %v5444_v54 = vadd.f32 1.0, %v9536_v21  ;;  %v12929_v42 = vsel %vm185_vm3, %v12724_v57, %v12729_v63 }
 0xad4   :  { %5654 = vrot.lane.b32.xlu0 %v5632_v40, %s9606_s17  ;;  %v6191_v2 = vmul.f32 %v12724_v57, %v12901_v12  ;;  %v5633_v34 = vmul.f32 %v12915_v31, %v12789_v38  ;;  %v6083_v0 = vmul.f32 %v12731_v53, %v12901_v12  ;;  %v5411_v40 = vpop.f32.mrf.mxu1  ;;  %v6079_v57 = vmul.f32 %v12943_v58, %v12824_v46 }
 0xad5   :  { %9539 = vrcp.f32 %v5444_v54  ;;  %v5744_v47 = vmul.f32 %v5730_v28, %v12901_v12  ;;  %v6072_v28 = vsel %vm253_vm6, %v12736_v49, %v12744_v59 }
 0xad7   :  { %5652 = vrot.lane.b32.xlu1 %v5631_v43, %s9606_s17  ;;  %v6187_v43 = vmul.f32 %v12929_v42, %v12824_v46 }
 0xad8   :  { %5874 = vrot.lane.b32.xlu0 %v5850_v4, %s9608_s20  ;;  %v12935_v4 = vadd.f32 %v5411_v40, %v12714_v24  ;;  %v5852_v24 = vmul.f32 %v12841_v45, %v12901_v12  ;;  %v12965_v45 = vsel %vm185_vm3, %v12727_v11, %v12733_v39  ;;  %v6081_v11 = vmul.f32 %v6072_v28, %v12866_v20 }
 0xada   :  { %v9373_v63 = vmul.f32 -1.442695, %v12935_v4 }
 0xadb   :  { %5544 = vrot.lane.b32.xlu1 %v5523_v9, %s9604_s1  ;;  %v5975_v9 = vmul.f32 %v12742_v37, %v12901_v12 }
 0xadc   :  { %5766 = vrot.lane.b32.xlu0 %v5742_v30, %s9605_s12  ;;  %v12955_v30 = vsel %vm322_vm7, %v12742_v37, %v12749_v23  ;;  %v9538_v17 = vpop.eup %9537  ;;  %9541 = vpow2.f32 %v9373_v63  ;;  %v6189_v23 = vmul.f32 %v12965_v45, %v12866_v20 }
 0xadd   :  { %v5971_v53 = vmul.f32 %v12955_v30, %v12824_v46  ;;  %v5443_v37 = vadd.f32 1.0, %v9538_v17 }
 0xadf   :  { %5872 = vrot.lane.b32.xlu1 %v5849_v50, %s9608_s20  ;;  %v5636_v50 = vmul.f32 %v5622_v10, %v12901_v12  ;;  %9543 = vrcp.f32 %v5443_v37  ;;  %v5964_v10 = vsel %vm322_vm7, %v12751_v61, %v12753_v55  ;;  %v13000_v55 = vpop.permute.xlu1 %5512 }
 0xae0   :  { %5658 = vrot.lane.b32.xlu0 %v5634_v14, %s9606_s17  ;;  %v5511_v14 = vpop.permute.xlu0 %5510  ;;  %v5973_v49 = vmul.f32 %v5964_v10, %v12866_v20 }
 0xae1   :  { %v5516_v40 = vsel %vm90_vm8, %v5511_v14, %v13000_v55 }
 0xae2   :  { %v9540_v32 = vpop.eup %9539 }
 0xae3   :  { %5764 = vrot.lane.b32.xlu1 %v5741_v16, %s9605_s12  ;;  %v12978_v39 = vmul.f32 %v9540_v32, %v12851_v7  ;;  %v5528_v16 = vmul.f32 %v12883_v29, %v12901_v12 }
 0xae4   :  { %6216 = vrot.lane.b32.xlu0 %v6191_v2, %s9612_s27  ;;  %v12986_v2 = vpop.permute.xlu0 %6278 }
 0xae5   :  { %v5854_v59 = vmul.f32 %v5840_v33, %v12978_v39  ;;  %v6193_v7 = vmul.f32 %v12795_v1, %v12978_v39  ;;  %v6085_v33 = vmul.f32 %v12807_v44, %v12978_v39  ;;  %v5977_v44 = vmul.f32 %v12820_v15, %v12978_v39 }
 0xae7   :  { %5656 = vrot.lane.b32.xlu1 %v5633_v34, %s9606_s17  ;;  %v5746_v34 = vmul.f32 %v5732_v35, %v12978_v39 }
 0xae8   :  { %6108 = vrot.lane.b32.xlu0 %v6083_v0, %s9609_s23  ;;  %v12996_v61 = vpop.permute.xlu0 %6282  ;;  %v5638_v0 = vmul.f32 %v12915_v31, %v12978_v39 }
 0xae9   :  { %v9542_v21 = vpop.eup %9541 }
 0xaea   :  { %v5445_v29 = vadd.f32 1.0, %v9542_v21 }
 0xaeb   :  { %6208 = vrot.lane.b32.xlu1 %v6187_v43, %s9612_s27  ;;  %v5530_v43 = vmul.f32 %v5516_v40, %v12978_v39 }
 0xaec   :  { %6000 = vrot.lane.b32.xlu0 %v5975_v9, %s9610_s25  ;;  %v9544_v54 = vpop.eup %9543  ;;  %9545 = vrcp.f32 %v5445_v29  ;;  %v13006_v1 = vpop.permute.xlu0 %6214 }
 0xaed   :  { %v13011_v35 = vmul.f32 %v9544_v54, %v12898_v52  ;;  %v6281_v9 = vpop.permute.xlu1 %6280 }
 0xaee   :  { %v6287_v32 = vsel %vm116_vm0, %v6281_v9, %v12996_v61 }
 0xaef   :  { %6100 = vrot.lane.b32.xlu1 %v6079_v57, %s9609_s23  ;;  %v5853_v57 = vmul.f32 %v12832_v13, %v13011_v35  ;;  %v6192_v52 = vmul.f32 %v12929_v42, %v13011_v35  ;;  %v5745_v15 = vmul.f32 %v12846_v60, %v13011_v35  ;;  %v5637_v13 = vmul.f32 %v12857_v19, %v13011_v35 }
 0xaf0   :  { %5878 = vrot.lane.b32.xlu0 %v5852_v24, %s9608_s20  ;;  %v13020_v31 = vpop.permute.xlu0 %6106  ;;  %v6084_v24 = vmul.f32 %v12943_v58, %v13011_v35  ;;  %v5976_v60 = vmul.f32 %v12955_v30, %v13011_v35  ;;  %v5515_v58 = vsel %vm90_vm8, %v12876_v62, %v5511_v14 }
 0xaf1   :  { %v6285_v63 = vpop.permute.xlu1 %6284 }
 0xaf3   :  { %5992 = vrot.lane.b32.xlu1 %v5971_v53, %s9610_s25 }
 0xaf4   :  { %5770 = vrot.lane.b32.xlu0 %v5744_v47, %s9605_s12  ;;  %v13032_v53 = vpop.permute.xlu0 %5998 }
 0xaf5   :  { %v13038_v42 = vpop.permute.xlu1 %6224 }
 0xaf7   :  { %6212 = vrot.lane.b32.xlu1 %v6189_v23, %s9612_s27  ;;  %v5529_v23 = vmul.f32 %v5515_v58, %v13011_v35 }
 0xaf8   :  { %5662 = vrot.lane.b32.xlu0 %v5636_v50, %s9606_s17  ;;  %v13049_v37 = vpop.permute.xlu0 %5876 }
 0xaf9   :  { %v9546_v17 = vpop.eup %9545  ;;  %v13054_v50 = vpop.permute.xlu1 %6116 }
 0xafa   :  { %v13041_v47 = vmul.f32 %v9546_v17, %v12935_v4  ;;  %v5525_v4 = vmul.f32 %v5516_v40, %v12789_v38  ;;  %v6299_v40 = vmul.f32 %v12986_v2, %v12901_v12  ;;  %v13125_v17 = vld [vmem:[%s14788_s7] sm:$0xff] }
 0xafb   :  { %6104 = vrot.lane.b32.xlu1 %v6081_v11, %s9609_s23  ;;  %14920 = vst [vmem:[#allocation24_spill] sm:$0xff] %v13125_v17 }
 0xafc   :  { %5554 = vrot.lane.b32.xlu0 %v5528_v16, %s9604_s1  ;;  %v6194_v19 = vmul.f32 %v12965_v45, %v13041_v47  ;;  %v6086_v30 = vmul.f32 %v6072_v28, %v13041_v47  ;;  %v13060_v62 = vpop.permute.xlu0 %5768  ;;  %v5978_v45 = vmul.f32 %v5964_v10, %v13041_v47  ;;  %v6301_v28 = vmul.f32 %v6287_v32, %v12978_v39 }
 0xafd   :  { %v13064_v14 = vpop.permute.xlu1 %6008  ;;  %v5524_v16 = vmul.f32 %v5515_v58, %v12824_v46  ;;  %v6298_v10 = vmul.f32 0.0, %v6285_v63 }
 0xaff   :  { %5996 = vrot.lane.b32.xlu1 %v5973_v49, %s9610_s25 }
 0xb00   :  { %5882 = vrot.lane.b32.xlu0 %v5854_v59, %s9608_s20  ;;  %v13072_v11 = vpop.permute.xlu0 %5660  ;;  %v6286_v59 = vsel %vm116_vm0, %v12986_v2, %v6281_v9  ;;  %v6296_v9 = vmul.f32 %v6287_v32, %v12789_v38 }
 0xb01   :  { %v13076_v49 = vpop.permute.xlu1 %5866  ;;  %v6295_v29 = vmul.f32 %v6286_v59, %v12824_v46 }
 0xb03   :  { %6220 = vrot.lane.b32.xlu1 %v6193_v7, %s9612_s27 }
 0xb04   :  { %5774 = vrot.lane.b32.xlu0 %v5746_v34, %s9605_s12  ;;  %v13084_v21 = vpop.permute.xlu0 %5552  ;;  %v6300_v34 = vmul.f32 %v6286_v59, %v13011_v35  ;;  %v6294_v59 = vmul.f32 %v12986_v2, %v12802_v36 }
 0xb05   :  { %v13086_v7 = vpop.permute.xlu1 %5758 }
 0xb07   :  { %6112 = vrot.lane.b32.xlu1 %v6085_v33, %s9609_s23 }
 0xb08   :  { %5666 = vrot.lane.b32.xlu0 %v5638_v0, %s9606_s17  ;;  %v5855_v0 = vmul.f32 %v12797_v8, %v13041_v47  ;;  %v5639_v8 = vmul.f32 %v12859_v6, %v13041_v47  ;;  %v5531_v6 = vmul.f32 %v13000_v55, %v13041_v47 }
 0xb09   :  { %v13093_v33 = vpop.permute.xlu1 %5650 }
 0xb0b   :  { %6004 = vrot.lane.b32.xlu1 %v5977_v44, %s9610_s25  ;;  %v5747_v44 = vmul.f32 %v12813_v22, %v13041_v47 }
 0xb0c   :  { %5558 = vrot.lane.b32.xlu0 %v5530_v43, %s9604_s1 }
 0xb0f   :  { %5880 = vrot.lane.b32.xlu1 %v5853_v57, %s9608_s20 }
 0xb10   :  { %6218 = vrot.lane.b32.xlu0 %v6192_v52, %s9612_s27  ;;  %v6288_v52 = vsel %vm116_vm0, %v12996_v61, %v6285_v63 }
 0xb11   :  { %v6302_v22 = vmul.f32 %v6288_v52, %v13041_v47 }
 0xb13   :  { %5772 = vrot.lane.b32.xlu1 %v5745_v15, %s9605_s12 }
 0xb14   :  { %6110 = vrot.lane.b32.xlu0 %v6084_v24, %s9609_s23 }
 0xb17   :  { %5664 = vrot.lane.b32.xlu1 %v5637_v13, %s9606_s17  ;;  %v6438_v13 = vcombine.high %v13125_v17, %v13125_v17  ;;  %v6676_v17 = vrot.slane %v9384_v56, %v14916_v25 }
 0xb18   :  { %6002 = vrot.lane.b32.xlu0 %v5976_v60, %s9610_s25  ;;  %v9390_v60 = vld [vmem:[%s14783_s2 + $0x20] ss:$8 sm:$0xf] }
 0xb19   :  { %9382 = vmatprep.mubr.msk.f32.mxu1 %vm185_vm3, %v6438_v13  ;;  %9381 = vmatprep.mubr.msk.f32.mxu0 %vm185_vm3, %v6438_v13  ;;  %v7090_v58 = vrot.slane %v9390_v60, %v14918_v26  ;;  %v7082_v32 = vrot.slane %v9390_v60, %v14916_v25  ;;  %v9387_v13 = vld [vmem:[%s14783_s2 + $0x5] ss:$8 sm:$0xf] }
 0xb1b   :  { %5556 = vrot.lane.b32.xlu1 %v5529_v23, %s9604_s1  ;;  %v6297_v23 = vmul.f32 %v6288_v52, %v12866_v20 }
 0xb1c   :  { %6222 = vrot.lane.b32.xlu0 %v6194_v19, %s9612_s27 }
 0xb1f   :  { %5548 = vrot.lane.b32.xlu1 %v5525_v4, %s9604_s1  ;;  %v6431_v4 = vld [vmem:[%s14789_s8] sm:$0xf] }
 0xb20   :  { %6114 = vrot.lane.b32.xlu0 %v6086_v30, %s9609_s23  ;;  %v9388_v30 = vld [vmem:[%s14783_s2 + $0x6] ss:$8 sm:$0xf] }
 0xb23   :  { %5542 = vrot.lane.b32.xlu1 %v12782_v3, %s9604_s1  ;;  %v5526_v3 = vmul.f32 %v13000_v55, %v12866_v20  ;;  %v7094_v55 = vrot.slane %v9390_v60, %v14919_v18 }
 0xb24   :  { %6006 = vrot.lane.b32.xlu0 %v5978_v45, %s9610_s25 }
 0xb27   :  { %6328 = vrot.lane.b32.xlu1 %v6301_v28, %s9611_s26  ;;  %v7086_v28 = vrot.slane %v9390_v60, %v14917_v41 }
 0xb28   :  { %5546 = vrot.lane.b32.xlu0 %v5524_v16, %s9604_s1  ;;  %v7096_v16 = vcombine.low %v7090_v58, %v7094_v55 }
 0xb2b   :  { %6332 = vrot.lane.b32.xlu1 %v6298_v10, %s9611_s26 }
 0xb2c   :  { %5550 = vrot.lane.b32.xlu0 %v5526_v3, %s9604_s1  ;;  %v6963_v3 = vrot.slane %v9388_v30, %v14919_v18 }
 0xb2f   :  { %6316 = vrot.lane.b32.xlu1 %v6295_v29, %s9611_s26 }
 0xb30   :  { %6326 = vrot.lane.b32.xlu0 %v6300_v34, %s9611_s26  ;;  %v9389_v34 = vld [vmem:[%s14783_s2 + $0x7] ss:$8 sm:$0xf] }
 0xb31   :  { %v7024_v2 = vrot.slane %v9389_v34, %v14918_v26  ;;  %v7028_v52 = vrot.slane %v9389_v34, %v14919_v18  ;;  %v7016_v58 = vrot.slane %v9389_v34, %v14916_v25  ;;  %v7020_v55 = vrot.slane %v9389_v34, %v14917_v41 }
 0xb32   :  { %v13096_v54 = vpop.permute.xlu0 %6210 }
 0xb33   :  { %5884 = vrot.lane.b32.xlu1 %v5855_v0, %s9608_s20 }
 0xb34   :  { %6324 = vrot.lane.b32.xlu0 %v6299_v40, %s9611_s26  ;;  %v7095_v40 = vcombine.low %v7082_v32, %v7086_v28  ;;  %v9385_v28 = vld [vmem:[%s14783_s2 + $0x2] ss:$8 sm:$0xf] }
 0xb35   :  { %v13106_v43 = vpop.permute.xlu1 %6206 }
 0xb36   :  { %v13109_v57 = vpop.permute.xlu0 %6102 }
 0xb37   :  { %5776 = vrot.lane.b32.xlu1 %v5747_v44, %s9605_s12  ;;  %v6951_v44 = vrot.slane %v9388_v30, %v14916_v25 }
 0xb38   :  { %6318 = vrot.lane.b32.xlu0 %v6296_v9, %s9611_s26  ;;  %v6955_v9 = vrot.slane %v9388_v30, %v14917_v41 }
 0xb39   :  { %v13117_v15 = vpop.permute.xlu1 %6098 }
 0xb3a   :  { %v13120_v24 = vpop.permute.xlu0 %5994  ;;  %v6964_v60 = vcombine.low %v6951_v44, %v6955_v9  ;;  %v6754_v44 = vrot.slane %v9385_v28, %v14919_v18 }
 0xb3b   :  { %5668 = vrot.lane.b32.xlu1 %v5639_v8, %s9606_s17 }
 0xb3c   :  { %6330 = vrot.lane.b32.xlu0 %v6302_v22, %s9611_s26 }
 0xb3d   :  { %v13133_v61 = vpop.permute.xlu1 %5990 }
 0xb3e   :  { %v13137_v63 = vpop.permute.xlu0 %5870 }
 0xb3f   :  { %5560 = vrot.lane.b32.xlu1 %v5531_v6, %s9604_s1 }
 0xb40   :  { %6322 = vrot.lane.b32.xlu0 %v6298_v10, %s9611_s26  ;;  %v6959_v10 = vrot.slane %v9388_v30, %v14918_v26  ;;  %v6897_v30 = vrot.slane %v9387_v13, %v14919_v18 }
 0xb41   :  { %v13147_v19 = vpop.permute.xlu1 %5868 }
 0xb42   :  { %v13155_v45 = vpop.permute.xlu0 %5762  ;;  %v6965_v8 = vcombine.low %v6959_v10, %v6963_v3  ;;  %v7029_v10 = vcombine.low %v7016_v58, %v7020_v55  ;;  %v6885_v3 = vrot.slane %v9387_v13, %v14916_v25 }
 0xb43   :  { %6320 = vrot.lane.b32.xlu1 %v6297_v23, %s9611_s26  ;;  %v7030_v23 = vcombine.low %v7024_v2, %v7028_v52 }
 0xb44   :  { %6434 = vperm.xlu0 %9443, %v6431_v4   ;;  %v6893_v4 = vrot.slane %v9387_v13, %v14918_v26 }
 0xb45   :  { %v13164_v29 = vpop.permute.xlu1 %5760 }
 0xb46   :  { %v13169_v0 = vpop.permute.xlu0 %5654  ;;  %v6899_v34 = vcombine.low %v6893_v4, %v6897_v30  ;;  %v6606_v30 = vld [vmem:[%s14783_s2] ss:$8 sm:$0xf] }
 0xb47   :  { %6314 = vrot.lane.b32.xlu1 %v6294_v59, %s9611_s26  ;;  %v6889_v59 = vrot.slane %v9387_v13, %v14917_v41  ;;  %v6742_v13 = vrot.slane %v9385_v28, %v14916_v25 }
 0xb48   :  { %7099 = vrot.lane.b32.xlu0 %v7096_v16, %s9604_s1 }
 0xb49   :  { %v13177_v22 = vpop.permute.xlu1 %5652  ;;  %v6898_v52 = vcombine.low %v6885_v3, %v6889_v59 }
 0xb4a   :  { %v13182_v6 = vpop.permute.xlu0 %5874 }
 0xb4b   :  { %7097 = vrot.lane.b32.xlu1 %v7095_v40, %s9604_s1  ;;  %v6750_v40 = vrot.slane %v9385_v28, %v14918_v26 }
 0xb4c   :  { %6968 = vrot.lane.b32.xlu0 %v6965_v8, %s9605_s12  ;;  %v9386_v8 = vld [vmem:[%s14783_s2 + $0x3] ss:$8 sm:$0xf] }
 0xb4d   :  { %v13190_v32 = vpop.permute.xlu1 %5544  ;;  %v6756_v58 = vcombine.low %v6750_v40, %v6754_v44  ;;  %v6815_v55 = vrot.slane %v9386_v8, %v14918_v26  ;;  %v6807_v3 = vrot.slane %v9386_v8, %v14916_v25  ;;  %v6623_v40 = vrot.slane %v6606_v30, %v14919_v18 }
 0xb4e   :  { %v13195_v16 = vpop.permute.xlu0 %5766 }
 0xb4f   :  { %14921 = vst [vmem:[#allocation13_spill] sm:$0xff] %v13195_v16  ;;  %6966 = vrot.lane.b32.xlu1 %v6964_v60, %s9605_s12  ;;  %v6746_v60 = vrot.slane %v9385_v28, %v14917_v41  ;;  %v6811_v28 = vrot.slane %v9386_v8, %v14917_v41 }
 0xb50   :  { %7033 = vrot.lane.b32.xlu0 %v7030_v23, %s9606_s17  ;;  %v6819_v23 = vrot.slane %v9386_v8, %v14919_v18  ;;  %v6615_v8 = vrot.slane %v6606_v30, %v14917_v41 }
 0xb51   :  { %v13203_v9 = vpop.permute.xlu1 %5872 }
 0xb52   :  { %v13208_v2 = vpop.permute.xlu0 %5658  ;;  %v6821_v59 = vcombine.low %v6815_v55, %v6819_v23  ;;  %v6688_v55 = vrot.slane %v9384_v56, %v14919_v18 }
 0xb53   :  { %14922 = vst [vmem:[#allocation15_spill] sm:$0xff] %v13208_v2  ;;  %7031 = vrot.lane.b32.xlu1 %v7029_v10, %s9606_s17  ;;  %v6755_v10 = vcombine.low %v6742_v13, %v6746_v60  ;;  %v6611_v13 = vrot.slane %v6606_v30, %v14916_v25 }
 0xb54   :  { %6902 = vrot.lane.b32.xlu0 %v6899_v34, %s9608_s20  ;;  %v6619_v34 = vrot.slane %v6606_v30, %v14918_v26 }
 0xb55   :  { %v13216_v4 = vpop.permute.xlu1 %5764  ;;  %v6624_v27 = vcombine.low %v6611_v13, %v6615_v8 }
 0xb56   :  { %14923 = vst [vmem:[#allocation19_spill] sm:$0xff] %v13216_v4  ;;  %v6217_v5 = vpop.permute.xlu0 %6216  ;;  %v6625_v60 = vcombine.low %v6619_v34, %v6623_v40 }
 0xb57   :  { %6900 = vrot.lane.b32.xlu1 %v6898_v52, %s9608_s20  ;;  %v6820_v52 = vcombine.low %v6807_v3, %v6811_v28 }
 0xb58   :  { %6759 = vrot.lane.b32.xlu0 %v6756_v58, %s9609_s23  ;;  %v6684_v58 = vrot.slane %v9384_v56, %v14918_v26 }
 0xb59   :  { %v13227_v44 = vpop.permute.xlu1 %5656 }
 0xb5a   :  { %14924 = vst [vmem:[#allocation22_spill] sm:$0xff] %v13227_v44  ;;  %v6109_v51 = vpop.permute.xlu0 %6108  ;;  %v6690_v3 = vcombine.low %v6684_v58, %v6688_v55 }
 0xb5b   :  { %6757 = vrot.lane.b32.xlu1 %v6755_v10, %s9609_s23  ;;  %v6680_v10 = vrot.slane %v9384_v56, %v14917_v41 }
 0xb5c   :  { %6824 = vrot.lane.b32.xlu0 %v6821_v59, %s9610_s25 }
 0xb5d   :  { %v6209_v23 = vpop.permute.xlu1 %6208  ;;  %v6689_v59 = vcombine.low %v6676_v17, %v6680_v10 }
 0xb5e   :  { %v6001_v48 = vpop.permute.xlu0 %6000  ;;  %v6227_v2 = vsel %vm159_vm5, %v6209_v23, %v13096_v54  ;;  %v6226_v4 = vsel %vm159_vm5, %v13106_v43, %v6209_v23 }
 0xb5f   :  { %6822 = vrot.lane.b32.xlu1 %v6820_v52, %s9610_s25 }
 0xb60   :  { %6628 = vrot.lane.b32.xlu0 %v6625_v60, %s9611_s26 }
 0xb61   :  { %v6101_v30 = vpop.permute.xlu1 %6100 }
 0xb62   :  { %v13242_v28 = vpop.permute.xlu0 %5878 }
 0xb63   :  { %6626 = vrot.lane.b32.xlu1 %v6624_v27, %s9611_s26 }
 0xb64   :  { %6693 = vrot.lane.b32.xlu0 %v6690_v3, %s9612_s27 }
 0xb65   :  { %v5993_v34 = vpop.permute.xlu1 %5992 }
 0xb66   :  { %v13246_v40 = vpop.permute.xlu0 %5770 }
 0xb67   :  { %6691 = vrot.lane.b32.xlu1 %v6689_v59, %s9612_s27 }
 0xb69   :  { %v6213_v52 = vpop.permute.xlu1 %6212 }
 0xb6a   :  { %v13249_v13 = vpop.permute.xlu0 %5662 }
 0xb6d   :  { %v13251_v56 = vpop.permute.xlu1 %6104 }
 0xb6e   :  { %v13253_v8 = vpop.permute.xlu0 %5554 }
 0xb71   :  { %v13255_v60 = vpop.permute.xlu1 %5996 }
 0xb72   :  { %v13257_v58 = vpop.permute.xlu0 %5882 }
 0xb75   :  { %v6221_v27 = vpop.permute.xlu1 %6220 }
 0xb76   :  { %v13259_v17 = vpop.permute.xlu0 %5774 }
 0xb77   :  { %14925 = vst [vmem:[#allocation18_spill] sm:$0xff] %v13259_v17 }
 0xb79   :  { %v6113_v55 = vpop.permute.xlu1 %6112 }
 0xb7a   :  { %v13261_v10 = vpop.permute.xlu0 %5666 }
 0xb7b   :  { %14926 = vst [vmem:[#allocation20_spill] sm:$0xff] %v13261_v10 }
 0xb7d   :  { %v13263_v3 = vpop.permute.xlu1 %6004 }
 0xb7e   :  { %v13265_v59 = vpop.permute.xlu0 %5558 }
 0xb7f   :  { %14927 = vst [vmem:[#allocation23_spill] sm:$0xff] %v13265_v59 }
 0xb81   :  { %v13267_v18 = vpop.permute.xlu1 %5880 }
 0xb82   :  { %v6219_v26 = vpop.permute.xlu0 %6218 }
 0xb83   :  { %v6231_v41 = vsel %vm159_vm5, %v6219_v26, %v6221_v27  ;;  %v6230_v25 = vsel %vm159_vm5, %v6217_v5, %v6219_v26  ;;  %v6119_v5 = vsel %vm228_vm2, %v6101_v30, %v13109_v57 }
 0xb84   :  { %6441 = vmatprep.subr.mxu0 %v6231_v41  ;;  %v6118_v41 = vsel %vm228_vm2, %v13117_v15, %v6101_v30  ;;  %v6229_v30 = vsel %vm159_vm5, %v6213_v52, %v13006_v1 }
 0xb85   :  { %v13271_v44 = vpop.permute.xlu1 %5772  ;;  %6442 = vmatpush1.msra.mxu0 %v6230_v25 }
 0xb86   :  { %6443 = vmatprep.subr.mxu0 %v6227_v2  ;;  %v6111_v10 = vpop.permute.xlu0 %6110 }
 0xb87   :  { %6444 = vmatpush1.msra.mxu0 %v6226_v4  ;;  %v6123_v59 = vsel %vm228_vm2, %v6111_v10, %v6113_v55  ;;  %v6122_v16 = vsel %vm228_vm2, %v6109_v51, %v6111_v10  ;;  %v6010_v4 = vsel %vm296_vm1, %v13133_v61, %v5993_v34 }
 0xb88   :  { %6445 = vmatprep.subr.mxu0 %v6123_v59 }
 0xb89   :  { %v13279_v17 = vpop.permute.xlu1 %5664  ;;  %6446 = vmatpush1.msra.mxu0 %v6122_v16  ;;  %v6011_v16 = vsel %vm296_vm1, %v5993_v34, %v13120_v24 }
 0xb8a   :  { %6447 = vmatprep.subr.mxu0 %v6119_v5  ;;  %v6003_v25 = vpop.permute.xlu0 %6002  ;;  %v5888_v5 = vsel %vm322_vm7, %v13137_v63, %v13203_v9 }
 0xb8b   :  { %6448 = vmatpush1.msra.mxu0 %v6118_v41  ;;  %v6015_v26 = vsel %vm296_vm1, %v6003_v25, %v13263_v3  ;;  %v6014_v43 = vsel %vm296_vm1, %v6001_v48, %v6003_v25  ;;  %v14928_v41 = vld [vmem:[#allocation18_spill] sm:$0xff] }
 0xb8c   :  { %6449 = vmatprep.subr.mxu0 %v6015_v26 }
 0xb8d   :  { %v13288_v51 = vpop.permute.xlu1 %5556  ;;  %6450 = vmatpush1.msra.mxu0 %v6014_v43  ;;  %v14930_v43 = vld [vmem:[#allocation19_spill] sm:$0xff] }
 0xb8e   :  { %6451 = vmatprep.subr.mxu0 %v6011_v16  ;;  %v6223_v2 = vpop.permute.xlu0 %6222 }
 0xb8f   :  { %6452 = vmatpush1.msra.mxu0 %v6010_v4  ;;  %v6233_v15 = vsel %vm159_vm5, %v6223_v2, %v13038_v42  ;;  %v6232_v23 = vsel %vm159_vm5, %v6221_v27, %v6223_v2  ;;  %v6228_v42 = vsel %vm159_vm5, %v13096_v54, %v6213_v52  ;;  %v6121_v54 = vsel %vm228_vm2, %v13251_v56, %v13020_v31  ;;  %v14931_v2 = vld [vmem:[#allocation20_spill] sm:$0xff] }
 0xb90   :  { %6453 = vmatprep.subr.mxu0 %v13011_v35  ;;  %6512 = vmatprep.subr.mxu1 %v6233_v15  ;;  %v5891_v35 = vsel %vm322_vm7, %v13242_v28, %v13267_v18  ;;  %v5886_v52 = vsel %vm322_vm7, %v13076_v49, %v13147_v19  ;;  %v5782_v49 = vsel %vm253_vm6, %v13060_v62, %v13246_v40  ;;  %v14932_v15 = vld [vmem:[#allocation15_spill] sm:$0xff] }
 0xb91   :  { %v13298_v48 = vpop.permute.xlu1 %5548  ;;  %6454 = vmatpush1.msra.mxu0 %v12901_v12  ;;  %6513 = vmatpush1.msra.mxu1 %v6232_v23  ;;  %v5778_v62 = vsel %vm253_vm6, %v13086_v7, %v13164_v29  ;;  %v5671_v7 = vsel %vm185_vm3, %v13177_v22, %v13169_v0  ;;  %v14933_v23 = vld [vmem:[#allocation22_spill] sm:$0xff] }
 0xb92   :  { %6455 = vmatprep.subr.mxu0 %v12824_v46  ;;  %6514 = vmatprep.subr.mxu1 %v6229_v30  ;;  %v6115_v61 = vpop.permute.xlu0 %6114  ;;  %v5890_v46 = vsel %vm322_vm7, %v13049_v37, %v13242_v28  ;;  %v6120_v37 = vsel %vm228_vm2, %v13109_v57, %v13251_v56  ;;  %v5783_v28 = vsel %vm253_vm6, %v13246_v40, %v13271_v44 }
 0xb93   :  { %6456 = vmatpush1.msra.mxu0 %v12802_v36  ;;  %6515 = vmatpush1.msra.mxu1 %v6228_v42  ;;  %v6125_v12 = vsel %vm228_vm2, %v6115_v61, %v13054_v50  ;;  %v6124_v34 = vsel %vm228_vm2, %v6113_v55, %v6115_v61  ;;  %v5887_v36 = vsel %vm322_vm7, %v13147_v19, %v13137_v63 }
 0xb94   :  { %6457 = vmatprep.subr.mxu0 %v5891_v35  ;;  %6516 = vmatprep.subr.mxu1 %v6125_v12  ;;  %v5779_v57 = vsel %vm253_vm6, %v13164_v29, %v13155_v45  ;;  %v6012_v40 = vsel %vm296_vm1, %v13120_v24, %v13255_v60  ;;  %v5675_v55 = vsel %vm185_vm3, %v13249_v13, %v13279_v17  ;;  %v14934_v35 = vld [vmem:[#allocation23_spill] sm:$0xff] }
 0xb95   :  { %v5543_v1 = vpop.permute.xlu1 %5542  ;;  %6458 = vmatpush1.msra.mxu0 %v5890_v46  ;;  %6517 = vmatpush1.msra.mxu1 %v6124_v34  ;;  %v5673_v30 = vsel %vm185_vm3, %v14933_v23, %v14932_v15 }
 0xb96   :  { %6459 = vmatprep.subr.mxu0 %v5887_v36  ;;  %6518 = vmatprep.subr.mxu1 %v6121_v54  ;;  %v6007_v50 = vpop.permute.xlu0 %6006 }
 0xb97   :  { %6460 = vmatpush1.msra.mxu0 %v5886_v52  ;;  %6519 = vmatpush1.msra.mxu1 %v6120_v37  ;;  %v6017_v31 = vsel %vm296_vm1, %v6007_v50, %v13064_v14  ;;  %v6016_v27 = vsel %vm296_vm1, %v13263_v3, %v6007_v50  ;;  %v6013_v14 = vsel %vm296_vm1, %v13255_v60, %v13032_v53 }
 0xb98   :  { %6461 = vmatprep.subr.mxu0 %v5783_v28  ;;  %6520 = vmatprep.subr.mxu1 %v6017_v31  ;;  %v5674_v53 = vsel %vm185_vm3, %v13072_v11, %v13249_v13  ;;  %v5567_v11 = vsel %vm116_vm0, %v13253_v8, %v13288_v51  ;;  %v5892_v3 = vsel %vm322_vm7, %v13267_v18, %v13257_v58  ;;  %v14936_v28 = vmov 0.0  }
 0xb99   :  { %v13338_v19 = vpop.permute.xlu1 %6328  ;;  %6462 = vmatpush1.msra.mxu0 %v5782_v49  ;;  %6521 = vmatpush1.msra.mxu1 %v6016_v27  ;;  %v7076_v27 = vld [vmem:[#allocation2 + $0x14] sm:$0xf] }
 0xb9a   :  { %6463 = vmatprep.subr.mxu0 %v5779_v57  ;;  %6522 = vmatprep.subr.mxu1 %v6013_v14  ;;  %v13346_v56 = vpop.permute.xlu0 %5546  ;;  %v6945_v14 = vld [vmem:[#allocation2 + $0x14] sm:$0xf] }
 0xb9b   :  { %6464 = vmatpush1.msra.mxu0 %v5778_v62  ;;  %6523 = vmatpush1.msra.mxu1 %v6012_v40 }
 0xb9c   :  { %6465 = vmatprep.subr.mxu0 %v5675_v55  ;;  %6524 = vmatprep.subr.mxu1 %v13041_v47  ;;  %v5670_v47 = vsel %vm185_vm3, %v13093_v33, %v13177_v22  ;;  %v5562_v33 = vsel %vm116_vm0, %v5543_v1, %v13190_v32  ;;  %v5564_v1 = vsel %vm116_vm0, %v13346_v56, %v13298_v48  ;;  %v7010_v55 = vld [vmem:[#allocation2 + $0x14] sm:$0xf] }
 0xb9d   :  { %v13361_v10 = vpop.permute.xlu1 %6332  ;;  %6466 = vmatpush1.msra.mxu0 %v5674_v53  ;;  %6525 = vmatpush1.msra.mxu1 %v12978_v39  ;;  %v5566_v39 = vsel %vm116_vm0, %v13084_v21, %v13253_v8 }
 0xb9e   :  { %6467 = vmatprep.subr.mxu0 %v5671_v7  ;;  %6526 = vmatprep.subr.mxu1 %v12866_v20  ;;  %v5551_v24 = vpop.permute.xlu0 %5550  ;;  %v5563_v20 = vsel %vm116_vm0, %v13190_v32, %v13346_v56  ;;  %v5889_v32 = vsel %vm322_vm7, %v13203_v9, %v13182_v6  ;;  %v14929_v6 = vld [vmem:[#allocation13_spill] sm:$0xff]  ;;  %v5780_v9 = vsel %vm253_vm6, %v13155_v45, %v14930_v43 }
 0xb9f   :  { %6468 = vmatpush1.msra.mxu0 %v5670_v47  ;;  %6527 = vmatpush1.msra.mxu1 %v12789_v38  ;;  %v5781_v16 = vsel %vm253_vm6, %v14930_v43, %v14929_v6  ;;  %v5672_v45 = vsel %vm185_vm3, %v13169_v0, %v14933_v23  ;;  %v5565_v34 = vsel %vm116_vm0, %v13298_v48, %v5551_v24  ;;  %v14935_v48 = vld [vmem:[#allocation24_spill] sm:$0xff]  ;;  %v14943_v23 = vld [vmem:[#allocation14_spill] sm:$0xff] }
 0xba0   :  { %6469 = vmatprep.subr.mxu0 %v5567_v11  ;;  %v6879_v24 = vld [vmem:[#allocation2 + $0x14] sm:$0xf] }
 0xba1   :  { %v13378_v29 = vpop.permute.xlu1 %6316  ;;  %6470 = vmatpush1.msra.mxu0 %v5566_v39 }
 0xba2   :  { %6471 = vmatprep.subr.mxu0 %v5563_v20  ;;  %v6327_v38 = vpop.permute.xlu0 %6326 }
 0xba3   :  { %6472 = vmatpush1.msra.mxu0 %v5562_v33  ;;  %v6339_v22 = vsel %vm90_vm8, %v6327_v38, %v13338_v19 }
 0xba4   :  { %6501 = vmatprep.subr.mxu0 %v6339_v22 }
 0xba5   :  { %v5885_v13 = vpop.permute.xlu1 %5884 }
 0xba6   :  { %v6325_v60 = vpop.permute.xlu0 %6324  ;;  %v5893_v21 = vsel %vm322_vm7, %v13257_v58, %v5885_v13  ;;  %v5784_v58 = vsel %vm253_vm6, %v13271_v44, %v14928_v41  ;;  %v5676_v44 = vsel %vm185_vm3, %v13279_v17, %v14931_v2  ;;  %v5568_v17 = vsel %vm116_vm0, %v13288_v51, %v14934_v35 }
 0xba7   :  { %v6338_v8 = vsel %vm90_vm8, %v6325_v60, %v6327_v38  ;;  %6528 = vmatprep.subr.mxu1 %v5893_v21  ;;  %v6584_v21 = vstv %s9383_s15 }
 0xba8   :  { %6502 = vmatpush2.msra.mxu0 %v6338_v8  ;;  %6529 = vmatpush1.msra.mxu1 %v5892_v3 }
 0xba9   :  { %v5777_v59 = vpop.permute.xlu1 %5776  ;;  %6530 = vmatprep.subr.mxu1 %v5889_v32 }
 0xbaa   :  { %6531 = vmatpush1.msra.mxu1 %v5888_v5  ;;  %v6319_v25 = vpop.permute.xlu0 %6318  ;;  %v5785_v26 = vsel %vm253_vm6, %v14928_v41, %v5777_v59 }
 0xbab   :  { %6532 = vmatprep.subr.mxu1 %v5785_v26  ;;  %v6335_v18 = vsel %vm90_vm8, %v13378_v29, %v6319_v25 }
 0xbac   :  { %6503 = vmatprep.subr.mxu0 %v6335_v18  ;;  %6533 = vmatpush1.msra.mxu1 %v5784_v58 }
 0xbad   :  { %v5669_v63 = vpop.permute.xlu1 %5668  ;;  %6534 = vmatprep.subr.mxu1 %v5781_v16 }
 0xbae   :  { %6535 = vmatpush1.msra.mxu1 %v5780_v9  ;;  %v5677_v4 = vsel %vm185_vm3, %v14931_v2, %v5669_v63  ;;  %v6331_v61 = vpop.permute.xlu0 %6330  ;;  %v14937_v63 = vld [vmem:[#allocation16_spill] sm:$0xff]  ;;  %v14939_v2 = vld [vmem:[#allocation21_spill] sm:$0xff] }
 0xbaf   :  { %6536 = vmatprep.subr.mxu1 %v5677_v4  ;;  %v6341_v0 = vsel %vm90_vm8, %v6331_v61, %v13361_v10  ;;  %v6340_v54 = vsel %vm90_vm8, %v13338_v19, %v6331_v61 }
 0xbb0   :  { %6537 = vmatpush1.msra.mxu1 %v5676_v44  ;;  %v14941_v44 = vld [vmem:[#allocation17_spill] sm:$0xff] }
 0xbb1   :  { %v5561_v42 = vpop.permute.xlu1 %5560  ;;  %6538 = vmatprep.subr.mxu1 %v5673_v30 }
 0xbb2   :  { %6539 = vmatpush1.msra.mxu1 %v5672_v45  ;;  %v5569_v12 = vsel %vm116_vm0, %v14934_v35, %v5561_v42  ;;  %v6323_v36 = vpop.permute.xlu0 %6322 }
 0xbb3   :  { %6540 = vmatprep.subr.mxu1 %v5569_v12 }
 0xbb4   :  { %6541 = vmatpush1.msra.mxu1 %v5568_v17 }
 0xbb5   :  { %v6321_v46 = vpop.permute.xlu1 %6320  ;;  %6542 = vmatprep.subr.mxu1 %v5565_v34 }
 0xbb6   :  { %6543 = vmatpush1.msra.mxu1 %v5564_v1  ;;  %v6337_v51 = vsel %vm90_vm8, %v6321_v46, %v6323_v36  ;;  %v6336_v52 = vsel %vm90_vm8, %v6319_v25, %v6321_v46 }
 0xbb7   :  { %6572 = vmatprep.subr.mxu1 %v6341_v0 }
 0xbb8   :  { %6573 = vmatpush2.msra.mxu1 %v6340_v54 }
 0xbb9   :  { %v6315_v50 = vpop.permute.xlu1 %6314  ;;  %6574 = vmatprep.subr.mxu1 %v6337_v51 }
 0xbba   :  { %v6334_v37 = vsel %vm90_vm8, %v6315_v50, %v13378_v29  ;;  %6575 = vmatpush2.msra.mxu1 %v6336_v52 }
 0xbbb   :  { %6504 = vmatpush2.msra.mxu0 %v6334_v37  ;;  %6577 = vmatmul.mubr.f32.vlgmr.msra.gmra.mxu1 %v14935_v48 }
 0xbbc   :  { %6506 = vmatmul.mubr.f32.vlgmr.msra.gmra.mxu0 %v14935_v48  ;;  %7333 = vmatprep.mubr.f32.mxu1 %v14936_v28 }
 0xbbd   :  { %7256 = vmatprep.mubr.f32.mxu0 %v14936_v28  ;;  %v7098_v33 = vpop.permute.xlu1 %7097 }
 0xbbe   :  { %v7101_v61 = vrot.slane %v7098_v33, 4 }
 0xbbf   :  { %v6435_v31 = vpop.permute.xlu0 %6434 }
 0xbc0   :  { %v7103_v17 = vsel %vm116_vm0, %v7101_v61, %v7098_v33 }
 0xbc1   :  { %v13469_v38 = vpop.permute.xlu1 %6966 }
 0xbc2   :  { %v6970_v36 = vrot.slane %v13469_v38, 4 }
 0xbc3   :  { %v13445_v49 = vpop.permute.xlu0 %7099 }
 0xbc4   :  { %v7102_v19 = vrot.slane %v13445_v49, 4  ;;  %v6972_v51 = vsel %vm253_vm6, %v6970_v36, %v13469_v38 }
 0xbc5   :  { %v13471_v22 = vpop.permute.xlu1 %7031 }
 0xbc6   :  { %v7111_v57 = vmul.f32 %v7102_v19, %v7076_v27  ;;  %v7035_v42 = vrot.slane %v13471_v22, 4 }
 0xbc7   :  { %v13450_v56 = vpop.permute.xlu0 %6968 }
 0xbc8   :  { %v6971_v62 = vrot.slane %v13450_v56, 4  ;;  %7125 = vrot.lane.b32.xlu0 %v7111_v57, %s9611_s26  ;;  %v7037_v34 = vsel %vm185_vm3, %v7035_v42, %v13471_v22 }
 0xbc9   :  { %v13473_v13 = vpop.permute.xlu1 %6900 }
 0xbca   :  { %v6980_v40 = vmul.f32 %v6971_v62, %v6945_v14  ;;  %v6904_v48 = vrot.slane %v13473_v13, 4 }
 0xbcb   :  { %v13456_v53 = vpop.permute.xlu0 %7033 }
 0xbcc   :  { %v7036_v10 = vrot.slane %v13456_v53, 4  ;;  %6994 = vrot.lane.b32.xlu1 %v6980_v40, %s9609_s23  ;;  %v6906_v57 = vsel %vm322_vm7, %v6904_v48, %v13473_v13 }
 0xbcd   :  { %v13475_v8 = vpop.permute.xlu1 %6757 }
 0xbce   :  { %v7045_v7 = vmul.f32 %v7036_v10, %v7010_v55  ;;  %v6761_v40 = vrot.slane %v13475_v8, 4 }
 0xbcf   :  { %v13462_v47 = vpop.permute.xlu0 %6902 }
 0xbd0   :  { %v7051_v11 = vcombine.low %v7045_v7, %v7045_v7  ;;  %v6905_v39 = vrot.slane %v13462_v47, 4  ;;  %v6763_v33 = vsel %vm228_vm2, %v6761_v40, %v13475_v8 }
 0xbd1   :  { %v13477_v16 = vpop.permute.xlu1 %6822 }
 0xbd2   :  { %v6914_v29 = vmul.f32 %v6905_v39, %v6879_v24  ;;  %7060 = vrot.lane.b32.xlu1 %v7051_v11, %s9612_s27  ;;  %v6826_v54 = vrot.slane %v13477_v16, 4  ;;  %v7104_v24 = vsel %vm92_vm4, %v7101_v61, %v7102_v19  ;;  %v7038_v19 = vsel %vm92_vm4, %v7035_v42, %v7036_v10 }
 0xbd3   :  { %v13496_v35 = vpop.permute.xlu0 %6759  ;;  %v7105_v38 = vsel %vm116_vm0, %v7104_v24, %v13445_v49  ;;  %v6907_v8 = vsel %vm92_vm4, %v6904_v48, %v6905_v39  ;;  %v6973_v10 = vsel %vm92_vm4, %v6970_v36, %v6971_v62 }
 0xbd4   :  { %v6920_v20 = vcombine.low %v6914_v29, %v6914_v29  ;;  %v6828_v27 = vsel %vm296_vm1, %v6826_v54, %v13477_v16  ;;  %v6762_v49 = vrot.slane %v13496_v35, 4  ;;  %v6908_v39 = vsel %vm322_vm7, %v6907_v8, %v13462_v47 }
 0xbd5   :  { %v13505_v46 = vpop.permute.xlu1 %6626  ;;  %v6974_v62 = vsel %vm253_vm6, %v6973_v10, %v13450_v56  ;;  %v14947_v10 = vld [vmem:[#allocation11_spill] sm:$0xff] }
 0xbd6   :  { %6929 = vrot.lane.b32.xlu1 %v6920_v20, %s9610_s25  ;;  %v6630_v56 = vrot.slane %v13505_v46, 4 }
 0xbd7   :  { %v13519_v50 = vpop.permute.xlu0 %6824 }
 0xbd9   :  { %v6692_v14 = vpop.permute.xlu1 %6691 }
 0xbda   :  { %v6695_v29 = vrot.slane %v6692_v14, 4 }
 0xbdb   :  { %v6629_v11 = vpop.permute.xlu0 %6628 }
 0xbdc   :  { %v6697_v13 = vsel %vm159_vm5, %v6695_v29, %v6692_v14  ;;  %v6631_v16 = vrot.slane %v6629_v11, 4 }
 0xbde   :  { %v6633_v61 = vsel %vm92_vm4, %v6630_v56, %v6631_v16 }
 0xc7b   :  { %v6578_v60 = vpop.f32.mrf.mxu1 }
 0xc7c   :  { %v6579_v3 = vadd.f32 %v6578_v60, %v6435_v31  ;;  %v6507_v32 = vpop.f32.mrf.mxu0 }
 0xc7d   :  { %v6508_v59 = vadd.f32 %v6507_v32, %v6435_v31  ;;  %v6580_v5 = vpop.f32.mrf.mxu1  ;;  %v7039_v32 = vsel %vm185_vm3, %v7038_v19, %v13456_v53  ;;  %v6764_v53 = vsel %vm92_vm4, %v6761_v40, %v6762_v49 }
 0xc7e   :  { %v6587_v25 = vmul.f32 %v6584_v21, %v6579_v3  ;;  %v6581_v41 = vadd.f32 %v6580_v5, %v6435_v31  ;;  %v6509_v26 = vpop.f32.mrf.mxu0  ;;  %v13565_v3 = vpop.permute.xlu0 %6693 }
 0xc7f   :  { %v6585_v18 = vmul.f32 %v6584_v21, %v6508_v59  ;;  %v6510_v58 = vadd.f32 %v6509_v26, %v6435_v31 }
 0xc80   :  { %v6588_v6 = vmul.f32 %v6584_v21, %v6581_v41  ;;  %v13480_v9 = vadd.f32 %v6587_v25, %v14937_v63  ;;  %v6696_v41 = vrot.slane %v13565_v3, 4 }
 0xc81   :  { %v6586_v43 = vmul.f32 %v6584_v21, %v6510_v58  ;;  %v13486_v15 = vadd.f32 %v6585_v18, %v14941_v44  ;;  %v6827_v21 = vrot.slane %v13519_v50, 4 }
 0xc82   :  { %14938 = vst [vmem:[#allocation18_spill] sm:$0xff] %v13480_v9  ;;  %v13483_v4 = vadd.f32 %v6588_v6, %v14939_v2  ;;  %v6765_v6 = vsel %vm228_vm2, %v6764_v53, %v13496_v35  ;;  %v6634_v35 = vsel %vm90_vm8, %v6633_v61, %v6629_v11  ;;  %v9412_v53 = vld [vmem:[%s14783_s2 + $0x5] ss:$8 sm:$0xf] }
 0xc83   :  { %14942 = vst [vmem:[#allocation19_spill] sm:$0xff] %v13486_v15  ;;  %v13489_v30 = vadd.f32 %v6586_v43, %v14943_v23  ;;  %v6829_v25 = vsel %vm92_vm4, %v6826_v54, %v6827_v21  ;;  %v6698_v43 = vsel %vm92_vm4, %v6695_v29, %v6696_v41  ;;  %v6632_v54 = vsel %vm90_vm8, %v6630_v56, %v13505_v46 }
 0xc84   :  { %14940 = vst [vmem:[#allocation13_spill] sm:$0xff] %v13483_v4  ;;  %v13494_v45 = vcombine.low %v13480_v9, %v13483_v4  ;;  %v9586_v37 = vcombine.low %v13483_v4, %v13483_v4  ;;  %v6830_v47 = vsel %vm296_vm1, %v6829_v25, %v13519_v50  ;;  %v6699_v44 = vsel %vm159_vm5, %v6698_v43, %v13565_v3 }
 0xc85   :  { %14944 = vst [vmem:[#allocation20_spill] sm:$0xff] %v13489_v30  ;;  %v6597_v12 = vcombine.low %v13486_v15, %v13489_v30  ;;  %v9585_v52 = vcombine.low %v13489_v30, %v13489_v30  ;;  %v9419_v15 = vld [vmem:[%s14783_s2 + $0x1] ss:$8 sm:$0xf] }
 0xc86   :  { %6602 = vst [vmem:[#allocation2 + $0xc] sm:$0xff] %v13494_v45  ;;  %6875 = vst [vmem:[#allocation4 + $0x28] sm:$0xf] %v13494_v45  ;;  %v7110_v60 = vmul.f32 %v7105_v38, %v13494_v45  ;;  %v7044_v5 = vmul.f32 %v7039_v32, %v13494_v45  ;;  %v6979_v26 = vmul.f32 %v6974_v62, %v13494_v45 }
 0xc87   :  { %6601 = vst [vmem:[#allocation2 + $0x4] sm:$0xff] %v6597_v12  ;;  %v13507_v1 = vmul.f32 %v7037_v34, %v6597_v12  ;;  %v13509_v0 = vmul.f32 %v7103_v17, %v6597_v12  ;;  %6873 = vst [vmem:[#allocation4 + $0x8] sm:$0xf] %v6597_v12  ;;  %v13526_v31 = vmul.f32 %v6972_v51, %v6597_v12 }
 0xc88   :  { %6874 = vst [vmem:[#allocation4 + $0x88] sm:$0xf] %v9585_v52  ;;  %6876 = vst [vmem:[#allocation4 + $0x40] sm:$0xf] %v9586_v37  ;;  %v13543_v20 = vmul.f32 %v6906_v57, %v6597_v12  ;;  %v6913_v58 = vmul.f32 %v6908_v39, %v13494_v45  ;;  %v7116_v46 = vcombine.high %v7110_v60, %v7110_v60 }
 0xc89   :  { %7054 = vrot.lane.b32.xlu0 %v13507_v1, %s9612_s27  ;;  %7117 = vrot.lane.b32.xlu1 %v13509_v0, %s9611_s26  ;;  %v7115_v12 = vcombine.high %v13509_v0, %v13509_v0  ;;  %v7049_v36 = vcombine.low %v13507_v1, %v13507_v1  ;;  %v6984_v37 = vcombine.high %v13526_v31, %v13526_v31 }
 0xc8a   :  { %v6918_v1 = vcombine.low %v13543_v20, %v13543_v20  ;;  %v6985_v57 = vcombine.high %v6979_v26, %v6979_v26  ;;  %v6919_v40 = vcombine.low %v6913_v58, %v6913_v58 }
 0xc8d   :  { %6986 = vrot.lane.b32.xlu0 %v13526_v31, %s9609_s23  ;;  %v6736_v23 = vld [vmem:[#allocation2 + $0x10] sm:$0xf]  ;;  %v7050_v31 = vcombine.low %v7044_v5, %v7044_v5 }
 0xc8e   :  { %v13535_v55 = vld [vmem:[#allocation2] sm:$0xff]  ;;  %v6735_v18 = vld [vmem:[#allocation2 + $0x8] sm:$0xff]  ;;  %v6771_v45 = vmul.f32 %v6762_v49, %v6736_v23  ;;  %v6605_v34 = vld [vmem:[#allocation2 + $0x10] sm:$0xf] }
 0xc8f   :  { %v13538_v7 = vmul.f32 %v6828_v27, %v13535_v55  ;;  %v6769_v22 = vmul.f32 %v13535_v55, %v6763_v33  ;;  %v13574_v59 = vmul.f32 %v13535_v55, %v6697_v13  ;;  %v6835_v63 = vmul.f32 %v6830_v47, %v6735_v18  ;;  %v6801_v14 = vld [vmem:[#allocation2 + $0x10] sm:$0xf]  ;;  %v14946_v49 = vld [vmem:[#allocation10_spill] sm:$0xff] }
 0xc90   :  { %v6770_v2 = vmul.f32 %v6765_v6, %v6735_v18  ;;  %v6704_v42 = vmul.f32 %v6735_v18, %v6699_v44  ;;  %v6639_v17 = vmul.f32 %v6735_v18, %v6634_v35  ;;  %v6640_v51 = vmul.f32 %v6631_v16, %v6605_v34  ;;  %v6670_v29 = vld [vmem:[#allocation2 + $0x10] sm:$0xf]  ;;  %v13691_v16 = vpop.permute.xlu1 %6994 }
 0xc91   :  { %6845 = vrot.lane.b32.xlu1 %v13538_v7, %s9608_s20  ;;  %6923 = vrot.lane.b32.xlu0 %v13543_v20, %s9610_s25  ;;  %v6638_v52 = vmul.f32 %v13535_v55, %v6632_v54  ;;  %v6775_v0 = vcombine.high %v6769_v22, %v6769_v22  ;;  %v6840_v27 = vcombine.low %v13538_v7, %v13538_v7  ;;  %v9391_v13 = vld [vmem:[%s14787_s6 + $0x30] sm:$0xff] }
 0xc92   :  { %v6836_v55 = vmul.f32 %v6827_v21, %v6801_v14  ;;  %v6841_v24 = vcombine.low %v6835_v63, %v6835_v63  ;;  %v6776_v7 = vcombine.high %v6770_v2, %v6770_v2  ;;  %v6645_v20 = vcombine.high %v6639_v17, %v6639_v17  ;;  %v14945_v21 = vld [vmem:[#allocation9_spill] sm:$0xff] }
 0xc93   :  { %v6644_v48 = vcombine.high %v6638_v52, %v6638_v52  ;;  %v6705_v33 = vmul.f32 %v6696_v41, %v6670_v29  ;;  %v6710_v38 = vcombine.low %v6704_v42, %v6704_v42  ;;  %v6709_v19 = vcombine.low %v13574_v59, %v13574_v59  ;;  %v9411_v6 = vld [vmem:[%s14783_s2 + $0x3] ss:$8 sm:$0xf]  ;;  %v9410_v44 = vld [vmem:[%s14783_s2 + $0x2] ss:$8 sm:$0xf] }
 0xc94   :  { %v6842_v11 = vcombine.low %v6836_v55, %v6836_v55  ;;  %v7873_v18 = vrot.slane %v9412_v53, %v14945_v21  ;;  %v7877_v47 = vrot.slane %v9412_v53, %v14946_v49  ;;  %v7749_v56 = vrot.slane %v9411_v6, %v14945_v21 }
 0xc95   :  { %6777 = vrot.lane.b32.xlu1 %v6769_v22, %s9605_s12  ;;  %7121 = vrot.lane.b32.xlu0 %v7110_v60, %s9611_s26  ;;  %v6711_v50 = vcombine.low %v6705_v33, %v6705_v33  ;;  %v9392_v22 = vld [vmem:[%s14787_s6 + $0x38] sm:$0xff]  ;;  %v7641_v61 = vrot.slane %v9410_v44, %v14945_v21  ;;  %v7649_v35 = vrot.slane %v9410_v44, %v14947_v10 }
 0xc96   :  { %v9414_v60 = vld [vmem:[%s14783_s2 + $0x7] ss:$8 sm:$0xf] }
 0xc97   :  { %v8089_v8 = vrot.slane %v9414_v60, %v14945_v21  ;;  %v8093_v3 = vrot.slane %v9414_v60, %v14946_v49  ;;  %v8097_v32 = vrot.slane %v9414_v60, %v14947_v10 }
 0xc99   :  { %6714 = vrot.lane.b32.xlu1 %v13574_v59, %s9606_s17  ;;  %7058 = vrot.lane.b32.xlu0 %v7044_v5, %s9612_s27  ;;  %v9413_v59 = vld [vmem:[%s14783_s2 + $0x6] ss:$8 sm:$0xf] }
 0xc9a   :  { %v14948_v5 = vld [vmem:[#allocation12_spill] sm:$0xff]  ;;  %v7981_v25 = vrot.slane %v9413_v59, %v14945_v21  ;;  %v7985_v41 = vrot.slane %v9413_v59, %v14946_v49  ;;  %v7989_v62 = vrot.slane %v9413_v59, %v14947_v10 }
 0xc9b   :  { %v8101_v39 = vrot.slane %v9414_v60, %v14948_v5  ;;  %v7885_v43 = vrot.slane %v9412_v53, %v14948_v5  ;;  %v7761_v23 = vrot.slane %v9411_v6, %v14948_v5 }
 0xc9d   :  { %6990 = vrot.lane.b32.xlu1 %v6979_v26, %s9609_s23  ;;  %6927 = vrot.lane.b32.xlu0 %v6913_v58, %s9610_s25  ;;  %v7993_v26 = vrot.slane %v9413_v59, %v14948_v5  ;;  %v7881_v58 = vrot.slane %v9412_v53, %v14947_v10 }
 0xca1   :  { %6849 = vrot.lane.b32.xlu1 %v6835_v63, %s9608_s20  ;;  %6781 = vrot.lane.b32.xlu0 %v6770_v2, %s9605_s12  ;;  %v7753_v63 = vrot.slane %v9411_v6, %v14946_v49  ;;  %v7757_v2 = vrot.slane %v9411_v6, %v14947_v10 }
 0xca5   :  { %6718 = vrot.lane.b32.xlu1 %v6704_v42, %s9606_s17  ;;  %6785 = vrot.lane.b32.xlu0 %v6771_v45, %s9605_s12  ;;  %v7061_v42 = vpop.permute.xlu1 %7060  ;;  %v7645_v45 = vrot.slane %v9410_v44, %v14946_v49 }
 0xca9   :  { %7119 = vrot.lane.b32.xlu1 %v7115_v12, %s9611_s26  ;;  %6650 = vrot.lane.b32.xlu0 %v6639_v17, %s9604_s1  ;;  %v13708_v12 = vpop.permute.xlu0 %7125  ;;  %v9409_v17 = vld [vmem:[%s14783_s2 + $0x1] ss:$8 sm:$0xf]  ;;  %v6930_v34 = vpop.permute.xlu1 %6929 }
 0xcaa   :  { %v7533_v54 = vrot.slane %v9409_v17, %v14945_v21 }
 0xcad   :  { %7052 = vrot.lane.b32.xlu1 %v7049_v36, %s9612_s27  ;;  %6654 = vrot.lane.b32.xlu0 %v6640_v51, %s9604_s1  ;;  %v7653_v36 = vrot.slane %v9410_v44, %v14948_v5 }
 0xcb1   :  { %6779 = vrot.lane.b32.xlu1 %v6775_v0, %s9605_s12  ;;  %6988 = vrot.lane.b32.xlu0 %v6984_v37, %s9609_s23  ;;  %v7541_v0 = vrot.slane %v9409_v17, %v14947_v10 }
 0xcb5   :  { %6648 = vrot.lane.b32.xlu1 %v6644_v48, %s9604_s1  ;;  %6921 = vrot.lane.b32.xlu0 %v6918_v1, %s9610_s25  ;;  %v7420_v1 = vld [vmem:[%s14783_s2] ss:$8 sm:$0xf] }
 0xcb6   :  { %v7429_v14 = vrot.slane %v7420_v1, %v14946_v49 }
 0xcb9   :  { %7123 = vrot.lane.b32.xlu1 %v7116_v46, %s9611_s26  ;;  %6843 = vrot.lane.b32.xlu0 %v6840_v27, %s9608_s20  ;;  %v7545_v46 = vrot.slane %v9409_v17, %v14948_v5  ;;  %v7425_v27 = vrot.slane %v7420_v1, %v14945_v21 }
 0xcbd   :  { %7056 = vrot.lane.b32.xlu1 %v7050_v31, %s9612_s27  ;;  %6992 = vrot.lane.b32.xlu0 %v6985_v57, %s9609_s23 }
 0xcc1   :  { %6925 = vrot.lane.b32.xlu1 %v6919_v40, %s9610_s25  ;;  %6847 = vrot.lane.b32.xlu0 %v6841_v24, %s9608_s20  ;;  %v7433_v40 = vrot.slane %v7420_v1, %v14947_v10  ;;  %v9415_v24 = vld [vmem:[%s14783_s2 + $0x20] ss:$8 sm:$0xf] }
 0xcc2   :  { %v8197_v29 = vrot.slane %v9415_v24, %v14945_v21 }
 0xcc5   :  { %6783 = vrot.lane.b32.xlu1 %v6776_v7, %s9605_s12  ;;  %6851 = vrot.lane.b32.xlu0 %v6842_v11, %s9608_s20  ;;  %v7437_v11 = vrot.slane %v7420_v1, %v14948_v5 }
 0xcc9   :  { %6652 = vrot.lane.b32.xlu1 %v6645_v20, %s9604_s1  ;;  %6716 = vrot.lane.b32.xlu0 %v6710_v38, %s9606_s17 }
 0xccd   :  { %6646 = vrot.lane.b32.xlu1 %v6638_v52, %s9604_s1  ;;  %6720 = vrot.lane.b32.xlu0 %v6711_v50, %s9606_s17  ;;  %v7537_v52 = vrot.slane %v9409_v17, %v14946_v49  ;;  %v8201_v50 = vrot.slane %v9415_v24, %v14946_v49 }
 0xcd1   :  { %7171 = vperm.xlu1 %9444, %v9392_v22   ;;  %6712 = vrot.lane.b32.xlu0 %v6709_v19, %s9606_s17  ;;  %v8205_v22 = vrot.slane %v9415_v24, %v14947_v10 }
 0xcd5   :  { %7166 = vperm.xlu0 %9443, %v9391_v13   ;;  %8102 = vrot.lane.b32.xlu1 %v8089_v8, %s9606_s17  ;;  %v8209_v8 = vrot.slane %v9415_v24, %v14948_v5 }
 0xcd9   :  { %8104 = vrot.lane.b32.xlu0 %v8093_v3, %s9606_s17  ;;  %8106 = vrot.lane.b32.xlu1 %v8097_v32, %s9606_s17 }
 0xcdd   :  { %8108 = vrot.lane.b32.xlu0 %v8101_v39, %s9606_s17  ;;  %7994 = vrot.lane.b32.xlu1 %v7981_v25, %s9605_s12 }
 0xce1   :  { %7996 = vrot.lane.b32.xlu0 %v7985_v41, %s9605_s12  ;;  %7998 = vrot.lane.b32.xlu1 %v7989_v62, %s9605_s12 }
 0xce5   :  { %8000 = vrot.lane.b32.xlu0 %v7993_v26, %s9605_s12  ;;  %7886 = vrot.lane.b32.xlu1 %v7873_v18, %s9608_s20 }
 0xce9   :  { %7888 = vrot.lane.b32.xlu0 %v7877_v47, %s9608_s20  ;;  %7890 = vrot.lane.b32.xlu1 %v7881_v58, %s9608_s20 }
 0xced   :  { %7892 = vrot.lane.b32.xlu0 %v7885_v43, %s9608_s20  ;;  %7762 = vrot.lane.b32.xlu1 %v7749_v56, %s9610_s25 }
 0xcf1   :  { %7764 = vrot.lane.b32.xlu0 %v7753_v63, %s9610_s25  ;;  %7766 = vrot.lane.b32.xlu1 %v7757_v2, %s9610_s25 }
 0xcf5   :  { %7768 = vrot.lane.b32.xlu0 %v7761_v23, %s9610_s25  ;;  %7654 = vrot.lane.b32.xlu1 %v7641_v61, %s9609_s23 }
 0xcf9   :  { %7656 = vrot.lane.b32.xlu0 %v7645_v45, %s9609_s23  ;;  %7658 = vrot.lane.b32.xlu1 %v7649_v35, %s9609_s23 }
 0xcfb   :  { %v13717_v51 = vpop.permute.xlu0 %7054  ;;  %v7118_v37 = vpop.permute.xlu1 %7117 }
 0xcfd   :  { %7660 = vrot.lane.b32.xlu0 %v7653_v36, %s9609_s23  ;;  %7546 = vrot.lane.b32.xlu1 %v7533_v54, %s9612_s27 }
 0xcff   :  { %v6987_v48 = vpop.permute.xlu0 %6986 }
 0xd01   :  { %7548 = vrot.lane.b32.xlu0 %v7537_v52, %s9612_s27  ;;  %7550 = vrot.lane.b32.xlu1 %v7541_v0, %s9612_s27 }
 0xd03   :  { %v13730_v31 = vpop.permute.xlu1 %6845  ;;  %v13732_v57 = vpop.permute.xlu0 %6923 }
 0xd05   :  { %7552 = vrot.lane.b32.xlu0 %v7545_v46, %s9612_s27  ;;  %7438 = vrot.lane.b32.xlu1 %v7425_v27, %s9611_s26 }
 0xd07   :  { %v6778_v55 = vpop.permute.xlu1 %6777  ;;  %v7122_v7 = vpop.permute.xlu0 %7121 }
 0xd09   :  { %7440 = vrot.lane.b32.xlu0 %v7429_v14, %s9611_s26  ;;  %7442 = vrot.lane.b32.xlu1 %v7433_v40, %s9611_s26 }
 0xd0b   :  { %v13745_v20 = vpop.permute.xlu1 %6714  ;;  %v7059_v33 = vpop.permute.xlu0 %7058 }
 0xd0c   :  { %v7065_v38 = vsel %vm159_vm5, %v7059_v33, %v7061_v42 }
 0xd0d   :  { %7073 = vst [vmem:[#allocation4 + $0x60] sm:$0xf0] %v7065_v38  ;;  %7444 = vrot.lane.b32.xlu0 %v7437_v11, %s9611_s26  ;;  %8210 = vrot.lane.b32.xlu1 %v8197_v29, %s9604_s1 }
 0xd0f   :  { %v6991_v19 = vpop.permute.xlu1 %6990  ;;  %v6928_v13 = vpop.permute.xlu0 %6927 }
 0xd10   :  { %v6934_v60 = vsel %vm296_vm1, %v6928_v13, %v6930_v34 }
 0xd11   :  { %6942 = vst [vmem:[#allocation4 + $0x40] sm:$0xf0] %v6934_v60  ;;  %8212 = vrot.lane.b32.xlu0 %v8201_v50, %s9604_s1  ;;  %8214 = vrot.lane.b32.xlu1 %v8205_v22, %s9604_s1 }
 0xd13   :  { %v13756_v3 = vpop.permute.xlu1 %6849  ;;  %v13758_v32 = vpop.permute.xlu0 %6781 }
 0xd15   :  { %8216 = vrot.lane.b32.xlu0 %v8209_v8, %s9604_s1 }
 0xd17   :  { %v13761_v59 = vpop.permute.xlu1 %6718  ;;  %v13763_v39 = vpop.permute.xlu0 %6785 }
 0xd18   :  { %v7152_v60 = vld [vmem:[#allocation4 + $0x40] sm:$0xff] }
 0xd1b   :  { %v7120_v25 = vpop.permute.xlu1 %7119  ;;  %v13767_v53 = vpop.permute.xlu0 %6650 }
 0xd1c   :  { %v7127_v41 = vsel %vm90_vm8, %v7118_v37, %v7120_v25  ;;  %v7128_v62 = vsel %vm90_vm8, %v7120_v25, %v7122_v7 }
 0xd1d   :  { %7135 = vst [vmem:[#allocation4 + $0x20] sm:$0xf] %v7127_v41  ;;  %7136 = vst [vmem:[#allocation4 + $0x48] sm:$0xf] %v7128_v62 }
 0xd1f   :  { %v7053_v26 = vpop.permute.xlu1 %7052  ;;  %v13771_v47 = vpop.permute.xlu0 %6654 }
 0xd20   :  { %v7062_v18 = vsel %vm159_vm5, %v7053_v26, %v13717_v51 }
 0xd21   :  { %7070 = vst [vmem:[#allocation4 + $0x58] sm:$0xf0] %v7062_v18 }
 0xd23   :  { %v6780_v58 = vpop.permute.xlu1 %6779  ;;  %v6989_v2 = vpop.permute.xlu0 %6988 }
 0xd24   :  { %v6787_v6 = vsel %vm253_vm6, %v6778_v55, %v6780_v58  ;;  %v6788_v43 = vsel %vm253_vm6, %v6780_v58, %v13758_v32  ;;  %v7158_v56 = vld [vmem:[#allocation4 + $0x48] sm:$0xf]  ;;  %v7157_v63 = vld [vmem:[#allocation4 + $0x20] sm:$0xf]  ;;  %v6996_v44 = vsel %vm228_vm2, %v6987_v48, %v6989_v2  ;;  %v6997_v23 = vsel %vm228_vm2, %v6989_v2, %v6991_v19 }
 0xd25   :  { %6795 = vst [vmem:[#allocation4 + $0x30] sm:$0xf] %v6787_v6  ;;  %6796 = vst [vmem:[#allocation4 + $0x68] sm:$0xf] %v6788_v43  ;;  %9393 = vmatprep.subr.msk.mxu0 %vm92_vm4, %v7158_v56 }
 0xd26   :  { %9394 = vmatpush1.msk.msra.mxu0 %vm92_vm4, %v7157_v63  ;;  %7004 = vst [vmem:[#allocation4 + $0x58] sm:$0xf] %v6996_v44  ;;  %7005 = vst [vmem:[#allocation4 + $0x10] sm:$0xf] %v6997_v23 }
 0xd27   :  { %v13780_v61 = vpop.permute.xlu1 %6648  ;;  %v6922_v45 = vpop.permute.xlu0 %6921 }
 0xd28   :  { %v6657_v42 = vsel %vm116_vm0, %v13780_v61, %v13767_v53  ;;  %v6931_v35 = vsel %vm296_vm1, %v6922_v45, %v13732_v57 }
 0xd29   :  { %6665 = vst [vmem:[#allocation4 + $0x38] sm:$0xf] %v6657_v42  ;;  %6939 = vst [vmem:[#allocation4 + $0x8] sm:$0xf0] %v6931_v35 }
 0xd2b   :  { %v7124_v17 = vpop.permute.xlu1 %7123  ;;  %v6844_v54 = vpop.permute.xlu0 %6843 }
 0xd2c   :  { %v7129_v34 = vsel %vm90_vm8, %v7122_v7, %v7124_v17  ;;  %v7130_v36 = vsel %vm90_vm8, %v7124_v17, %v13708_v12  ;;  %v6853_v52 = vsel %vm322_vm7, %v6844_v54, %v13730_v31 }
 0xd2d   :  { %7137 = vst [vmem:[#allocation4 + $0x70] sm:$0xf] %v7129_v34  ;;  %7138 = vst [vmem:[#allocation4 + $0x90] sm:$0xf] %v7130_v36 }
 0xd2e   :  { %6861 = vst [vmem:[#allocation4 + $0x30] sm:$0xf0] %v6853_v52 }
 0xd2f   :  { %v7057_v0 = vpop.permute.xlu1 %7056  ;;  %v6993_v1 = vpop.permute.xlu0 %6992 }
 0xd30   :  { %v7063_v37 = vsel %vm159_vm5, %v13717_v51, %v7057_v0  ;;  %v7064_v48 = vsel %vm159_vm5, %v7057_v0, %v7059_v33  ;;  %v6998_v46 = vsel %vm228_vm2, %v6991_v19, %v6993_v1  ;;  %v6999_v12 = vsel %vm228_vm2, %v6993_v1, %v13691_v16 }
 0xd31   :  { %7071 = vst [vmem:[#allocation4 + $0x10] sm:$0xf0] %v7063_v37  ;;  %7072 = vst [vmem:[#allocation4 + $0x98] sm:$0xf0] %v7064_v48 }
 0xd32   :  { %7006 = vst [vmem:[#allocation4 + $0x98] sm:$0xf] %v6998_v46  ;;  %7007 = vst [vmem:[#allocation4 + $0x60] sm:$0xf] %v6999_v12 }
 0xd33   :  { %v6926_v27 = vpop.permute.xlu1 %6925  ;;  %v6848_v24 = vpop.permute.xlu0 %6847 }
 0xd34   :  { %v6932_v14 = vsel %vm296_vm1, %v13732_v57, %v6926_v27  ;;  %v6933_v40 = vsel %vm296_vm1, %v6926_v27, %v6928_v13  ;;  %v7160_v55 = vld [vmem:[#allocation4 + $0x90] sm:$0xf]  ;;  %v6854_v7 = vsel %vm322_vm7, %v13730_v31, %v6848_v24  ;;  %v6855_v16 = vsel %vm322_vm7, %v6848_v24, %v13756_v3  ;;  %v7153_v31 = vld [vmem:[#allocation4 + $0x58] sm:$0xff] }
 0xd35   :  { %v7159_v51 = vld [vmem:[#allocation4 + $0x70] sm:$0xf]  ;;  %6940 = vst [vmem:[#allocation4 + $0x88] sm:$0xf0] %v6932_v14  ;;  %6941 = vst [vmem:[#allocation4 + $0x28] sm:$0xf0] %v6933_v40  ;;  %9397 = vmatprep.subr.msk.mxu1 %vm92_vm4, %v7160_v55 }
 0xd36   :  { %9398 = vmatpush1.msk.msra.mxu1 %vm92_vm4, %v7159_v51  ;;  %6862 = vst [vmem:[#allocation4 + $0x68] sm:$0xf0] %v6854_v7  ;;  %6863 = vst [vmem:[#allocation4 + $0x78] sm:$0xf0] %v6855_v16 }
 0xd37   :  { %v6784_v57 = vpop.permute.xlu1 %6783  ;;  %v6852_v38 = vpop.permute.xlu0 %6851 }
 0xd38   :  { %v6789_v11 = vsel %vm253_vm6, %v13758_v32, %v6784_v57  ;;  %v6790_v29 = vsel %vm253_vm6, %v6784_v57, %v13763_v39  ;;  %v7154_v33 = vld [vmem:[#allocation4 + $0x10] sm:$0xff]  ;;  %v6856_v50 = vsel %vm322_vm7, %v13756_v3, %v6852_v38  ;;  %v7149_v3 = vld [vmem:[#allocation4 + $0x8] sm:$0xff] }
 0xd39   :  { %6797 = vst [vmem:[#allocation4 + $0x78] sm:$0xf] %v6789_v11  ;;  %6798 = vst [vmem:[#allocation4 + $0x80] sm:$0xf] %v6790_v29  ;;  %7216 = vmatprep.subr.mxu0 %v7154_v33  ;;  %v7156_v22 = vld [vmem:[#allocation4 + $0x60] sm:$0xff]  ;;  %v7155_v19 = vld [vmem:[#allocation4 + $0x98] sm:$0xff] }
 0xd3a   :  { %7217 = vmatpush1.msra.mxu0 %v7153_v31  ;;  %6864 = vst [vmem:[#allocation4 + $0x80] sm:$0xf0] %v6856_v50  ;;  %7293 = vmatprep.subr.mxu1 %v7156_v22 }
 0xd3b   :  { %v6653_v13 = vpop.permute.xlu1 %6652  ;;  %7294 = vmatpush1.msra.mxu1 %v7155_v19  ;;  %v6717_v25 = vpop.permute.xlu0 %6716 }
 0xd3c   :  { %v6658_v8 = vsel %vm116_vm0, %v13767_v53, %v6653_v13  ;;  %v6659_v32 = vsel %vm116_vm0, %v6653_v13, %v13771_v47  ;;  %v7150_v39 = vld [vmem:[#allocation4 + $0x88] sm:$0xff]  ;;  %7295 = vmatprep.subr.mxu1 %v7152_v60  ;;  %v6723_v62 = vsel %vm185_vm3, %v13745_v20, %v6717_v25  ;;  %v6724_v26 = vsel %vm185_vm3, %v6717_v25, %v13761_v59  ;;  %v7145_v47 = vld [vmem:[#allocation4 + $0x30] sm:$0xff] }
 0xd3d   :  { %v7151_v41 = vld [vmem:[#allocation4 + $0x28] sm:$0xff]  ;;  %6666 = vst [vmem:[#allocation4 + $0x50] sm:$0xf] %v6658_v8  ;;  %6667 = vst [vmem:[#allocation4 + $0x18] sm:$0xf] %v6659_v32  ;;  %7218 = vmatprep.subr.mxu0 %v7150_v39 }
 0xd3e   :  { %7296 = vmatpush1.msra.mxu1 %v7151_v41  ;;  %7219 = vmatpush1.msra.mxu0 %v7149_v3  ;;  %6731 = vst [vmem:[#allocation4 + $0x38] sm:$0xf0] %v6723_v62  ;;  %6732 = vst [vmem:[#allocation4 + $0x50] sm:$0xf0] %v6724_v26  ;;  %v7146_v53 = vld [vmem:[#allocation4 + $0x68] sm:$0xff] }
 0xd3f   :  { %v6647_v18 = vpop.permute.xlu1 %6646  ;;  %7220 = vmatprep.subr.mxu0 %v7146_v53  ;;  %v6721_v6 = vpop.permute.xlu0 %6720 }
 0xd40   :  { %v6656_v58 = vsel %vm116_vm0, %v6647_v18, %v13780_v61  ;;  %7221 = vmatpush1.msra.mxu0 %v7145_v47  ;;  %v7147_v43 = vld [vmem:[#allocation4 + $0x78] sm:$0xff]  ;;  %v6725_v56 = vsel %vm185_vm3, %v13761_v59, %v6721_v6  ;;  %v7139_v61 = vld [vmem:[%s14786_s5] sm:$0xff] }
 0xd41   :  { %6664 = vst [vmem:[#allocation4] sm:$0xf] %v6656_v58  ;;  %v7148_v63 = vld [vmem:[#allocation4 + $0x80] sm:$0xff]  ;;  %6733 = vst [vmem:[#allocation4 + $0x18] sm:$0xf0] %v6725_v56 }
 0xd42   :  { %7297 = vmatprep.subr.mxu1 %v7148_v63 }
 0xd43   :  { %7298 = vmatpush1.msra.mxu1 %v7147_v43  ;;  %v6713_v2 = vpop.permute.xlu0 %6712 }
 0xd44   :  { %v6722_v44 = vsel %vm185_vm3, %v6713_v2, %v13745_v20  ;;  %v7140_v20 = vld [vmem:[%s14786_s5 + $0x8] sm:$0xff] }
 0xd45   :  { %v7142_v23 = vld [vmem:[#allocation4 + $0x38] sm:$0xff]  ;;  %6730 = vst [vmem:[#allocation4] sm:$0xf0] %v6722_v44  ;;  %v7143_v45 = vld [vmem:[#allocation4 + $0x50] sm:$0xff] }
 0xd46   :  { %7222 = vmatprep.subr.mxu0 %v7142_v23 }
 0xd48   :  { %v7144_v42 = vld [vmem:[#allocation4 + $0x18] sm:$0xff] }
 0xd49   :  { %7299 = vmatprep.subr.mxu1 %v7144_v42 }
 0xd4a   :  { %7300 = vmatpush1.msra.mxu1 %v7143_v45 }
 0xd4b   :  { %9399 = vmatmul.mubr.msk.f32.vlgmr.msra.gmra.mxu1 %vm640_vm9, %v7139_v61 }
 0xd4c   :  { %v13830_v59 = vpop.permute.xlu1 %7171  ;;  %v7141_v35 = vld [vmem:[#allocation4] sm:$0xff]  ;;  %7339 = vmatprep.mubr.f32.mxu1 %v14936_v28 }
 0xd4d   :  { %7223 = vmatpush1.msra.mxu0 %v7141_v35 }
 0xd4e   :  { %9395 = vmatmul.mubr.msk.f32.vlgmr.msra.gmra.mxu0 %vm640_vm9, %v7139_v61 }
 0xd4f   :  { %9400 = vmatmul.mubr.msk.f32.gmra.mxu1 %vm640_vm9, %v7140_v20  ;;  %7262 = vmatprep.mubr.f32.mxu0 %v14936_v28 }
 0xd50   :  { %v13840_v17 = vpop.permute.xlu1 %8102  ;;  %v7167_v34 = vpop.permute.xlu0 %7166 }
 0xd52   :  { %9396 = vmatmul.mubr.msk.f32.gmra.mxu0 %vm640_vm9, %v7140_v20 }
 0xd54   :  { %v13843_v36 = vpop.permute.xlu1 %8106  ;;  %v13845_v54 = vpop.permute.xlu0 %8104 }
 0xd55   :  { %v13911_v45 = vsel %vm185_vm3, %v13845_v54, %v13843_v36 }
 0xd58   :  { %v13847_v52 = vpop.permute.xlu1 %7994  ;;  %v13849_v0 = vpop.permute.xlu0 %8108 }
 0xd59   :  { %v8122_v37 = vmul.f32 0.0, %v13849_v0 }
 0xd5b   :  { %8146 = vrot.lane.b32.xlu1 %v8122_v37, %s9612_s27  ;;  %8156 = vrot.lane.b32.xlu0 %v8122_v37, %s9612_s27 }
 0xd5c   :  { %v13852_v48 = vpop.permute.xlu1 %7998  ;;  %v13856_v1 = vpop.permute.xlu0 %7996 }
 0xd60   :  { %v13858_v46 = vpop.permute.xlu1 %7886  ;;  %v13860_v12 = vpop.permute.xlu0 %8000 }
 0xd61   :  { %v8014_v27 = vmul.f32 0.0, %v13860_v12 }
 0xd63   :  { %8038 = vrot.lane.b32.xlu1 %v8014_v27, %s9609_s23  ;;  %8048 = vrot.lane.b32.xlu0 %v8014_v27, %s9609_s23 }
 0xd64   :  { %v13865_v14 = vpop.permute.xlu0 %7888  ;;  %v13867_v40 = vpop.permute.xlu1 %7890 }
 0xd68   :  { %v13869_v55 = vpop.permute.xlu0 %7892  ;;  %v13872_v24 = vpop.permute.xlu1 %7762 }
 0xd69   :  { %v7906_v51 = vmul.f32 0.0, %v13869_v55  ;;  %v7778_v7 = vmul.f32 0.0, %v13872_v24 }
 0xd6b   :  { %7930 = vrot.lane.b32.xlu1 %v7906_v51, %s9610_s25  ;;  %7940 = vrot.lane.b32.xlu0 %v7906_v51, %s9610_s25 }
 0xd6c   :  { %v13879_v16 = vpop.permute.xlu1 %7766  ;;  %v7765_v63 = vpop.permute.xlu0 %7764 }
 0xd6f   :  { %7808 = vrot.lane.b32.xlu1 %v7778_v7, %s9608_s20  ;;  %7798 = vrot.lane.b32.xlu0 %v7778_v7, %s9608_s20 }
 0xd70   :  { %v13881_v57 = vpop.permute.xlu1 %7654  ;;  %v13913_v35 = vpop.permute.xlu0 %7768 }
 0xd71   :  { %v7670_v33 = vmul.f32 0.0, %v13881_v57 }
 0xd73   :  { %7700 = vrot.lane.b32.xlu1 %v7670_v33, %s9605_s12  ;;  %7690 = vrot.lane.b32.xlu0 %v7670_v33, %s9605_s12  ;;  %v13923_v33 = vsel %vm253_vm6, %v13856_v1, %v13852_v48 }
 0xd74   :  { %v13883_v11 = vpop.permute.xlu1 %7658  ;;  %v7657_v51 = vpop.permute.xlu0 %7656 }
 0xd78   :  { %v13885_v29 = vpop.permute.xlu1 %7546 }
 0xd79   :  { %v7562_v31 = vmul.f32 0.0, %v13885_v29 }
 0xd7b   :  { %7592 = vrot.lane.b32.xlu1 %v7562_v31, %s9606_s17  ;;  %7582 = vrot.lane.b32.xlu0 %v7562_v31, %s9606_s17 }
 0xd7c   :  { %v13888_v38 = vpop.permute.xlu1 %7550 }
 0xd80   :  { %v13895_v50 = vpop.permute.xlu1 %7438 }
 0xd81   :  { %v13898_v22 = vmul.f32 0.0, %v13895_v50 }
 0xd83   :  { %7484 = vrot.lane.b32.xlu1 %v13898_v22, %s9604_s1 }
 0xe0b   :  { %v7335_v19 = vpop.f32.mrf.mxu1 }
 0xe0c   :  { %v7336_v13 = vadd.f32 %v7335_v19, %v7167_v34 }
 0xe0d   :  { %v7337_v62 = vpop.f32.mrf.mxu1 }
 0xe0e   :  { %v9403_v60 = vmul.f32 -1.442695, %v7336_v13  ;;  %v7258_v8 = vpop.f32.mrf.mxu0  ;;  %v7338_v18 = vadd.f32 %v7337_v62, %v7167_v34  ;;  %v13948_v62 = vsel %vm296_vm1, %v7765_v63, %v13879_v16 }
 0xe0f   :  { %v7259_v32 = vadd.f32 %v7258_v8, %v7167_v34  ;;  %v13936_v8 = vsel %vm322_vm7, %v13865_v14, %v13867_v40 }
 0xe10   :  { %9547 = vpow2.f32 %v9403_v60  ;;  %v7260_v39 = vpop.f32.mrf.mxu0  ;;  %v9404_v6 = vmul.f32 -1.442695, %v7338_v18  ;;  %v13929_v60 = vpop.permute.xlu0 %7660 }
 0xe11   :  { %v9401_v25 = vmul.f32 -1.442695, %v7259_v32  ;;  %v7261_v41 = vadd.f32 %v7260_v39, %v7167_v34 }
 0xe12   :  { %v7264_v56 = vpop.f32.mrf.mxu0 }
 0xe13   :  { %9549 = vpow2.f32 %v9401_v25  ;;  %v9402_v3 = vmul.f32 -1.442695, %v7261_v41  ;;  %v13903_v44 = vadd.f32 %v7264_v56, %v13830_v59 }
 0xe15   :  { %9551 = vpow2.f32 %v9402_v3  ;;  %v9405_v61 = vmul.f32 -1.442695, %v13903_v44 }
 0xe1d   :  { %v9548_v26 = vpop.eup %9547 }
 0xe1e   :  { %v7372_v53 = vadd.f32 1.0, %v9548_v26  ;;  %v7549_v26 = vpop.permute.xlu0 %7548 }
 0xe20   :  { %v9550_v47 = vpop.eup %9549  ;;  %9553 = vrcp.f32 %v7372_v53 }
 0xe21   :  { %v7370_v58 = vadd.f32 1.0, %v9550_v47 }
 0xe22   :  { %v9552_v43 = vpop.eup %9551 }
 0xe23   :  { %9555 = vrcp.f32 %v7370_v58  ;;  %v7371_v2 = vadd.f32 1.0, %v9552_v43  ;;  %v7341_v58 = vpop.f32.mrf.mxu1  ;;  %v13962_v43 = vsel %vm228_vm2, %v7657_v51, %v13883_v11 }
 0xe24   :  { %9557 = vpow2.f32 %v9404_v6  ;;  %v13957_v6 = vsel %vm296_vm1, %v13872_v24, %v7765_v63  ;;  %v13973_v24 = vsel %vm159_vm5, %v7549_v26, %v13888_v38  ;;  %v13975_v63 = vpop.permute.xlu0 %7552 }
 0xe25   :  { %9559 = vrcp.f32 %v7371_v2  ;;  %v13967_v2 = vadd.f32 %v7341_v58, %v13830_v59  ;;  %v7664_v58 = vsel %vm228_vm2, %v13883_v11, %v13929_v60 }
 0xe26   :  { %9561 = vpow2.f32 %v9405_v61 }
 0xe2d   :  { %v9554_v23 = vpop.eup %9553 }
 0xe2e   :  { %v13905_v42 = vmul.f32 %v9554_v23, %v7336_v13 }
 0xe30   :  { %v8120_v20 = vmul.f32 %v13911_v45, %v13905_v42  ;;  %v9556_v34 = vpop.eup %9555  ;;  %v8012_v19 = vmul.f32 %v13923_v33, %v13905_v42  ;;  %v7904_v25 = vmul.f32 %v13936_v8, %v13905_v42 }
 0xe31   :  { %v9558_v37 = vpop.eup %9557  ;;  %v13918_v27 = vmul.f32 %v9556_v34, %v7259_v32 }
 0xe32   :  { %8142 = vrot.lane.b32.xlu1 %v8120_v20, %s9612_s27  ;;  %v7373_v7 = vadd.f32 1.0, %v9558_v37  ;;  %v9560_v13 = vpop.eup %9559  ;;  %v7662_v20 = vsel %vm228_vm2, %v13881_v57, %v7657_v51  ;;  %v13992_v51 = vpop.permute.xlu0 %7440 }
 0xe33   :  { %v8118_v31 = vmul.f32 %v13840_v17, %v13918_v27  ;;  %v8010_v32 = vmul.f32 %v13847_v52, %v13918_v27  ;;  %v13940_v39 = vmul.f32 %v9560_v13, %v7261_v41  ;;  %v9562_v3 = vpop.eup %9561  ;;  %v7902_v53 = vmul.f32 %v13858_v46, %v13918_v27 }
 0xe34   :  { %9563 = vrcp.f32 %v7373_v7  ;;  %v7374_v47 = vadd.f32 1.0, %v9562_v3  ;;  %v7779_v56 = vmul.f32 %v13957_v6, %v13918_v27  ;;  %v7671_v34 = vmul.f32 %v7662_v20, %v13918_v27 }
 0xe35   :  { %8138 = vrot.lane.b32.xlu0 %v8118_v31, %s9612_s27  ;;  %v7780_v41 = vmul.f32 %v13948_v62, %v13940_v39  ;;  %v7672_v23 = vmul.f32 %v13962_v43, %v13940_v39  ;;  %v9407_v7 = vmul.f32 -1.442695, %v13967_v2  ;;  %v7564_v31 = vmul.f32 %v13973_v24, %v13940_v39 }
 0xe36   :  { %8034 = vrot.lane.b32.xlu1 %v8012_v19, %s9609_s23  ;;  %9565 = vrcp.f32 %v7374_v47  ;;  %v7554_v19 = vsel %vm159_vm5, %v13885_v29, %v7549_v26  ;;  %v13999_v13 = vsel %vm90_vm8, %v13895_v50, %v13992_v51  ;;  %v7772_v26 = vsel %vm296_vm1, %v13879_v16, %v13913_v35 }
 0xe37   :  { %v7563_v57 = vmul.f32 %v7554_v19, %v13918_v27  ;;  %9567 = vpow2.f32 %v9407_v7  ;;  %v7455_v29 = vmul.f32 %v13999_v13, %v13918_v27  ;;  %v7781_v50 = vmul.f32 %v7772_v26, %v13905_v42 }
 0xe39   :  { %8030 = vrot.lane.b32.xlu0 %v8010_v32, %s9609_s23  ;;  %v7266_v32 = vpop.f32.mrf.mxu0 }
 0xe3a   :  { %7926 = vrot.lane.b32.xlu1 %v7904_v25, %s9610_s25 }
 0xe3d   :  { %7922 = vrot.lane.b32.xlu0 %v7902_v53, %s9610_s25  ;;  %v14014_v53 = vadd.f32 %v7266_v32, %v13830_v59  ;;  %v14059_v32 = vsel %vm253_vm6, %v13847_v52, %v13856_v1 }
 0xe3e   :  { %7802 = vrot.lane.b32.xlu1 %v7780_v41, %s9608_s20 }
 0xe3f   :  { %v9406_v16 = vmul.f32 -1.442695, %v14014_v53 }
 0xe41   :  { %v9564_v61 = vpop.eup %9563  ;;  %7800 = vrot.lane.b32.xlu0 %v7779_v56, %s9608_s20  ;;  %v7673_v56 = vmul.f32 %v7664_v58, %v13905_v42  ;;  %9569 = vpow2.f32 %v9406_v16 }
 0xe42   :  { %7694 = vrot.lane.b32.xlu1 %v7672_v23, %s9605_s12  ;;  %v13982_v37 = vmul.f32 %v9564_v61, %v7338_v18 }
 0xe43   :  { %v9566_v3 = vpop.eup %9565 }
 0xe44   :  { %v7782_v18 = vmul.f32 %v13913_v35, %v13982_v37  ;;  %v7674_v25 = vmul.f32 %v13929_v60, %v13982_v37  ;;  %v14017_v47 = vmul.f32 %v9566_v3, %v13903_v44  ;;  %v7566_v41 = vmul.f32 %v13975_v63, %v13982_v37  ;;  %v9568_v61 = vpop.eup %9567 }
 0xe45   :  { %7692 = vrot.lane.b32.xlu0 %v7671_v34, %s9605_s12  ;;  %v14031_v44 = vsel %vm159_vm5, %v13888_v38, %v13975_v63  ;;  %v7376_v34 = vadd.f32 1.0, %v9568_v61  ;;  %v14045_v38 = vsel %vm185_vm3, %v13840_v17, %v13845_v54 }
 0xe46   :  { %7586 = vrot.lane.b32.xlu1 %v7564_v31, %s9606_s17  ;;  %v8123_v23 = vmul.f32 %v13840_v17, %v14017_v47  ;;  %v7565_v11 = vmul.f32 %v14031_v44, %v13905_v42  ;;  %v8015_v7 = vmul.f32 %v13847_v52, %v14017_v47  ;;  %v7343_v31 = vpop.f32.mrf.mxu1  ;;  %v8011_v17 = vmul.f32 %v14059_v32, %v13940_v39 }
 0xe47   :  { %9571 = vrcp.f32 %v7376_v34  ;;  %v7676_v3 = vmul.f32 %v7662_v20, %v14017_v47  ;;  %v8004_v20 = vsel %vm253_vm6, %v13852_v48, %v13860_v12 }
 0xe49   :  { %7584 = vrot.lane.b32.xlu0 %v7563_v57, %s9606_s17  ;;  %v8119_v57 = vmul.f32 %v14045_v38, %v13940_v39 }
 0xe4a   :  { %7806 = vrot.lane.b32.xlu1 %v7782_v18, %s9608_s20  ;;  %v14051_v18 = vadd.f32 %v7343_v31, %v13830_v59  ;;  %v7784_v59 = vmul.f32 %v13957_v6, %v14017_v47  ;;  %v14081_v6 = vsel %vm185_vm3, %v13843_v36, %v13849_v0  ;;  %v8013_v36 = vmul.f32 %v8004_v20, %v13982_v37 }
 0xe4c   :  { %v9408_v54 = vmul.f32 -1.442695, %v14051_v18 }
 0xe4d   :  { %7476 = vrot.lane.b32.xlu0 %v7455_v29, %s9604_s1  ;;  %v7907_v29 = vmul.f32 %v13858_v46, %v14017_v47 }
 0xe4e   :  { %7698 = vrot.lane.b32.xlu1 %v7674_v25, %s9605_s12  ;;  %v14071_v25 = vsel %vm322_vm7, %v13858_v46, %v13865_v14  ;;  %v9570_v1 = vpop.eup %9569  ;;  %9573 = vpow2.f32 %v9408_v54  ;;  %v8121_v14 = vmul.f32 %v14081_v6, %v13982_v37 }
 0xe4f   :  { %v7903_v52 = vmul.f32 %v14071_v25, %v13940_v39  ;;  %v7375_v46 = vadd.f32 1.0, %v9570_v1 }
 0xe51   :  { %7804 = vrot.lane.b32.xlu0 %v7781_v50, %s9608_s20  ;;  %v7568_v50 = vmul.f32 %v7554_v19, %v14017_v47  ;;  %9575 = vrcp.f32 %v7375_v46  ;;  %v7896_v19 = vsel %vm322_vm7, %v13867_v40, %v13869_v55  ;;  %v14116_v55 = vpop.permute.xlu0 %7444 }
 0xe52   :  { %7590 = vrot.lane.b32.xlu1 %v7566_v41, %s9606_s17  ;;  %v7443_v41 = vpop.permute.xlu1 %7442  ;;  %v7905_v48 = vmul.f32 %v7896_v19, %v13982_v37 }
 0xe53   :  { %v7448_v31 = vsel %vm90_vm8, %v7443_v41, %v14116_v55 }
 0xe54   :  { %v9572_v16 = vpop.eup %9571 }
 0xe55   :  { %7696 = vrot.lane.b32.xlu0 %v7673_v56, %s9605_s12  ;;  %v14094_v0 = vmul.f32 %v9572_v16, %v13967_v2  ;;  %v7460_v56 = vmul.f32 %v13999_v13, %v14017_v47 }
 0xe56   :  { %8148 = vrot.lane.b32.xlu1 %v8123_v23, %s9612_s27  ;;  %v14102_v23 = vpop.permute.xlu1 %8210 }
 0xe57   :  { %v7786_v12 = vmul.f32 %v7772_v26, %v14094_v0  ;;  %v8125_v2 = vmul.f32 %v13911_v45, %v14094_v0  ;;  %v8017_v26 = vmul.f32 %v13923_v33, %v14094_v0  ;;  %v7909_v33 = vmul.f32 %v13936_v8, %v14094_v0 }
 0xe59   :  { %7588 = vrot.lane.b32.xlu0 %v7565_v11, %s9606_s17  ;;  %v7678_v11 = vmul.f32 %v7664_v58, %v14094_v0 }
 0xe5a   :  { %8040 = vrot.lane.b32.xlu1 %v8015_v7, %s9609_s23  ;;  %v14112_v40 = vpop.permute.xlu1 %8214  ;;  %v7570_v7 = vmul.f32 %v14031_v44, %v14094_v0 }
 0xe5b   :  { %v9574_v61 = vpop.eup %9573 }
 0xe5c   :  { %v7377_v13 = vadd.f32 1.0, %v9574_v61 }
 0xe5d   :  { %8140 = vrot.lane.b32.xlu0 %v8119_v57, %s9612_s27  ;;  %v7462_v57 = vmul.f32 %v7448_v31, %v14094_v0 }
 0xe5e   :  { %7932 = vrot.lane.b32.xlu1 %v7907_v29, %s9610_s25  ;;  %v9576_v34 = vpop.eup %9575  ;;  %9577 = vrcp.f32 %v7377_v13  ;;  %v14122_v45 = vpop.permute.xlu1 %8146 }
 0xe5f   :  { %v14127_v58 = vmul.f32 %v9576_v34, %v14014_v53  ;;  %v8213_v29 = vpop.permute.xlu0 %8212 }
 0xe60   :  { %v8219_v16 = vsel %vm116_vm0, %v8213_v29, %v14112_v40 }
 0xe61   :  { %8032 = vrot.lane.b32.xlu0 %v8011_v17, %s9609_s23  ;;  %v7785_v17 = vmul.f32 %v13948_v62, %v14127_v58  ;;  %v8124_v53 = vmul.f32 %v14045_v38, %v14127_v58  ;;  %v7677_v8 = vmul.f32 %v13962_v43, %v14127_v58  ;;  %v7569_v62 = vmul.f32 %v13973_v24, %v14127_v58 }
 0xe62   :  { %7810 = vrot.lane.b32.xlu1 %v7784_v59, %s9608_s20  ;;  %v14136_v44 = vpop.permute.xlu1 %8038  ;;  %v8016_v59 = vmul.f32 %v14059_v32, %v14127_v58  ;;  %v7908_v43 = vmul.f32 %v14071_v25, %v14127_v58  ;;  %v7447_v32 = vsel %vm90_vm8, %v13992_v51, %v7443_v41 }
 0xe63   :  { %v8217_v54 = vpop.permute.xlu0 %8216 }
 0xe65   :  { %7924 = vrot.lane.b32.xlu0 %v7903_v52, %s9610_s25 }
 0xe66   :  { %7702 = vrot.lane.b32.xlu1 %v7676_v3, %s9605_s12  ;;  %v14148_v52 = vpop.permute.xlu1 %7930 }
 0xe67   :  { %v14154_v38 = vpop.permute.xlu0 %8156 }
 0xe69   :  { %8144 = vrot.lane.b32.xlu0 %v8121_v14, %s9612_s27  ;;  %v7461_v14 = vmul.f32 %v7447_v32, %v14127_v58 }
 0xe6a   :  { %7594 = vrot.lane.b32.xlu1 %v7568_v50, %s9606_s17  ;;  %v14165_v46 = vpop.permute.xlu1 %7808 }
 0xe6b   :  { %v9578_v1 = vpop.eup %9577  ;;  %v14170_v50 = vpop.permute.xlu0 %8048 }
 0xe6c   :  { %v14157_v3 = vmul.f32 %v9578_v1, %v14051_v18  ;;  %v7457_v18 = vmul.f32 %v7448_v31, %v13905_v42  ;;  %v8231_v31 = vmul.f32 %v14102_v23, %v14017_v47  ;;  %v14241_v1 = vld [vmem:[%s14788_s7] sm:$0xff] }
 0xe6d   :  { %8036 = vrot.lane.b32.xlu0 %v8013_v36, %s9609_s23  ;;  %14949 = vst [vmem:[#allocation15_spill] sm:$0xff] %v14241_v1 }
 0xe6e   :  { %7486 = vrot.lane.b32.xlu1 %v7460_v56, %s9604_s1  ;;  %v8126_v24 = vmul.f32 %v14081_v6, %v14157_v3  ;;  %v8018_v25 = vmul.f32 %v8004_v20, %v14157_v3  ;;  %v14176_v51 = vpop.permute.xlu1 %7700  ;;  %v7910_v6 = vmul.f32 %v7896_v19, %v14157_v3  ;;  %v8233_v20 = vmul.f32 %v8219_v16, %v14094_v0 }
 0xe6f   :  { %v14180_v41 = vpop.permute.xlu0 %7940  ;;  %v7456_v56 = vmul.f32 %v7447_v32, %v13940_v39  ;;  %v8230_v19 = vmul.f32 0.0, %v8217_v54 }
 0xe71   :  { %7928 = vrot.lane.b32.xlu0 %v7905_v48, %s9610_s25 }
 0xe72   :  { %7814 = vrot.lane.b32.xlu1 %v7786_v12, %s9608_s20  ;;  %v14188_v36 = vpop.permute.xlu1 %7592  ;;  %v8218_v12 = vsel %vm116_vm0, %v14102_v23, %v8213_v29  ;;  %v8228_v29 = vmul.f32 %v8219_v16, %v13905_v42 }
 0xe73   :  { %v14192_v48 = vpop.permute.xlu0 %7798  ;;  %v8227_v13 = vmul.f32 %v8218_v12, %v13940_v39 }
 0xe75   :  { %8152 = vrot.lane.b32.xlu0 %v8125_v2, %s9612_s27 }
 0xe76   :  { %7706 = vrot.lane.b32.xlu1 %v7678_v11, %s9605_s12  ;;  %v14200_v61 = vpop.permute.xlu1 %7484  ;;  %v8232_v11 = vmul.f32 %v8218_v12, %v14127_v58  ;;  %v8226_v12 = vmul.f32 %v14102_v23, %v13918_v27 }
 0xe77   :  { %v14202_v2 = vpop.permute.xlu0 %7690 }
 0xe79   :  { %8044 = vrot.lane.b32.xlu0 %v8017_v26, %s9609_s23 }
 0xe7a   :  { %7598 = vrot.lane.b32.xlu1 %v7570_v7, %s9606_s17  ;;  %v7787_v7 = vmul.f32 %v13913_v35, %v14157_v3  ;;  %v7571_v35 = vmul.f32 %v13975_v63, %v14157_v3  ;;  %v7463_v63 = vmul.f32 %v14116_v55, %v14157_v3 }
 0xe7b   :  { %v14209_v26 = vpop.permute.xlu0 %7582 }
 0xe7d   :  { %7936 = vrot.lane.b32.xlu0 %v7909_v33, %s9610_s25  ;;  %v7679_v33 = vmul.f32 %v13929_v60, %v14157_v3 }
 0xe7e   :  { %7490 = vrot.lane.b32.xlu1 %v7462_v57, %s9604_s1 }
 0xe81   :  { %7812 = vrot.lane.b32.xlu0 %v7785_v17, %s9608_s20 }
 0xe82   :  { %8150 = vrot.lane.b32.xlu1 %v8124_v53, %s9612_s27  ;;  %v8220_v53 = vsel %vm116_vm0, %v14112_v40, %v8217_v54 }
 0xe83   :  { %v8234_v60 = vmul.f32 %v8220_v53, %v14157_v3 }
 0xe85   :  { %7704 = vrot.lane.b32.xlu0 %v7677_v8, %s9605_s12 }
 0xe86   :  { %8042 = vrot.lane.b32.xlu1 %v8016_v59, %s9609_s23 }
 0xe89   :  { %7596 = vrot.lane.b32.xlu0 %v7569_v62, %s9606_s17  ;;  %v8370_v62 = vcombine.high %v14241_v1, %v14241_v1  ;;  %v8608_v1 = vrot.slane %v9419_v15, %v14945_v21 }
 0xe8a   :  { %7934 = vrot.lane.b32.xlu1 %v7908_v43, %s9610_s25  ;;  %v9425_v43 = vld [vmem:[%s14783_s2 + $0x20] ss:$8 sm:$0xf] }
 0xe8b   :  { %9417 = vmatprep.mubr.msk.f32.mxu1 %vm185_vm3, %v8370_v62  ;;  %9416 = vmatprep.mubr.msk.f32.mxu0 %vm185_vm3, %v8370_v62  ;;  %v9022_v32 = vrot.slane %v9425_v43, %v14947_v10  ;;  %v9014_v16 = vrot.slane %v9425_v43, %v14945_v21  ;;  %v9422_v62 = vld [vmem:[%s14783_s2 + $0x5] ss:$8 sm:$0xf] }
 0xe8d   :  { %7488 = vrot.lane.b32.xlu0 %v7461_v14, %s9604_s1  ;;  %v8229_v14 = vmul.f32 %v8220_v53, %v13982_v37 }
 0xe8e   :  { %8154 = vrot.lane.b32.xlu1 %v8126_v24, %s9612_s27 }
 0xe91   :  { %7480 = vrot.lane.b32.xlu0 %v7457_v18, %s9604_s1  ;;  %v8363_v18 = vld [vmem:[%s14789_s8] sm:$0xf] }
 0xe92   :  { %8046 = vrot.lane.b32.xlu1 %v8018_v25, %s9609_s23  ;;  %v9423_v25 = vld [vmem:[%s14783_s2 + $0x6] ss:$8 sm:$0xf] }
 0xe95   :  { %7474 = vrot.lane.b32.xlu0 %v13898_v22, %s9604_s1  ;;  %v7458_v22 = vmul.f32 %v14116_v55, %v13982_v37  ;;  %v9026_v55 = vrot.slane %v9425_v43, %v14948_v5 }
 0xe96   :  { %7938 = vrot.lane.b32.xlu1 %v7910_v6, %s9610_s25 }
 0xe99   :  { %8260 = vrot.lane.b32.xlu0 %v8233_v20, %s9611_s26  ;;  %v9018_v20 = vrot.slane %v9425_v43, %v14946_v49 }
 0xe9a   :  { %7478 = vrot.lane.b32.xlu1 %v7456_v56, %s9604_s1  ;;  %v9028_v56 = vcombine.low %v9022_v32, %v9026_v55 }
 0xe9d   :  { %8264 = vrot.lane.b32.xlu0 %v8230_v19, %s9611_s26 }
 0xe9e   :  { %7482 = vrot.lane.b32.xlu1 %v7458_v22, %s9604_s1  ;;  %v8895_v22 = vrot.slane %v9423_v25, %v14948_v5 }
 0xea1   :  { %8248 = vrot.lane.b32.xlu0 %v8227_v13, %s9611_s26 }
 0xea2   :  { %8258 = vrot.lane.b32.xlu1 %v8232_v11, %s9611_s26  ;;  %v9424_v11 = vld [vmem:[%s14783_s2 + $0x7] ss:$8 sm:$0xf] }
 0xea3   :  { %v8956_v23 = vrot.slane %v9424_v11, %v14947_v10  ;;  %v8960_v53 = vrot.slane %v9424_v11, %v14948_v5  ;;  %v8948_v32 = vrot.slane %v9424_v11, %v14945_v21  ;;  %v8952_v55 = vrot.slane %v9424_v11, %v14946_v49 }
 0xea4   :  { %v14212_v34 = vpop.permute.xlu1 %8142 }
 0xea5   :  { %7816 = vrot.lane.b32.xlu0 %v7787_v7, %s9608_s20 }
 0xea6   :  { %8256 = vrot.lane.b32.xlu1 %v8231_v31, %s9611_s26  ;;  %v9027_v31 = vcombine.low %v9014_v16, %v9018_v20  ;;  %v9420_v20 = vld [vmem:[%s14783_s2 + $0x2] ss:$8 sm:$0xf] }
 0xea7   :  { %v14222_v57 = vpop.permute.xlu0 %8138 }
 0xea8   :  { %v14225_v17 = vpop.permute.xlu1 %8034 }
 0xea9   :  { %7708 = vrot.lane.b32.xlu0 %v7679_v33, %s9605_s12  ;;  %v8883_v33 = vrot.slane %v9423_v25, %v14945_v21 }
 0xeaa   :  { %8250 = vrot.lane.b32.xlu1 %v8228_v29, %s9611_s26  ;;  %v8887_v29 = vrot.slane %v9423_v25, %v14946_v49 }
 0xeab   :  { %v14233_v8 = vpop.permute.xlu0 %8030 }
 0xeac   :  { %v14236_v59 = vpop.permute.xlu1 %7926  ;;  %v8896_v43 = vcombine.low %v8883_v33, %v8887_v29  ;;  %v8686_v33 = vrot.slane %v9420_v20, %v14948_v5 }
 0xead   :  { %7600 = vrot.lane.b32.xlu0 %v7571_v35, %s9606_s17 }
 0xeae   :  { %8262 = vrot.lane.b32.xlu1 %v8234_v60, %s9611_s26 }
 0xeaf   :  { %v14249_v40 = vpop.permute.xlu0 %7922 }
 0xeb0   :  { %v14253_v54 = vpop.permute.xlu1 %7802 }
 0xeb1   :  { %7492 = vrot.lane.b32.xlu0 %v7463_v63, %s9604_s1 }
 0xeb2   :  { %8254 = vrot.lane.b32.xlu1 %v8230_v19, %s9611_s26  ;;  %v8891_v19 = vrot.slane %v9423_v25, %v14947_v10  ;;  %v8829_v25 = vrot.slane %v9422_v62, %v14948_v5 }
 0xeb3   :  { %v14263_v24 = vpop.permute.xlu0 %7800 }
 0xeb4   :  { %v14271_v6 = vpop.permute.xlu1 %7694  ;;  %v8897_v35 = vcombine.low %v8891_v19, %v8895_v22  ;;  %v8961_v19 = vcombine.low %v8948_v32, %v8952_v55  ;;  %v8817_v22 = vrot.slane %v9422_v62, %v14945_v21 }
 0xeb5   :  { %8252 = vrot.lane.b32.xlu0 %v8229_v14, %s9611_s26  ;;  %v8962_v14 = vcombine.low %v8956_v23, %v8960_v53 }
 0xeb6   :  { %8366 = vperm.xlu1 %9444, %v8363_v18   ;;  %v8825_v18 = vrot.slane %v9422_v62, %v14947_v10 }
 0xeb7   :  { %v14280_v13 = vpop.permute.xlu0 %7692 }
 0xeb8   :  { %v14285_v7 = vpop.permute.xlu1 %7586  ;;  %v8831_v11 = vcombine.low %v8825_v18, %v8829_v25  ;;  %v8538_v25 = vld [vmem:[%s14783_s2] ss:$8 sm:$0xf] }
 0xeb9   :  { %8246 = vrot.lane.b32.xlu0 %v8226_v12, %s9611_s26  ;;  %v8821_v12 = vrot.slane %v9422_v62, %v14946_v49  ;;  %v8674_v62 = vrot.slane %v9420_v20, %v14945_v21 }
 0xeba   :  { %9031 = vrot.lane.b32.xlu1 %v9028_v56, %s9604_s1 }
 0xebb   :  { %v14293_v60 = vpop.permute.xlu0 %7584  ;;  %v8830_v53 = vcombine.low %v8817_v22, %v8821_v12 }
 0xebc   :  { %v14298_v63 = vpop.permute.xlu1 %7806 }
 0xebd   :  { %9029 = vrot.lane.b32.xlu0 %v9027_v31, %s9604_s1  ;;  %v8682_v31 = vrot.slane %v9420_v20, %v14947_v10 }
 0xebe   :  { %8900 = vrot.lane.b32.xlu1 %v8897_v35, %s9605_s12  ;;  %v9421_v35 = vld [vmem:[%s14783_s2 + $0x3] ss:$8 sm:$0xf]  ;;  %s9418_s2 = sld [smem:[#allocation7 + $0x3]] }
 0xebf   :  { %v14306_v16 = vpop.permute.xlu0 %7476  ;;  %v8688_v32 = vcombine.low %v8682_v31, %v8686_v33  ;;  %v8747_v55 = vrot.slane %v9421_v35, %v14947_v10  ;;  %v8739_v22 = vrot.slane %v9421_v35, %v14945_v21  ;;  %v8555_v31 = vrot.slane %v8538_v25, %v14948_v5 }
 0xec0   :  { %v14311_v56 = vpop.permute.xlu1 %7698 }
 0xec1   :  { %14950 = vst [vmem:[#allocation22_spill] sm:$0xff] %v14311_v56  ;;  %8898 = vrot.lane.b32.xlu0 %v8896_v43, %s9605_s12  ;;  %v8678_v43 = vrot.slane %v9420_v20, %v14946_v49  ;;  %v8743_v20 = vrot.slane %v9421_v35, %v14946_v49 }
 0xec2   :  { %8965 = vrot.lane.b32.xlu1 %v8962_v14, %s9606_s17  ;;  %v8751_v14 = vrot.slane %v9421_v35, %v14948_v5  ;;  %v8547_v35 = vrot.slane %v8538_v25, %v14946_v49 }
 0xec3   :  { %v14319_v29 = vpop.permute.xlu0 %7804 }
 0xec4   :  { %v14324_v23 = vpop.permute.xlu1 %7590  ;;  %v8753_v12 = vcombine.low %v8747_v55, %v8751_v14  ;;  %v8620_v55 = vrot.slane %v9419_v15, %v14948_v5 }
 0xec5   :  { %14951 = vst [vmem:[#allocation23_spill] sm:$0xff] %v14324_v23  ;;  %8963 = vrot.lane.b32.xlu0 %v8961_v19, %s9606_s17  ;;  %v8687_v19 = vcombine.low %v8674_v62, %v8678_v43  ;;  %v8543_v62 = vrot.slane %v8538_v25, %v14945_v21 }
 0xec6   :  { %8834 = vrot.lane.b32.xlu1 %v8831_v11, %s9608_s20  ;;  %v8551_v11 = vrot.slane %v8538_v25, %v14947_v10 }
 0xec7   :  { %v14332_v18 = vpop.permute.xlu0 %7696  ;;  %v8556_v28 = vcombine.low %v8543_v62, %v8547_v35 }
 0xec8   :  { %14952 = vst [vmem:[#allocation24_spill] sm:$0xff] %v14332_v18  ;;  %v8149_v30 = vpop.permute.xlu1 %8148  ;;  %v8557_v43 = vcombine.low %v8551_v11, %v8555_v31 }
 0xec9   :  { %8832 = vrot.lane.b32.xlu0 %v8830_v53, %s9608_s20  ;;  %v8752_v53 = vcombine.low %v8739_v22, %v8743_v20 }
 0xeca   :  { %8691 = vrot.lane.b32.xlu1 %v8688_v32, %s9609_s23  ;;  %v8616_v32 = vrot.slane %v9419_v15, %v14947_v10 }
 0xecb   :  { %v14343_v33 = vpop.permute.xlu0 %7588 }
 0xecc   :  { %14953 = vst [vmem:[#allocation16_spill] sm:$0xff] %v14343_v33  ;;  %v8041_v4 = vpop.permute.xlu1 %8040  ;;  %v8622_v22 = vcombine.low %v8616_v32, %v8620_v55 }
 0xecd   :  { %8689 = vrot.lane.b32.xlu0 %v8687_v19, %s9609_s23  ;;  %v8612_v19 = vrot.slane %v9419_v15, %v14946_v49 }
 0xece   :  { %8756 = vrot.lane.b32.xlu1 %v8753_v12, %s9610_s25 }
 0xecf   :  { %v8141_v14 = vpop.permute.xlu0 %8140  ;;  %v8621_v10 = vcombine.low %v8608_v1, %v8612_v19 }
 0xed0   :  { %v7933_v9 = vpop.permute.xlu1 %7932  ;;  %v8159_v23 = vsel %vm159_vm5, %v8141_v14, %v14212_v34 }
 0xed1   :  { %8754 = vrot.lane.b32.xlu0 %v8752_v53, %s9610_s25 }
 0xed2   :  { %8560 = vrot.lane.b32.xlu1 %v8557_v43, %s9611_s26 }
 0xed3   :  { %v8033_v25 = vpop.permute.xlu0 %8032 }
 0xed4   :  { %v14358_v20 = vpop.permute.xlu1 %7810 }
 0xed5   :  { %8558 = vrot.lane.b32.xlu0 %v8556_v28, %s9611_s26 }
 0xed6   :  { %8625 = vrot.lane.b32.xlu1 %v8622_v22, %s9612_s27 }
 0xed7   :  { %v7925_v5 = vpop.permute.xlu0 %7924 }
 0xed8   :  { %v14362_v12 = vpop.permute.xlu1 %7702 }
 0xed9   :  { %8623 = vrot.lane.b32.xlu0 %v8621_v10, %s9612_s27 }
 0xedb   :  { %v8145_v11 = vpop.permute.xlu0 %8144 }
 0xedc   :  { %v14365_v21 = vpop.permute.xlu1 %7594 }
 0xedf   :  { %v14367_v15 = vpop.permute.xlu0 %8036 }
 0xee0   :  { %v14369_v49 = vpop.permute.xlu1 %7486 }
 0xee3   :  { %v14371_v31 = vpop.permute.xlu0 %7928 }
 0xee4   :  { %v14373_v53 = vpop.permute.xlu1 %7814 }
 0xee7   :  { %v8153_v28 = vpop.permute.xlu0 %8152 }
 0xee8   :  { %v14375_v1 = vpop.permute.xlu1 %7706 }
 0xeeb   :  { %v8045_v62 = vpop.permute.xlu0 %8044 }
 0xeec   :  { %v14377_v35 = vpop.permute.xlu1 %7598 }
 0xeed   :  { %14954 = vst [vmem:[#allocation21_spill] sm:$0xff] %v14377_v35  ;;  %v8158_v35 = vsel %vm159_vm5, %v14222_v57, %v8141_v14  ;;  %v7942_v14 = vsel %vm296_vm1, %v14249_v40, %v7925_v5  ;;  %v8160_v40 = vsel %vm159_vm5, %v14212_v34, %v8145_v11  ;;  %v8053_v34 = vsel %vm228_vm2, %v14367_v15, %v14136_v44 }
 0xeef   :  { %v14379_v43 = vpop.permute.xlu0 %7936 }
 0xef0   :  { %v14381_v32 = vpop.permute.xlu1 %7490 }
 0xef1   :  { %14955 = vst [vmem:[#allocation17_spill] sm:$0xff] %v14381_v32 }
 0xef3   :  { %v14383_v55 = vpop.permute.xlu0 %7812 }
 0xef4   :  { %v8151_v19 = vpop.permute.xlu1 %8150 }
 0xef5   :  { %v8162_v22 = vsel %vm159_vm5, %v8149_v30, %v8151_v19  ;;  %v8163_v10 = vsel %vm159_vm5, %v8151_v19, %v8153_v28  ;;  %v8051_v19 = vsel %vm228_vm2, %v8033_v25, %v14225_v17 }
 0xef6   :  { %8373 = vmatprep.subr.mxu0 %v8163_v10 }
 0xef7   :  { %8374 = vmatpush1.msra.mxu0 %v8162_v22  ;;  %v14387_v33 = vpop.permute.xlu0 %7704 }
 0xef8   :  { %v8043_v18 = vpop.permute.xlu1 %8042  ;;  %8375 = vmatprep.subr.mxu0 %v8159_v23  ;;  %v8050_v23 = vsel %vm228_vm2, %v14233_v8, %v8033_v25  ;;  %v7715_v44 = vsel %vm253_vm6, %v14362_v12, %v14387_v33 }
 0xef9   :  { %v8054_v32 = vsel %vm228_vm2, %v8041_v4, %v8043_v18  ;;  %8376 = vmatpush1.msra.mxu0 %v8158_v35  ;;  %v8055_v56 = vsel %vm228_vm2, %v8043_v18, %v8045_v62  ;;  %v8161_v35 = vsel %vm159_vm5, %v8145_v11, %v14122_v45 }
 0xefa   :  { %8377 = vmatprep.subr.mxu0 %v8055_v56  ;;  %v7943_v56 = vsel %vm296_vm1, %v7925_v5, %v14236_v59 }
 0xefb   :  { %8378 = vmatpush1.msra.mxu0 %v8054_v32  ;;  %v14395_v30 = vpop.permute.xlu0 %7596 }
 0xefc   :  { %v7935_v22 = vpop.permute.xlu1 %7934  ;;  %8379 = vmatprep.subr.mxu0 %v8051_v19 }
 0xefd   :  { %v7946_v10 = vsel %vm296_vm1, %v7933_v9, %v7935_v22  ;;  %8380 = vmatpush1.msra.mxu0 %v8050_v23  ;;  %v7947_v4 = vsel %vm296_vm1, %v7935_v22, %v14379_v43  ;;  %v7820_v22 = vsel %vm322_vm7, %v14253_v54, %v14319_v29 }
 0xefe   :  { %8381 = vmatprep.subr.mxu0 %v7947_v4  ;;  %v14957_v4 = vld [vmem:[#allocation24_spill] sm:$0xff] }
 0xeff   :  { %8382 = vmatpush1.msra.mxu0 %v7946_v10  ;;  %v14404_v57 = vpop.permute.xlu0 %7488 }
 0xf00   :  { %v8155_v18 = vpop.permute.xlu1 %8154  ;;  %8383 = vmatprep.subr.mxu0 %v7943_v56 }
 0xf01   :  { %v8164_v8 = vsel %vm159_vm5, %v8153_v28, %v8155_v18  ;;  %8384 = vmatpush1.msra.mxu0 %v7942_v14  ;;  %v8165_v9 = vsel %vm159_vm5, %v8155_v18, %v14154_v38  ;;  %v14958_v18 = vld [vmem:[#allocation21_spill] sm:$0xff] }
 0xf02   :  { %8385 = vmatprep.subr.mxu0 %v14127_v58  ;;  %8444 = vmatprep.subr.mxu1 %v8165_v9 }
 0xf03   :  { %8386 = vmatpush1.msra.mxu0 %v14017_v47  ;;  %8445 = vmatpush1.msra.mxu1 %v8164_v8  ;;  %v14415_v25 = vpop.permute.xlu0 %7480  ;;  %v7823_v47 = vsel %vm322_vm7, %v14358_v20, %v14383_v55  ;;  %v14960_v8 = vld [vmem:[#allocation16_spill] sm:$0xff] }
 0xf04   :  { %v8047_v32 = vpop.permute.xlu1 %8046  ;;  %8387 = vmatprep.subr.mxu0 %v13940_v39  ;;  %8446 = vmatprep.subr.mxu1 %v8161_v35  ;;  %v7822_v39 = vsel %vm322_vm7, %v14165_v46, %v14358_v20  ;;  %v7818_v46 = vsel %vm322_vm7, %v14192_v48, %v14263_v24 }
 0xf05   :  { %v8056_v38 = vsel %vm228_vm2, %v8045_v62, %v8047_v32  ;;  %8388 = vmatpush1.msra.mxu0 %v13918_v27  ;;  %8447 = vmatpush1.msra.mxu1 %v8160_v40  ;;  %v8057_v58 = vsel %vm228_vm2, %v8047_v32, %v14170_v50  ;;  %v7819_v27 = vsel %vm322_vm7, %v14263_v24, %v14253_v54  ;;  %v14961_v40 = vld [vmem:[#allocation17_spill] sm:$0xff] }
 0xf06   :  { %8389 = vmatprep.subr.mxu0 %v7823_v47  ;;  %8448 = vmatprep.subr.mxu1 %v8057_v58  ;;  %v8052_v50 = vsel %vm228_vm2, %v14225_v17, %v14367_v15  ;;  %v7714_v17 = vsel %vm253_vm6, %v14176_v51, %v14362_v12  ;;  %v7711_v24 = vsel %vm253_vm6, %v14280_v13, %v14271_v6 }
 0xf07   :  { %8390 = vmatpush1.msra.mxu0 %v7822_v39  ;;  %8449 = vmatpush1.msra.mxu1 %v8056_v38  ;;  %v7475_v45 = vpop.permute.xlu0 %7474  ;;  %v7945_v15 = vsel %vm296_vm1, %v14371_v31, %v14148_v52  ;;  %v7710_v51 = vsel %vm253_vm6, %v14202_v2, %v14280_v13  ;;  %v7607_v12 = vsel %vm185_vm3, %v14365_v21, %v14395_v30 }
 0xf08   :  { %v7939_v5 = vpop.permute.xlu1 %7938  ;;  %8391 = vmatprep.subr.mxu0 %v7819_v27  ;;  %8450 = vmatprep.subr.mxu1 %v8053_v34  ;;  %v7606_v52 = vsel %vm185_vm3, %v14188_v36, %v14365_v21  ;;  %v7603_v2 = vsel %vm185_vm3, %v14293_v60, %v14285_v7  ;;  %v7602_v36 = vsel %vm185_vm3, %v14209_v26, %v14293_v60 }
 0xf09   :  { %v7948_v20 = vsel %vm296_vm1, %v14379_v43, %v7939_v5  ;;  %8392 = vmatpush1.msra.mxu0 %v7818_v46  ;;  %8451 = vmatpush1.msra.mxu1 %v8052_v50  ;;  %v7949_v11 = vsel %vm296_vm1, %v7939_v5, %v14180_v41  ;;  %v7944_v41 = vsel %vm296_vm1, %v14236_v59, %v14371_v31  ;;  %v14962_v5 = vld [vmem:[#allocation15_spill] sm:$0xff]  ;;  %v14963_v46 = vmov 0.0  }
 0xf0a   :  { %8393 = vmatprep.subr.mxu0 %v7715_v44  ;;  %8452 = vmatprep.subr.mxu1 %v7949_v11  ;;  %v7494_v26 = vsel %vm116_vm0, %v7475_v45, %v14306_v16  ;;  %v9008_v44 = vld [vmem:[#allocation2 + $0x14] sm:$0xf] }
 0xf0b   :  { %8394 = vmatpush1.msra.mxu0 %v7714_v17  ;;  %8453 = vmatpush1.msra.mxu1 %v7948_v20  ;;  %v14454_v48 = vpop.permute.xlu0 %8260 }
 0xf0c   :  { %v14465_v28 = vpop.permute.xlu1 %7478  ;;  %8395 = vmatprep.subr.mxu0 %v7711_v24  ;;  %8454 = vmatprep.subr.mxu1 %v7945_v15  ;;  %v8877_v24 = vld [vmem:[#allocation2 + $0x14] sm:$0xf] }
 0xf0d   :  { %8396 = vmatpush1.msra.mxu0 %v7710_v51  ;;  %8455 = vmatpush1.msra.mxu1 %v7944_v41  ;;  %v7496_v58 = vsel %vm116_vm0, %v14465_v28, %v14415_v25  ;;  %v8942_v51 = vld [vmem:[#allocation2 + $0x14] sm:$0xf] }
 0xf0e   :  { %8397 = vmatprep.subr.mxu0 %v7607_v12  ;;  %8456 = vmatprep.subr.mxu1 %v14157_v3  ;;  %v7498_v3 = vsel %vm116_vm0, %v14200_v61, %v14369_v49 }
 0xf0f   :  { %8398 = vmatpush1.msra.mxu0 %v7606_v52  ;;  %8457 = vmatpush1.msra.mxu1 %v14094_v0  ;;  %v14478_v59 = vpop.permute.xlu0 %8264  ;;  %v7499_v0 = vsel %vm116_vm0, %v14369_v49, %v14404_v57  ;;  %v7824_v49 = vsel %vm322_vm7, %v14383_v55, %v14373_v53  ;;  %v7716_v55 = vsel %vm253_vm6, %v14387_v33, %v14375_v1 }
 0xf10   :  { %v7483_v13 = vpop.permute.xlu1 %7482  ;;  %8399 = vmatprep.subr.mxu0 %v7603_v2  ;;  %8458 = vmatprep.subr.mxu1 %v13982_v37  ;;  %v7495_v37 = vsel %vm116_vm0, %v14306_v16, %v14465_v28  ;;  %v7821_v16 = vsel %vm322_vm7, %v14319_v29, %v14298_v63  ;;  %v14956_v63 = vld [vmem:[#allocation22_spill] sm:$0xff]  ;;  %v7712_v29 = vsel %vm253_vm6, %v14271_v6, %v14957_v4  ;;  %v8811_v2 = vld [vmem:[#allocation2 + $0x14] sm:$0xf] }
 0xf11   :  { %8400 = vmatpush1.msra.mxu0 %v7602_v36  ;;  %8459 = vmatpush1.msra.mxu1 %v13905_v42  ;;  %v7713_v56 = vsel %vm253_vm6, %v14957_v4, %v14956_v63  ;;  %v7608_v33 = vsel %vm185_vm3, %v14395_v30, %v14958_v18  ;;  %v7604_v6 = vsel %vm185_vm3, %v14285_v7, %v14960_v8  ;;  %v8516_v4 = vstv %s9418_s2 }
 0xf12   :  { %8401 = vmatprep.subr.mxu0 %v7499_v0  ;;  %v7500_v30 = vsel %vm116_vm0, %v14404_v57, %v14961_v40  ;;  %v7497_v47 = vsel %vm116_vm0, %v14415_v25, %v7483_v13 }
 0xf13   :  { %8402 = vmatpush1.msra.mxu0 %v7498_v3  ;;  %v8249_v21 = vpop.permute.xlu0 %8248 }
 0xf14   :  { %v8259_v60 = vpop.permute.xlu1 %8258  ;;  %8403 = vmatprep.subr.mxu0 %v7495_v37 }
 0xf15   :  { %8404 = vmatpush1.msra.mxu0 %v7494_v26  ;;  %v8271_v42 = vsel %vm90_vm8, %v8259_v60, %v14454_v48 }
 0xf16   :  { %8433 = vmatprep.subr.mxu0 %v8271_v42 }
 0xf17   :  { %v7817_v31 = vpop.permute.xlu0 %7816 }
 0xf18   :  { %v8257_v62 = vpop.permute.xlu1 %8256  ;;  %v7825_v61 = vsel %vm322_vm7, %v14373_v53, %v7817_v31 }
 0xf19   :  { %v8270_v43 = vsel %vm90_vm8, %v8257_v62, %v8259_v60  ;;  %8460 = vmatprep.subr.mxu1 %v7825_v61 }
 0xf1a   :  { %8434 = vmatpush2.msra.mxu0 %v8270_v43  ;;  %8461 = vmatpush1.msra.mxu1 %v7824_v49 }
 0xf1b   :  { %8462 = vmatprep.subr.mxu1 %v7821_v16  ;;  %v7709_v19 = vpop.permute.xlu0 %7708 }
 0xf1c   :  { %v8251_v23 = vpop.permute.xlu1 %8250  ;;  %8463 = vmatpush1.msra.mxu1 %v7820_v22  ;;  %v7717_v53 = vsel %vm253_vm6, %v14375_v1, %v7709_v19  ;;  %v14959_v1 = vld [vmem:[#allocation23_spill] sm:$0xff] }
 0xf1d   :  { %8464 = vmatprep.subr.mxu1 %v7717_v53  ;;  %v8267_v10 = vsel %vm90_vm8, %v8249_v21, %v8251_v23  ;;  %v7605_v9 = vsel %vm185_vm3, %v14960_v8, %v14959_v1 }
 0xf1e   :  { %8435 = vmatprep.subr.mxu0 %v8267_v10  ;;  %8465 = vmatpush1.msra.mxu1 %v7716_v55 }
 0xf1f   :  { %8466 = vmatprep.subr.mxu1 %v7713_v56  ;;  %v7601_v54 = vpop.permute.xlu0 %7600 }
 0xf20   :  { %8467 = vmatpush1.msra.mxu1 %v7712_v29  ;;  %v7609_v14 = vsel %vm185_vm3, %v14958_v18, %v7601_v54  ;;  %v8263_v35 = vpop.permute.xlu1 %8262 }
 0xf21   :  { %8468 = vmatprep.subr.mxu1 %v7609_v14  ;;  %v8273_v7 = vsel %vm90_vm8, %v8263_v35, %v14478_v59  ;;  %v8272_v45 = vsel %vm90_vm8, %v14454_v48, %v8263_v35 }
 0xf22   :  { %8469 = vmatpush1.msra.mxu1 %v7608_v33 }
 0xf23   :  { %8470 = vmatprep.subr.mxu1 %v7605_v9  ;;  %v7493_v32 = vpop.permute.xlu0 %7492 }
 0xf24   :  { %8471 = vmatpush1.msra.mxu1 %v7604_v6  ;;  %v7501_v38 = vsel %vm116_vm0, %v14961_v40, %v7493_v32  ;;  %v8255_v27 = vpop.permute.xlu1 %8254 }
 0xf25   :  { %8472 = vmatprep.subr.mxu1 %v7501_v38  ;;  %v14964_v38 = vld [vmem:[#allocation18_spill] sm:$0xff] }
 0xf26   :  { %8473 = vmatpush1.msra.mxu1 %v7500_v30 }
 0xf27   :  { %8474 = vmatprep.subr.mxu1 %v7497_v47  ;;  %v8253_v39 = vpop.permute.xlu0 %8252  ;;  %v14965_v47 = vld [vmem:[#allocation13_spill] sm:$0xff] }
 0xf28   :  { %8475 = vmatpush1.msra.mxu1 %v7496_v58  ;;  %v8269_v57 = vsel %vm90_vm8, %v8253_v39, %v8255_v27  ;;  %v8268_v34 = vsel %vm90_vm8, %v8251_v23, %v8253_v39  ;;  %v14966_v39 = vld [vmem:[#allocation19_spill] sm:$0xff] }
 0xf29   :  { %8504 = vmatprep.subr.mxu1 %v8273_v7 }
 0xf2a   :  { %8505 = vmatpush2.msra.mxu1 %v8272_v45  ;;  %v14967_v45 = vld [vmem:[#allocation20_spill] sm:$0xff] }
 0xf2b   :  { %8506 = vmatprep.subr.mxu1 %v8269_v57  ;;  %v8247_v50 = vpop.permute.xlu0 %8246 }
 0xf2c   :  { %v8266_v25 = vsel %vm90_vm8, %v8247_v50, %v8249_v21  ;;  %8507 = vmatpush2.msra.mxu1 %v8268_v34 }
 0xf2d   :  { %8436 = vmatpush2.msra.mxu0 %v8266_v25  ;;  %8509 = vmatmul.mubr.f32.vlgmr.msra.gmra.mxu1 %v14962_v5 }
 0xf2e   :  { %8438 = vmatmul.mubr.f32.vlgmr.msra.gmra.mxu0 %v14962_v5  ;;  %9248 = vmatprep.mubr.f32.mxu1 %v14963_v46 }
 0xf2f   :  { %9177 = vmatprep.mubr.f32.mxu0 %v14963_v46  ;;  %v9030_v37 = vpop.permute.xlu0 %9029 }
 0xf30   :  { %v9033_v60 = vrot.slane %v9030_v37, 4 }
 0xf31   :  { %v8367_v20 = vpop.permute.xlu1 %8366 }
 0xf32   :  { %v9035_v25 = vsel %vm116_vm0, %v9033_v60, %v9030_v37 }
 0xf33   :  { %v8899_v26 = vpop.permute.xlu0 %8898 }
 0xf34   :  { %v8902_v62 = vrot.slane %v8899_v26, 4 }
 0xf35   :  { %v9032_v11 = vpop.permute.xlu1 %9031 }
 0xf36   :  { %v9034_v17 = vrot.slane %v9032_v11, 4 }
 0xf37   :  { %v8964_v42 = vpop.permute.xlu0 %8963 }
 0xf38   :  { %v9043_v48 = vmul.f32 %v9034_v17, %v9008_v44  ;;  %v9036_v31 = vsel %vm92_vm4, %v9033_v60, %v9034_v17  ;;  %v8967_v43 = vrot.slane %v8964_v42, 4  ;;  %v8904_v17 = vsel %vm253_vm6, %v8902_v62, %v8899_v26 }
 0xf39   :  { %v8901_v15 = vpop.permute.xlu1 %8900  ;;  %v14563_v61 = vsel %vm116_vm0, %v9036_v31, %v9032_v11 }
 0xf3a   :  { %v8903_v41 = vrot.slane %v8901_v15, 4  ;;  %9057 = vrot.lane.b32.xlu1 %v9043_v48, %s9611_s26  ;;  %v8969_v5 = vsel %vm185_vm3, %v8967_v43, %v8964_v42 }
 0xf3b   :  { %v8833_v16 = vpop.permute.xlu0 %8832 }
 0xf3c   :  { %v8912_v28 = vmul.f32 %v8903_v41, %v8877_v24  ;;  %v8905_v49 = vsel %vm92_vm4, %v8902_v62, %v8903_v41  ;;  %v8836_v19 = vrot.slane %v8833_v16, 4 }
 0xf3d   :  { %v8966_v12 = vpop.permute.xlu1 %8965  ;;  %v14567_v22 = vsel %vm253_vm6, %v8905_v49, %v8901_v15 }
 0xf3e   :  { %v8968_v52 = vrot.slane %v8966_v12, 4  ;;  %8926 = vrot.lane.b32.xlu0 %v8912_v28, %s9609_s23 }
 0xf3f   :  { %v14577_v56 = vpop.permute.xlu0 %8689 }
 0xf40   :  { %v8977_v59 = vmul.f32 %v8968_v52, %v8942_v51  ;;  %v8970_v23 = vsel %vm92_vm4, %v8967_v43, %v8968_v52  ;;  %v8838_v51 = vsel %vm322_vm7, %v8836_v19, %v8833_v16 }
 0xf41   :  { %v8835_v13 = vpop.permute.xlu1 %8834  ;;  %v14572_v55 = vsel %vm185_vm3, %v8970_v23, %v8966_v12 }
 0xf42   :  { %v8983_v36 = vcombine.low %v8977_v59, %v8977_v59  ;;  %v8837_v0 = vrot.slane %v8835_v13, 4  ;;  %v8693_v59 = vrot.slane %v14577_v56, 4 }
 0xf43   :  { %v8755_v40 = vpop.permute.xlu0 %8754 }
 0xf44   :  { %v8846_v3 = vmul.f32 %v8837_v0, %v8811_v2  ;;  %8992 = vrot.lane.b32.xlu0 %v8983_v36, %s9612_s27  ;;  %v8839_v53 = vsel %vm92_vm4, %v8836_v19, %v8837_v0  ;;  %v8758_v11 = vrot.slane %v8755_v40, 4 }
 0xf45   :  { %v14575_v10 = vsel %vm322_vm7, %v8839_v53, %v8835_v13  ;;  %v14583_v34 = vpop.permute.xlu1 %8691 }
 0xf46   :  { %v8852_v21 = vcombine.low %v8846_v3, %v8846_v3  ;;  %v8760_v28 = vsel %vm296_vm1, %v8758_v11, %v8755_v40  ;;  %v8695_v3 = vsel %vm228_vm2, %v8693_v59, %v14577_v56  ;;  %v8694_v42 = vrot.slane %v14583_v34, 4 }
 0xf47   :  { %v14587_v46 = vpop.permute.xlu0 %8558 }
 0xf48   :  { %8861 = vrot.lane.b32.xlu0 %v8852_v21, %s9610_s25  ;;  %v8696_v16 = vsel %vm92_vm4, %v8693_v59, %v8694_v42 }
 0xf49   :  { %v14598_v48 = vpop.permute.xlu1 %8756 }
 0xf4a   :  { %v8759_v60 = vrot.slane %v14598_v48, 4 }
 0xf4b   :  { %v8624_v12 = vpop.permute.xlu0 %8623 }
 0xf4c   :  { %v8627_v36 = vrot.slane %v8624_v12, 4  ;;  %v8761_v43 = vsel %vm92_vm4, %v8758_v11, %v8759_v60 }
 0xf4d   :  { %v8561_v13 = vpop.permute.xlu1 %8560 }
 0xf4e   :  { %v8629_v37 = vsel %vm159_vm5, %v8627_v36, %v8624_v12  ;;  %v8563_v56 = vrot.slane %v8561_v13, 4 }
 0xf51   :  { %v14619_v31 = vpop.permute.xlu1 %8625 }
 0xfed   :  { %v8510_v63 = vpop.f32.mrf.mxu1 }
 0xfee   :  { %v8511_v54 = vadd.f32 %v8510_v63, %v8367_v20  ;;  %v8439_v29 = vpop.f32.mrf.mxu0 }
 0xfef   :  { %v8440_v18 = vadd.f32 %v8439_v29, %v8367_v20  ;;  %v8512_v14 = vpop.f32.mrf.mxu1 }
 0xff0   :  { %v8519_v33 = vmul.f32 %v8516_v4, %v8511_v54  ;;  %v8513_v1 = vadd.f32 %v8512_v14, %v8367_v20  ;;  %v8441_v8 = vpop.f32.mrf.mxu0  ;;  %v8562_v54 = vrot.slane %v14587_v46, 4 }
 0xff1   :  { %v8517_v9 = vmul.f32 %v8516_v4, %v8440_v18  ;;  %v8442_v35 = vadd.f32 %v8441_v8, %v8367_v20 }
 0xff2   :  { %v8520_v32 = vmul.f32 %v8516_v4, %v8513_v1  ;;  %v8523_v30 = vadd.f32 %v8519_v33, %v14964_v38  ;;  %v8565_v14 = vsel %vm92_vm4, %v8562_v54, %v8563_v56  ;;  %v8564_v38 = vsel %vm90_vm8, %v8562_v54, %v14587_v46 }
 0xff3   :  { %v8518_v6 = vmul.f32 %v8516_v4, %v8442_v35  ;;  %v8521_v7 = vadd.f32 %v8517_v9, %v14966_v39  ;;  %v8697_v4 = vsel %vm228_vm2, %v8696_v16, %v14583_v34  ;;  %v8566_v8 = vsel %vm90_vm8, %v8565_v14, %v8561_v13 }
 0xff4   :  { %v8524_v58 = vadd.f32 %v8520_v32, %v14965_v47 }
 0xff5   :  { %v8522_v27 = vadd.f32 %v8518_v6, %v14967_v45 }
 0xff6   :  { %v8530_v57 = vcombine.low %v8523_v30, %v8524_v58  ;;  %v9588_v15 = vcombine.low %v8524_v58, %v8524_v58 }
 0xff7   :  { %v8529_v50 = vcombine.low %v8521_v7, %v8522_v27  ;;  %v9587_v24 = vcombine.low %v8522_v27, %v8522_v27 }
 0xff8   :  { %8534 = vst [vmem:[#allocation2 + $0xc] sm:$0xff] %v8530_v57  ;;  %8807 = vst [vmem:[#allocation4 + $0x28] sm:$0xf] %v8530_v57  ;;  %v9042_v26 = vmul.f32 %v14563_v61, %v8530_v57  ;;  %v8976_v49 = vmul.f32 %v14572_v55, %v8530_v57  ;;  %v8628_v61 = vrot.slane %v14619_v31, 4  ;;  %v8911_v19 = vmul.f32 %v14567_v22, %v8530_v57 }
 0xff9   :  { %8533 = vst [vmem:[#allocation2 + $0x4] sm:$0xff] %v8529_v50  ;;  %v14589_v20 = vmul.f32 %v9035_v25, %v8529_v50  ;;  %v14591_v44 = vmul.f32 %v8969_v5, %v8529_v50  ;;  %8805 = vst [vmem:[#allocation4 + $0x8] sm:$0xf] %v8529_v50  ;;  %v14600_v41 = vmul.f32 %v8904_v17, %v8529_v50 }
 0xffa   :  { %8806 = vst [vmem:[#allocation4 + $0x88] sm:$0xf] %v9587_v24  ;;  %8808 = vst [vmem:[#allocation4 + $0x40] sm:$0xf] %v9588_v15  ;;  %v8844_v0 = vmul.f32 %v8838_v51, %v8529_v50  ;;  %v8845_v23 = vmul.f32 %v14575_v10, %v8530_v57  ;;  %v8762_v55 = vsel %vm296_vm1, %v8761_v43, %v14598_v48  ;;  %v14693_v51 = vpop.permute.xlu0 %8926 }
 0xffb   :  { %9049 = vrot.lane.b32.xlu0 %v14589_v20, %s9611_s26  ;;  %8986 = vrot.lane.b32.xlu1 %v14591_v44, %s9612_s27  ;;  %v8630_v63 = vsel %vm92_vm4, %v8627_v36, %v8628_v61  ;;  %v9047_v9 = vcombine.high %v14589_v20, %v14589_v20  ;;  %v8981_v6 = vcombine.low %v14591_v44, %v14591_v44 }
 0xffc   :  { %v8631_v29 = vsel %vm159_vm5, %v8630_v63, %v14619_v31  ;;  %v8916_v58 = vcombine.high %v14600_v41, %v14600_v41  ;;  %v8850_v7 = vcombine.low %v8844_v0, %v8844_v0  ;;  %v9048_v45 = vcombine.high %v9042_v26, %v9042_v26 }
 0xffd   :  { %v8982_v57 = vcombine.low %v8976_v49, %v8976_v49  ;;  %v8917_v34 = vcombine.high %v8911_v19, %v8911_v19  ;;  %v8851_v25 = vcombine.low %v8845_v23, %v8845_v23 }
 0xffe   :  { %v8993_v12 = vpop.permute.xlu0 %8992 }
 0xfff   :  { %8918 = vrot.lane.b32.xlu1 %v14600_v41, %s9609_s23  ;;  %v8668_v18 = vld [vmem:[#allocation2 + $0x10] sm:$0xf]  ;;  %v9092_v41 = vld [vmem:[%s14791_s10] sm:$0xf] }
0x1000   :  { %v8666_v52 = vld [vmem:[#allocation2] sm:$0xff]  ;;  %v8732_v53 = vld [vmem:[#allocation2 + $0x8] sm:$0xff]  ;;  %v8703_v1 = vmul.f32 %v8694_v42, %v8668_v18  ;;  %v8537_v32 = vld [vmem:[#allocation2 + $0x10] sm:$0xf] }
0x1001   :  { %v14607_v2 = vmul.f32 %v8760_v28, %v8666_v52  ;;  %v8701_v21 = vmul.f32 %v8695_v3, %v8666_v52  ;;  %v14622_v62 = vmul.f32 %v8666_v52, %v8629_v37  ;;  %v8767_v22 = vmul.f32 %v8762_v55, %v8732_v53  ;;  %v8733_v50 = vld [vmem:[#allocation2 + $0x10] sm:$0xf] }
0x1002   :  { %v8702_v10 = vmul.f32 %v8732_v53, %v8697_v4  ;;  %v8636_v33 = vmul.f32 %v8732_v53, %v8631_v29  ;;  %v8571_v35 = vmul.f32 %v8732_v53, %v8566_v8  ;;  %v8572_v40 = vmul.f32 %v8563_v56, %v8537_v32  ;;  %v8602_v11 = vld [vmem:[#allocation2 + $0x10] sm:$0xf]  ;;  %v8862_v59 = vpop.permute.xlu0 %8861 }
0x1003   :  { %8777 = vrot.lane.b32.xlu0 %v14607_v2, %s9608_s20  ;;  %8855 = vrot.lane.b32.xlu1 %v8844_v0, %s9610_s25  ;;  %v8707_v30 = vcombine.high %v8701_v21, %v8701_v21  ;;  %v8570_v47 = vmul.f32 %v8666_v52, %v8564_v38  ;;  %v8772_v27 = vcombine.low %v14607_v2, %v14607_v2  ;;  %v9058_v52 = vpop.permute.xlu1 %9057 }
0x1004   :  { %v8768_v5 = vmul.f32 %v8759_v60, %v8733_v50  ;;  %v8773_v46 = vcombine.low %v8767_v22, %v8767_v22  ;;  %v8708_v20 = vcombine.high %v8702_v10, %v8702_v10  ;;  %v8577_v17 = vcombine.high %v8571_v35, %v8571_v35 }
0x1005   :  { %v8576_v39 = vcombine.high %v8570_v47, %v8570_v47  ;;  %v8637_v24 = vmul.f32 %v8628_v61, %v8602_v11  ;;  %v8642_v15 = vcombine.low %v8636_v33, %v8636_v33  ;;  %v8641_v28 = vcombine.low %v14622_v62, %v14622_v62 }
0x1006   :  { %v8774_v44 = vcombine.low %v8768_v5, %v8768_v5 }
0x1007   :  { %8709 = vrot.lane.b32.xlu0 %v8701_v21, %s9605_s12  ;;  %9053 = vrot.lane.b32.xlu1 %v9042_v26, %s9611_s26  ;;  %v8643_v48 = vcombine.low %v8637_v24, %v8637_v24 }
0x100b   :  { %8646 = vrot.lane.b32.xlu0 %v14622_v62, %s9606_s17  ;;  %8990 = vrot.lane.b32.xlu1 %v8976_v49, %s9612_s27 }
0x100f   :  { %8922 = vrot.lane.b32.xlu0 %v8911_v19, %s9609_s23  ;;  %8859 = vrot.lane.b32.xlu1 %v8845_v23, %s9610_s25 }
0x1013   :  { %8781 = vrot.lane.b32.xlu0 %v8767_v22, %s9608_s20  ;;  %8713 = vrot.lane.b32.xlu1 %v8702_v10, %s9605_s12 }
0x1017   :  { %8650 = vrot.lane.b32.xlu0 %v8636_v33, %s9606_s17  ;;  %8717 = vrot.lane.b32.xlu1 %v8703_v1, %s9605_s12 }
0x101b   :  { %9051 = vrot.lane.b32.xlu0 %v9047_v9, %s9611_s26  ;;  %8582 = vrot.lane.b32.xlu1 %v8571_v35, %s9604_s1 }
0x101f   :  { %8984 = vrot.lane.b32.xlu0 %v8981_v6, %s9612_s27  ;;  %8586 = vrot.lane.b32.xlu1 %v8572_v40, %s9604_s1 }
0x1023   :  { %8711 = vrot.lane.b32.xlu0 %v8707_v30, %s9605_s12  ;;  %8920 = vrot.lane.b32.xlu1 %v8916_v58, %s9609_s23 }
0x1027   :  { %8580 = vrot.lane.b32.xlu0 %v8576_v39, %s9604_s1  ;;  %8853 = vrot.lane.b32.xlu1 %v8850_v7, %s9610_s25 }
0x102b   :  { %9055 = vrot.lane.b32.xlu0 %v9048_v45, %s9611_s26  ;;  %8775 = vrot.lane.b32.xlu1 %v8772_v27, %s9608_s20 }
0x102f   :  { %8988 = vrot.lane.b32.xlu0 %v8982_v57, %s9612_s27  ;;  %8924 = vrot.lane.b32.xlu1 %v8917_v34, %s9609_s23 }
0x1033   :  { %8857 = vrot.lane.b32.xlu0 %v8851_v25, %s9610_s25  ;;  %8779 = vrot.lane.b32.xlu1 %v8773_v46, %s9608_s20 }
0x1037   :  { %8715 = vrot.lane.b32.xlu0 %v8708_v20, %s9605_s12  ;;  %8783 = vrot.lane.b32.xlu1 %v8774_v44, %s9608_s20 }
0x103b   :  { %8584 = vrot.lane.b32.xlu0 %v8577_v17, %s9604_s1  ;;  %8648 = vrot.lane.b32.xlu1 %v8642_v15, %s9606_s17 }
0x103f   :  { %8578 = vrot.lane.b32.xlu0 %v8570_v47, %s9604_s1  ;;  %8652 = vrot.lane.b32.xlu1 %v8643_v48, %s9606_s17 }
0x1043   :  { %9095 = vperm.xlu0 %9443, %v9092_v41   ;;  %8644 = vrot.lane.b32.xlu1 %v8641_v28, %s9606_s17 }
0x106d   :  { %v8987_v2 = vpop.permute.xlu1 %8986  ;;  %v9050_v13 = vpop.permute.xlu0 %9049 }
0x1071   :  { %v8919_v36 = vpop.permute.xlu1 %8918 }
0x1075   :  { %v14695_v0 = vpop.permute.xlu0 %8777  ;;  %v14697_v3 = vpop.permute.xlu1 %8855 }
0x1079   :  { %v8710_v21 = vpop.permute.xlu0 %8709  ;;  %v9054_v37 = vpop.permute.xlu1 %9053 }
0x107d   :  { %v14699_v26 = vpop.permute.xlu0 %8646  ;;  %v8991_v60 = vpop.permute.xlu1 %8990 }
0x107e   :  { %v8997_v42 = vsel %vm159_vm5, %v8991_v60, %v8993_v12 }
0x107f   :  { %9005 = vst [vmem:[#allocation4 + $0x60] sm:$0xf0] %v8997_v42 }
0x1081   :  { %v8923_v31 = vpop.permute.xlu0 %8922  ;;  %v8860_v62 = vpop.permute.xlu1 %8859 }
0x1082   :  { %v8866_v49 = vsel %vm296_vm1, %v8860_v62, %v8862_v59 }
0x1083   :  { %8874 = vst [vmem:[#allocation4 + $0x40] sm:$0xf0] %v8866_v49 }
0x1085   :  { %v14703_v43 = vpop.permute.xlu0 %8781  ;;  %v14705_v61 = vpop.permute.xlu1 %8713 }
0x1089   :  { %v14707_v16 = vpop.permute.xlu0 %8650  ;;  %v14709_v19 = vpop.permute.xlu1 %8717 }
0x108d   :  { %v9052_v23 = vpop.permute.xlu0 %9051  ;;  %v14713_v63 = vpop.permute.xlu1 %8582 }
0x108e   :  { %v9059_v53 = vsel %vm90_vm8, %v9050_v13, %v9052_v23  ;;  %v9060_v55 = vsel %vm90_vm8, %v9052_v23, %v9054_v37  ;;  %v9083_v13 = vld [vmem:[#allocation4 + $0x40] sm:$0xff] }
0x108f   :  { %9067 = vst [vmem:[#allocation4 + $0x20] sm:$0xf] %v9059_v53  ;;  %9068 = vst [vmem:[#allocation4 + $0x48] sm:$0xf] %v9060_v55 }
0x1091   :  { %v8985_v4 = vpop.permute.xlu0 %8984  ;;  %v14716_v54 = vpop.permute.xlu1 %8586 }
0x1092   :  { %v8994_v56 = vsel %vm159_vm5, %v8985_v4, %v8987_v2 }
0x1093   :  { %9002 = vst [vmem:[#allocation4 + $0x58] sm:$0xf0] %v8994_v56 }
0x1095   :  { %v8712_v22 = vpop.permute.xlu0 %8711  ;;  %v8921_v33 = vpop.permute.xlu1 %8920 }
0x1096   :  { %v8719_v10 = vsel %vm253_vm6, %v8710_v21, %v8712_v22  ;;  %v8720_v29 = vsel %vm253_vm6, %v8712_v22, %v14705_v61  ;;  %v9089_v18 = vld [vmem:[#allocation4 + $0x48] sm:$0xf]  ;;  %v9088_v14 = vld [vmem:[#allocation4 + $0x20] sm:$0xf]  ;;  %v8928_v1 = vsel %vm228_vm2, %v8919_v36, %v8921_v33  ;;  %v8929_v8 = vsel %vm228_vm2, %v8921_v33, %v8923_v31 }
0x1097   :  { %8727 = vst [vmem:[#allocation4 + $0x30] sm:$0xf] %v8719_v10  ;;  %8728 = vst [vmem:[#allocation4 + $0x68] sm:$0xf] %v8720_v29  ;;  %9426 = vmatprep.subr.msk.mxu0 %vm92_vm4, %v9089_v18  ;;  %v9071_v22 = vld [vmem:[%s14790_s9] sm:$0xf] }
0x1098   :  { %9427 = vmatpush1.msk.msra.mxu0 %vm92_vm4, %v9088_v14  ;;  %8936 = vst [vmem:[#allocation4 + $0x58] sm:$0xf] %v8928_v1  ;;  %8937 = vst [vmem:[#allocation4 + $0x10] sm:$0xf] %v8929_v8 }
0x1099   :  { %v14725_v9 = vpop.permute.xlu0 %8580  ;;  %v8854_v32 = vpop.permute.xlu1 %8853 }
0x109a   :  { %v8589_v35 = vsel %vm116_vm0, %v14725_v9, %v14713_v63  ;;  %v8863_v6 = vsel %vm296_vm1, %v8854_v32, %v14697_v3 }
0x109b   :  { %8597 = vst [vmem:[#allocation4 + $0x38] sm:$0xf] %v8589_v35  ;;  %8871 = vst [vmem:[#allocation4 + $0x8] sm:$0xf0] %v8863_v6 }
0x109d   :  { %v9056_v40 = vpop.permute.xlu0 %9055  ;;  %v8776_v47 = vpop.permute.xlu1 %8775 }
0x109e   :  { %v9061_v38 = vsel %vm90_vm8, %v9054_v37, %v9056_v40  ;;  %v9062_v30 = vsel %vm90_vm8, %v9056_v40, %v9058_v52  ;;  %v8785_v58 = vsel %vm322_vm7, %v8776_v47, %v14695_v0 }
0x109f   :  { %9069 = vst [vmem:[#allocation4 + $0x70] sm:$0xf] %v9061_v38  ;;  %9070 = vst [vmem:[#allocation4 + $0x90] sm:$0xf] %v9062_v30 }
0x10a0   :  { %8793 = vst [vmem:[#allocation4 + $0x30] sm:$0xf0] %v8785_v58 }
0x10a1   :  { %v8989_v39 = vpop.permute.xlu0 %8988  ;;  %v8925_v27 = vpop.permute.xlu1 %8924 }
0x10a2   :  { %v8995_v7 = vsel %vm159_vm5, %v8987_v2, %v8989_v39  ;;  %v8996_v45 = vsel %vm159_vm5, %v8989_v39, %v8991_v60  ;;  %v8930_v57 = vsel %vm228_vm2, %v8923_v31, %v8925_v27  ;;  %v8931_v34 = vsel %vm228_vm2, %v8925_v27, %v14693_v51  ;;  %v9084_v51 = vld [vmem:[#allocation4 + $0x58] sm:$0xff]  ;;  %v9080_v60 = vld [vmem:[#allocation4 + $0x8] sm:$0xff] }
0x10a3   :  { %9003 = vst [vmem:[#allocation4 + $0x10] sm:$0xf0] %v8995_v7  ;;  %9004 = vst [vmem:[#allocation4 + $0x98] sm:$0xf0] %v8996_v45 }
0x10a4   :  { %8938 = vst [vmem:[#allocation4 + $0x98] sm:$0xf] %v8930_v57  ;;  %8939 = vst [vmem:[#allocation4 + $0x60] sm:$0xf] %v8931_v34 }
0x10a5   :  { %v8858_v50 = vpop.permute.xlu0 %8857  ;;  %v8780_v44 = vpop.permute.xlu1 %8779 }
0x10a6   :  { %v8864_v25 = vsel %vm296_vm1, %v14697_v3, %v8858_v50  ;;  %v8865_v5 = vsel %vm296_vm1, %v8858_v50, %v8860_v62  ;;  %v9091_v46 = vld [vmem:[#allocation4 + $0x90] sm:$0xf]  ;;  %v8786_v11 = vsel %vm322_vm7, %v14695_v0, %v8780_v44  ;;  %v8787_v17 = vsel %vm322_vm7, %v8780_v44, %v14703_v43 }
0x10a7   :  { %v9090_v20 = vld [vmem:[#allocation4 + $0x70] sm:$0xf]  ;;  %8872 = vst [vmem:[#allocation4 + $0x88] sm:$0xf0] %v8864_v25  ;;  %8873 = vst [vmem:[#allocation4 + $0x28] sm:$0xf0] %v8865_v5  ;;  %9429 = vmatprep.subr.msk.mxu1 %vm92_vm4, %v9091_v46 }
0x10a8   :  { %9430 = vmatpush1.msk.msra.mxu1 %vm92_vm4, %v9090_v20  ;;  %8794 = vst [vmem:[#allocation4 + $0x68] sm:$0xf0] %v8786_v11  ;;  %8795 = vst [vmem:[#allocation4 + $0x78] sm:$0xf0] %v8787_v17 }
0x10a9   :  { %v8716_v24 = vpop.permute.xlu0 %8715  ;;  %v8784_v28 = vpop.permute.xlu1 %8783 }
0x10aa   :  { %v8721_v15 = vsel %vm253_vm6, %v14705_v61, %v8716_v24  ;;  %v8722_v48 = vsel %vm253_vm6, %v8716_v24, %v14709_v19  ;;  %v9085_v41 = vld [vmem:[#allocation4 + $0x10] sm:$0xff]  ;;  %v8788_v12 = vsel %vm322_vm7, %v14703_v43, %v8784_v28 }
0x10ab   :  { %8729 = vst [vmem:[#allocation4 + $0x78] sm:$0xf] %v8721_v15  ;;  %8730 = vst [vmem:[#allocation4 + $0x80] sm:$0xf] %v8722_v48  ;;  %9137 = vmatprep.subr.mxu0 %v9085_v41  ;;  %v9087_v52 = vld [vmem:[#allocation4 + $0x60] sm:$0xff]  ;;  %v9086_v59 = vld [vmem:[#allocation4 + $0x98] sm:$0xff] }
0x10ac   :  { %9138 = vmatpush1.msra.mxu0 %v9084_v51  ;;  %8796 = vst [vmem:[#allocation4 + $0x80] sm:$0xf0] %v8788_v12  ;;  %9208 = vmatprep.subr.mxu1 %v9087_v52  ;;  %v9076_v43 = vld [vmem:[#allocation4 + $0x30] sm:$0xff] }
0x10ad   :  { %v8585_v2 = vpop.permute.xlu0 %8584  ;;  %9209 = vmatpush1.msra.mxu1 %v9086_v59  ;;  %v8649_v21 = vpop.permute.xlu1 %8648 }
0x10ae   :  { %v8590_v36 = vsel %vm116_vm0, %v14713_v63, %v8585_v2  ;;  %v8591_v0 = vsel %vm116_vm0, %v8585_v2, %v14716_v54  ;;  %v9081_v3 = vld [vmem:[#allocation4 + $0x88] sm:$0xff]  ;;  %9210 = vmatprep.subr.mxu1 %v9083_v13  ;;  %v8655_v42 = vsel %vm185_vm3, %v14699_v26, %v8649_v21  ;;  %v8656_v31 = vsel %vm185_vm3, %v8649_v21, %v14707_v16 }
0x10af   :  { %v9082_v37 = vld [vmem:[#allocation4 + $0x28] sm:$0xff]  ;;  %8598 = vst [vmem:[#allocation4 + $0x50] sm:$0xf] %v8590_v36  ;;  %8599 = vst [vmem:[#allocation4 + $0x18] sm:$0xf] %v8591_v0  ;;  %9139 = vmatprep.subr.mxu0 %v9081_v3 }
0x10b0   :  { %9211 = vmatpush1.msra.mxu1 %v9082_v37  ;;  %9140 = vmatpush1.msra.mxu0 %v9080_v60  ;;  %8663 = vst [vmem:[#allocation4 + $0x38] sm:$0xf0] %v8655_v42  ;;  %8664 = vst [vmem:[#allocation4 + $0x50] sm:$0xf0] %v8656_v31  ;;  %v9077_v62 = vld [vmem:[#allocation4 + $0x68] sm:$0xff] }
0x10b1   :  { %v8579_v49 = vpop.permute.xlu0 %8578  ;;  %9141 = vmatprep.subr.mxu0 %v9077_v62  ;;  %v8653_v19 = vpop.permute.xlu1 %8652 }
0x10b2   :  { %v8588_v61 = vsel %vm116_vm0, %v8579_v49, %v14725_v9  ;;  %9142 = vmatpush1.msra.mxu0 %v9076_v43  ;;  %v9078_v23 = vld [vmem:[#allocation4 + $0x78] sm:$0xff]  ;;  %v8657_v53 = vsel %vm185_vm3, %v14707_v16, %v8653_v19 }
0x10b3   :  { %8596 = vst [vmem:[#allocation4] sm:$0xf] %v8588_v61  ;;  %v9079_v55 = vld [vmem:[#allocation4 + $0x80] sm:$0xff]  ;;  %8665 = vst [vmem:[#allocation4 + $0x18] sm:$0xf0] %v8657_v53 }
0x10b4   :  { %9212 = vmatprep.subr.mxu1 %v9079_v55 }
0x10b5   :  { %9213 = vmatpush1.msra.mxu1 %v9078_v23  ;;  %v8645_v63 = vpop.permute.xlu1 %8644 }
0x10b6   :  { %v8654_v4 = vsel %vm185_vm3, %v8645_v63, %v14699_v26 }
0x10b7   :  { %v9073_v56 = vld [vmem:[#allocation4 + $0x38] sm:$0xff]  ;;  %8662 = vst [vmem:[#allocation4] sm:$0xf0] %v8654_v4  ;;  %v9074_v10 = vld [vmem:[#allocation4 + $0x50] sm:$0xff] }
0x10b8   :  { %9143 = vmatprep.subr.mxu0 %v9073_v56 }
0x10ba   :  { %v9075_v54 = vld [vmem:[#allocation4 + $0x18] sm:$0xff] }
0x10bb   :  { %9214 = vmatprep.subr.mxu1 %v9075_v54 }
0x10bc   :  { %9215 = vmatpush1.msra.mxu1 %v9074_v10 }
0x10bd   :  { %9431 = vmatmul.mubr.msk.f32.vlgmr.msra.gmra.mxu1 %vm640_vm9, %v9071_v22 }
0x10be   :  { %v9072_v16 = vld [vmem:[#allocation4] sm:$0xff]  ;;  %v9096_v18 = vpop.permute.xlu0 %9095 }
0x10bf   :  { %9144 = vmatpush1.msra.mxu0 %v9072_v16 }
0x10c0   :  { %9428 = vmatmul.mubr.msk.f32.vlgmr.msra.gmra.mxu0 %vm640_vm9, %v9071_v22 }
0x117d   :  { %v9250_v29 = vpop.f32.mrf.mxu1 }
0x117e   :  { %v9251_v14 = vadd.f32 %v9250_v29, %v9096_v18 }
0x117f   :  { %v9252_v26 = vpop.f32.mrf.mxu1 }
0x1180   :  { %v9253_v33 = vadd.f32 %v9252_v26, %v9096_v18  ;;  %v9179_v1 = vpop.f32.mrf.mxu0 }
0x1181   :  { %v9180_v35 = vadd.f32 %v9179_v1, %v9096_v18 }
0x1182   :  { %v9260_v8 = vcombine.low %v9251_v14, %v9253_v33  ;;  %v9181_v9 = vpop.f32.mrf.mxu0 }
0x1183   :  { %v9182_v32 = vadd.f32 %v9181_v9, %v9096_v18 }
0x1184   :  { %9264 = vst [vmem:[%s14792_s11 + $0x8] sm:$0xff] %v9260_v8 }
0x1185   :  { %v9259_v6 = vcombine.low %v9180_v35, %v9182_v32 }
0x1187   :  { %9263 = vst [vmem:[%s14792_s11] sm:$0xff] %v9259_v6 }

</bundles_post_ra>
